<compile_context>
chip_gen: v5e
topology: v5e:2x2
jax: 0.10.0
libtpu: 0.0.40
codegen_flags: <defaults>
</compile_context>

<pallas_src>
import functools

import jax
import jax.numpy as jnp
from jax.experimental import pallas as pl
from jax.experimental.pallas import tpu as pltpu

EPS = 1e-5  # PyTorch LayerNorm default


# ------------------------------ kernel body --------------------------------

def _encoder_layer_kernel(
        x_ref, nw_ref, nb_ref,
        lqkv_ref, lbqkv_ref, lwo_ref, lbo_ref,
        gqkv_ref, gbqkv_ref, gwo_ref, gbo_ref,
        c1w_ref, c1b_ref, c2w_ref, c2b_ref,
        o_ref, *, nhead, d_yc):
    bt, L, D = x_ref.shape
    N = bt * L
    dh = D // nhead

    def ln(v, i):                              # LayerNorm i in {0,1,2}, f32 VPU
        mu = jnp.mean(v, axis=-1, keepdims=True)
        var = jnp.mean((v - mu) ** 2, axis=-1, keepdims=True)
        return (v - mu) * jax.lax.rsqrt(var + EPS) * nw_ref[i] + nb_ref[i]

    def mha(xn, wqkv_ref, bqkv_ref, wo_ref, bo_ref, groups):
        """MHA over `groups` independent token windows of a (N, D) slab.

        Projections / out-projection are fused full-width MXU matmuls; only
        the score and P@V matmuls are per-head, batched over the group axis.
        1/sqrt(dh) is pre-folded into Wq / bq at pack time.
        """
        gl = N // groups                       # tokens per attention window
        xb = xn.astype(jnp.bfloat16)
        q = jnp.dot(xb, wqkv_ref[0], preferred_element_type=jnp.float32) + bqkv_ref[0]
        k = jnp.dot(xb, wqkv_ref[1], preferred_element_type=jnp.float32) + bqkv_ref[1]
        v = jnp.dot(xb, wqkv_ref[2], preferred_element_type=jnp.float32) + bqkv_ref[2]
        heads = []
        for h in range(nhead):                 # static unroll; nhead is small
            sl = slice(h * dh, (h + 1) * dh)
            qh = q[:, sl].reshape(groups, gl, dh).astype(jnp.bfloat16)
            kh = k[:, sl].reshape(groups, gl, dh).astype(jnp.bfloat16)
            vh = v[:, sl].reshape(groups, gl, dh).astype(jnp.bfloat16)
            s = jnp.einsum('gqd,gkd->gqk', qh, kh,
                           preferred_element_type=jnp.float32)
            m = jnp.max(s, axis=-1, keepdims=True)
            p = jnp.exp(s - m)
            p = p * pl.reciprocal(jnp.sum(p, axis=-1, keepdims=True))  # exact, EUP
            oh = jnp.einsum('gqk,gkd->gqd', p.astype(jnp.bfloat16), vh,
                            preferred_element_type=jnp.float32)
            heads.append(oh.reshape(N, dh))
        o_cat = jnp.concatenate(heads, axis=-1).astype(jnp.bfloat16)   # (N, D)
        return jnp.dot(o_cat, wo_ref[...],
                       preferred_element_type=jnp.float32) + bo_ref[...]

    x = x_ref[...].reshape(N, D)               # (bt*L, D) token slab, f32

    # local branch: Localize -> MHA -> ReverseLocalize == per-variable windows
    x = x + mha(ln(x, 0), lqkv_ref, lbqkv_ref, lwo_ref, lbo_ref,
                groups=bt * d_yc)
    # global branch: each batch element attends over its full L tokens.
    # (For production-scale L, tile this branch over KV blocks with online
    #  softmax to cap the live score tile on v7x's 64 MiB VMEM.)
    x = x + mha(ln(x, 1), gqkv_ref, gbqkv_ref, gwo_ref, gbo_ref, groups=bt)

    # feed-forward: Conv1d(k=1) -> relu -> Conv1d(k=1); residual fused in store
    x3 = ln(x, 2).astype(jnp.bfloat16)
    h1 = jnp.dot(x3, c1w_ref[...], preferred_element_type=jnp.float32) + c1b_ref[...]
    h1 = jnp.maximum(h1, 0.0).astype(jnp.bfloat16)       # d_ff -> lane-dense
    y = jnp.dot(h1, c2w_ref[...], preferred_element_type=jnp.float32) + c2b_ref[...]
    # TODO(synk): dropout_ff / dropout_attn_out modeled as eval-mode identity.
    o_ref[...] = (x + y).reshape(bt, L, D).astype(o_ref.dtype)


# --------------------------- wrapper / packing ------------------------------

def _pack_attn(p, nhead):
    """Pack q/k/v/out projection weights for fused (D,D) matmuls.

    Returns wqkv (3, D, D) bf16, bqkv (3, 1, D) f32, wo (D, D) bf16,
    bo (1, D) f32.  The 1/sqrt(dh) attention scale is folded into wq / bq.
    (Weights are (in, out) for y = x @ W; transpose PyTorch (out, in) first.)
    """
    D = p["wq"].shape[0]
    scale = 1.0 / float(D // nhead) ** 0.5
    wqkv = jnp.stack([p["wq"] * scale, p["wk"], p["wv"]],
                     axis=0).astype(jnp.bfloat16)                  # (3, D, D)
    bqkv = jnp.stack([p["bq"] * scale, p["bk"], p["bv"]],
                     axis=0).reshape(3, 1, D).astype(jnp.float32)  # (3, 1, D)
    wo = p["wo"].astype(jnp.bfloat16)                              # (D, D)
    bo = p["bo"].reshape(1, D).astype(jnp.float32)
    return wqkv, bqkv, wo, bo


def _pick_batch_block(B):
    """Largest divisor of B that still leaves >= 2 grid steps (v7x has 2 TCs)."""
    if B <= 1:
        return 1
    for bt in range(B // 2, 0, -1):
        if B % bt == 0:
            return bt
    return 1


def _const_spec(shape, pipeline_mode):
    """BlockSpec for a grid-invariant (weight) input; optionally single-buffered."""
    nd = len(shape)
    index_map = lambda b, _nd=nd: (0,) * _nd
    if pipeline_mode is None:
        return pl.BlockSpec(shape, index_map)
    return pl.BlockSpec(shape, index_map, pipeline_mode=pipeline_mode)


def encoder_layer_forward(x, params, *, d_yc, nhead, output_attn=False,
                          batch_block=None):
    B, L, D = x.shape
    assert L % d_yc == 0 and D % nhead == 0
    d_ff = params["conv1_w"].shape[1]
    bt = batch_block or _pick_batch_block(B)
    assert B % bt == 0

    norm_w = jnp.stack([params["norm1_w"], params["norm2_w"], params["norm3_w"]],
                       axis=0).reshape(3, 1, D).astype(jnp.float32)
    norm_b = jnp.stack([params["norm1_b"], params["norm2_b"], params["norm3_b"]],
                       axis=0).reshape(3, 1, D).astype(jnp.float32)
    lw, lb, lwo, lbo = _pack_attn(params["local_attn"], nhead)
    gw, gb, gwo, gbo = _pack_attn(params["global_attn"], nhead)
    c1w = params["conv1_w"].astype(jnp.bfloat16)
    c1b = params["conv1_b"].reshape(1, d_ff).astype(jnp.float32)
    c2w = params["conv2_w"].astype(jnp.bfloat16)
    c2b = params["conv2_b"].reshape(1, D).astype(jnp.float32)

    def build(const_mode):
        return pl.pallas_call(
            functools.partial(_encoder_layer_kernel, nhead=nhead, d_yc=d_yc),
            grid=(B // bt,),
            in_specs=[
                pl.BlockSpec((bt, L, D), lambda b: (b, 0, 0)),       # x
                _const_spec((3, 1, D), const_mode),                  # LN weight
                _const_spec((3, 1, D), const_mode),                  # LN bias
                _const_spec((3, D, D), const_mode),                  # local Wqkv
                _const_spec((3, 1, D), const_mode),                  # local bqkv
                _const_spec((D, D), const_mode),                     # local Wo
                _const_spec((1, D), const_mode),                     # local bo
                _const_spec((3, D, D), const_mode),                  # global Wqkv
                _const_spec((3, 1, D), const_mode),                  # global bqkv
                _const_spec((D, D), const_mode),                     # global Wo
                _const_spec((1, D), const_mode),                     # global bo
                _const_spec((D, d_ff), const_mode),                  # conv1 w
                _const_spec((1, d_ff), const_mode),                  # conv1 b
                _const_spec((d_ff, D), const_mode),                  # conv2 w
                _const_spec((1, D), const_mode),                     # conv2 b
            ],
            out_specs=pl.BlockSpec((bt, L, D), lambda b: (b, 0, 0)),
            out_shape=jax.ShapeDtypeStruct((B, L, D), x.dtype),
            compiler_params=pltpu.CompilerParams(
                dimension_semantics=("parallel",),       # shard grid over TCs
                vmem_limit_bytes=32 * 1024 * 1024),
        )

    args = (x, norm_w, norm_b, lw, lb, lwo, lbo, gw, gb, gwo, gbo,
            c1w, c1b, c2w, c2b)
    try:
        # Single-buffer the grid-invariant weights (halves their VMEM footprint).
        out = build(pl.Buffered(1))(*args)
    except Exception:
        # Fall back to default double-buffering if this build rejects Buffered(1).
        out = build(None)(*args)

    # TODO(synk): output_attn=True (returning attention maps) not implemented.
    local_attns, global_attns = None, None
    return out, (local_attns, global_attns)


# --------------------------- parameter creation -----------------------------

def init_params(key, d_model, d_ff, nhead):
    keys = iter(jax.random.split(key, 32))
    f32 = jnp.float32

    def w(shape, scale=0.05):
        return (scale * jax.random.normal(next(keys), shape)).astype(f32)

    def attn_params():
        return dict(
            wq=w((d_model, d_model)), bq=w((d_model,)),
            wk=w((d_model, d_model)), bk=w((d_model,)),
            wv=w((d_model, d_model)), bv=w((d_model,)),
            wo=w((d_model, d_model)), bo=w((d_model,)),
        )

    return dict(
        norm1_w=jnp.ones((d_model,), f32), norm1_b=jnp.zeros((d_model,), f32),
        norm2_w=jnp.ones((d_model,), f32), norm2_b=jnp.zeros((d_model,), f32),
        norm3_w=jnp.ones((d_model,), f32), norm3_b=jnp.zeros((d_model,), f32),
        local_attn=attn_params(),
        global_attn=attn_params(),
        conv1_w=w((d_model, d_ff)), conv1_b=w((d_ff,)),
        conv2_w=w((d_ff, d_model)), conv2_b=w((d_model,)),
    )


# ---------------------------------- main ------------------------------------

if __name__ == "__main__":
    B, d_yc, S = 2, 4, 8           # batch, number of variables, seq per variable
    L = d_yc * S                   # total token length = 32
    d_model = 32
    d_ff = 4 * d_model             # 128
    nhead = 4

    key = jax.random.PRNGKey(0)
    kx, kp = jax.random.split(key)
    x = jax.random.normal(kx, (B, L, d_model), dtype=jnp.float32)
    params = init_params(kp, d_model, d_ff, nhead)

    out, (local_attns, global_attns) = encoder_layer_forward(
        x, params, d_yc=d_yc, nhead=nhead, output_attn=False)
    out = jax.block_until_ready(out)

    assert out.shape == (B, L, d_model)
    assert bool(jnp.all(jnp.isfinite(out)))
    print("KERNEL_OK")
</pallas_src>

<mosaic_0001>
module attributes {stable_mosaic.version = 11 : i64} {
  func.func @_encoder_layer_kernel(%arg0: i32, %arg1: memref<1x32x32xf32, #tpu.memory_space<vmem>>, %arg2: memref<3x1x32xf32, #tpu.memory_space<vmem>>, %arg3: memref<3x1x32xf32, #tpu.memory_space<vmem>>, %arg4: memref<3x32x32xbf16, #tpu.memory_space<vmem>>, %arg5: memref<3x1x32xf32, #tpu.memory_space<vmem>>, %arg6: memref<32x32xbf16, #tpu.memory_space<vmem>>, %arg7: memref<1x32xf32, #tpu.memory_space<vmem>>, %arg8: memref<3x32x32xbf16, #tpu.memory_space<vmem>>, %arg9: memref<3x1x32xf32, #tpu.memory_space<vmem>>, %arg10: memref<32x32xbf16, #tpu.memory_space<vmem>>, %arg11: memref<1x32xf32, #tpu.memory_space<vmem>>, %arg12: memref<32x128xbf16, #tpu.memory_space<vmem>>, %arg13: memref<1x128xf32, #tpu.memory_space<vmem>>, %arg14: memref<128x32xbf16, #tpu.memory_space<vmem>>, %arg15: memref<1x32xf32, #tpu.memory_space<vmem>>, %arg16: memref<1x32x32xf32, #tpu.memory_space<vmem>>) attributes {dimension_semantics = [#tpu.dimension_semantics<parallel>], iteration_bounds = array<i64: 2>, scalar_prefetch = 0 : i64, scratch_operands = 0 : i64, tpu.core_type = #tpu.core_type<tc>, window_params = [{transform_indices = @transform_0, window_bounds = array<i64: 1, 32, 32>}, {pipeline_mode = #tpu.pipeline_mode<synchronous>, transform_indices = @transform_1, window_bounds = array<i64: 3, 1, 32>}, {pipeline_mode = #tpu.pipeline_mode<synchronous>, transform_indices = @transform_2, window_bounds = array<i64: 3, 1, 32>}, {pipeline_mode = #tpu.pipeline_mode<synchronous>, transform_indices = @transform_3, window_bounds = array<i64: 3, 32, 32>}, {pipeline_mode = #tpu.pipeline_mode<synchronous>, transform_indices = @transform_4, window_bounds = array<i64: 3, 1, 32>}, {pipeline_mode = #tpu.pipeline_mode<synchronous>, transform_indices = @transform_5, window_bounds = array<i64: 32, 32>}, {pipeline_mode = #tpu.pipeline_mode<synchronous>, transform_indices = @transform_6, window_bounds = array<i64: 1, 32>}, {pipeline_mode = #tpu.pipeline_mode<synchronous>, transform_indices = @transform_7, window_bounds = array<i64: 3, 32, 32>}, {pipeline_mode = #tpu.pipeline_mode<synchronous>, transform_indices = @transform_8, window_bounds = array<i64: 3, 1, 32>}, {pipeline_mode = #tpu.pipeline_mode<synchronous>, transform_indices = @transform_9, window_bounds = array<i64: 32, 32>}, {pipeline_mode = #tpu.pipeline_mode<synchronous>, transform_indices = @transform_10, window_bounds = array<i64: 1, 32>}, {pipeline_mode = #tpu.pipeline_mode<synchronous>, transform_indices = @transform_11, window_bounds = array<i64: 32, 128>}, {pipeline_mode = #tpu.pipeline_mode<synchronous>, transform_indices = @transform_12, window_bounds = array<i64: 1, 128>}, {pipeline_mode = #tpu.pipeline_mode<synchronous>, transform_indices = @transform_13, window_bounds = array<i64: 128, 32>}, {pipeline_mode = #tpu.pipeline_mode<synchronous>, transform_indices = @transform_14, window_bounds = array<i64: 1, 32>}, {transform_indices = @transform_15, window_bounds = array<i64: 1, 32, 32>}]} {
    %c0 = arith.constant 0 : index
    %c0_0 = arith.constant 0 : index
    %c0_1 = arith.constant 0 : index
    %0 = vector.load %arg1[%c0, %c0_0, %c0_1] : memref<1x32x32xf32, #tpu.memory_space<vmem>>, vector<1x32x32xf32>
    %1 = vector.shape_cast %0 : vector<1x32x32xf32> to vector<32x32xf32>
    %cst = arith.constant dense<0.000000e+00> : vector<32xf32>
    %2 = vector.multi_reduction <add>, %1, %cst [1] : vector<32x32xf32> to vector<32xf32>
    %3 = vector.shape_cast %2 : vector<32xf32> to vector<32x1xf32>
    %cst_2 = arith.constant 3.200000e+01 : f32
    %4 = vector.broadcast %cst_2 : f32 to vector<32x1xf32>
    %5 = arith.divf %3, %4 : vector<32x1xf32>
    %6 = vector.broadcast %5 : vector<32x1xf32> to vector<32x32xf32>
    %7 = arith.subf %1, %6 : vector<32x32xf32>
    %8 = arith.mulf %7, %7 : vector<32x32xf32>
    %cst_3 = arith.constant dense<0.000000e+00> : vector<32xf32>
    %9 = vector.multi_reduction <add>, %8, %cst_3 [1] : vector<32x32xf32> to vector<32xf32>
    %10 = vector.shape_cast %9 : vector<32xf32> to vector<32x1xf32>
    %cst_4 = arith.constant 3.200000e+01 : f32
    %11 = vector.broadcast %cst_4 : f32 to vector<32x1xf32>
    %12 = arith.divf %10, %11 : vector<32x1xf32>
    %13 = vector.broadcast %5 : vector<32x1xf32> to vector<32x32xf32>
    %14 = arith.subf %1, %13 : vector<32x32xf32>
    %cst_5 = arith.constant 9.99999974E-6 : f32
    %15 = vector.broadcast %cst_5 : f32 to vector<32x1xf32>
    %16 = arith.addf %12, %15 : vector<32x1xf32>
    %17 = math.rsqrt %16 : vector<32x1xf32>
    %18 = vector.broadcast %17 : vector<32x1xf32> to vector<32x32xf32>
    %19 = arith.mulf %14, %18 : vector<32x32xf32>
    %c0_6 = arith.constant 0 : index
    %c0_7 = arith.constant 0 : index
    %c0_8 = arith.constant 0 : index
    %20 = vector.load %arg2[%c0_6, %c0_7, %c0_8] : memref<3x1x32xf32, #tpu.memory_space<vmem>>, vector<1x1x32xf32>
    %21 = vector.shape_cast %20 : vector<1x1x32xf32> to vector<1x32xf32>
    %22 = vector.broadcast %21 : vector<1x32xf32> to vector<32x32xf32>
    %23 = arith.mulf %19, %22 : vector<32x32xf32>
    %c0_9 = arith.constant 0 : index
    %c0_10 = arith.constant 0 : index
    %c0_11 = arith.constant 0 : index
    %24 = vector.load %arg3[%c0_9, %c0_10, %c0_11] : memref<3x1x32xf32, #tpu.memory_space<vmem>>, vector<1x1x32xf32>
    %25 = vector.shape_cast %24 : vector<1x1x32xf32> to vector<1x32xf32>
    %26 = vector.broadcast %25 : vector<1x32xf32> to vector<32x32xf32>
    %27 = arith.addf %23, %26 : vector<32x32xf32>
    %28 = arith.truncf %27 : vector<32x32xf32> to vector<32x32xbf16>
    %c0_12 = arith.constant 0 : index
    %c0_13 = arith.constant 0 : index
    %c0_14 = arith.constant 0 : index
    %29 = vector.load %arg4[%c0_12, %c0_13, %c0_14] : memref<3x32x32xbf16, #tpu.memory_space<vmem>>, vector<1x32x32xbf16>
    %30 = vector.shape_cast %29 : vector<1x32x32xbf16> to vector<32x32xbf16>
    %cst_15 = arith.constant dense<0.000000e+00> : vector<32x32xf32>
    %31 = tpu.matmul %28, %30, %cst_15 {dimension_numbers = #tpu.dot_dimension_numbers<[1], [0], [0], [1], [0, 0, 1, 1], [], []>} : vector<32x32xbf16>, vector<32x32xbf16>, vector<32x32xf32> -> vector<32x32xf32>
    %c0_16 = arith.constant 0 : index
    %c0_17 = arith.constant 0 : index
    %c0_18 = arith.constant 0 : index
    %32 = vector.load %arg5[%c0_16, %c0_17, %c0_18] : memref<3x1x32xf32, #tpu.memory_space<vmem>>, vector<1x1x32xf32>
    %33 = vector.shape_cast %32 : vector<1x1x32xf32> to vector<1x32xf32>
    %34 = vector.broadcast %33 : vector<1x32xf32> to vector<32x32xf32>
    %35 = arith.addf %31, %34 : vector<32x32xf32>
    %c1 = arith.constant 1 : index
    %c0_19 = arith.constant 0 : index
    %c0_20 = arith.constant 0 : index
    %36 = vector.load %arg4[%c1, %c0_19, %c0_20] : memref<3x32x32xbf16, #tpu.memory_space<vmem>>, vector<1x32x32xbf16>
    %37 = vector.shape_cast %36 : vector<1x32x32xbf16> to vector<32x32xbf16>
    %cst_21 = arith.constant dense<0.000000e+00> : vector<32x32xf32>
    %38 = tpu.matmul %28, %37, %cst_21 {dimension_numbers = #tpu.dot_dimension_numbers<[1], [0], [0], [1], [0, 0, 1, 1], [], []>} : vector<32x32xbf16>, vector<32x32xbf16>, vector<32x32xf32> -> vector<32x32xf32>
    %c1_22 = arith.constant 1 : index
    %c0_23 = arith.constant 0 : index
    %c0_24 = arith.constant 0 : index
    %39 = vector.load %arg5[%c1_22, %c0_23, %c0_24] : memref<3x1x32xf32, #tpu.memory_space<vmem>>, vector<1x1x32xf32>
    %40 = vector.shape_cast %39 : vector<1x1x32xf32> to vector<1x32xf32>
    %41 = vector.broadcast %40 : vector<1x32xf32> to vector<32x32xf32>
    %42 = arith.addf %38, %41 : vector<32x32xf32>
    %c2 = arith.constant 2 : index
    %c0_25 = arith.constant 0 : index
    %c0_26 = arith.constant 0 : index
    %43 = vector.load %arg4[%c2, %c0_25, %c0_26] : memref<3x32x32xbf16, #tpu.memory_space<vmem>>, vector<1x32x32xbf16>
    %44 = vector.shape_cast %43 : vector<1x32x32xbf16> to vector<32x32xbf16>
    %cst_27 = arith.constant dense<0.000000e+00> : vector<32x32xf32>
    %45 = tpu.matmul %28, %44, %cst_27 {dimension_numbers = #tpu.dot_dimension_numbers<[1], [0], [0], [1], [0, 0, 1, 1], [], []>} : vector<32x32xbf16>, vector<32x32xbf16>, vector<32x32xf32> -> vector<32x32xf32>
    %c2_28 = arith.constant 2 : index
    %c0_29 = arith.constant 0 : index
    %c0_30 = arith.constant 0 : index
    %46 = vector.load %arg5[%c2_28, %c0_29, %c0_30] : memref<3x1x32xf32, #tpu.memory_space<vmem>>, vector<1x1x32xf32>
    %47 = vector.shape_cast %46 : vector<1x1x32xf32> to vector<1x32xf32>
    %48 = vector.broadcast %47 : vector<1x32xf32> to vector<32x32xf32>
    %49 = arith.addf %45, %48 : vector<32x32xf32>
    %50 = vector.extract_strided_slice %35 {offsets = [0, 0], sizes = [32, 8], strides = [1, 1]} : vector<32x32xf32> to vector<32x8xf32>
    %51 = vector.shape_cast %50 : vector<32x8xf32> to vector<4x8x8xf32>
    %52 = arith.truncf %51 : vector<4x8x8xf32> to vector<4x8x8xbf16>
    %53 = vector.extract_strided_slice %42 {offsets = [0, 0], sizes = [32, 8], strides = [1, 1]} : vector<32x32xf32> to vector<32x8xf32>
    %54 = vector.shape_cast %53 : vector<32x8xf32> to vector<4x8x8xf32>
    %55 = arith.truncf %54 : vector<4x8x8xf32> to vector<4x8x8xbf16>
    %56 = vector.extract_strided_slice %49 {offsets = [0, 0], sizes = [32, 8], strides = [1, 1]} : vector<32x32xf32> to vector<32x8xf32>
    %57 = vector.shape_cast %56 : vector<32x8xf32> to vector<4x8x8xf32>
    %58 = arith.truncf %57 : vector<4x8x8xf32> to vector<4x8x8xbf16>
    "tpu.trace_start"() <{level = 10 : i32, message = "gqd,gkd->gqk"}> : () -> ()
    %cst_31 = arith.constant dense<0.000000e+00> : vector<4x8x8xf32>
    %59 = tpu.matmul %52, %55, %cst_31 {dimension_numbers = #tpu.dot_dimension_numbers<[2], [2], [1], [1], [0, 0, 0, 1, 1, 1], [0], [0]>} : vector<4x8x8xbf16>, vector<4x8x8xbf16>, vector<4x8x8xf32> -> vector<4x8x8xf32>
    "tpu.trace_stop"() : () -> ()
    %cst_32 = arith.constant dense<0xFF800000> : vector<4x8xf32>
    %60 = vector.multi_reduction <maximumf>, %59, %cst_32 [2] : vector<4x8x8xf32> to vector<4x8xf32>
    %61 = vector.shape_cast %60 : vector<4x8xf32> to vector<4x8x1xf32>
    %62 = vector.broadcast %61 : vector<4x8x1xf32> to vector<4x8x8xf32>
    %63 = arith.subf %59, %62 : vector<4x8x8xf32>
    %64 = math.exp %63 : vector<4x8x8xf32>
    %cst_33 = arith.constant dense<0.000000e+00> : vector<4x8xf32>
    %65 = vector.multi_reduction <add>, %64, %cst_33 [2] : vector<4x8x8xf32> to vector<4x8xf32>
    %66 = vector.shape_cast %65 : vector<4x8xf32> to vector<4x8x1xf32>
    %67 = tpu.reciprocal %66 : vector<4x8x1xf32> -> vector<4x8x1xf32>
    %68 = vector.broadcast %67 : vector<4x8x1xf32> to vector<4x8x8xf32>
    %69 = arith.mulf %64, %68 : vector<4x8x8xf32>
    %70 = arith.truncf %69 : vector<4x8x8xf32> to vector<4x8x8xbf16>
    "tpu.trace_start"() <{level = 10 : i32, message = "gqk,gkd->gqd"}> : () -> ()
    %cst_34 = arith.constant dense<0.000000e+00> : vector<4x8x8xf32>
    %71 = tpu.matmul %70, %58, %cst_34 {dimension_numbers = #tpu.dot_dimension_numbers<[2], [1], [1], [2], [0, 0, 0, 1, 1, 2], [0], [0]>} : vector<4x8x8xbf16>, vector<4x8x8xbf16>, vector<4x8x8xf32> -> vector<4x8x8xf32>
    "tpu.trace_stop"() : () -> ()
    %72 = vector.shape_cast %71 : vector<4x8x8xf32> to vector<32x8xf32>
    %73 = vector.extract_strided_slice %35 {offsets = [0, 8], sizes = [32, 8], strides = [1, 1]} : vector<32x32xf32> to vector<32x8xf32>
    %74 = vector.shape_cast %73 : vector<32x8xf32> to vector<4x8x8xf32>
    %75 = arith.truncf %74 : vector<4x8x8xf32> to vector<4x8x8xbf16>
    %76 = vector.extract_strided_slice %42 {offsets = [0, 8], sizes = [32, 8], strides = [1, 1]} : vector<32x32xf32> to vector<32x8xf32>
    %77 = vector.shape_cast %76 : vector<32x8xf32> to vector<4x8x8xf32>
    %78 = arith.truncf %77 : vector<4x8x8xf32> to vector<4x8x8xbf16>
    %79 = vector.extract_strided_slice %49 {offsets = [0, 8], sizes = [32, 8], strides = [1, 1]} : vector<32x32xf32> to vector<32x8xf32>
    %80 = vector.shape_cast %79 : vector<32x8xf32> to vector<4x8x8xf32>
    %81 = arith.truncf %80 : vector<4x8x8xf32> to vector<4x8x8xbf16>
    "tpu.trace_start"() <{level = 10 : i32, message = "gqd,gkd->gqk"}> : () -> ()
    %cst_35 = arith.constant dense<0.000000e+00> : vector<4x8x8xf32>
    %82 = tpu.matmul %75, %78, %cst_35 {dimension_numbers = #tpu.dot_dimension_numbers<[2], [2], [1], [1], [0, 0, 0, 1, 1, 1], [0], [0]>} : vector<4x8x8xbf16>, vector<4x8x8xbf16>, vector<4x8x8xf32> -> vector<4x8x8xf32>
    "tpu.trace_stop"() : () -> ()
    %cst_36 = arith.constant dense<0xFF800000> : vector<4x8xf32>
    %83 = vector.multi_reduction <maximumf>, %82, %cst_36 [2] : vector<4x8x8xf32> to vector<4x8xf32>
    %84 = vector.shape_cast %83 : vector<4x8xf32> to vector<4x8x1xf32>
    %85 = vector.broadcast %84 : vector<4x8x1xf32> to vector<4x8x8xf32>
    %86 = arith.subf %82, %85 : vector<4x8x8xf32>
    %87 = math.exp %86 : vector<4x8x8xf32>
    %cst_37 = arith.constant dense<0.000000e+00> : vector<4x8xf32>
    %88 = vector.multi_reduction <add>, %87, %cst_37 [2] : vector<4x8x8xf32> to vector<4x8xf32>
    %89 = vector.shape_cast %88 : vector<4x8xf32> to vector<4x8x1xf32>
    %90 = tpu.reciprocal %89 : vector<4x8x1xf32> -> vector<4x8x1xf32>
    %91 = vector.broadcast %90 : vector<4x8x1xf32> to vector<4x8x8xf32>
    %92 = arith.mulf %87, %91 : vector<4x8x8xf32>
    %93 = arith.truncf %92 : vector<4x8x8xf32> to vector<4x8x8xbf16>
    "tpu.trace_start"() <{level = 10 : i32, message = "gqk,gkd->gqd"}> : () -> ()
    %cst_38 = arith.constant dense<0.000000e+00> : vector<4x8x8xf32>
    %94 = tpu.matmul %93, %81, %cst_38 {dimension_numbers = #tpu.dot_dimension_numbers<[2], [1], [1], [2], [0, 0, 0, 1, 1, 2], [0], [0]>} : vector<4x8x8xbf16>, vector<4x8x8xbf16>, vector<4x8x8xf32> -> vector<4x8x8xf32>
    "tpu.trace_stop"() : () -> ()
    %95 = vector.shape_cast %94 : vector<4x8x8xf32> to vector<32x8xf32>
    %96 = vector.extract_strided_slice %35 {offsets = [0, 16], sizes = [32, 8], strides = [1, 1]} : vector<32x32xf32> to vector<32x8xf32>
    %97 = vector.shape_cast %96 : vector<32x8xf32> to vector<4x8x8xf32>
    %98 = arith.truncf %97 : vector<4x8x8xf32> to vector<4x8x8xbf16>
    %99 = vector.extract_strided_slice %42 {offsets = [0, 16], sizes = [32, 8], strides = [1, 1]} : vector<32x32xf32> to vector<32x8xf32>
    %100 = vector.shape_cast %99 : vector<32x8xf32> to vector<4x8x8xf32>
    %101 = arith.truncf %100 : vector<4x8x8xf32> to vector<4x8x8xbf16>
    %102 = vector.extract_strided_slice %49 {offsets = [0, 16], sizes = [32, 8], strides = [1, 1]} : vector<32x32xf32> to vector<32x8xf32>
    %103 = vector.shape_cast %102 : vector<32x8xf32> to vector<4x8x8xf32>
    %104 = arith.truncf %103 : vector<4x8x8xf32> to vector<4x8x8xbf16>
    "tpu.trace_start"() <{level = 10 : i32, message = "gqd,gkd->gqk"}> : () -> ()
    %cst_39 = arith.constant dense<0.000000e+00> : vector<4x8x8xf32>
    %105 = tpu.matmul %98, %101, %cst_39 {dimension_numbers = #tpu.dot_dimension_numbers<[2], [2], [1], [1], [0, 0, 0, 1, 1, 1], [0], [0]>} : vector<4x8x8xbf16>, vector<4x8x8xbf16>, vector<4x8x8xf32> -> vector<4x8x8xf32>
    "tpu.trace_stop"() : () -> ()
    %cst_40 = arith.constant dense<0xFF800000> : vector<4x8xf32>
    %106 = vector.multi_reduction <maximumf>, %105, %cst_40 [2] : vector<4x8x8xf32> to vector<4x8xf32>
    %107 = vector.shape_cast %106 : vector<4x8xf32> to vector<4x8x1xf32>
    %108 = vector.broadcast %107 : vector<4x8x1xf32> to vector<4x8x8xf32>
    %109 = arith.subf %105, %108 : vector<4x8x8xf32>
    %110 = math.exp %109 : vector<4x8x8xf32>
    %cst_41 = arith.constant dense<0.000000e+00> : vector<4x8xf32>
    %111 = vector.multi_reduction <add>, %110, %cst_41 [2] : vector<4x8x8xf32> to vector<4x8xf32>
    %112 = vector.shape_cast %111 : vector<4x8xf32> to vector<4x8x1xf32>
    %113 = tpu.reciprocal %112 : vector<4x8x1xf32> -> vector<4x8x1xf32>
    %114 = vector.broadcast %113 : vector<4x8x1xf32> to vector<4x8x8xf32>
    %115 = arith.mulf %110, %114 : vector<4x8x8xf32>
    %116 = arith.truncf %115 : vector<4x8x8xf32> to vector<4x8x8xbf16>
    "tpu.trace_start"() <{level = 10 : i32, message = "gqk,gkd->gqd"}> : () -> ()
    %cst_42 = arith.constant dense<0.000000e+00> : vector<4x8x8xf32>
    %117 = tpu.matmul %116, %104, %cst_42 {dimension_numbers = #tpu.dot_dimension_numbers<[2], [1], [1], [2], [0, 0, 0, 1, 1, 2], [0], [0]>} : vector<4x8x8xbf16>, vector<4x8x8xbf16>, vector<4x8x8xf32> -> vector<4x8x8xf32>
    "tpu.trace_stop"() : () -> ()
    %118 = vector.shape_cast %117 : vector<4x8x8xf32> to vector<32x8xf32>
    %119 = vector.extract_strided_slice %35 {offsets = [0, 24], sizes = [32, 8], strides = [1, 1]} : vector<32x32xf32> to vector<32x8xf32>
    %120 = vector.shape_cast %119 : vector<32x8xf32> to vector<4x8x8xf32>
    %121 = arith.truncf %120 : vector<4x8x8xf32> to vector<4x8x8xbf16>
    %122 = vector.extract_strided_slice %42 {offsets = [0, 24], sizes = [32, 8], strides = [1, 1]} : vector<32x32xf32> to vector<32x8xf32>
    %123 = vector.shape_cast %122 : vector<32x8xf32> to vector<4x8x8xf32>
    %124 = arith.truncf %123 : vector<4x8x8xf32> to vector<4x8x8xbf16>
    %125 = vector.extract_strided_slice %49 {offsets = [0, 24], sizes = [32, 8], strides = [1, 1]} : vector<32x32xf32> to vector<32x8xf32>
    %126 = vector.shape_cast %125 : vector<32x8xf32> to vector<4x8x8xf32>
    %127 = arith.truncf %126 : vector<4x8x8xf32> to vector<4x8x8xbf16>
    "tpu.trace_start"() <{level = 10 : i32, message = "gqd,gkd->gqk"}> : () -> ()
    %cst_43 = arith.constant dense<0.000000e+00> : vector<4x8x8xf32>
    %128 = tpu.matmul %121, %124, %cst_43 {dimension_numbers = #tpu.dot_dimension_numbers<[2], [2], [1], [1], [0, 0, 0, 1, 1, 1], [0], [0]>} : vector<4x8x8xbf16>, vector<4x8x8xbf16>, vector<4x8x8xf32> -> vector<4x8x8xf32>
    "tpu.trace_stop"() : () -> ()
    %cst_44 = arith.constant dense<0xFF800000> : vector<4x8xf32>
    %129 = vector.multi_reduction <maximumf>, %128, %cst_44 [2] : vector<4x8x8xf32> to vector<4x8xf32>
    %130 = vector.shape_cast %129 : vector<4x8xf32> to vector<4x8x1xf32>
    %131 = vector.broadcast %130 : vector<4x8x1xf32> to vector<4x8x8xf32>
    %132 = arith.subf %128, %131 : vector<4x8x8xf32>
    %133 = math.exp %132 : vector<4x8x8xf32>
    %cst_45 = arith.constant dense<0.000000e+00> : vector<4x8xf32>
    %134 = vector.multi_reduction <add>, %133, %cst_45 [2] : vector<4x8x8xf32> to vector<4x8xf32>
    %135 = vector.shape_cast %134 : vector<4x8xf32> to vector<4x8x1xf32>
    %136 = tpu.reciprocal %135 : vector<4x8x1xf32> -> vector<4x8x1xf32>
    %137 = vector.broadcast %136 : vector<4x8x1xf32> to vector<4x8x8xf32>
    %138 = arith.mulf %133, %137 : vector<4x8x8xf32>
    %139 = arith.truncf %138 : vector<4x8x8xf32> to vector<4x8x8xbf16>
    "tpu.trace_start"() <{level = 10 : i32, message = "gqk,gkd->gqd"}> : () -> ()
    %cst_46 = arith.constant dense<0.000000e+00> : vector<4x8x8xf32>
    %140 = tpu.matmul %139, %127, %cst_46 {dimension_numbers = #tpu.dot_dimension_numbers<[2], [1], [1], [2], [0, 0, 0, 1, 1, 2], [0], [0]>} : vector<4x8x8xbf16>, vector<4x8x8xbf16>, vector<4x8x8xf32> -> vector<4x8x8xf32>
    "tpu.trace_stop"() : () -> ()
    %141 = vector.shape_cast %140 : vector<4x8x8xf32> to vector<32x8xf32>
    %142 = tpu.concatenate %72, %95, %118, %141 in 1 : vector<32x8xf32>, vector<32x8xf32>, vector<32x8xf32>, vector<32x8xf32> -> vector<32x32xf32>
    %143 = arith.truncf %142 : vector<32x32xf32> to vector<32x32xbf16>
    %c0_47 = arith.constant 0 : index
    %c0_48 = arith.constant 0 : index
    %144 = vector.load %arg6[%c0_47, %c0_48] : memref<32x32xbf16, #tpu.memory_space<vmem>>, vector<32x32xbf16>
    %cst_49 = arith.constant dense<0.000000e+00> : vector<32x32xf32>
    %145 = tpu.matmul %143, %144, %cst_49 {dimension_numbers = #tpu.dot_dimension_numbers<[1], [0], [0], [1], [0, 0, 1, 1], [], []>} : vector<32x32xbf16>, vector<32x32xbf16>, vector<32x32xf32> -> vector<32x32xf32>
    %c0_50 = arith.constant 0 : index
    %c0_51 = arith.constant 0 : index
    %146 = vector.load %arg7[%c0_50, %c0_51] : memref<1x32xf32, #tpu.memory_space<vmem>>, vector<1x32xf32>
    %147 = vector.broadcast %146 : vector<1x32xf32> to vector<32x32xf32>
    %148 = arith.addf %145, %147 : vector<32x32xf32>
    %149 = arith.addf %1, %148 : vector<32x32xf32>
    %cst_52 = arith.constant dense<0.000000e+00> : vector<32xf32>
    %150 = vector.multi_reduction <add>, %149, %cst_52 [1] : vector<32x32xf32> to vector<32xf32>
    %151 = vector.shape_cast %150 : vector<32xf32> to vector<32x1xf32>
    %cst_53 = arith.constant 3.200000e+01 : f32
    %152 = vector.broadcast %cst_53 : f32 to vector<32x1xf32>
    %153 = arith.divf %151, %152 : vector<32x1xf32>
    %154 = vector.broadcast %153 : vector<32x1xf32> to vector<32x32xf32>
    %155 = arith.subf %149, %154 : vector<32x32xf32>
    %156 = arith.mulf %155, %155 : vector<32x32xf32>
    %cst_54 = arith.constant dense<0.000000e+00> : vector<32xf32>
    %157 = vector.multi_reduction <add>, %156, %cst_54 [1] : vector<32x32xf32> to vector<32xf32>
    %158 = vector.shape_cast %157 : vector<32xf32> to vector<32x1xf32>
    %cst_55 = arith.constant 3.200000e+01 : f32
    %159 = vector.broadcast %cst_55 : f32 to vector<32x1xf32>
    %160 = arith.divf %158, %159 : vector<32x1xf32>
    %161 = vector.broadcast %153 : vector<32x1xf32> to vector<32x32xf32>
    %162 = arith.subf %149, %161 : vector<32x32xf32>
    %cst_56 = arith.constant 9.99999974E-6 : f32
    %163 = vector.broadcast %cst_56 : f32 to vector<32x1xf32>
    %164 = arith.addf %160, %163 : vector<32x1xf32>
    %165 = math.rsqrt %164 : vector<32x1xf32>
    %166 = vector.broadcast %165 : vector<32x1xf32> to vector<32x32xf32>
    %167 = arith.mulf %162, %166 : vector<32x32xf32>
    %c1_57 = arith.constant 1 : index
    %c0_58 = arith.constant 0 : index
    %c0_59 = arith.constant 0 : index
    %168 = vector.load %arg2[%c1_57, %c0_58, %c0_59] : memref<3x1x32xf32, #tpu.memory_space<vmem>>, vector<1x1x32xf32>
    %169 = vector.shape_cast %168 : vector<1x1x32xf32> to vector<1x32xf32>
    %170 = vector.broadcast %169 : vector<1x32xf32> to vector<32x32xf32>
    %171 = arith.mulf %167, %170 : vector<32x32xf32>
    %c1_60 = arith.constant 1 : index
    %c0_61 = arith.constant 0 : index
    %c0_62 = arith.constant 0 : index
    %172 = vector.load %arg3[%c1_60, %c0_61, %c0_62] : memref<3x1x32xf32, #tpu.memory_space<vmem>>, vector<1x1x32xf32>
    %173 = vector.shape_cast %172 : vector<1x1x32xf32> to vector<1x32xf32>
    %174 = vector.broadcast %173 : vector<1x32xf32> to vector<32x32xf32>
    %175 = arith.addf %171, %174 : vector<32x32xf32>
    %176 = arith.truncf %175 : vector<32x32xf32> to vector<32x32xbf16>
    %c0_63 = arith.constant 0 : index
    %c0_64 = arith.constant 0 : index
    %c0_65 = arith.constant 0 : index
    %177 = vector.load %arg8[%c0_63, %c0_64, %c0_65] : memref<3x32x32xbf16, #tpu.memory_space<vmem>>, vector<1x32x32xbf16>
    %178 = vector.shape_cast %177 : vector<1x32x32xbf16> to vector<32x32xbf16>
    %cst_66 = arith.constant dense<0.000000e+00> : vector<32x32xf32>
    %179 = tpu.matmul %176, %178, %cst_66 {dimension_numbers = #tpu.dot_dimension_numbers<[1], [0], [0], [1], [0, 0, 1, 1], [], []>} : vector<32x32xbf16>, vector<32x32xbf16>, vector<32x32xf32> -> vector<32x32xf32>
    %c0_67 = arith.constant 0 : index
    %c0_68 = arith.constant 0 : index
    %c0_69 = arith.constant 0 : index
    %180 = vector.load %arg9[%c0_67, %c0_68, %c0_69] : memref<3x1x32xf32, #tpu.memory_space<vmem>>, vector<1x1x32xf32>
    %181 = vector.shape_cast %180 : vector<1x1x32xf32> to vector<1x32xf32>
    %182 = vector.broadcast %181 : vector<1x32xf32> to vector<32x32xf32>
    %183 = arith.addf %179, %182 : vector<32x32xf32>
    %c1_70 = arith.constant 1 : index
    %c0_71 = arith.constant 0 : index
    %c0_72 = arith.constant 0 : index
    %184 = vector.load %arg8[%c1_70, %c0_71, %c0_72] : memref<3x32x32xbf16, #tpu.memory_space<vmem>>, vector<1x32x32xbf16>
    %185 = vector.shape_cast %184 : vector<1x32x32xbf16> to vector<32x32xbf16>
    %cst_73 = arith.constant dense<0.000000e+00> : vector<32x32xf32>
    %186 = tpu.matmul %176, %185, %cst_73 {dimension_numbers = #tpu.dot_dimension_numbers<[1], [0], [0], [1], [0, 0, 1, 1], [], []>} : vector<32x32xbf16>, vector<32x32xbf16>, vector<32x32xf32> -> vector<32x32xf32>
    %c1_74 = arith.constant 1 : index
    %c0_75 = arith.constant 0 : index
    %c0_76 = arith.constant 0 : index
    %187 = vector.load %arg9[%c1_74, %c0_75, %c0_76] : memref<3x1x32xf32, #tpu.memory_space<vmem>>, vector<1x1x32xf32>
    %188 = vector.shape_cast %187 : vector<1x1x32xf32> to vector<1x32xf32>
    %189 = vector.broadcast %188 : vector<1x32xf32> to vector<32x32xf32>
    %190 = arith.addf %186, %189 : vector<32x32xf32>
    %c2_77 = arith.constant 2 : index
    %c0_78 = arith.constant 0 : index
    %c0_79 = arith.constant 0 : index
    %191 = vector.load %arg8[%c2_77, %c0_78, %c0_79] : memref<3x32x32xbf16, #tpu.memory_space<vmem>>, vector<1x32x32xbf16>
    %192 = vector.shape_cast %191 : vector<1x32x32xbf16> to vector<32x32xbf16>
    %cst_80 = arith.constant dense<0.000000e+00> : vector<32x32xf32>
    %193 = tpu.matmul %176, %192, %cst_80 {dimension_numbers = #tpu.dot_dimension_numbers<[1], [0], [0], [1], [0, 0, 1, 1], [], []>} : vector<32x32xbf16>, vector<32x32xbf16>, vector<32x32xf32> -> vector<32x32xf32>
    %c2_81 = arith.constant 2 : index
    %c0_82 = arith.constant 0 : index
    %c0_83 = arith.constant 0 : index
    %194 = vector.load %arg9[%c2_81, %c0_82, %c0_83] : memref<3x1x32xf32, #tpu.memory_space<vmem>>, vector<1x1x32xf32>
    %195 = vector.shape_cast %194 : vector<1x1x32xf32> to vector<1x32xf32>
    %196 = vector.broadcast %195 : vector<1x32xf32> to vector<32x32xf32>
    %197 = arith.addf %193, %196 : vector<32x32xf32>
    %198 = vector.extract_strided_slice %183 {offsets = [0, 0], sizes = [32, 8], strides = [1, 1]} : vector<32x32xf32> to vector<32x8xf32>
    %199 = vector.shape_cast %198 : vector<32x8xf32> to vector<1x32x8xf32>
    %200 = arith.truncf %199 : vector<1x32x8xf32> to vector<1x32x8xbf16>
    %201 = vector.extract_strided_slice %190 {offsets = [0, 0], sizes = [32, 8], strides = [1, 1]} : vector<32x32xf32> to vector<32x8xf32>
    %202 = vector.shape_cast %201 : vector<32x8xf32> to vector<1x32x8xf32>
    %203 = arith.truncf %202 : vector<1x32x8xf32> to vector<1x32x8xbf16>
    %204 = vector.extract_strided_slice %197 {offsets = [0, 0], sizes = [32, 8], strides = [1, 1]} : vector<32x32xf32> to vector<32x8xf32>
    %205 = vector.shape_cast %204 : vector<32x8xf32> to vector<1x32x8xf32>
    %206 = arith.truncf %205 : vector<1x32x8xf32> to vector<1x32x8xbf16>
    "tpu.trace_start"() <{level = 10 : i32, message = "gqd,gkd->gqk"}> : () -> ()
    %cst_84 = arith.constant dense<0.000000e+00> : vector<1x32x32xf32>
    %207 = tpu.matmul %200, %203, %cst_84 {dimension_numbers = #tpu.dot_dimension_numbers<[2], [2], [1], [1], [0, 0, 0, 1, 1, 1], [0], [0]>} : vector<1x32x8xbf16>, vector<1x32x8xbf16>, vector<1x32x32xf32> -> vector<1x32x32xf32>
    "tpu.trace_stop"() : () -> ()
    %cst_85 = arith.constant dense<0xFF800000> : vector<1x32xf32>
    %208 = vector.multi_reduction <maximumf>, %207, %cst_85 [2] : vector<1x32x32xf32> to vector<1x32xf32>
    %209 = vector.shape_cast %208 : vector<1x32xf32> to vector<1x32x1xf32>
    %210 = vector.broadcast %209 : vector<1x32x1xf32> to vector<1x32x32xf32>
    %211 = arith.subf %207, %210 : vector<1x32x32xf32>
    %212 = math.exp %211 : vector<1x32x32xf32>
    %cst_86 = arith.constant dense<0.000000e+00> : vector<1x32xf32>
    %213 = vector.multi_reduction <add>, %212, %cst_86 [2] : vector<1x32x32xf32> to vector<1x32xf32>
    %214 = vector.shape_cast %213 : vector<1x32xf32> to vector<1x32x1xf32>
    %215 = tpu.reciprocal %214 : vector<1x32x1xf32> -> vector<1x32x1xf32>
    %216 = vector.broadcast %215 : vector<1x32x1xf32> to vector<1x32x32xf32>
    %217 = arith.mulf %212, %216 : vector<1x32x32xf32>
    %218 = arith.truncf %217 : vector<1x32x32xf32> to vector<1x32x32xbf16>
    "tpu.trace_start"() <{level = 10 : i32, message = "gqk,gkd->gqd"}> : () -> ()
    %cst_87 = arith.constant dense<0.000000e+00> : vector<1x32x8xf32>
    %219 = tpu.matmul %218, %206, %cst_87 {dimension_numbers = #tpu.dot_dimension_numbers<[2], [1], [1], [2], [0, 0, 0, 1, 1, 2], [0], [0]>} : vector<1x32x32xbf16>, vector<1x32x8xbf16>, vector<1x32x8xf32> -> vector<1x32x8xf32>
    "tpu.trace_stop"() : () -> ()
    %220 = vector.shape_cast %219 : vector<1x32x8xf32> to vector<32x8xf32>
    %221 = vector.extract_strided_slice %183 {offsets = [0, 8], sizes = [32, 8], strides = [1, 1]} : vector<32x32xf32> to vector<32x8xf32>
    %222 = vector.shape_cast %221 : vector<32x8xf32> to vector<1x32x8xf32>
    %223 = arith.truncf %222 : vector<1x32x8xf32> to vector<1x32x8xbf16>
    %224 = vector.extract_strided_slice %190 {offsets = [0, 8], sizes = [32, 8], strides = [1, 1]} : vector<32x32xf32> to vector<32x8xf32>
    %225 = vector.shape_cast %224 : vector<32x8xf32> to vector<1x32x8xf32>
    %226 = arith.truncf %225 : vector<1x32x8xf32> to vector<1x32x8xbf16>
    %227 = vector.extract_strided_slice %197 {offsets = [0, 8], sizes = [32, 8], strides = [1, 1]} : vector<32x32xf32> to vector<32x8xf32>
    %228 = vector.shape_cast %227 : vector<32x8xf32> to vector<1x32x8xf32>
    %229 = arith.truncf %228 : vector<1x32x8xf32> to vector<1x32x8xbf16>
    "tpu.trace_start"() <{level = 10 : i32, message = "gqd,gkd->gqk"}> : () -> ()
    %cst_88 = arith.constant dense<0.000000e+00> : vector<1x32x32xf32>
    %230 = tpu.matmul %223, %226, %cst_88 {dimension_numbers = #tpu.dot_dimension_numbers<[2], [2], [1], [1], [0, 0, 0, 1, 1, 1], [0], [0]>} : vector<1x32x8xbf16>, vector<1x32x8xbf16>, vector<1x32x32xf32> -> vector<1x32x32xf32>
    "tpu.trace_stop"() : () -> ()
    %cst_89 = arith.constant dense<0xFF800000> : vector<1x32xf32>
    %231 = vector.multi_reduction <maximumf>, %230, %cst_89 [2] : vector<1x32x32xf32> to vector<1x32xf32>
    %232 = vector.shape_cast %231 : vector<1x32xf32> to vector<1x32x1xf32>
    %233 = vector.broadcast %232 : vector<1x32x1xf32> to vector<1x32x32xf32>
    %234 = arith.subf %230, %233 : vector<1x32x32xf32>
    %235 = math.exp %234 : vector<1x32x32xf32>
    %cst_90 = arith.constant dense<0.000000e+00> : vector<1x32xf32>
    %236 = vector.multi_reduction <add>, %235, %cst_90 [2] : vector<1x32x32xf32> to vector<1x32xf32>
    %237 = vector.shape_cast %236 : vector<1x32xf32> to vector<1x32x1xf32>
    %238 = tpu.reciprocal %237 : vector<1x32x1xf32> -> vector<1x32x1xf32>
    %239 = vector.broadcast %238 : vector<1x32x1xf32> to vector<1x32x32xf32>
    %240 = arith.mulf %235, %239 : vector<1x32x32xf32>
    %241 = arith.truncf %240 : vector<1x32x32xf32> to vector<1x32x32xbf16>
    "tpu.trace_start"() <{level = 10 : i32, message = "gqk,gkd->gqd"}> : () -> ()
    %cst_91 = arith.constant dense<0.000000e+00> : vector<1x32x8xf32>
    %242 = tpu.matmul %241, %229, %cst_91 {dimension_numbers = #tpu.dot_dimension_numbers<[2], [1], [1], [2], [0, 0, 0, 1, 1, 2], [0], [0]>} : vector<1x32x32xbf16>, vector<1x32x8xbf16>, vector<1x32x8xf32> -> vector<1x32x8xf32>
    "tpu.trace_stop"() : () -> ()
    %243 = vector.shape_cast %242 : vector<1x32x8xf32> to vector<32x8xf32>
    %244 = vector.extract_strided_slice %183 {offsets = [0, 16], sizes = [32, 8], strides = [1, 1]} : vector<32x32xf32> to vector<32x8xf32>
    %245 = vector.shape_cast %244 : vector<32x8xf32> to vector<1x32x8xf32>
    %246 = arith.truncf %245 : vector<1x32x8xf32> to vector<1x32x8xbf16>
    %247 = vector.extract_strided_slice %190 {offsets = [0, 16], sizes = [32, 8], strides = [1, 1]} : vector<32x32xf32> to vector<32x8xf32>
    %248 = vector.shape_cast %247 : vector<32x8xf32> to vector<1x32x8xf32>
    %249 = arith.truncf %248 : vector<1x32x8xf32> to vector<1x32x8xbf16>
    %250 = vector.extract_strided_slice %197 {offsets = [0, 16], sizes = [32, 8], strides = [1, 1]} : vector<32x32xf32> to vector<32x8xf32>
    %251 = vector.shape_cast %250 : vector<32x8xf32> to vector<1x32x8xf32>
    %252 = arith.truncf %251 : vector<1x32x8xf32> to vector<1x32x8xbf16>
    "tpu.trace_start"() <{level = 10 : i32, message = "gqd,gkd->gqk"}> : () -> ()
    %cst_92 = arith.constant dense<0.000000e+00> : vector<1x32x32xf32>
    %253 = tpu.matmul %246, %249, %cst_92 {dimension_numbers = #tpu.dot_dimension_numbers<[2], [2], [1], [1], [0, 0, 0, 1, 1, 1], [0], [0]>} : vector<1x32x8xbf16>, vector<1x32x8xbf16>, vector<1x32x32xf32> -> vector<1x32x32xf32>
    "tpu.trace_stop"() : () -> ()
    %cst_93 = arith.constant dense<0xFF800000> : vector<1x32xf32>
    %254 = vector.multi_reduction <maximumf>, %253, %cst_93 [2] : vector<1x32x32xf32> to vector<1x32xf32>
    %255 = vector.shape_cast %254 : vector<1x32xf32> to vector<1x32x1xf32>
    %256 = vector.broadcast %255 : vector<1x32x1xf32> to vector<1x32x32xf32>
    %257 = arith.subf %253, %256 : vector<1x32x32xf32>
    %258 = math.exp %257 : vector<1x32x32xf32>
    %cst_94 = arith.constant dense<0.000000e+00> : vector<1x32xf32>
    %259 = vector.multi_reduction <add>, %258, %cst_94 [2] : vector<1x32x32xf32> to vector<1x32xf32>
    %260 = vector.shape_cast %259 : vector<1x32xf32> to vector<1x32x1xf32>
    %261 = tpu.reciprocal %260 : vector<1x32x1xf32> -> vector<1x32x1xf32>
    %262 = vector.broadcast %261 : vector<1x32x1xf32> to vector<1x32x32xf32>
    %263 = arith.mulf %258, %262 : vector<1x32x32xf32>
    %264 = arith.truncf %263 : vector<1x32x32xf32> to vector<1x32x32xbf16>
    "tpu.trace_start"() <{level = 10 : i32, message = "gqk,gkd->gqd"}> : () -> ()
    %cst_95 = arith.constant dense<0.000000e+00> : vector<1x32x8xf32>
    %265 = tpu.matmul %264, %252, %cst_95 {dimension_numbers = #tpu.dot_dimension_numbers<[2], [1], [1], [2], [0, 0, 0, 1, 1, 2], [0], [0]>} : vector<1x32x32xbf16>, vector<1x32x8xbf16>, vector<1x32x8xf32> -> vector<1x32x8xf32>
    "tpu.trace_stop"() : () -> ()
    %266 = vector.shape_cast %265 : vector<1x32x8xf32> to vector<32x8xf32>
    %267 = vector.extract_strided_slice %183 {offsets = [0, 24], sizes = [32, 8], strides = [1, 1]} : vector<32x32xf32> to vector<32x8xf32>
    %268 = vector.shape_cast %267 : vector<32x8xf32> to vector<1x32x8xf32>
    %269 = arith.truncf %268 : vector<1x32x8xf32> to vector<1x32x8xbf16>
    %270 = vector.extract_strided_slice %190 {offsets = [0, 24], sizes = [32, 8], strides = [1, 1]} : vector<32x32xf32> to vector<32x8xf32>
    %271 = vector.shape_cast %270 : vector<32x8xf32> to vector<1x32x8xf32>
    %272 = arith.truncf %271 : vector<1x32x8xf32> to vector<1x32x8xbf16>
    %273 = vector.extract_strided_slice %197 {offsets = [0, 24], sizes = [32, 8], strides = [1, 1]} : vector<32x32xf32> to vector<32x8xf32>
    %274 = vector.shape_cast %273 : vector<32x8xf32> to vector<1x32x8xf32>
    %275 = arith.truncf %274 : vector<1x32x8xf32> to vector<1x32x8xbf16>
    "tpu.trace_start"() <{level = 10 : i32, message = "gqd,gkd->gqk"}> : () -> ()
    %cst_96 = arith.constant dense<0.000000e+00> : vector<1x32x32xf32>
    %276 = tpu.matmul %269, %272, %cst_96 {dimension_numbers = #tpu.dot_dimension_numbers<[2], [2], [1], [1], [0, 0, 0, 1, 1, 1], [0], [0]>} : vector<1x32x8xbf16>, vector<1x32x8xbf16>, vector<1x32x32xf32> -> vector<1x32x32xf32>
    "tpu.trace_stop"() : () -> ()
    %cst_97 = arith.constant dense<0xFF800000> : vector<1x32xf32>
    %277 = vector.multi_reduction <maximumf>, %276, %cst_97 [2] : vector<1x32x32xf32> to vector<1x32xf32>
    %278 = vector.shape_cast %277 : vector<1x32xf32> to vector<1x32x1xf32>
    %279 = vector.broadcast %278 : vector<1x32x1xf32> to vector<1x32x32xf32>
    %280 = arith.subf %276, %279 : vector<1x32x32xf32>
    %281 = math.exp %280 : vector<1x32x32xf32>
    %cst_98 = arith.constant dense<0.000000e+00> : vector<1x32xf32>
    %282 = vector.multi_reduction <add>, %281, %cst_98 [2] : vector<1x32x32xf32> to vector<1x32xf32>
    %283 = vector.shape_cast %282 : vector<1x32xf32> to vector<1x32x1xf32>
    %284 = tpu.reciprocal %283 : vector<1x32x1xf32> -> vector<1x32x1xf32>
    %285 = vector.broadcast %284 : vector<1x32x1xf32> to vector<1x32x32xf32>
    %286 = arith.mulf %281, %285 : vector<1x32x32xf32>
    %287 = arith.truncf %286 : vector<1x32x32xf32> to vector<1x32x32xbf16>
    "tpu.trace_start"() <{level = 10 : i32, message = "gqk,gkd->gqd"}> : () -> ()
    %cst_99 = arith.constant dense<0.000000e+00> : vector<1x32x8xf32>
    %288 = tpu.matmul %287, %275, %cst_99 {dimension_numbers = #tpu.dot_dimension_numbers<[2], [1], [1], [2], [0, 0, 0, 1, 1, 2], [0], [0]>} : vector<1x32x32xbf16>, vector<1x32x8xbf16>, vector<1x32x8xf32> -> vector<1x32x8xf32>
    "tpu.trace_stop"() : () -> ()
    %289 = vector.shape_cast %288 : vector<1x32x8xf32> to vector<32x8xf32>
    %290 = tpu.concatenate %220, %243, %266, %289 in 1 : vector<32x8xf32>, vector<32x8xf32>, vector<32x8xf32>, vector<32x8xf32> -> vector<32x32xf32>
    %291 = arith.truncf %290 : vector<32x32xf32> to vector<32x32xbf16>
    %c0_100 = arith.constant 0 : index
    %c0_101 = arith.constant 0 : index
    %292 = vector.load %arg10[%c0_100, %c0_101] : memref<32x32xbf16, #tpu.memory_space<vmem>>, vector<32x32xbf16>
    %cst_102 = arith.constant dense<0.000000e+00> : vector<32x32xf32>
    %293 = tpu.matmul %291, %292, %cst_102 {dimension_numbers = #tpu.dot_dimension_numbers<[1], [0], [0], [1], [0, 0, 1, 1], [], []>} : vector<32x32xbf16>, vector<32x32xbf16>, vector<32x32xf32> -> vector<32x32xf32>
    %c0_103 = arith.constant 0 : index
    %c0_104 = arith.constant 0 : index
    %294 = vector.load %arg11[%c0_103, %c0_104] : memref<1x32xf32, #tpu.memory_space<vmem>>, vector<1x32xf32>
    %295 = vector.broadcast %294 : vector<1x32xf32> to vector<32x32xf32>
    %296 = arith.addf %293, %295 : vector<32x32xf32>
    %297 = arith.addf %149, %296 : vector<32x32xf32>
    %cst_105 = arith.constant dense<0.000000e+00> : vector<32xf32>
    %298 = vector.multi_reduction <add>, %297, %cst_105 [1] : vector<32x32xf32> to vector<32xf32>
    %299 = vector.shape_cast %298 : vector<32xf32> to vector<32x1xf32>
    %cst_106 = arith.constant 3.200000e+01 : f32
    %300 = vector.broadcast %cst_106 : f32 to vector<32x1xf32>
    %301 = arith.divf %299, %300 : vector<32x1xf32>
    %302 = vector.broadcast %301 : vector<32x1xf32> to vector<32x32xf32>
    %303 = arith.subf %297, %302 : vector<32x32xf32>
    %304 = arith.mulf %303, %303 : vector<32x32xf32>
    %cst_107 = arith.constant dense<0.000000e+00> : vector<32xf32>
    %305 = vector.multi_reduction <add>, %304, %cst_107 [1] : vector<32x32xf32> to vector<32xf32>
    %306 = vector.shape_cast %305 : vector<32xf32> to vector<32x1xf32>
    %cst_108 = arith.constant 3.200000e+01 : f32
    %307 = vector.broadcast %cst_108 : f32 to vector<32x1xf32>
    %308 = arith.divf %306, %307 : vector<32x1xf32>
    %309 = vector.broadcast %301 : vector<32x1xf32> to vector<32x32xf32>
    %310 = arith.subf %297, %309 : vector<32x32xf32>
    %cst_109 = arith.constant 9.99999974E-6 : f32
    %311 = vector.broadcast %cst_109 : f32 to vector<32x1xf32>
    %312 = arith.addf %308, %311 : vector<32x1xf32>
    %313 = math.rsqrt %312 : vector<32x1xf32>
    %314 = vector.broadcast %313 : vector<32x1xf32> to vector<32x32xf32>
    %315 = arith.mulf %310, %314 : vector<32x32xf32>
    %c2_110 = arith.constant 2 : index
    %c0_111 = arith.constant 0 : index
    %c0_112 = arith.constant 0 : index
    %316 = vector.load %arg2[%c2_110, %c0_111, %c0_112] : memref<3x1x32xf32, #tpu.memory_space<vmem>>, vector<1x1x32xf32>
    %317 = vector.shape_cast %316 : vector<1x1x32xf32> to vector<1x32xf32>
    %318 = vector.broadcast %317 : vector<1x32xf32> to vector<32x32xf32>
    %319 = arith.mulf %315, %318 : vector<32x32xf32>
    %c2_113 = arith.constant 2 : index
    %c0_114 = arith.constant 0 : index
    %c0_115 = arith.constant 0 : index
    %320 = vector.load %arg3[%c2_113, %c0_114, %c0_115] : memref<3x1x32xf32, #tpu.memory_space<vmem>>, vector<1x1x32xf32>
    %321 = vector.shape_cast %320 : vector<1x1x32xf32> to vector<1x32xf32>
    %322 = vector.broadcast %321 : vector<1x32xf32> to vector<32x32xf32>
    %323 = arith.addf %319, %322 : vector<32x32xf32>
    %324 = arith.truncf %323 : vector<32x32xf32> to vector<32x32xbf16>
    %c0_116 = arith.constant 0 : index
    %c0_117 = arith.constant 0 : index
    %325 = vector.load %arg12[%c0_116, %c0_117] : memref<32x128xbf16, #tpu.memory_space<vmem>>, vector<32x128xbf16>
    %cst_118 = arith.constant dense<0.000000e+00> : vector<32x128xf32>
    %326 = tpu.matmul %324, %325, %cst_118 {dimension_numbers = #tpu.dot_dimension_numbers<[1], [0], [0], [1], [0, 0, 1, 1], [], []>} : vector<32x32xbf16>, vector<32x128xbf16>, vector<32x128xf32> -> vector<32x128xf32>
    %c0_119 = arith.constant 0 : index
    %c0_120 = arith.constant 0 : index
    %327 = vector.load %arg13[%c0_119, %c0_120] : memref<1x128xf32, #tpu.memory_space<vmem>>, vector<1x128xf32>
    %328 = vector.broadcast %327 : vector<1x128xf32> to vector<32x128xf32>
    %329 = arith.addf %326, %328 : vector<32x128xf32>
    %cst_121 = arith.constant 0.000000e+00 : f32
    %330 = vector.broadcast %cst_121 : f32 to vector<32x128xf32>
    %331 = arith.maximumf %329, %330 : vector<32x128xf32>
    %332 = arith.truncf %331 : vector<32x128xf32> to vector<32x128xbf16>
    %c0_122 = arith.constant 0 : index
    %c0_123 = arith.constant 0 : index
    %333 = vector.load %arg14[%c0_122, %c0_123] : memref<128x32xbf16, #tpu.memory_space<vmem>>, vector<128x32xbf16>
    %cst_124 = arith.constant dense<0.000000e+00> : vector<32x32xf32>
    %334 = tpu.matmul %332, %333, %cst_124 {dimension_numbers = #tpu.dot_dimension_numbers<[1], [0], [0], [1], [0, 0, 1, 1], [], []>} : vector<32x128xbf16>, vector<128x32xbf16>, vector<32x32xf32> -> vector<32x32xf32>
    %c0_125 = arith.constant 0 : index
    %c0_126 = arith.constant 0 : index
    %335 = vector.load %arg15[%c0_125, %c0_126] : memref<1x32xf32, #tpu.memory_space<vmem>>, vector<1x32xf32>
    %336 = vector.broadcast %335 : vector<1x32xf32> to vector<32x32xf32>
    %337 = arith.addf %334, %336 : vector<32x32xf32>
    %338 = arith.addf %297, %337 : vector<32x32xf32>
    %339 = vector.shape_cast %338 : vector<32x32xf32> to vector<1x32x32xf32>
    %c0_127 = arith.constant 0 : index
    %c0_128 = arith.constant 0 : index
    %c0_129 = arith.constant 0 : index
    %340 = vector.load %arg16[%c0_127, %c0_128, %c0_129] : memref<1x32x32xf32, #tpu.memory_space<vmem>>, vector<1x32x32xf32>
    tpu.vector_store %arg16[%c0_127, %c0_128, %c0_129], %339 {strides = array<i32>} : memref<1x32x32xf32, #tpu.memory_space<vmem>>, vector<1x32x32xf32>,
    return
  }
  func.func @transform_0(%arg0: i32) -> (i32, i32, i32) {
    %c0_i32 = arith.constant 0 : i32
    %c0_i32_0 = arith.constant 0 : i32
    %c0_i32_1 = arith.constant 0 : i32
    return %arg0, %c0_i32, %c0_i32_0 : i32, i32, i32
  }
  func.func @transform_1(%arg0: i32) -> (i32, i32, i32) {
    %c0_i32 = arith.constant 0 : i32
    %c0_i32_0 = arith.constant 0 : i32
    %c0_i32_1 = arith.constant 0 : i32
    %c0_i32_2 = arith.constant 0 : i32
    return %c0_i32, %c0_i32_0, %c0_i32_1 : i32, i32, i32
  }
  func.func @transform_2(%arg0: i32) -> (i32, i32, i32) {
    %c0_i32 = arith.constant 0 : i32
    %c0_i32_0 = arith.constant 0 : i32
    %c0_i32_1 = arith.constant 0 : i32
    %c0_i32_2 = arith.constant 0 : i32
    return %c0_i32, %c0_i32_0, %c0_i32_1 : i32, i32, i32
  }
  func.func @transform_3(%arg0: i32) -> (i32, i32, i32) {
    %c0_i32 = arith.constant 0 : i32
    %c0_i32_0 = arith.constant 0 : i32
    %c0_i32_1 = arith.constant 0 : i32
    %c0_i32_2 = arith.constant 0 : i32
    return %c0_i32, %c0_i32_0, %c0_i32_1 : i32, i32, i32
  }
  func.func @transform_4(%arg0: i32) -> (i32, i32, i32) {
    %c0_i32 = arith.constant 0 : i32
    %c0_i32_0 = arith.constant 0 : i32
    %c0_i32_1 = arith.constant 0 : i32
    %c0_i32_2 = arith.constant 0 : i32
    return %c0_i32, %c0_i32_0, %c0_i32_1 : i32, i32, i32
  }
  func.func @transform_5(%arg0: i32) -> (i32, i32) {
    %c0_i32 = arith.constant 0 : i32
    %c0_i32_0 = arith.constant 0 : i32
    %c0_i32_1 = arith.constant 0 : i32
    return %c0_i32, %c0_i32_0 : i32, i32
  }
  func.func @transform_6(%arg0: i32) -> (i32, i32) {
    %c0_i32 = arith.constant 0 : i32
    %c0_i32_0 = arith.constant 0 : i32
    %c0_i32_1 = arith.constant 0 : i32
    return %c0_i32, %c0_i32_0 : i32, i32
  }
  func.func @transform_7(%arg0: i32) -> (i32, i32, i32) {
    %c0_i32 = arith.constant 0 : i32
    %c0_i32_0 = arith.constant 0 : i32
    %c0_i32_1 = arith.constant 0 : i32
    %c0_i32_2 = arith.constant 0 : i32
    return %c0_i32, %c0_i32_0, %c0_i32_1 : i32, i32, i32
  }
  func.func @transform_8(%arg0: i32) -> (i32, i32, i32) {
    %c0_i32 = arith.constant 0 : i32
    %c0_i32_0 = arith.constant 0 : i32
    %c0_i32_1 = arith.constant 0 : i32
    %c0_i32_2 = arith.constant 0 : i32
    return %c0_i32, %c0_i32_0, %c0_i32_1 : i32, i32, i32
  }
  func.func @transform_9(%arg0: i32) -> (i32, i32) {
    %c0_i32 = arith.constant 0 : i32
    %c0_i32_0 = arith.constant 0 : i32
    %c0_i32_1 = arith.constant 0 : i32
    return %c0_i32, %c0_i32_0 : i32, i32
  }
  func.func @transform_10(%arg0: i32) -> (i32, i32) {
    %c0_i32 = arith.constant 0 : i32
    %c0_i32_0 = arith.constant 0 : i32
    %c0_i32_1 = arith.constant 0 : i32
    return %c0_i32, %c0_i32_0 : i32, i32
  }
  func.func @transform_11(%arg0: i32) -> (i32, i32) {
    %c0_i32 = arith.constant 0 : i32
    %c0_i32_0 = arith.constant 0 : i32
    %c0_i32_1 = arith.constant 0 : i32
    return %c0_i32, %c0_i32_0 : i32, i32
  }
  func.func @transform_12(%arg0: i32) -> (i32, i32) {
    %c0_i32 = arith.constant 0 : i32
    %c0_i32_0 = arith.constant 0 : i32
    %c0_i32_1 = arith.constant 0 : i32
    return %c0_i32, %c0_i32_0 : i32, i32
  }
  func.func @transform_13(%arg0: i32) -> (i32, i32) {
    %c0_i32 = arith.constant 0 : i32
    %c0_i32_0 = arith.constant 0 : i32
    %c0_i32_1 = arith.constant 0 : i32
    return %c0_i32, %c0_i32_0 : i32, i32
  }
  func.func @transform_14(%arg0: i32) -> (i32, i32) {
    %c0_i32 = arith.constant 0 : i32
    %c0_i32_0 = arith.constant 0 : i32
    %c0_i32_1 = arith.constant 0 : i32
    return %c0_i32, %c0_i32_0 : i32, i32
  }
  func.func @transform_15(%arg0: i32) -> (i32, i32, i32) {
    %c0_i32 = arith.constant 0 : i32
    %c0_i32_0 = arith.constant 0 : i32
    %c0_i32_1 = arith.constant 0 : i32
    return %arg0, %c0_i32, %c0_i32_0 : i32, i32, i32
  }
}

module attributes {stable_mosaic.version = 11 : i64} {
  func.func @_encoder_layer_kernel(%arg0: i32, %arg1: memref<1x32x32xf32, #tpu.memory_space<vmem>>, %arg2: memref<3x1x32xf32, #tpu.memory_space<vmem>>, %arg3: memref<3x1x32xf32, #tpu.memory_space<vmem>>, %arg4: memref<3x32x32xbf16, #tpu.memory_space<vmem>>, %arg5: memref<3x1x32xf32, #tpu.memory_space<vmem>>, %arg6: memref<32x32xbf16, #tpu.memory_space<vmem>>, %arg7: memref<1x32xf32, #tpu.memory_space<vmem>>, %arg8: memref<3x32x32xbf16, #tpu.memory_space<vmem>>, %arg9: memref<3x1x32xf32, #tpu.memory_space<vmem>>, %arg10: memref<32x32xbf16, #tpu.memory_space<vmem>>, %arg11: memref<1x32xf32, #tpu.memory_space<vmem>>, %arg12: memref<32x128xbf16, #tpu.memory_space<vmem>>, %arg13: memref<1x128xf32, #tpu.memory_space<vmem>>, %arg14: memref<128x32xbf16, #tpu.memory_space<vmem>>, %arg15: memref<1x32xf32, #tpu.memory_space<vmem>>, %arg16: memref<1x32x32xf32, #tpu.memory_space<vmem>>) attributes {dimension_semantics = [#tpu.dimension_semantics<parallel>], iteration_bounds = array<i64: 2>, scalar_prefetch = 0 : i64, scratch_operands = 0 : i64, tpu.core_type = #tpu.core_type<tc>, window_params = [{transform_indices = @transform_0, window_bounds = array<i64: 1, 32, 32>}, {pipeline_mode = #tpu.pipeline_mode<synchronous>, transform_indices = @transform_1, window_bounds = array<i64: 3, 1, 32>}, {pipeline_mode = #tpu.pipeline_mode<synchronous>, transform_indices = @transform_2, window_bounds = array<i64: 3, 1, 32>}, {pipeline_mode = #tpu.pipeline_mode<synchronous>, transform_indices = @transform_3, window_bounds = array<i64: 3, 32, 32>}, {pipeline_mode = #tpu.pipeline_mode<synchronous>, transform_indices = @transform_4, window_bounds = array<i64: 3, 1, 32>}, {pipeline_mode = #tpu.pipeline_mode<synchronous>, transform_indices = @transform_5, window_bounds = array<i64: 32, 32>}, {pipeline_mode = #tpu.pipeline_mode<synchronous>, transform_indices = @transform_6, window_bounds = array<i64: 1, 32>}, {pipeline_mode = #tpu.pipeline_mode<synchronous>, transform_indices = @transform_7, window_bounds = array<i64: 3, 32, 32>}, {pipeline_mode = #tpu.pipeline_mode<synchronous>, transform_indices = @transform_8, window_bounds = array<i64: 3, 1, 32>}, {pipeline_mode = #tpu.pipeline_mode<synchronous>, transform_indices = @transform_9, window_bounds = array<i64: 32, 32>}, {pipeline_mode = #tpu.pipeline_mode<synchronous>, transform_indices = @transform_10, window_bounds = array<i64: 1, 32>}, {pipeline_mode = #tpu.pipeline_mode<synchronous>, transform_indices = @transform_11, window_bounds = array<i64: 32, 128>}, {pipeline_mode = #tpu.pipeline_mode<synchronous>, transform_indices = @transform_12, window_bounds = array<i64: 1, 128>}, {pipeline_mode = #tpu.pipeline_mode<synchronous>, transform_indices = @transform_13, window_bounds = array<i64: 128, 32>}, {pipeline_mode = #tpu.pipeline_mode<synchronous>, transform_indices = @transform_14, window_bounds = array<i64: 1, 32>}, {transform_indices = @transform_15, window_bounds = array<i64: 1, 32, 32>}]} {
    %c0 = arith.constant 0 : index
    %c0_0 = arith.constant 0 : index
    %c0_1 = arith.constant 0 : index
    %0 = vector.load %arg1[%c0, %c0_0, %c0_1] : memref<1x32x32xf32, #tpu.memory_space<vmem>>, vector<1x32x32xf32>
    %1 = vector.shape_cast %0 : vector<1x32x32xf32> to vector<32x32xf32>
    %cst = arith.constant dense<0.000000e+00> : vector<32xf32>
    %2 = vector.multi_reduction <add>, %1, %cst [1] : vector<32x32xf32> to vector<32xf32>
    %3 = vector.shape_cast %2 : vector<32xf32> to vector<32x1xf32>
    %cst_2 = arith.constant 3.200000e+01 : f32
    %4 = vector.broadcast %cst_2 : f32 to vector<32x1xf32>
    %5 = arith.divf %3, %4 : vector<32x1xf32>
    %6 = vector.broadcast %5 : vector<32x1xf32> to vector<32x32xf32>
    %7 = arith.subf %1, %6 : vector<32x32xf32>
    %8 = arith.mulf %7, %7 : vector<32x32xf32>
    %cst_3 = arith.constant dense<0.000000e+00> : vector<32xf32>
    %9 = vector.multi_reduction <add>, %8, %cst_3 [1] : vector<32x32xf32> to vector<32xf32>
    %10 = vector.shape_cast %9 : vector<32xf32> to vector<32x1xf32>
    %cst_4 = arith.constant 3.200000e+01 : f32
    %11 = vector.broadcast %cst_4 : f32 to vector<32x1xf32>
    %12 = arith.divf %10, %11 : vector<32x1xf32>
    %13 = vector.broadcast %5 : vector<32x1xf32> to vector<32x32xf32>
    %14 = arith.subf %1, %13 : vector<32x32xf32>
    %cst_5 = arith.constant 9.99999974E-6 : f32
    %15 = vector.broadcast %cst_5 : f32 to vector<32x1xf32>
    %16 = arith.addf %12, %15 : vector<32x1xf32>
    %17 = math.rsqrt %16 : vector<32x1xf32>
    %18 = vector.broadcast %17 : vector<32x1xf32> to vector<32x32xf32>
    %19 = arith.mulf %14, %18 : vector<32x32xf32>
    %c0_6 = arith.constant 0 : index
    %c0_7 = arith.constant 0 : index
    %c0_8 = arith.constant 0 : index
    %20 = vector.load %arg2[%c0_6, %c0_7, %c0_8] : memref<3x1x32xf32, #tpu.memory_space<vmem>>, vector<1x1x32xf32>
    %21 = vector.shape_cast %20 : vector<1x1x32xf32> to vector<1x32xf32>
    %22 = vector.broadcast %21 : vector<1x32xf32> to vector<32x32xf32>
    %23 = arith.mulf %19, %22 : vector<32x32xf32>
    %c0_9 = arith.constant 0 : index
    %c0_10 = arith.constant 0 : index
    %c0_11 = arith.constant 0 : index
    %24 = vector.load %arg3[%c0_9, %c0_10, %c0_11] : memref<3x1x32xf32, #tpu.memory_space<vmem>>, vector<1x1x32xf32>
    %25 = vector.shape_cast %24 : vector<1x1x32xf32> to vector<1x32xf32>
    %26 = vector.broadcast %25 : vector<1x32xf32> to vector<32x32xf32>
    %27 = arith.addf %23, %26 : vector<32x32xf32>
    %28 = arith.truncf %27 : vector<32x32xf32> to vector<32x32xbf16>
    %c0_12 = arith.constant 0 : index
    %c0_13 = arith.constant 0 : index
    %c0_14 = arith.constant 0 : index
    %29 = vector.load %arg4[%c0_12, %c0_13, %c0_14] : memref<3x32x32xbf16, #tpu.memory_space<vmem>>, vector<1x32x32xbf16>
    %30 = vector.shape_cast %29 : vector<1x32x32xbf16> to vector<32x32xbf16>
    %cst_15 = arith.constant dense<0.000000e+00> : vector<32x32xf32>
    %31 = tpu.matmul %28, %30, %cst_15 {dimension_numbers = #tpu.dot_dimension_numbers<[1], [0], [0], [1], [0, 0, 1, 1], [], []>} : vector<32x32xbf16>, vector<32x32xbf16>, vector<32x32xf32> -> vector<32x32xf32>
    %c0_16 = arith.constant 0 : index
    %c0_17 = arith.constant 0 : index
    %c0_18 = arith.constant 0 : index
    %32 = vector.load %arg5[%c0_16, %c0_17, %c0_18] : memref<3x1x32xf32, #tpu.memory_space<vmem>>, vector<1x1x32xf32>
    %33 = vector.shape_cast %32 : vector<1x1x32xf32> to vector<1x32xf32>
    %34 = vector.broadcast %33 : vector<1x32xf32> to vector<32x32xf32>
    %35 = arith.addf %31, %34 : vector<32x32xf32>
    %c1 = arith.constant 1 : index
    %c0_19 = arith.constant 0 : index
    %c0_20 = arith.constant 0 : index
    %36 = vector.load %arg4[%c1, %c0_19, %c0_20] : memref<3x32x32xbf16, #tpu.memory_space<vmem>>, vector<1x32x32xbf16>
    %37 = vector.shape_cast %36 : vector<1x32x32xbf16> to vector<32x32xbf16>
    %cst_21 = arith.constant dense<0.000000e+00> : vector<32x32xf32>
    %38 = tpu.matmul %28, %37, %cst_21 {dimension_numbers = #tpu.dot_dimension_numbers<[1], [0], [0], [1], [0, 0, 1, 1], [], []>} : vector<32x32xbf16>, vector<32x32xbf16>, vector<32x32xf32> -> vector<32x32xf32>
    %c1_22 = arith.constant 1 : index
    %c0_23 = arith.constant 0 : index
    %c0_24 = arith.constant 0 : index
    %39 = vector.load %arg5[%c1_22, %c0_23, %c0_24] : memref<3x1x32xf32, #tpu.memory_space<vmem>>, vector<1x1x32xf32>
    %40 = vector.shape_cast %39 : vector<1x1x32xf32> to vector<1x32xf32>
    %41 = vector.broadcast %40 : vector<1x32xf32> to vector<32x32xf32>
    %42 = arith.addf %38, %41 : vector<32x32xf32>
    %c2 = arith.constant 2 : index
    %c0_25 = arith.constant 0 : index
    %c0_26 = arith.constant 0 : index
    %43 = vector.load %arg4[%c2, %c0_25, %c0_26] : memref<3x32x32xbf16, #tpu.memory_space<vmem>>, vector<1x32x32xbf16>
    %44 = vector.shape_cast %43 : vector<1x32x32xbf16> to vector<32x32xbf16>
    %cst_27 = arith.constant dense<0.000000e+00> : vector<32x32xf32>
    %45 = tpu.matmul %28, %44, %cst_27 {dimension_numbers = #tpu.dot_dimension_numbers<[1], [0], [0], [1], [0, 0, 1, 1], [], []>} : vector<32x32xbf16>, vector<32x32xbf16>, vector<32x32xf32> -> vector<32x32xf32>
    %c2_28 = arith.constant 2 : index
    %c0_29 = arith.constant 0 : index
    %c0_30 = arith.constant 0 : index
    %46 = vector.load %arg5[%c2_28, %c0_29, %c0_30] : memref<3x1x32xf32, #tpu.memory_space<vmem>>, vector<1x1x32xf32>
    %47 = vector.shape_cast %46 : vector<1x1x32xf32> to vector<1x32xf32>
    %48 = vector.broadcast %47 : vector<1x32xf32> to vector<32x32xf32>
    %49 = arith.addf %45, %48 : vector<32x32xf32>
    %50 = vector.extract_strided_slice %35 {offsets = [0, 0], sizes = [32, 8], strides = [1, 1]} : vector<32x32xf32> to vector<32x8xf32>
    %51 = vector.shape_cast %50 : vector<32x8xf32> to vector<4x8x8xf32>
    %52 = arith.truncf %51 : vector<4x8x8xf32> to vector<4x8x8xbf16>
    %53 = vector.extract_strided_slice %42 {offsets = [0, 0], sizes = [32, 8], strides = [1, 1]} : vector<32x32xf32> to vector<32x8xf32>
    %54 = vector.shape_cast %53 : vector<32x8xf32> to vector<4x8x8xf32>
    %55 = arith.truncf %54 : vector<4x8x8xf32> to vector<4x8x8xbf16>
    %56 = vector.extract_strided_slice %49 {offsets = [0, 0], sizes = [32, 8], strides = [1, 1]} : vector<32x32xf32> to vector<32x8xf32>
    %57 = vector.shape_cast %56 : vector<32x8xf32> to vector<4x8x8xf32>
    %58 = arith.truncf %57 : vector<4x8x8xf32> to vector<4x8x8xbf16>
    "tpu.trace_start"() <{level = 10 : i32, message = "gqd,gkd->gqk"}> : () -> ()
    %cst_31 = arith.constant dense<0.000000e+00> : vector<4x8x8xf32>
    %59 = tpu.matmul %52, %55, %cst_31 {dimension_numbers = #tpu.dot_dimension_numbers<[2], [2], [1], [1], [0, 0, 0, 1, 1, 1], [0], [0]>} : vector<4x8x8xbf16>, vector<4x8x8xbf16>, vector<4x8x8xf32> -> vector<4x8x8xf32>
    "tpu.trace_stop"() : () -> ()
    %cst_32 = arith.constant dense<0xFF800000> : vector<4x8xf32>
    %60 = vector.multi_reduction <maximumf>, %59, %cst_32 [2] : vector<4x8x8xf32> to vector<4x8xf32>
    %61 = vector.shape_cast %60 : vector<4x8xf32> to vector<4x8x1xf32>
    %62 = vector.broadcast %61 : vector<4x8x1xf32> to vector<4x8x8xf32>
    %63 = arith.subf %59, %62 : vector<4x8x8xf32>
    %64 = math.exp %63 : vector<4x8x8xf32>
    %cst_33 = arith.constant dense<0.000000e+00> : vector<4x8xf32>
    %65 = vector.multi_reduction <add>, %64, %cst_33 [2] : vector<4x8x8xf32> to vector<4x8xf32>
    %66 = vector.shape_cast %65 : vector<4x8xf32> to vector<4x8x1xf32>
    %67 = tpu.reciprocal %66 : vector<4x8x1xf32> -> vector<4x8x1xf32>
    %68 = vector.broadcast %67 : vector<4x8x1xf32> to vector<4x8x8xf32>
    %69 = arith.mulf %64, %68 : vector<4x8x8xf32>
    %70 = arith.truncf %69 : vector<4x8x8xf32> to vector<4x8x8xbf16>
    "tpu.trace_start"() <{level = 10 : i32, message = "gqk,gkd->gqd"}> : () -> ()
    %cst_34 = arith.constant dense<0.000000e+00> : vector<4x8x8xf32>
    %71 = tpu.matmul %70, %58, %cst_34 {dimension_numbers = #tpu.dot_dimension_numbers<[2], [1], [1], [2], [0, 0, 0, 1, 1, 2], [0], [0]>} : vector<4x8x8xbf16>, vector<4x8x8xbf16>, vector<4x8x8xf32> -> vector<4x8x8xf32>
    "tpu.trace_stop"() : () -> ()
    %72 = vector.shape_cast %71 : vector<4x8x8xf32> to vector<32x8xf32>
    %73 = vector.extract_strided_slice %35 {offsets = [0, 8], sizes = [32, 8], strides = [1, 1]} : vector<32x32xf32> to vector<32x8xf32>
    %74 = vector.shape_cast %73 : vector<32x8xf32> to vector<4x8x8xf32>
    %75 = arith.truncf %74 : vector<4x8x8xf32> to vector<4x8x8xbf16>
    %76 = vector.extract_strided_slice %42 {offsets = [0, 8], sizes = [32, 8], strides = [1, 1]} : vector<32x32xf32> to vector<32x8xf32>
    %77 = vector.shape_cast %76 : vector<32x8xf32> to vector<4x8x8xf32>
    %78 = arith.truncf %77 : vector<4x8x8xf32> to vector<4x8x8xbf16>
    %79 = vector.extract_strided_slice %49 {offsets = [0, 8], sizes = [32, 8], strides = [1, 1]} : vector<32x32xf32> to vector<32x8xf32>
    %80 = vector.shape_cast %79 : vector<32x8xf32> to vector<4x8x8xf32>
    %81 = arith.truncf %80 : vector<4x8x8xf32> to vector<4x8x8xbf16>
    "tpu.trace_start"() <{level = 10 : i32, message = "gqd,gkd->gqk"}> : () -> ()
    %cst_35 = arith.constant dense<0.000000e+00> : vector<4x8x8xf32>
    %82 = tpu.matmul %75, %78, %cst_35 {dimension_numbers = #tpu.dot_dimension_numbers<[2], [2], [1], [1], [0, 0, 0, 1, 1, 1], [0], [0]>} : vector<4x8x8xbf16>, vector<4x8x8xbf16>, vector<4x8x8xf32> -> vector<4x8x8xf32>
    "tpu.trace_stop"() : () -> ()
    %cst_36 = arith.constant dense<0xFF800000> : vector<4x8xf32>
    %83 = vector.multi_reduction <maximumf>, %82, %cst_36 [2] : vector<4x8x8xf32> to vector<4x8xf32>
    %84 = vector.shape_cast %83 : vector<4x8xf32> to vector<4x8x1xf32>
    %85 = vector.broadcast %84 : vector<4x8x1xf32> to vector<4x8x8xf32>
    %86 = arith.subf %82, %85 : vector<4x8x8xf32>
    %87 = math.exp %86 : vector<4x8x8xf32>
    %cst_37 = arith.constant dense<0.000000e+00> : vector<4x8xf32>
    %88 = vector.multi_reduction <add>, %87, %cst_37 [2] : vector<4x8x8xf32> to vector<4x8xf32>
    %89 = vector.shape_cast %88 : vector<4x8xf32> to vector<4x8x1xf32>
    %90 = tpu.reciprocal %89 : vector<4x8x1xf32> -> vector<4x8x1xf32>
    %91 = vector.broadcast %90 : vector<4x8x1xf32> to vector<4x8x8xf32>
    %92 = arith.mulf %87, %91 : vector<4x8x8xf32>
    %93 = arith.truncf %92 : vector<4x8x8xf32> to vector<4x8x8xbf16>
    "tpu.trace_start"() <{level = 10 : i32, message = "gqk,gkd->gqd"}> : () -> ()
    %cst_38 = arith.constant dense<0.000000e+00> : vector<4x8x8xf32>
    %94 = tpu.matmul %93, %81, %cst_38 {dimension_numbers = #tpu.dot_dimension_numbers<[2], [1], [1], [2], [0, 0, 0, 1, 1, 2], [0], [0]>} : vector<4x8x8xbf16>, vector<4x8x8xbf16>, vector<4x8x8xf32> -> vector<4x8x8xf32>
    "tpu.trace_stop"() : () -> ()
    %95 = vector.shape_cast %94 : vector<4x8x8xf32> to vector<32x8xf32>
    %96 = vector.extract_strided_slice %35 {offsets = [0, 16], sizes = [32, 8], strides = [1, 1]} : vector<32x32xf32> to vector<32x8xf32>
    %97 = vector.shape_cast %96 : vector<32x8xf32> to vector<4x8x8xf32>
    %98 = arith.truncf %97 : vector<4x8x8xf32> to vector<4x8x8xbf16>
    %99 = vector.extract_strided_slice %42 {offsets = [0, 16], sizes = [32, 8], strides = [1, 1]} : vector<32x32xf32> to vector<32x8xf32>
    %100 = vector.shape_cast %99 : vector<32x8xf32> to vector<4x8x8xf32>
    %101 = arith.truncf %100 : vector<4x8x8xf32> to vector<4x8x8xbf16>
    %102 = vector.extract_strided_slice %49 {offsets = [0, 16], sizes = [32, 8], strides = [1, 1]} : vector<32x32xf32> to vector<32x8xf32>
    %103 = vector.shape_cast %102 : vector<32x8xf32> to vector<4x8x8xf32>
    %104 = arith.truncf %103 : vector<4x8x8xf32> to vector<4x8x8xbf16>
    "tpu.trace_start"() <{level = 10 : i32, message = "gqd,gkd->gqk"}> : () -> ()
    %cst_39 = arith.constant dense<0.000000e+00> : vector<4x8x8xf32>
    %105 = tpu.matmul %98, %101, %cst_39 {dimension_numbers = #tpu.dot_dimension_numbers<[2], [2], [1], [1], [0, 0, 0, 1, 1, 1], [0], [0]>} : vector<4x8x8xbf16>, vector<4x8x8xbf16>, vector<4x8x8xf32> -> vector<4x8x8xf32>
    "tpu.trace_stop"() : () -> ()
    %cst_40 = arith.constant dense<0xFF800000> : vector<4x8xf32>
    %106 = vector.multi_reduction <maximumf>, %105, %cst_40 [2] : vector<4x8x8xf32> to vector<4x8xf32>
    %107 = vector.shape_cast %106 : vector<4x8xf32> to vector<4x8x1xf32>
    %108 = vector.broadcast %107 : vector<4x8x1xf32> to vector<4x8x8xf32>
    %109 = arith.subf %105, %108 : vector<4x8x8xf32>
    %110 = math.exp %109 : vector<4x8x8xf32>
    %cst_41 = arith.constant dense<0.000000e+00> : vector<4x8xf32>
    %111 = vector.multi_reduction <add>, %110, %cst_41 [2] : vector<4x8x8xf32> to vector<4x8xf32>
    %112 = vector.shape_cast %111 : vector<4x8xf32> to vector<4x8x1xf32>
    %113 = tpu.reciprocal %112 : vector<4x8x1xf32> -> vector<4x8x1xf32>
    %114 = vector.broadcast %113 : vector<4x8x1xf32> to vector<4x8x8xf32>
    %115 = arith.mulf %110, %114 : vector<4x8x8xf32>
    %116 = arith.truncf %115 : vector<4x8x8xf32> to vector<4x8x8xbf16>
    "tpu.trace_start"() <{level = 10 : i32, message = "gqk,gkd->gqd"}> : () -> ()
    %cst_42 = arith.constant dense<0.000000e+00> : vector<4x8x8xf32>
    %117 = tpu.matmul %116, %104, %cst_42 {dimension_numbers = #tpu.dot_dimension_numbers<[2], [1], [1], [2], [0, 0, 0, 1, 1, 2], [0], [0]>} : vector<4x8x8xbf16>, vector<4x8x8xbf16>, vector<4x8x8xf32> -> vector<4x8x8xf32>
    "tpu.trace_stop"() : () -> ()
    %118 = vector.shape_cast %117 : vector<4x8x8xf32> to vector<32x8xf32>
    %119 = vector.extract_strided_slice %35 {offsets = [0, 24], sizes = [32, 8], strides = [1, 1]} : vector<32x32xf32> to vector<32x8xf32>
    %120 = vector.shape_cast %119 : vector<32x8xf32> to vector<4x8x8xf32>
    %121 = arith.truncf %120 : vector<4x8x8xf32> to vector<4x8x8xbf16>
    %122 = vector.extract_strided_slice %42 {offsets = [0, 24], sizes = [32, 8], strides = [1, 1]} : vector<32x32xf32> to vector<32x8xf32>
    %123 = vector.shape_cast %122 : vector<32x8xf32> to vector<4x8x8xf32>
    %124 = arith.truncf %123 : vector<4x8x8xf32> to vector<4x8x8xbf16>
    %125 = vector.extract_strided_slice %49 {offsets = [0, 24], sizes = [32, 8], strides = [1, 1]} : vector<32x32xf32> to vector<32x8xf32>
    %126 = vector.shape_cast %125 : vector<32x8xf32> to vector<4x8x8xf32>
    %127 = arith.truncf %126 : vector<4x8x8xf32> to vector<4x8x8xbf16>
    "tpu.trace_start"() <{level = 10 : i32, message = "gqd,gkd->gqk"}> : () -> ()
    %cst_43 = arith.constant dense<0.000000e+00> : vector<4x8x8xf32>
    %128 = tpu.matmul %121, %124, %cst_43 {dimension_numbers = #tpu.dot_dimension_numbers<[2], [2], [1], [1], [0, 0, 0, 1, 1, 1], [0], [0]>} : vector<4x8x8xbf16>, vector<4x8x8xbf16>, vector<4x8x8xf32> -> vector<4x8x8xf32>
    "tpu.trace_stop"() : () -> ()
    %cst_44 = arith.constant dense<0xFF800000> : vector<4x8xf32>
    %129 = vector.multi_reduction <maximumf>, %128, %cst_44 [2] : vector<4x8x8xf32> to vector<4x8xf32>
    %130 = vector.shape_cast %129 : vector<4x8xf32> to vector<4x8x1xf32>
    %131 = vector.broadcast %130 : vector<4x8x1xf32> to vector<4x8x8xf32>
    %132 = arith.subf %128, %131 : vector<4x8x8xf32>
    %133 = math.exp %132 : vector<4x8x8xf32>
    %cst_45 = arith.constant dense<0.000000e+00> : vector<4x8xf32>
    %134 = vector.multi_reduction <add>, %133, %cst_45 [2] : vector<4x8x8xf32> to vector<4x8xf32>
    %135 = vector.shape_cast %134 : vector<4x8xf32> to vector<4x8x1xf32>
    %136 = tpu.reciprocal %135 : vector<4x8x1xf32> -> vector<4x8x1xf32>
    %137 = vector.broadcast %136 : vector<4x8x1xf32> to vector<4x8x8xf32>
    %138 = arith.mulf %133, %137 : vector<4x8x8xf32>
    %139 = arith.truncf %138 : vector<4x8x8xf32> to vector<4x8x8xbf16>
    "tpu.trace_start"() <{level = 10 : i32, message = "gqk,gkd->gqd"}> : () -> ()
    %cst_46 = arith.constant dense<0.000000e+00> : vector<4x8x8xf32>
    %140 = tpu.matmul %139, %127, %cst_46 {dimension_numbers = #tpu.dot_dimension_numbers<[2], [1], [1], [2], [0, 0, 0, 1, 1, 2], [0], [0]>} : vector<4x8x8xbf16>, vector<4x8x8xbf16>, vector<4x8x8xf32> -> vector<4x8x8xf32>
    "tpu.trace_stop"() : () -> ()
    %141 = vector.shape_cast %140 : vector<4x8x8xf32> to vector<32x8xf32>
    %142 = tpu.concatenate %72, %95, %118, %141 in 1 : vector<32x8xf32>, vector<32x8xf32>, vector<32x8xf32>, vector<32x8xf32> -> vector<32x32xf32>
    %143 = arith.truncf %142 : vector<32x32xf32> to vector<32x32xbf16>
    %c0_47 = arith.constant 0 : index
    %c0_48 = arith.constant 0 : index
    %144 = vector.load %arg6[%c0_47, %c0_48] : memref<32x32xbf16, #tpu.memory_space<vmem>>, vector<32x32xbf16>
    %cst_49 = arith.constant dense<0.000000e+00> : vector<32x32xf32>
    %145 = tpu.matmul %143, %144, %cst_49 {dimension_numbers = #tpu.dot_dimension_numbers<[1], [0], [0], [1], [0, 0, 1, 1], [], []>} : vector<32x32xbf16>, vector<32x32xbf16>, vector<32x32xf32> -> vector<32x32xf32>
    %c0_50 = arith.constant 0 : index
    %c0_51 = arith.constant 0 : index
    %146 = vector.load %arg7[%c0_50, %c0_51] : memref<1x32xf32, #tpu.memory_space<vmem>>, vector<1x32xf32>
    %147 = vector.broadcast %146 : vector<1x32xf32> to vector<32x32xf32>
    %148 = arith.addf %145, %147 : vector<32x32xf32>
    %149 = arith.addf %1, %148 : vector<32x32xf32>
    %cst_52 = arith.constant dense<0.000000e+00> : vector<32xf32>
    %150 = vector.multi_reduction <add>, %149, %cst_52 [1] : vector<32x32xf32> to vector<32xf32>
    %151 = vector.shape_cast %150 : vector<32xf32> to vector<32x1xf32>
    %cst_53 = arith.constant 3.200000e+01 : f32
    %152 = vector.broadcast %cst_53 : f32 to vector<32x1xf32>
    %153 = arith.divf %151, %152 : vector<32x1xf32>
    %154 = vector.broadcast %153 : vector<32x1xf32> to vector<32x32xf32>
    %155 = arith.subf %149, %154 : vector<32x32xf32>
    %156 = arith.mulf %155, %155 : vector<32x32xf32>
    %cst_54 = arith.constant dense<0.000000e+00> : vector<32xf32>
    %157 = vector.multi_reduction <add>, %156, %cst_54 [1] : vector<32x32xf32> to vector<32xf32>
    %158 = vector.shape_cast %157 : vector<32xf32> to vector<32x1xf32>
    %cst_55 = arith.constant 3.200000e+01 : f32
    %159 = vector.broadcast %cst_55 : f32 to vector<32x1xf32>
    %160 = arith.divf %158, %159 : vector<32x1xf32>
    %161 = vector.broadcast %153 : vector<32x1xf32> to vector<32x32xf32>
    %162 = arith.subf %149, %161 : vector<32x32xf32>
    %cst_56 = arith.constant 9.99999974E-6 : f32
    %163 = vector.broadcast %cst_56 : f32 to vector<32x1xf32>
    %164 = arith.addf %160, %163 : vector<32x1xf32>
    %165 = math.rsqrt %164 : vector<32x1xf32>
    %166 = vector.broadcast %165 : vector<32x1xf32> to vector<32x32xf32>
    %167 = arith.mulf %162, %166 : vector<32x32xf32>
    %c1_57 = arith.constant 1 : index
    %c0_58 = arith.constant 0 : index
    %c0_59 = arith.constant 0 : index
    %168 = vector.load %arg2[%c1_57, %c0_58, %c0_59] : memref<3x1x32xf32, #tpu.memory_space<vmem>>, vector<1x1x32xf32>
    %169 = vector.shape_cast %168 : vector<1x1x32xf32> to vector<1x32xf32>
    %170 = vector.broadcast %169 : vector<1x32xf32> to vector<32x32xf32>
    %171 = arith.mulf %167, %170 : vector<32x32xf32>
    %c1_60 = arith.constant 1 : index
    %c0_61 = arith.constant 0 : index
    %c0_62 = arith.constant 0 : index
    %172 = vector.load %arg3[%c1_60, %c0_61, %c0_62] : memref<3x1x32xf32, #tpu.memory_space<vmem>>, vector<1x1x32xf32>
    %173 = vector.shape_cast %172 : vector<1x1x32xf32> to vector<1x32xf32>
    %174 = vector.broadcast %173 : vector<1x32xf32> to vector<32x32xf32>
    %175 = arith.addf %171, %174 : vector<32x32xf32>
    %176 = arith.truncf %175 : vector<32x32xf32> to vector<32x32xbf16>
    %c0_63 = arith.constant 0 : index
    %c0_64 = arith.constant 0 : index
    %c0_65 = arith.constant 0 : index
    %177 = vector.load %arg8[%c0_63, %c0_64, %c0_65] : memref<3x32x32xbf16, #tpu.memory_space<vmem>>, vector<1x32x32xbf16>
    %178 = vector.shape_cast %177 : vector<1x32x32xbf16> to vector<32x32xbf16>
    %cst_66 = arith.constant dense<0.000000e+00> : vector<32x32xf32>
    %179 = tpu.matmul %176, %178, %cst_66 {dimension_numbers = #tpu.dot_dimension_numbers<[1], [0], [0], [1], [0, 0, 1, 1], [], []>} : vector<32x32xbf16>, vector<32x32xbf16>, vector<32x32xf32> -> vector<32x32xf32>
    %c0_67 = arith.constant 0 : index
    %c0_68 = arith.constant 0 : index
    %c0_69 = arith.constant 0 : index
    %180 = vector.load %arg9[%c0_67, %c0_68, %c0_69] : memref<3x1x32xf32, #tpu.memory_space<vmem>>, vector<1x1x32xf32>
    %181 = vector.shape_cast %180 : vector<1x1x32xf32> to vector<1x32xf32>
    %182 = vector.broadcast %181 : vector<1x32xf32> to vector<32x32xf32>
    %183 = arith.addf %179, %182 : vector<32x32xf32>
    %c1_70 = arith.constant 1 : index
    %c0_71 = arith.constant 0 : index
    %c0_72 = arith.constant 0 : index
    %184 = vector.load %arg8[%c1_70, %c0_71, %c0_72] : memref<3x32x32xbf16, #tpu.memory_space<vmem>>, vector<1x32x32xbf16>
    %185 = vector.shape_cast %184 : vector<1x32x32xbf16> to vector<32x32xbf16>
    %cst_73 = arith.constant dense<0.000000e+00> : vector<32x32xf32>
    %186 = tpu.matmul %176, %185, %cst_73 {dimension_numbers = #tpu.dot_dimension_numbers<[1], [0], [0], [1], [0, 0, 1, 1], [], []>} : vector<32x32xbf16>, vector<32x32xbf16>, vector<32x32xf32> -> vector<32x32xf32>
    %c1_74 = arith.constant 1 : index
    %c0_75 = arith.constant 0 : index
    %c0_76 = arith.constant 0 : index
    %187 = vector.load %arg9[%c1_74, %c0_75, %c0_76] : memref<3x1x32xf32, #tpu.memory_space<vmem>>, vector<1x1x32xf32>
    %188 = vector.shape_cast %187 : vector<1x1x32xf32> to vector<1x32xf32>
    %189 = vector.broadcast %188 : vector<1x32xf32> to vector<32x32xf32>
    %190 = arith.addf %186, %189 : vector<32x32xf32>
    %c2_77 = arith.constant 2 : index
    %c0_78 = arith.constant 0 : index
    %c0_79 = arith.constant 0 : index
    %191 = vector.load %arg8[%c2_77, %c0_78, %c0_79] : memref<3x32x32xbf16, #tpu.memory_space<vmem>>, vector<1x32x32xbf16>
    %192 = vector.shape_cast %191 : vector<1x32x32xbf16> to vector<32x32xbf16>
    %cst_80 = arith.constant dense<0.000000e+00> : vector<32x32xf32>
    %193 = tpu.matmul %176, %192, %cst_80 {dimension_numbers = #tpu.dot_dimension_numbers<[1], [0], [0], [1], [0, 0, 1, 1], [], []>} : vector<32x32xbf16>, vector<32x32xbf16>, vector<32x32xf32> -> vector<32x32xf32>
    %c2_81 = arith.constant 2 : index
    %c0_82 = arith.constant 0 : index
    %c0_83 = arith.constant 0 : index
    %194 = vector.load %arg9[%c2_81, %c0_82, %c0_83] : memref<3x1x32xf32, #tpu.memory_space<vmem>>, vector<1x1x32xf32>
    %195 = vector.shape_cast %194 : vector<1x1x32xf32> to vector<1x32xf32>
    %196 = vector.broadcast %195 : vector<1x32xf32> to vector<32x32xf32>
    %197 = arith.addf %193, %196 : vector<32x32xf32>
    %198 = vector.extract_strided_slice %183 {offsets = [0, 0], sizes = [32, 8], strides = [1, 1]} : vector<32x32xf32> to vector<32x8xf32>
    %199 = vector.shape_cast %198 : vector<32x8xf32> to vector<1x32x8xf32>
    %200 = arith.truncf %199 : vector<1x32x8xf32> to vector<1x32x8xbf16>
    %201 = vector.extract_strided_slice %190 {offsets = [0, 0], sizes = [32, 8], strides = [1, 1]} : vector<32x32xf32> to vector<32x8xf32>
    %202 = vector.shape_cast %201 : vector<32x8xf32> to vector<1x32x8xf32>
    %203 = arith.truncf %202 : vector<1x32x8xf32> to vector<1x32x8xbf16>
    %204 = vector.extract_strided_slice %197 {offsets = [0, 0], sizes = [32, 8], strides = [1, 1]} : vector<32x32xf32> to vector<32x8xf32>
    %205 = vector.shape_cast %204 : vector<32x8xf32> to vector<1x32x8xf32>
    %206 = arith.truncf %205 : vector<1x32x8xf32> to vector<1x32x8xbf16>
    "tpu.trace_start"() <{level = 10 : i32, message = "gqd,gkd->gqk"}> : () -> ()
    %cst_84 = arith.constant dense<0.000000e+00> : vector<1x32x32xf32>
    %207 = tpu.matmul %200, %203, %cst_84 {dimension_numbers = #tpu.dot_dimension_numbers<[2], [2], [1], [1], [0, 0, 0, 1, 1, 1], [0], [0]>} : vector<1x32x8xbf16>, vector<1x32x8xbf16>, vector<1x32x32xf32> -> vector<1x32x32xf32>
    "tpu.trace_stop"() : () -> ()
    %cst_85 = arith.constant dense<0xFF800000> : vector<1x32xf32>
    %208 = vector.multi_reduction <maximumf>, %207, %cst_85 [2] : vector<1x32x32xf32> to vector<1x32xf32>
    %209 = vector.shape_cast %208 : vector<1x32xf32> to vector<1x32x1xf32>
    %210 = vector.broadcast %209 : vector<1x32x1xf32> to vector<1x32x32xf32>
    %211 = arith.subf %207, %210 : vector<1x32x32xf32>
    %212 = math.exp %211 : vector<1x32x32xf32>
    %cst_86 = arith.constant dense<0.000000e+00> : vector<1x32xf32>
    %213 = vector.multi_reduction <add>, %212, %cst_86 [2] : vector<1x32x32xf32> to vector<1x32xf32>
    %214 = vector.shape_cast %213 : vector<1x32xf32> to vector<1x32x1xf32>
    %215 = tpu.reciprocal %214 : vector<1x32x1xf32> -> vector<1x32x1xf32>
    %216 = vector.broadcast %215 : vector<1x32x1xf32> to vector<1x32x32xf32>
    %217 = arith.mulf %212, %216 : vector<1x32x32xf32>
    %218 = arith.truncf %217 : vector<1x32x32xf32> to vector<1x32x32xbf16>
    "tpu.trace_start"() <{level = 10 : i32, message = "gqk,gkd->gqd"}> : () -> ()
    %cst_87 = arith.constant dense<0.000000e+00> : vector<1x32x8xf32>
    %219 = tpu.matmul %218, %206, %cst_87 {dimension_numbers = #tpu.dot_dimension_numbers<[2], [1], [1], [2], [0, 0, 0, 1, 1, 2], [0], [0]>} : vector<1x32x32xbf16>, vector<1x32x8xbf16>, vector<1x32x8xf32> -> vector<1x32x8xf32>
    "tpu.trace_stop"() : () -> ()
    %220 = vector.shape_cast %219 : vector<1x32x8xf32> to vector<32x8xf32>
    %221 = vector.extract_strided_slice %183 {offsets = [0, 8], sizes = [32, 8], strides = [1, 1]} : vector<32x32xf32> to vector<32x8xf32>
    %222 = vector.shape_cast %221 : vector<32x8xf32> to vector<1x32x8xf32>
    %223 = arith.truncf %222 : vector<1x32x8xf32> to vector<1x32x8xbf16>
    %224 = vector.extract_strided_slice %190 {offsets = [0, 8], sizes = [32, 8], strides = [1, 1]} : vector<32x32xf32> to vector<32x8xf32>
    %225 = vector.shape_cast %224 : vector<32x8xf32> to vector<1x32x8xf32>
    %226 = arith.truncf %225 : vector<1x32x8xf32> to vector<1x32x8xbf16>
    %227 = vector.extract_strided_slice %197 {offsets = [0, 8], sizes = [32, 8], strides = [1, 1]} : vector<32x32xf32> to vector<32x8xf32>
    %228 = vector.shape_cast %227 : vector<32x8xf32> to vector<1x32x8xf32>
    %229 = arith.truncf %228 : vector<1x32x8xf32> to vector<1x32x8xbf16>
    "tpu.trace_start"() <{level = 10 : i32, message = "gqd,gkd->gqk"}> : () -> ()
    %cst_88 = arith.constant dense<0.000000e+00> : vector<1x32x32xf32>
    %230 = tpu.matmul %223, %226, %cst_88 {dimension_numbers = #tpu.dot_dimension_numbers<[2], [2], [1], [1], [0, 0, 0, 1, 1, 1], [0], [0]>} : vector<1x32x8xbf16>, vector<1x32x8xbf16>, vector<1x32x32xf32> -> vector<1x32x32xf32>
    "tpu.trace_stop"() : () -> ()
    %cst_89 = arith.constant dense<0xFF800000> : vector<1x32xf32>
    %231 = vector.multi_reduction <maximumf>, %230, %cst_89 [2] : vector<1x32x32xf32> to vector<1x32xf32>
    %232 = vector.shape_cast %231 : vector<1x32xf32> to vector<1x32x1xf32>
    %233 = vector.broadcast %232 : vector<1x32x1xf32> to vector<1x32x32xf32>
    %234 = arith.subf %230, %233 : vector<1x32x32xf32>
    %235 = math.exp %234 : vector<1x32x32xf32>
    %cst_90 = arith.constant dense<0.000000e+00> : vector<1x32xf32>
    %236 = vector.multi_reduction <add>, %235, %cst_90 [2] : vector<1x32x32xf32> to vector<1x32xf32>
    %237 = vector.shape_cast %236 : vector<1x32xf32> to vector<1x32x1xf32>
    %238 = tpu.reciprocal %237 : vector<1x32x1xf32> -> vector<1x32x1xf32>
    %239 = vector.broadcast %238 : vector<1x32x1xf32> to vector<1x32x32xf32>
    %240 = arith.mulf %235, %239 : vector<1x32x32xf32>
    %241 = arith.truncf %240 : vector<1x32x32xf32> to vector<1x32x32xbf16>
    "tpu.trace_start"() <{level = 10 : i32, message = "gqk,gkd->gqd"}> : () -> ()
    %cst_91 = arith.constant dense<0.000000e+00> : vector<1x32x8xf32>
    %242 = tpu.matmul %241, %229, %cst_91 {dimension_numbers = #tpu.dot_dimension_numbers<[2], [1], [1], [2], [0, 0, 0, 1, 1, 2], [0], [0]>} : vector<1x32x32xbf16>, vector<1x32x8xbf16>, vector<1x32x8xf32> -> vector<1x32x8xf32>
    "tpu.trace_stop"() : () -> ()
    %243 = vector.shape_cast %242 : vector<1x32x8xf32> to vector<32x8xf32>
    %244 = vector.extract_strided_slice %183 {offsets = [0, 16], sizes = [32, 8], strides = [1, 1]} : vector<32x32xf32> to vector<32x8xf32>
    %245 = vector.shape_cast %244 : vector<32x8xf32> to vector<1x32x8xf32>
    %246 = arith.truncf %245 : vector<1x32x8xf32> to vector<1x32x8xbf16>
    %247 = vector.extract_strided_slice %190 {offsets = [0, 16], sizes = [32, 8], strides = [1, 1]} : vector<32x32xf32> to vector<32x8xf32>
    %248 = vector.shape_cast %247 : vector<32x8xf32> to vector<1x32x8xf32>
    %249 = arith.truncf %248 : vector<1x32x8xf32> to vector<1x32x8xbf16>
    %250 = vector.extract_strided_slice %197 {offsets = [0, 16], sizes = [32, 8], strides = [1, 1]} : vector<32x32xf32> to vector<32x8xf32>
    %251 = vector.shape_cast %250 : vector<32x8xf32> to vector<1x32x8xf32>
    %252 = arith.truncf %251 : vector<1x32x8xf32> to vector<1x32x8xbf16>
    "tpu.trace_start"() <{level = 10 : i32, message = "gqd,gkd->gqk"}> : () -> ()
    %cst_92 = arith.constant dense<0.000000e+00> : vector<1x32x32xf32>
    %253 = tpu.matmul %246, %249, %cst_92 {dimension_numbers = #tpu.dot_dimension_numbers<[2], [2], [1], [1], [0, 0, 0, 1, 1, 1], [0], [0]>} : vector<1x32x8xbf16>, vector<1x32x8xbf16>, vector<1x32x32xf32> -> vector<1x32x32xf32>
    "tpu.trace_stop"() : () -> ()
    %cst_93 = arith.constant dense<0xFF800000> : vector<1x32xf32>
    %254 = vector.multi_reduction <maximumf>, %253, %cst_93 [2] : vector<1x32x32xf32> to vector<1x32xf32>
    %255 = vector.shape_cast %254 : vector<1x32xf32> to vector<1x32x1xf32>
    %256 = vector.broadcast %255 : vector<1x32x1xf32> to vector<1x32x32xf32>
    %257 = arith.subf %253, %256 : vector<1x32x32xf32>
    %258 = math.exp %257 : vector<1x32x32xf32>
    %cst_94 = arith.constant dense<0.000000e+00> : vector<1x32xf32>
    %259 = vector.multi_reduction <add>, %258, %cst_94 [2] : vector<1x32x32xf32> to vector<1x32xf32>
    %260 = vector.shape_cast %259 : vector<1x32xf32> to vector<1x32x1xf32>
    %261 = tpu.reciprocal %260 : vector<1x32x1xf32> -> vector<1x32x1xf32>
    %262 = vector.broadcast %261 : vector<1x32x1xf32> to vector<1x32x32xf32>
    %263 = arith.mulf %258, %262 : vector<1x32x32xf32>
    %264 = arith.truncf %263 : vector<1x32x32xf32> to vector<1x32x32xbf16>
    "tpu.trace_start"() <{level = 10 : i32, message = "gqk,gkd->gqd"}> : () -> ()
    %cst_95 = arith.constant dense<0.000000e+00> : vector<1x32x8xf32>
    %265 = tpu.matmul %264, %252, %cst_95 {dimension_numbers = #tpu.dot_dimension_numbers<[2], [1], [1], [2], [0, 0, 0, 1, 1, 2], [0], [0]>} : vector<1x32x32xbf16>, vector<1x32x8xbf16>, vector<1x32x8xf32> -> vector<1x32x8xf32>
    "tpu.trace_stop"() : () -> ()
    %266 = vector.shape_cast %265 : vector<1x32x8xf32> to vector<32x8xf32>
    %267 = vector.extract_strided_slice %183 {offsets = [0, 24], sizes = [32, 8], strides = [1, 1]} : vector<32x32xf32> to vector<32x8xf32>
    %268 = vector.shape_cast %267 : vector<32x8xf32> to vector<1x32x8xf32>
    %269 = arith.truncf %268 : vector<1x32x8xf32> to vector<1x32x8xbf16>
    %270 = vector.extract_strided_slice %190 {offsets = [0, 24], sizes = [32, 8], strides = [1, 1]} : vector<32x32xf32> to vector<32x8xf32>
    %271 = vector.shape_cast %270 : vector<32x8xf32> to vector<1x32x8xf32>
    %272 = arith.truncf %271 : vector<1x32x8xf32> to vector<1x32x8xbf16>
    %273 = vector.extract_strided_slice %197 {offsets = [0, 24], sizes = [32, 8], strides = [1, 1]} : vector<32x32xf32> to vector<32x8xf32>
    %274 = vector.shape_cast %273 : vector<32x8xf32> to vector<1x32x8xf32>
    %275 = arith.truncf %274 : vector<1x32x8xf32> to vector<1x32x8xbf16>
    "tpu.trace_start"() <{level = 10 : i32, message = "gqd,gkd->gqk"}> : () -> ()
    %cst_96 = arith.constant dense<0.000000e+00> : vector<1x32x32xf32>
    %276 = tpu.matmul %269, %272, %cst_96 {dimension_numbers = #tpu.dot_dimension_numbers<[2], [2], [1], [1], [0, 0, 0, 1, 1, 1], [0], [0]>} : vector<1x32x8xbf16>, vector<1x32x8xbf16>, vector<1x32x32xf32> -> vector<1x32x32xf32>
    "tpu.trace_stop"() : () -> ()
    %cst_97 = arith.constant dense<0xFF800000> : vector<1x32xf32>
    %277 = vector.multi_reduction <maximumf>, %276, %cst_97 [2] : vector<1x32x32xf32> to vector<1x32xf32>
    %278 = vector.shape_cast %277 : vector<1x32xf32> to vector<1x32x1xf32>
    %279 = vector.broadcast %278 : vector<1x32x1xf32> to vector<1x32x32xf32>
    %280 = arith.subf %276, %279 : vector<1x32x32xf32>
    %281 = math.exp %280 : vector<1x32x32xf32>
    %cst_98 = arith.constant dense<0.000000e+00> : vector<1x32xf32>
    %282 = vector.multi_reduction <add>, %281, %cst_98 [2] : vector<1x32x32xf32> to vector<1x32xf32>
    %283 = vector.shape_cast %282 : vector<1x32xf32> to vector<1x32x1xf32>
    %284 = tpu.reciprocal %283 : vector<1x32x1xf32> -> vector<1x32x1xf32>
    %285 = vector.broadcast %284 : vector<1x32x1xf32> to vector<1x32x32xf32>
    %286 = arith.mulf %281, %285 : vector<1x32x32xf32>
    %287 = arith.truncf %286 : vector<1x32x32xf32> to vector<1x32x32xbf16>
    "tpu.trace_start"() <{level = 10 : i32, message = "gqk,gkd->gqd"}> : () -> ()
    %cst_99 = arith.constant dense<0.000000e+00> : vector<1x32x8xf32>
    %288 = tpu.matmul %287, %275, %cst_99 {dimension_numbers = #tpu.dot_dimension_numbers<[2], [1], [1], [2], [0, 0, 0, 1, 1, 2], [0], [0]>} : vector<1x32x32xbf16>, vector<1x32x8xbf16>, vector<1x32x8xf32> -> vector<1x32x8xf32>
    "tpu.trace_stop"() : () -> ()
    %289 = vector.shape_cast %288 : vector<1x32x8xf32> to vector<32x8xf32>
    %290 = tpu.concatenate %220, %243, %266, %289 in 1 : vector<32x8xf32>, vector<32x8xf32>, vector<32x8xf32>, vector<32x8xf32> -> vector<32x32xf32>
    %291 = arith.truncf %290 : vector<32x32xf32> to vector<32x32xbf16>
    %c0_100 = arith.constant 0 : index
    %c0_101 = arith.constant 0 : index
    %292 = vector.load %arg10[%c0_100, %c0_101] : memref<32x32xbf16, #tpu.memory_space<vmem>>, vector<32x32xbf16>
    %cst_102 = arith.constant dense<0.000000e+00> : vector<32x32xf32>
    %293 = tpu.matmul %291, %292, %cst_102 {dimension_numbers = #tpu.dot_dimension_numbers<[1], [0], [0], [1], [0, 0, 1, 1], [], []>} : vector<32x32xbf16>, vector<32x32xbf16>, vector<32x32xf32> -> vector<32x32xf32>
    %c0_103 = arith.constant 0 : index
    %c0_104 = arith.constant 0 : index
    %294 = vector.load %arg11[%c0_103, %c0_104] : memref<1x32xf32, #tpu.memory_space<vmem>>, vector<1x32xf32>
    %295 = vector.broadcast %294 : vector<1x32xf32> to vector<32x32xf32>
    %296 = arith.addf %293, %295 : vector<32x32xf32>
    %297 = arith.addf %149, %296 : vector<32x32xf32>
    %cst_105 = arith.constant dense<0.000000e+00> : vector<32xf32>
    %298 = vector.multi_reduction <add>, %297, %cst_105 [1] : vector<32x32xf32> to vector<32xf32>
    %299 = vector.shape_cast %298 : vector<32xf32> to vector<32x1xf32>
    %cst_106 = arith.constant 3.200000e+01 : f32
    %300 = vector.broadcast %cst_106 : f32 to vector<32x1xf32>
    %301 = arith.divf %299, %300 : vector<32x1xf32>
    %302 = vector.broadcast %301 : vector<32x1xf32> to vector<32x32xf32>
    %303 = arith.subf %297, %302 : vector<32x32xf32>
    %304 = arith.mulf %303, %303 : vector<32x32xf32>
    %cst_107 = arith.constant dense<0.000000e+00> : vector<32xf32>
    %305 = vector.multi_reduction <add>, %304, %cst_107 [1] : vector<32x32xf32> to vector<32xf32>
    %306 = vector.shape_cast %305 : vector<32xf32> to vector<32x1xf32>
    %cst_108 = arith.constant 3.200000e+01 : f32
    %307 = vector.broadcast %cst_108 : f32 to vector<32x1xf32>
    %308 = arith.divf %306, %307 : vector<32x1xf32>
    %309 = vector.broadcast %301 : vector<32x1xf32> to vector<32x32xf32>
    %310 = arith.subf %297, %309 : vector<32x32xf32>
    %cst_109 = arith.constant 9.99999974E-6 : f32
    %311 = vector.broadcast %cst_109 : f32 to vector<32x1xf32>
    %312 = arith.addf %308, %311 : vector<32x1xf32>
    %313 = math.rsqrt %312 : vector<32x1xf32>
    %314 = vector.broadcast %313 : vector<32x1xf32> to vector<32x32xf32>
    %315 = arith.mulf %310, %314 : vector<32x32xf32>
    %c2_110 = arith.constant 2 : index
    %c0_111 = arith.constant 0 : index
    %c0_112 = arith.constant 0 : index
    %316 = vector.load %arg2[%c2_110, %c0_111, %c0_112] : memref<3x1x32xf32, #tpu.memory_space<vmem>>, vector<1x1x32xf32>
    %317 = vector.shape_cast %316 : vector<1x1x32xf32> to vector<1x32xf32>
    %318 = vector.broadcast %317 : vector<1x32xf32> to vector<32x32xf32>
    %319 = arith.mulf %315, %318 : vector<32x32xf32>
    %c2_113 = arith.constant 2 : index
    %c0_114 = arith.constant 0 : index
    %c0_115 = arith.constant 0 : index
    %320 = vector.load %arg3[%c2_113, %c0_114, %c0_115] : memref<3x1x32xf32, #tpu.memory_space<vmem>>, vector<1x1x32xf32>
    %321 = vector.shape_cast %320 : vector<1x1x32xf32> to vector<1x32xf32>
    %322 = vector.broadcast %321 : vector<1x32xf32> to vector<32x32xf32>
    %323 = arith.addf %319, %322 : vector<32x32xf32>
    %324 = arith.truncf %323 : vector<32x32xf32> to vector<32x32xbf16>
    %c0_116 = arith.constant 0 : index
    %c0_117 = arith.constant 0 : index
    %325 = vector.load %arg12[%c0_116, %c0_117] : memref<32x128xbf16, #tpu.memory_space<vmem>>, vector<32x128xbf16>
    %cst_118 = arith.constant dense<0.000000e+00> : vector<32x128xf32>
    %326 = tpu.matmul %324, %325, %cst_118 {dimension_numbers = #tpu.dot_dimension_numbers<[1], [0], [0], [1], [0, 0, 1, 1], [], []>} : vector<32x32xbf16>, vector<32x128xbf16>, vector<32x128xf32> -> vector<32x128xf32>
    %c0_119 = arith.constant 0 : index
    %c0_120 = arith.constant 0 : index
    %327 = vector.load %arg13[%c0_119, %c0_120] : memref<1x128xf32, #tpu.memory_space<vmem>>, vector<1x128xf32>
    %328 = vector.broadcast %327 : vector<1x128xf32> to vector<32x128xf32>
    %329 = arith.addf %326, %328 : vector<32x128xf32>
    %cst_121 = arith.constant 0.000000e+00 : f32
    %330 = vector.broadcast %cst_121 : f32 to vector<32x128xf32>
    %331 = arith.maximumf %329, %330 : vector<32x128xf32>
    %332 = arith.truncf %331 : vector<32x128xf32> to vector<32x128xbf16>
    %c0_122 = arith.constant 0 : index
    %c0_123 = arith.constant 0 : index
    %333 = vector.load %arg14[%c0_122, %c0_123] : memref<128x32xbf16, #tpu.memory_space<vmem>>, vector<128x32xbf16>
    %cst_124 = arith.constant dense<0.000000e+00> : vector<32x32xf32>
    %334 = tpu.matmul %332, %333, %cst_124 {dimension_numbers = #tpu.dot_dimension_numbers<[1], [0], [0], [1], [0, 0, 1, 1], [], []>} : vector<32x128xbf16>, vector<128x32xbf16>, vector<32x32xf32> -> vector<32x32xf32>
    %c0_125 = arith.constant 0 : index
    %c0_126 = arith.constant 0 : index
    %335 = vector.load %arg15[%c0_125, %c0_126] : memref<1x32xf32, #tpu.memory_space<vmem>>, vector<1x32xf32>
    %336 = vector.broadcast %335 : vector<1x32xf32> to vector<32x32xf32>
    %337 = arith.addf %334, %336 : vector<32x32xf32>
    %338 = arith.addf %297, %337 : vector<32x32xf32>
    %339 = vector.shape_cast %338 : vector<32x32xf32> to vector<1x32x32xf32>
    %c0_127 = arith.constant 0 : index
    %c0_128 = arith.constant 0 : index
    %c0_129 = arith.constant 0 : index
    %340 = vector.load %arg16[%c0_127, %c0_128, %c0_129] : memref<1x32x32xf32, #tpu.memory_space<vmem>>, vector<1x32x32xf32>
    tpu.vector_store %arg16[%c0_127, %c0_128, %c0_129], %339 {strides = array<i32>} : memref<1x32x32xf32, #tpu.memory_space<vmem>>, vector<1x32x32xf32>,
    return
  }
  func.func @transform_0(%arg0: i32) -> (i32, i32, i32) {
    %c0_i32 = arith.constant 0 : i32
    %c0_i32_0 = arith.constant 0 : i32
    %c0_i32_1 = arith.constant 0 : i32
    return %arg0, %c0_i32, %c0_i32_0 : i32, i32, i32
  }
  func.func @transform_1(%arg0: i32) -> (i32, i32, i32) {
    %c0_i32 = arith.constant 0 : i32
    %c0_i32_0 = arith.constant 0 : i32
    %c0_i32_1 = arith.constant 0 : i32
    %c0_i32_2 = arith.constant 0 : i32
    return %c0_i32, %c0_i32_0, %c0_i32_1 : i32, i32, i32
  }
  func.func @transform_2(%arg0: i32) -> (i32, i32, i32) {
    %c0_i32 = arith.constant 0 : i32
    %c0_i32_0 = arith.constant 0 : i32
    %c0_i32_1 = arith.constant 0 : i32
    %c0_i32_2 = arith.constant 0 : i32
    return %c0_i32, %c0_i32_0, %c0_i32_1 : i32, i32, i32
  }
  func.func @transform_3(%arg0: i32) -> (i32, i32, i32) {
    %c0_i32 = arith.constant 0 : i32
    %c0_i32_0 = arith.constant 0 : i32
    %c0_i32_1 = arith.constant 0 : i32
    %c0_i32_2 = arith.constant 0 : i32
    return %c0_i32, %c0_i32_0, %c0_i32_1 : i32, i32, i32
  }
  func.func @transform_4(%arg0: i32) -> (i32, i32, i32) {
    %c0_i32 = arith.constant 0 : i32
    %c0_i32_0 = arith.constant 0 : i32
    %c0_i32_1 = arith.constant 0 : i32
    %c0_i32_2 = arith.constant 0 : i32
    return %c0_i32, %c0_i32_0, %c0_i32_1 : i32, i32, i32
  }
  func.func @transform_5(%arg0: i32) -> (i32, i32) {
    %c0_i32 = arith.constant 0 : i32
    %c0_i32_0 = arith.constant 0 : i32
    %c0_i32_1 = arith.constant 0 : i32
    return %c0_i32, %c0_i32_0 : i32, i32
  }
  func.func @transform_6(%arg0: i32) -> (i32, i32) {
    %c0_i32 = arith.constant 0 : i32
    %c0_i32_0 = arith.constant 0 : i32
    %c0_i32_1 = arith.constant 0 : i32
    return %c0_i32, %c0_i32_0 : i32, i32
  }
  func.func @transform_7(%arg0: i32) -> (i32, i32, i32) {
    %c0_i32 = arith.constant 0 : i32
    %c0_i32_0 = arith.constant 0 : i32
    %c0_i32_1 = arith.constant 0 : i32
    %c0_i32_2 = arith.constant 0 : i32
    return %c0_i32, %c0_i32_0, %c0_i32_1 : i32, i32, i32
  }
  func.func @transform_8(%arg0: i32) -> (i32, i32, i32) {
    %c0_i32 = arith.constant 0 : i32
    %c0_i32_0 = arith.constant 0 : i32
    %c0_i32_1 = arith.constant 0 : i32
    %c0_i32_2 = arith.constant 0 : i32
    return %c0_i32, %c0_i32_0, %c0_i32_1 : i32, i32, i32
  }
  func.func @transform_9(%arg0: i32) -> (i32, i32) {
    %c0_i32 = arith.constant 0 : i32
    %c0_i32_0 = arith.constant 0 : i32
    %c0_i32_1 = arith.constant 0 : i32
    return %c0_i32, %c0_i32_0 : i32, i32
  }
  func.func @transform_10(%arg0: i32) -> (i32, i32) {
    %c0_i32 = arith.constant 0 : i32
    %c0_i32_0 = arith.constant 0 : i32
    %c0_i32_1 = arith.constant 0 : i32
    return %c0_i32, %c0_i32_0 : i32, i32
  }
  func.func @transform_11(%arg0: i32) -> (i32, i32) {
    %c0_i32 = arith.constant 0 : i32
    %c0_i32_0 = arith.constant 0 : i32
    %c0_i32_1 = arith.constant 0 : i32
    return %c0_i32, %c0_i32_0 : i32, i32
  }
  func.func @transform_12(%arg0: i32) -> (i32, i32) {
    %c0_i32 = arith.constant 0 : i32
    %c0_i32_0 = arith.constant 0 : i32
    %c0_i32_1 = arith.constant 0 : i32
    return %c0_i32, %c0_i32_0 : i32, i32
  }
  func.func @transform_13(%arg0: i32) -> (i32, i32) {
    %c0_i32 = arith.constant 0 : i32
    %c0_i32_0 = arith.constant 0 : i32
    %c0_i32_1 = arith.constant 0 : i32
    return %c0_i32, %c0_i32_0 : i32, i32
  }
  func.func @transform_14(%arg0: i32) -> (i32, i32) {
    %c0_i32 = arith.constant 0 : i32
    %c0_i32_0 = arith.constant 0 : i32
    %c0_i32_1 = arith.constant 0 : i32
    return %c0_i32, %c0_i32_0 : i32, i32
  }
  func.func @transform_15(%arg0: i32) -> (i32, i32, i32) {
    %c0_i32 = arith.constant 0 : i32
    %c0_i32_0 = arith.constant 0 : i32
    %c0_i32_1 = arith.constant 0 : i32
    return %arg0, %c0_i32, %c0_i32_0 : i32, i32, i32
  }
}

</mosaic_0001>

<bundles_post_ra>
// kernel: tpu_custom_call.1
= control target key start
LH: loop header
LB: loop body
LE: loop exit
PB: predicated region body
PF: predicated region fallthrough
CT: control target
= control target key end

     0   :  { %s5597_s0 = inlined_call_operand.vmem [shape: f32[2,32,32], index: 0, kind: input, shape index: {}]   ;;  %s5598_s1 = inlined_call_operand.hbm [shape: f32[3,1,32], index: 1, kind: input, shape index: {}]   ;;  %s5599_s2 = inlined_call_operand.hbm [shape: f32[3,1,32], index: 2, kind: input, shape index: {}]   ;;  %s5600_s3 = inlined_call_operand.hbm [shape: bf16[3,32,32], index: 3, kind: input, shape index: {}]   ;;  %s5601_s4 = inlined_call_operand.vmem [shape: f32[3,1,32], index: 4, kind: input, shape index: {}]   ;;  %s5602_s5 = inlined_call_operand.vmem [shape: bf16[32,32], index: 5, kind: input, shape index: {}]   ;;  %s5603_s6 = inlined_call_operand.hbm [shape: f32[1,32], index: 6, kind: input, shape index: {}]   ;;  %s5604_s7 = inlined_call_operand.hbm [shape: bf16[3,32,32], index: 7, kind: input, shape index: {}]   ;;  %s5605_s8 = inlined_call_operand.vmem [shape: f32[3,1,32], index: 8, kind: input, shape index: {}]   ;;  %s5606_s9 = inlined_call_operand.hbm [shape: bf16[32,32], index: 9, kind: input, shape index: {}]   ;;  %s5607_s10 = inlined_call_operand.vmem [shape: f32[1,32], index: 10, kind: input, shape index: {}]   ;;  %s5608_s11 = inlined_call_operand.hbm [shape: bf16[32,128], index: 11, kind: input, shape index: {}]   ;;  %s5609_s12 = inlined_call_operand.vmem [shape: f32[1,128], index: 12, kind: input, shape index: {}]   ;;  %s5610_s13 = inlined_call_operand.vmem [shape: bf16[128,32], index: 13, kind: input, shape index: {}]   ;;  %s5611_s14 = inlined_call_operand.vmem [shape: f32[1,32], index: 14, kind: input, shape index: {}]   ;;  %s5612_s15 = inlined_call_operand.hbm [shape: f32[2,32,32], index: 15, kind: output, shape index: {}]  }
   0x1   :  { %5622 = sst [smem:[#allocation27_spill]] %s5598_s1 }
   0x2   :  { %5623 = sst [smem:[#allocation28_spill]] %s5599_s2 }
   0x3   :  { %5624 = sst [smem:[#allocation29_spill]] %s5603_s6 }
   0x4   :  { %5625 = sst [smem:[#allocation30_spill]] %s5606_s9 }
   0x5   :  { %5626 = sst [smem:[#allocation31_spill]] %s5611_s14 }
   0x6   :  { %5627 = sst [smem:[#allocation32_spill]] %s5612_s15 }
   0x7   :  { %20 = vsyncpa [#allocation3], 0 }
   0x8   :  { %21 = vsyncpa [#allocation6], 0 }
   0x9   :  { %22 = vsyncpa [#allocation9], 0 }
   0xa   :  { %23 = vsyncpa [#allocation12], 0 }
   0xb   :  { %24 = vsyncpa [#allocation4], 0 }
   0xc   :  { %26 = vsyncpa [#allocation4 + $0x1], 0  ;;  %s4568_s18 = smov 0   ;;  %s4570_s19 = smov 0  }
   0xd   :  { %s4572_s20 = smov 0   ;;  %s4574_s21 = smov 0  }
   0xe LB: > { %5628 = sst [smem:[#allocation20_spill]] %s4455_s18  ;;  %s4589_s22 = sadd.s32 4294967295, %s4467_s21   ;;  %s4467_s21 = sphi %s4574_s21, %s5658_s21   ;;  %s4463_s20 = sphi %s4572_s20, %s5660_s20   ;;  %s4459_s19 = sphi %s4570_s19, %s5662_s19   ;;  %s4455_s18 = sphi %s4568_s18, %s5661_s18  }
   0xf   : > { %5629 = sst [smem:[#allocation21_spill]] %s4463_s20  ;;  %s3593_s23 = sadd.s32 4294967294, %s4467_s21  }
  0x10   : > { %5630 = sst [smem:[#allocation22_spill]] %s4467_s21  ;;  %s4593_s24 = sadd.s32 1, %s4467_s21  }
  0x11   : > { %5631 = sst [smem:[#allocation23_spill]] %s4593_s24  ;;  %s359_s25 = sadd.s32 1, %s4463_s20 }
  0x12   : > { %s356_s26 = ssub.s32 %s4467_s21, %s4593_s24  ;;  %p369_p0 = scmp.ne.s32.totalorder %s4463_s20, %s4459_s19 }
  0x13   : > { %p357_p1 = scmp.eq.s32.totalorder %s356_s26, 0  ;;  %p370_p2 = scmp.eq.s32.totalorder %s4589_s22, 1 }
  0x14   : > { %p375_p3 = scmp.ne.s32.totalorder %s4459_s19, %s4455_s18  ;;  %p376_p4 = scmp.eq.s32.totalorder %s3593_s23, 1 }
  0x15   : > { %s4604_s27 = scalar_select %p357_p1, %s4463_s20, %s359_s25  }
  0x16   : > { %p4606_p5 = por %p370_p2, %p369_p0  ;;  %p4610_p6 = por %p376_p4, %p375_p3 }
  0x17   : > { %5632 = sst [smem:[#allocation24_spill]] %s4604_s27  ;;  %p3594_p7 = scmp.ge.s32.totalorder %s4467_s21, 1 }
  0x18   : > { %s5633_s28 = scalar_select %p4606_p5, 1, 0 }
  0x19   : > { %s5635_s29 = scalar_select %p4610_p6, 1, 0 }
  0x1a   : > { %5634 = sst [smem:[#allocation25_spill]] %s5633_s28  ;;  %p383_p8 = scmp.lt.s32.totalorder %s4467_s21, 3 }
  0x1b   : > { %5636 = sst [smem:[#allocation26_spill]] %s5635_s29  ;;  %p3879_p9 = scmp.eq.s32.totalorder %s4589_s22, 0 }
  0x1c   : > { %p4617_p10 = pnand %p3594_p7, %p383_p8  ;;  %s5638_s2 = sld [smem:[#allocation28_spill]] }
  0x1d   : > { %s5639_s6 = sld [smem:[#allocation29_spill]]  ;;  %s4469_s24 = smov [#allocation5]  }
  0x1e   : > { %p3853_p11 = pneg %p4617_p10  ;;  %s410_s29 = sshll.u32 %s4469_s24, 4  ;;  %s411_s29 = int_to_ptr.vmem [resolvable:$true] %s410_s29 }
  0x1f   : > { %s4470_s16 = smov 16   ;;  %s4471_s17 = smov 1  }
  0x20   : > { %p4631_p12 = pnand %p3879_p9, %p3853_p11  ;;  %s5641_s9 = sld [smem:[#allocation30_spill]] }
  0x21   : > { %s4473_s21 = smov [#allocation11]   ;;  %s5642_s1 = sld [smem:[#allocation27_spill]] }
  0x22   : > { %s408_s23 = sshll.u32 %s5638_s2, 4  ;;  %s4472_s2 = smov [#allocation8]   ;;  %s409_s23 = int_to_ptr.hbm [resolvable:$true] %s408_s23 }
  0x23   : > { %s443_s27 = sshll.u32 %s5639_s6, 4  ;;  %s445_s18 = sshll.u32 %s4472_s2, 4  ;;  %s444_s27 = int_to_ptr.hbm [resolvable:$true] %s443_s27  ;;  %s446_s18 = int_to_ptr.vmem [resolvable:$true] %s445_s18 }
  0x24   : > { %3859 = dma.hbm_to_vmem [thread:$0]  (!%p4631_p12), %s409_s23, 48, %s411_s29, [#allocation6], %s4470_s16, %s4470_s16, %s4471_s17  }
  0x25   : > { %3865 = dma.hbm_to_vmem [thread:$0]  (!%p4631_p12), %s444_s27, 16, %s446_s18, [#allocation9]  }
  0x26   : > { %s471_s6 = sshll.u32 %s5641_s9, 4  ;;  %s473_s24 = sshll.u32 %s4473_s21, 4  ;;  %s472_s6 = int_to_ptr.hbm [resolvable:$true] %s471_s6  ;;  %s474_s24 = int_to_ptr.vmem [resolvable:$true] %s473_s24 }
  0x27   : > { %s394_s14 = sshll.u32 %s5642_s1, 4  ;;  %s4474_s29 = smov 64   ;;  %s395_s14 = int_to_ptr.hbm [resolvable:$true] %s394_s14 }
  0x28   : > { %s4475_s23 = smov 4   ;;  %s4476_s2 = smov [#allocation2]  }
  0x29   : > { %3871 = dma.hbm_to_vmem [thread:$0]  (!%p4631_p12), %s472_s6, 256, %s474_s24, [#allocation12], %s4474_s29, %s4474_s29, %s4475_s23  }
  0x2a   : > { %s396_s18 = sshll.u32 %s4476_s2, 4  ;;  %s422_s26 = sshll.u32 %s5600_s3, 4  ;;  %s397_s18 = int_to_ptr.vmem [resolvable:$true] %s396_s18  ;;  %s423_s26 = int_to_ptr.hbm [resolvable:$true] %s422_s26 }
  0x2b   : > { %3856 = dma.hbm_to_vmem [thread:$0]  (!%p4631_p12), %s395_s14, 48, %s397_s18, [#allocation3], %s4470_s16, %s4470_s16, %s4471_s17  }
  0x2c   : > { %s454_s28 = sshll.u32 %s5604_s7, 4  ;;  %s4477_s1 = smov [#allocation7]   ;;  %s455_s28 = int_to_ptr.hbm [resolvable:$true] %s454_s28 }
  0x2d   : > { %s424_s9 = sshll.u32 %s4477_s1, 4  ;;  %s4478_s6 = smov [#allocation10]   ;;  %s425_s9 = int_to_ptr.vmem [resolvable:$true] %s424_s9 }
  0x2e   : > { %3862 = dma.hbm_to_vmem [thread:$0]  (!%p4631_p12), %s423_s26, 768, %s425_s9, [#allocation6], %s4474_s29, %s4474_s29, %s4475_s23  }
  0x2f   : > { %s456_s24 = sshll.u32 %s4478_s6, 4  ;;  %s488_s25 = sshll.u32 %s5608_s11, 4  ;;  %s457_s24 = int_to_ptr.vmem [resolvable:$true] %s456_s24  ;;  %s489_s25 = int_to_ptr.hbm [resolvable:$true] %s488_s25 }
  0x30   : > { %3868 = dma.hbm_to_vmem [thread:$0]  (!%p4631_p12), %s455_s28, 768, %s457_s24, [#allocation9], %s4474_s29, %s4474_s29, %s4475_s23  }
  0x31   : > { %s4479_s14 = smov [#allocation13]   ;;  %523 = sbr.rel (%p4617_p10) target bundleno = 4649 (0x1229), region = 80 }
  0x32   : > { %s490_s16 = sshll.u32 %s4479_s14, 4  ;;  %s491_s16 = int_to_ptr.vmem [resolvable:$true] %s490_s16 }
  0x33   : > { %3874 = dma.hbm_to_vmem [thread:$0]  (!%p4631_p12), %s489_s25, 256, %s491_s16, [#allocation12], %s4474_s29, %s4474_s29, %s4475_s23  }
  0x36   : > { %4434 = dma.done.wait (%p3879_p9), [#allocation3], 48  }
  0x37   : > { %4436 = vsyncadd (%p3879_p9), [#allocation3], 4294967248 }
  0x38   : > { %4438 = dma.done.wait (%p3879_p9), [#allocation6], 816  }
  0x39   : > { %4440 = vsyncadd (%p3879_p9), [#allocation6], 4294966480 }
  0x3a   : > { %4442 = dma.done.wait (%p3879_p9), [#allocation9], 784  }
  0x3b   : > { %4444 = vsyncadd (%p3879_p9), [#allocation9], 4294966512 }
  0x3c   : > { %4446 = dma.done.wait (%p3879_p9), [#allocation12], 512  }
  0x3d   : > { %4448 = vsyncadd (%p3879_p9), [#allocation12], 4294966784  ;;  %p602_p13 = scmp.lt.s32.totalorder %s4589_s22, 1  ;;  %vm612_vm0 = vcmask 261120   ;;  %v4480_v8 = vmov 32.0   ;;  %v3795_v35 = vld [vmem:[#allocation7 + $0x8] sm:$0xff] }
  0x3e   : > { %4021 = vrcp.f32 %v4480_v8  ;;  %v3799_v36 = vld [vmem:[#allocation7 + $0x28] sm:$0xff]  ;;  %758 = vmatpush.bf16.msra.mxu0 %v3795_v35  ;;  %3821 = vmatpush.bf16.msra.mxu1 %v3795_v35  ;;  %v3794_v41 = vld [vmem:[#allocation7] sm:$0xff]  ;;  %v3797_v47 = vld [vmem:[#allocation7 + $0x18] sm:$0xff]  ;;  %vm1045_vm14 = vcmask 1043456   ;;  %vm865_vm15 = vcmask 64512   ;;  %s4481_s28 = smov 120  }
  0x3f   : > { %s603_s1 = scalar_select %p602_p13, %s4589_s22, 1  ;;  %840 = vmatpush.bf16.msra.mxu2 %v3799_v36  ;;  %v3798_v42 = vld [vmem:[#allocation7 + $0x20] sm:$0xff]  ;;  %v3796_v50 = vld [vmem:[#allocation7 + $0x10] sm:$0xff] }
  0x40   : > { %s4482_s6 = smov 112   ;;  %s4483_s24 = smov 104  }
  0x41   : > { %s3793_s9 = sshll.u32 %s603_s1, 5  ;;  %s4484_s2 = smov 16  }
  0x42   : > { %s4687_s17 = scalar_lea.vmem %s5597_s0, %s3793_s9  ;;  %759 = vmatpush.bf16.msra.mxu0 %v3794_v41  ;;  %3822 = vmatpush.bf16.msra.mxu1 %v3794_v41  ;;  %v4009_v41 = vld [vmem:[%s5601_s4 + $0x1] ss:$0 sm:$0xff]  ;;  %s4485_s27 = smov 8  }
  0x43   : > { %v610_v0 = vld [vmem:[%s4687_s17 + $0x10] sm:$0xff]  ;;  %v608_v1 = vld [vmem:[%s4687_s17] sm:$0xff]  ;;  %v611_v2 = vld [vmem:[%s4687_s17 + $0x18] sm:$0xff]  ;;  %841 = vmatpush.bf16.msra.mxu2 %v3798_v42  ;;  %s4486_s16 = smov 24   ;;  %s599_s15 = sand.u32 1, %s4459_s19  }
  0x44   : > { %v619_v3 = vsel %vm612_vm0, %v610_v0, 0.0  ;;  %v613_v4 = vsel %vm612_vm0, %v608_v1, 0.0  ;;  %v609_v5 = vld [vmem:[%s4687_s17 + $0x8] sm:$0xff]  ;;  %v622_v6 = vsel %vm612_vm0, %v611_v2, 0.0  ;;  %v4022_v9 = vpop.eup %4021  ;;  %s3820_s14 = sshll.u32 %s4589_s22, 5  ;;  %s5653_s20 = sld [smem:[#allocation32_spill]] }
  0x45   : > { %620 = vadd.xlane.f32.xlu0 %v619_v3  ;;  %614 = vadd.xlane.f32.xlu1 %v613_v4  ;;  %v616_v7 = vsel %vm612_vm0, %v609_v5, 0.0  ;;  %v626_v10 = vmul.f32 32.0, %v4022_v9  ;;  %vm630_vm1 = vweird.f32 %v4022_v9  ;;  %s3447_s22 = scalar_lea.sflag [#allocation4], %s599_s15 }
  0x46   : > { %799 = vmatpush.bf16.msrb.mxu1 %v3797_v47 }
  0x47   : > { %v627_v11 = vsub.f32 1.0, %v626_v10 }
  0x49   : > { %v628_v12 = vmul.f32 %v4022_v9, %v627_v11 }
  0x4a   : > { %800 = vmatpush.bf16.msrb.mxu1 %v3796_v50  ;;  %s5654_s30 = smov %s5653_s20 }
  0x4b   : > { %v629_v13 = vadd.f32 %v4022_v9, %v628_v12 }
  0x4d   : > { %623 = vadd.xlane.f32.xlu0 %v622_v6  ;;  %617 = vadd.xlane.f32.xlu1 %v616_v7  ;;  %v4697_v14 = vsel %vm630_vm1, %v4022_v9, %v629_v13  ;;  %v4005_v13 = vld [vmem:[#allocation2] ss:$0 sm:$0xff] }
  0xb8   : > { %v621_v15 = vpop.xlane.xlu0 %620  ;;  %v615_v16 = vpop.xlane.xlu1 %614 }
  0xb9   : > { %v634_v17 = vmul.f32 %v4697_v14, %v621_v15  ;;  %v632_v18 = vmul.f32 %v4697_v14, %v615_v16 }
  0xbb   : > { %v4701_v19 = vsub.f32 %v608_v1, %v632_v18  ;;  %v4703_v20 = vsub.f32 %v610_v0, %v634_v17 }
  0xbd   : > { %v642_v21 = vmul.f32 %v4703_v20, %v4703_v20  ;;  %v640_v22 = vmul.f32 %v4701_v19, %v4701_v19 }
  0xbf   : > { %v650_v23 = vsel %vm612_vm0, %v642_v21, 0.0  ;;  %v644_v24 = vsel %vm612_vm0, %v640_v22, 0.0 }
  0xc0   : > { %651 = vadd.xlane.f32.xlu2 %v650_v23  ;;  %v624_v25 = vpop.xlane.xlu0 %623  ;;  %645 = vadd.xlane.f32.xlu0 %v644_v24  ;;  %v618_v26 = vpop.xlane.xlu1 %617  ;;  %v4006_v23 = vld [vmem:[#allocation5] ss:$0 sm:$0xff] }
  0xc1   : > { %v635_v27 = vmul.f32 %v4697_v14, %v624_v25  ;;  %v633_v28 = vmul.f32 %v4697_v14, %v618_v26 }
  0xc3   : > { %v4713_v29 = vsub.f32 %v611_v2, %v635_v27  ;;  %v4715_v30 = vsub.f32 %v609_v5, %v633_v28 }
  0xc5   : > { %v643_v31 = vmul.f32 %v4713_v29, %v4713_v29  ;;  %v641_v32 = vmul.f32 %v4715_v30, %v4715_v30 }
  0xc7   : > { %v653_v33 = vsel %vm612_vm0, %v643_v31, 0.0  ;;  %v647_v34 = vsel %vm612_vm0, %v641_v32, 0.0 }
  0xc8   : > { %654 = vadd.xlane.f32.xlu2 %v653_v33  ;;  %648 = vadd.xlane.f32.xlu1 %v647_v34 }
 0x133   : > { %v652_v37 = vpop.xlane.xlu2 %651  ;;  %v646_v38 = vpop.xlane.xlu0 %645 }
 0x134   : > { %v658_v39 = vmul.f32 %v652_v37, %v4697_v14  ;;  %v656_v40 = vmul.f32 %v646_v38, %v4697_v14 }
 0x136   : > { %v662_v43 = vadd.f32 1e-05, %v658_v39  ;;  %v660_v44 = vadd.f32 1e-05, %v656_v40 }
 0x138   : > { %4023 = vrsqrt.f32 %v662_v43  ;;  %vm670_vm2 = vweird.f32 %v660_v44  ;;  %vm690_vm5 = vweird.f32 %v662_v43 }
 0x139   : > { %4025 = vrsqrt.f32 %v660_v44 }
 0x13b   : > { %v655_v45 = vpop.xlane.xlu2 %654  ;;  %v649_v46 = vpop.xlane.xlu1 %648 }
 0x13c   : > { %v659_v48 = vmul.f32 %v655_v45, %v4697_v14  ;;  %v657_v49 = vmul.f32 %v649_v46, %v4697_v14  ;;  %v4007_v45 = vld [vmem:[%s5601_s4] ss:$0 sm:$0xff] }
 0x13e   : > { %v4024_v51 = vpop.eup %4023  ;;  %v663_v52 = vadd.f32 1e-05, %v659_v48  ;;  %v661_v53 = vadd.f32 1e-05, %v657_v49 }
 0x13f   : > { %v4026_v54 = vpop.eup %4025  ;;  %v685_v55 = vmul.f32 %v4024_v51, %v662_v43  ;;  %vm691_vm4 = vweird.f32 %v4024_v51 }
 0x140   : > { %v665_v56 = vmul.f32 %v4026_v54, %v660_v44  ;;  %4027 = vrsqrt.f32 %v663_v52  ;;  %vm671_vm3 = vweird.f32 %v4026_v54  ;;  %vm692_vm7 = vmor %vm690_vm5, %vm691_vm4  ;;  %vm680_vm8 = vweird.f32 %v661_v53 }
 0x141   : > { %v686_v57 = vmul.f32 %v4024_v51, %v685_v55  ;;  %4029 = vrsqrt.f32 %v661_v53  ;;  %vm672_vm6 = vmor %vm670_vm2, %vm671_vm3  ;;  %vm700_vm11 = vweird.f32 %v663_v52 }
 0x142   : > { %v666_v58 = vmul.f32 %v4026_v54, %v665_v56 }
 0x143   : > { %v687_v59 = vmul.f32 0.5, %v686_v57 }
 0x144   : > { %v667_v60 = vmul.f32 0.5, %v666_v58 }
 0x145   : > { %v688_v61 = vsub.f32 1.5, %v687_v59 }
 0x146   : > { %v4028_v62 = vpop.eup %4027  ;;  %v668_v63 = vsub.f32 1.5, %v667_v60 }
 0x147   : > { %v4030_v0 = vpop.eup %4029  ;;  %v689_v1 = vmul.f32 %v4024_v51, %v688_v61  ;;  %v695_v2 = vmul.f32 %v4028_v62, %v663_v52  ;;  %vm701_vm10 = vweird.f32 %v4028_v62 }
 0x148   : > { %v669_v3 = vmul.f32 %v4026_v54, %v668_v63  ;;  %v675_v4 = vmul.f32 %v4030_v0, %v661_v53  ;;  %vm681_vm9 = vweird.f32 %v4030_v0  ;;  %vm702_vm13 = vmor %vm700_vm11, %vm701_vm10 }
 0x149   : > { %v696_v5 = vmul.f32 %v4028_v62, %v695_v2  ;;  %v693_v7 = vsel %vm692_vm7, %v4024_v51, %v689_v1  ;;  %vm682_vm12 = vmor %vm680_vm8, %vm681_vm9 }
 0x14a   : > { %v676_v6 = vmul.f32 %v4030_v0, %v675_v4  ;;  %v673_v9 = vsel %vm672_vm6, %v4026_v54, %v669_v3  ;;  %v706_v15 = vmul.f32 %v693_v7, %v4703_v20 }
 0x14b   : > { %v697_v8 = vmul.f32 0.5, %v696_v5  ;;  %v704_v16 = vmul.f32 %v673_v9, %v4701_v19 }
 0x14c   : > { %v677_v10 = vmul.f32 0.5, %v676_v6  ;;  %v714_v25 = vmul.f32 %v4005_v13, %v706_v15 }
 0x14d   : > { %v698_v11 = vsub.f32 1.5, %v697_v8  ;;  %v712_v27 = vmul.f32 %v4005_v13, %v704_v16 }
 0x14e   : > { %v678_v12 = vsub.f32 1.5, %v677_v10  ;;  %v722_v32 = vadd.f32 %v4006_v23, %v714_v25 }
 0x14f   : > { %v699_v17 = vmul.f32 %v4028_v62, %v698_v11  ;;  %v720_v33 = vadd.f32 %v4006_v23, %v712_v27 }
 0x150   : > { %v679_v18 = vmul.f32 %v4030_v0, %v678_v12 }
 0x151   : > { %v703_v21 = vsel %vm702_vm13, %v4028_v62, %v699_v17 }
 0x152   : > { %v683_v22 = vsel %vm682_vm12, %v4030_v0, %v679_v18  ;;  %v707_v24 = vmul.f32 %v703_v21, %v4713_v29 }
 0x153   : > { %v705_v26 = vmul.f32 %v683_v22, %v4715_v30  ;;  %v4008_v30 = vld [vmem:[%s5601_s4 + $0x2] ss:$0 sm:$0xff] }
 0x154   : > { %v715_v28 = vmul.f32 %v4005_v13, %v707_v24 }
 0x155   : > { %v713_v31 = vmul.f32 %v4005_v13, %v705_v26 }
 0x156   : > { %v723_v20 = vadd.f32 %v4006_v23, %v715_v28 }
 0x157   : > { %v721_v19 = vadd.f32 %v4006_v23, %v713_v31 }
 0x158   : > { %v725_v34 = vpack.c.bf16 %v723_v20, %v722_v32 }
 0x159   : > { %v724_v35 = vpack.c.bf16 %v721_v19, %v720_v33 }
 0x15a   : > { %3623 = vmatmul.msk.bf16.vlgmr.msra.gmra.mxu1 %vm612_vm0, %v725_v34 }
 0x15b   : > { %3622 = vmatmul.msk.bf16.vlgmr.msra.gmra.mxu0 %vm612_vm0, %v724_v35  ;;  %3644 = vmatmul.msk.bf16.vlgmr.msra.gmra.mxu2 %vm612_vm0, %v724_v35 }
 0x16a   : > { %3633 = vmatmul.msk.bf16.vlgmr.msrb.gmra.mxu1 %vm612_vm0, %v724_v35 }
 0x16b   : > { %3645 = vmatmul.msk.bf16.gmra.mxu2 %vm612_vm0, %v725_v34 }
 0x17a   : > { %3634 = vmatmul.msk.bf16.gmra.mxu1 %vm612_vm0, %v725_v34 }
 0x1d7   : > { %v766_v29 = vpop.f32.mrf.mxu1 }
 0x1d8   : > { %v761_v47 = vpop.f32.mrf.mxu0  ;;  %v767_v5 = vadd.f32 %v4007_v45, %v766_v29 }
 0x1d9   : > { %v762_v50 = vadd.f32 %v4007_v45, %v761_v47 }
 0x1da   : > { %v4773_v10 = vpack.c.bf16 %v767_v5, %v767_v5 }
 0x1db   : > { %v4753_v55 = vpack.c.bf16 %v762_v50, %v762_v50 }
 0x1de   : > { %v843_v36 = vpop.f32.mrf.mxu2 }
 0x1df   : > { %v844_v37 = vadd.f32 %v4008_v30, %v843_v36  ;;  %v768_v38 = vpop.f32.mrf.mxu1 }
 0x1e0   : > { %v763_v1 = vpop.f32.mrf.mxu0  ;;  %v769_v16 = vadd.f32 %v4007_v45, %v768_v38 }
 0x1e1   : > { %v4740_v39 = vpack.c.bf16 %v844_v37, %v844_v37  ;;  %v764_v6 = vadd.f32 %v4007_v45, %v763_v1 }
 0x1e2   : > { %v4784_v17 = vpack.c.bf16 %v769_v16, %v769_v16 }
 0x1e3   : > { %v1047_v40 = vsel %vm1045_vm14, %v4740_v39, 0  ;;  %v854_v11 = vpack.c.bf16 %v764_v6, %v764_v6 }
 0x1e4   : > { %1056 = vmatpush.bf16.msrb.mxu2 %v1047_v40  ;;  %v1207_v5 = vunpack.c.l.b16 %v4784_v17 }
 0x1e5   : > { %v1149_v34 = vunpack.c.l.b16 %v854_v11 }
 0x1e6   : > { %v845_v42 = vpop.f32.mrf.mxu2  ;;  %v4843_v6 = vpack.c.b16 %v1207_v5, %v1207_v5 }
 0x1e7   : > { %v802_v43 = vpop.f32.mrf.mxu1  ;;  %v846_v49 = vadd.f32 %v4008_v30, %v845_v42  ;;  %v4796_v35 = vpack.c.b16 %v1149_v34, %v1149_v34 }
 0x1e8   : > { %v803_v44 = vadd.f32 %v4009_v41, %v802_v43 }
 0x1e9   : > { %v4751_v54 = vpack.c.bf16 %v846_v49, %v846_v49  ;;  %v1120_v49 = vunpack.c.l.b16 %v4753_v55 }
 0x1ea   : > { %v857_v46 = vpack.c.bf16 %v803_v44, %v803_v44 }
 0x1eb   : > { %v1066_v59 = vsel %vm1045_vm14, %v4751_v54, 0  ;;  %v4815_v50 = vpack.c.b16 %v1120_v49, %v1120_v49 }
 0x1ec   : > { %v870_v48 = vsel %vm865_vm15, %v857_v46, 0  ;;  %v1125_v31 = vunpack.c.l.b16 %v857_v46 }
 0x1ed   : > { %879 = vmatpush.bf16.xpose.msra.mxu3 %v870_v48 }
 0x1ee   : > { %v848_v52 = vpop.f32.mrf.mxu2  ;;  %v4791_v32 = vpack.c.b16 %v1125_v31, %v1125_v31 }
 0x1ef   : > { %v804_v51 = vpop.f32.mrf.mxu1  ;;  %v849_v58 = vadd.f32 %v4008_v30, %v848_v52 }
 0x1f0   : > { %v805_v53 = vadd.f32 %v4009_v41, %v804_v51 }
 0x1f1   : > { %v4763_v62 = vpack.c.bf16 %v849_v58, %v849_v58 }
 0x1f2   : > { %v4755_v56 = vpack.c.bf16 %v805_v53, %v805_v53 }
 0x1f3   : > { %v1085_v3 = vsel %vm1045_vm14, %v4763_v62, 0 }
 0x1f4   : > { %3646 = vmatmul.msk.bf16.vlgmr.msra.gmra.mxu3 %vm865_vm15, %v4753_v55  ;;  %v889_v57 = vsel %vm865_vm15, %v4755_v56, 0  ;;  %v1154_v46 = vunpack.c.l.b16 %v4755_v56 }
 0x1f5   : > { %898 = vmatpush.bf16.xpose.msrb.mxu3 %v889_v57 }
 0x1f6   : > { %v850_v63 = vpop.f32.mrf.mxu2  ;;  %v4810_v48 = vpack.c.b16 %v1154_v46, %v1154_v46 }
 0x1f7   : > { %v807_v60 = vpop.f32.mrf.mxu1  ;;  %v851_v4 = vadd.f32 %v4008_v30, %v850_v63 }
 0x1f8   : > { %v808_v61 = vadd.f32 %v4009_v41, %v807_v60 }
 0x1f9   : > { %v4771_v9 = vpack.c.bf16 %v851_v4, %v851_v4 }
 0x1fa   : > { %v4765_v0 = vpack.c.bf16 %v808_v61, %v808_v61 }
 0x1fb   : > { %v1104_v15 = vsel %vm1045_vm14, %v4771_v9, 0 }
 0x1fc   : > { %v908_v2 = vsel %vm865_vm15, %v4765_v0, 0  ;;  %v1183_v52 = vunpack.c.l.b16 %v4765_v0  ;;  %v1178_v0 = vunpack.c.l.b16 %v4773_v10 }
 0x1fd   : > { %1075 = vmatpush.bf16.msra.mxu3 %v1066_v59  ;;  %917 = vmatpush.bf16.xpose.msrb.mxu0 %v908_v2 }
 0x1fe   : > { %v4820_v56 = vpack.c.b16 %v1183_v52, %v1183_v52 }
 0x1ff   : > { %v809_v7 = vpop.f32.mrf.mxu1 }
 0x200   : > { %v810_v8 = vadd.f32 %v4009_v41, %v809_v7  ;;  %v1336_v7 = vunpack.c.l.b16 %v4740_v39 }
 0x202   : > { %v4775_v12 = vpack.c.bf16 %v810_v8, %v810_v8  ;;  %v4848_v8 = vpack.c.b16 %v1336_v7, %v1336_v7 }
 0x204   : > { %3647 = vmatmul.msk.bf16.vlgmr.msrb.gmra.mxu3 %vm865_vm15, %v854_v11  ;;  %3648 = vmatmul.msk.bf16.vlgmr.msrb.gmra.mxu0 %vm865_vm15, %v4773_v10  ;;  %v927_v13 = vsel %vm865_vm15, %v4775_v12, 0  ;;  %v1212_v58 = vunpack.c.l.b16 %v4775_v12 }
 0x205   : > { %1094 = vmatpush.bf16.msra.mxu0 %v1085_v3  ;;  %936 = vmatpush.bf16.xpose.msra.mxu1 %v927_v13  ;;  %v4836_v3 = vpack.c.b16 %v1178_v0, %v1178_v0 }
 0x206   : > { %v4825_v61 = vpack.c.b16 %v1212_v58, %v1212_v58 }
 0x20c   : > { %3649 = vmatmul.msk.bf16.vlgmr.msra.gmra.mxu1 %vm865_vm15, %v4784_v17 }
 0x20d   : > { %1113 = vmatpush.bf16.msrb.mxu1 %v1104_v15 }
 0x277   : > { %v881_v18 = vpop.f32.mrf.mxu3 }
 0x278   : > { %v942_v21 = vsel %vm865_vm15, %v881_v18, -inf }
 0x279   : > { %943 = vmax.xlane.f32.xlu2 %v942_v21 }
 0x27f   : > { %v883_v22 = vpop.f32.mrf.mxu3 }
 0x281   : > { %v919_v23 = vpop.f32.mrf.mxu0 }
 0x282   : > { %v948_v24 = vsel %vm865_vm15, %v919_v23, -inf }
 0x283   : > { %949 = vmax.xlane.f32.xlu1 %v948_v24 }
 0x287   : > { %v900_v25 = vpop.f32.mrf.mxu3 }
 0x288   : > { %v945_v26 = vsel %vm865_vm15, %v900_v25, -inf }
 0x289   : > { %v921_v27 = vpop.f32.mrf.mxu0  ;;  %v938_v28 = vpop.f32.mrf.mxu1  ;;  %946 = vmax.xlane.f32.xlu0 %v945_v26 }
 0x28a   : > { %v951_v19 = vsel %vm865_vm15, %v938_v28, -inf }
 0x28f   : > { %v902_v20 = vpop.f32.mrf.mxu3 }
 0x291   : > { %v940_v33 = vpop.f32.mrf.mxu1  ;;  %1127 = vrot.lane.b32.xlu2 %v4791_v32, %s4481_s28 }
 0x2ba   : > { %952 = vmax.xlane.f32.xlu2 %v951_v19 }
 0x2d2   : > { %1151 = vrot.lane.b32.xlu2 %v4796_v35, %s4481_s28 }
 0x2ec   : > { %v944_v29 = vpop.xlane.xlu2 %943 }
 0x2ed   : > { %v954_v30 = vsub.f32 %v881_v18, %v944_v29 }
 0x2ef   : > { %v958_v36 = vmul.f32 1.442695, %v954_v30 }
 0x2f1   : > { %4031 = vpow2.f32 %v958_v36 }
 0x2f4   : > { %v1128_v37 = vpop.permute.xlu2 %1127 }
 0x2f5   : > { %v1133_v38 = vsel %vm865_vm15, %v1128_v37, 0 }
 0x2f6   : > { %1142 = vmatpush.bf16.xpose.msra.mxu2 %v1133_v38  ;;  %v950_v51 = vpop.xlane.xlu1 %949 }
 0x2f7   : > { %v4801_v40 = vpop.eup %4031  ;;  %v956_v53 = vsub.f32 %v919_v23, %v950_v51 }
 0x2f8   : > { %v966_v41 = vsel %vm865_vm15, %v4801_v40, 0.0 }
 0x2f9   : > { %967 = vadd.xlane.f32.xlu0 %v966_v41  ;;  %v962_v57 = vmul.f32 1.442695, %v956_v53 }
 0x2fc   : > { %v947_v42 = vpop.xlane.xlu0 %946 }
 0x2fd   : > { %v955_v43 = vsub.f32 %v900_v25, %v947_v42 }
 0x2ff   : > { %v960_v44 = vmul.f32 1.442695, %v955_v43 }
 0x301   : > { %4033 = vpow2.f32 %v960_v44 }
 0x302   : > { %4035 = vpow2.f32 %v962_v57 }
 0x307   : > { %v4805_v45 = vpop.eup %4033 }
 0x308   : > { %v969_v47 = vsel %vm865_vm15, %v4805_v45, 0.0  ;;  %v4829_v63 = vpop.eup %4035 }
 0x309   : > { %970 = vadd.xlane.f32.xlu1 %v969_v47  ;;  %v972_v1 = vsel %vm865_vm15, %v4829_v63, 0.0 }
 0x30d   : > { %1156 = vrot.lane.b32.xlu0 %v4810_v48, %s4481_s28 }
 0x322   : > { %1122 = vrot.lane.b32.xlu1 %v4815_v50, %s4481_s28 }
 0x32a   : > { %1185 = vrot.lane.b32.xlu1 %v4820_v56, %s4481_s28 }
 0x32d   : > { %v953_v59 = vpop.xlane.xlu2 %952 }
 0x32e   : > { %v957_v55 = vsub.f32 %v938_v28, %v953_v59 }
 0x330   : > { %v964_v60 = vmul.f32 1.442695, %v957_v55 }
 0x332   : > { %4037 = vpow2.f32 %v964_v60  ;;  %1214 = vrot.lane.b32.xlu1 %v4825_v61, %s4481_s28 }
 0x335   : > { %v1152_v44 = vpop.permute.xlu2 %1151 }
 0x337   : > { %973 = vadd.xlane.f32.xlu0 %v972_v1 }
 0x338   : > { %v4834_v2 = vpop.eup %4037 }
 0x339   : > { %v975_v4 = vsel %vm865_vm15, %v4834_v2, 0.0 }
 0x33a   : > { %976 = vadd.xlane.f32.xlu2 %v975_v4  ;;  %1180 = vrot.lane.b32.xlu1 %v4836_v3, %s4481_s28 }
 0x342   : > { %1209 = vrot.lane.b32.xlu1 %v4843_v6, %s4481_s28 }
 0x352   : > { %1338 = vrot.lane.b32.xlu2 %v4848_v8, %s4481_s28 }
 0x36c   : > { %v968_v10 = vpop.xlane.xlu0 %967 }
 0x36d   : > { %4039 = vrcp.f32 %v968_v10  ;;  %v989_v16 = vand.u32 2147483648, %v968_v10  ;;  %v987_v17 = vand.u32 2147483647, %v968_v10  ;;  %vm983_vm2 = vweird.f32 %v968_v10 }
 0x36f   : > { %v990_v21 = vor.u32 1.1754944e-38, %v989_v16  ;;  %vm988_vm4 = vcmp.eq.f32.partialorder %v987_v17, 8.507059e+37 }
 0x373   : > { %v4040_v11 = vpop.eup %4039 }
 0x374   : > { %v979_v12 = vmul.f32 %v4040_v11, %v968_v10  ;;  %vm984_vm1 = vweird.f32 %v4040_v11 }
 0x375   : > { %vm985_vm3 = vmor %vm983_vm2, %vm984_vm1 }
 0x376   : > { %v980_v13 = vsub.f32 1.0, %v979_v12 }
 0x378   : > { %v981_v15 = vmul.f32 %v4040_v11, %v980_v13 }
 0x37a   : > { %v982_v18 = vadd.f32 %v4040_v11, %v981_v15 }
 0x37c   : > { %v971_v22 = vpop.xlane.xlu1 %970  ;;  %v986_v39 = vsel %vm985_vm3, %v4040_v11, %v982_v18 }
 0x37d   : > { %4041 = vrcp.f32 %v971_v22  ;;  %v991_v23 = vsel %vm988_vm4, %v990_v21, %v986_v39  ;;  %v1003_v33 = vand.u32 2147483648, %v971_v22  ;;  %v1001_v34 = vand.u32 2147483647, %v971_v22 }
 0x37e   : > { %v1034_v25 = vmul.f32 %v4801_v40, %v991_v23  ;;  %vm997_vm6 = vweird.f32 %v971_v22 }
 0x37f   : > { %v1157_v24 = vpop.permute.xlu0 %1156  ;;  %v1004_v30 = vor.u32 1.1754944e-38, %v1003_v33  ;;  %vm1002_vm8 = vcmp.eq.f32.partialorder %v1001_v34, 8.507059e+37 }
 0x380   : > { %v1162_v26 = vsel %vm865_vm15, %v1157_v24, 0  ;;  %v1038_v27 = vpack.c.bf16 %v1034_v25, %v1034_v25 }
 0x381   : > { %1171 = vmatpush.bf16.xpose.msrb.mxu3 %v1162_v26 }
 0x382   : > { %3650 = vmatmul.msk.bf16.vlgmr.msrb.gmra.mxu2 %vm865_vm15, %v1038_v27 }
 0x383   : > { %v4042_v28 = vpop.eup %4041 }
 0x384   : > { %v993_v31 = vmul.f32 %v4042_v28, %v971_v22  ;;  %vm998_vm5 = vweird.f32 %v4042_v28 }
 0x385   : > { %vm999_vm7 = vmor %vm997_vm6, %vm998_vm5 }
 0x386   : > { %v994_v20 = vsub.f32 1.0, %v993_v31 }
 0x388   : > { %v995_v19 = vmul.f32 %v4042_v28, %v994_v20 }
 0x38a   : > { %v996_v29 = vadd.f32 %v4042_v28, %v995_v19 }
 0x38c   : > { %v1000_v36 = vsel %vm999_vm7, %v4042_v28, %v996_v29 }
 0x38d   : > { %v1005_v37 = vsel %vm1002_vm8, %v1004_v30, %v1000_v36  ;;  %v1384_v36 = vunpack.c.l.b16 %v4763_v62 }
 0x38e   : > { %v1035_v38 = vmul.f32 %v4805_v45, %v1005_v37 }
 0x390   : > { %v1039_v40 = vpack.c.bf16 %v1035_v38, %v1035_v38 }
 0x392   : > { %3651 = vmatmul.msk.bf16.vlgmr.msra.gmra.mxu3 %vm865_vm15, %v1039_v40  ;;  %v4884_v40 = vpack.c.b16 %v1384_v36, %v1384_v36 }
 0x394   : > { %v1123_v41 = vpop.permute.xlu1 %1122 }
 0x395   : > { %3654 = vmatmul.msk.bf16.vlgmr.msra.gmra.mxu2 %vm865_vm15, %v1123_v41 }
 0x39c   : > { %v1186_v42 = vpop.permute.xlu1 %1185 }
 0x39d   : > { %v1191_v43 = vsel %vm865_vm15, %v1186_v42, 0 }
 0x39e   : > { %1200 = vmatpush.bf16.xpose.msrb.mxu0 %v1191_v43 }
 0x3a2   : > { %3655 = vmatmul.msk.bf16.vlgmr.msrb.gmra.mxu3 %vm865_vm15, %v1152_v44 }
 0x3a4   : > { %v1215_v46 = vpop.permute.xlu1 %1214 }
 0x3a5   : > { %v1220_v47 = vsel %vm865_vm15, %v1215_v46, 0 }
 0x3a6   : > { %1229 = vmatpush.bf16.xpose.msra.mxu1 %v1220_v47 }
 0x3aa   : > { %v974_v49 = vpop.xlane.xlu0 %973 }
 0x3ab   : > { %4043 = vrcp.f32 %v974_v49  ;;  %v1017_v58 = vand.u32 2147483648, %v974_v49  ;;  %v1015_v0 = vand.u32 2147483647, %v974_v49  ;;  %vm1011_vm10 = vweird.f32 %v974_v49 }
 0x3ac   : > { %v1181_v25 = vpop.permute.xlu1 %1180 }
 0x3ad   : > { %v977_v45 = vpop.xlane.xlu2 %976  ;;  %v1018_v10 = vor.u32 1.1754944e-38, %v1017_v58  ;;  %vm1016_vm13 = vcmp.eq.f32.partialorder %v1015_v0, 8.507059e+37 }
 0x3ae   : > { %4045 = vrcp.f32 %v977_v45  ;;  %v1031_v7 = vand.u32 2147483648, %v977_v45  ;;  %v1029_v12 = vand.u32 2147483647, %v977_v45  ;;  %vm1025_vm1 = vweird.f32 %v977_v45 }
 0x3b0   : > { %v1032_v18 = vor.u32 1.1754944e-38, %v1031_v7  ;;  %vm1030_vm3 = vcmp.eq.f32.partialorder %v1029_v12, 8.507059e+37 }
 0x3b1   : > { %v4044_v51 = vpop.eup %4043 }
 0x3b2   : > { %v1007_v52 = vmul.f32 %v4044_v51, %v974_v49  ;;  %vm1012_vm9 = vweird.f32 %v4044_v51 }
 0x3b3   : > { %vm1013_vm11 = vmor %vm1011_vm10, %vm1012_vm9 }
 0x3b4   : > { %v4046_v53 = vpop.eup %4045  ;;  %v1008_v57 = vsub.f32 1.0, %v1007_v52  ;;  %v1210_v26 = vpop.permute.xlu1 %1209 }
 0x3b5   : > { %v1021_v59 = vmul.f32 %v4046_v53, %v977_v45  ;;  %v1339_v55 = vpop.permute.xlu2 %1338  ;;  %vm1026_vm12 = vweird.f32 %v4046_v53 }
 0x3b6   : > { %v1009_v60 = vmul.f32 %v4044_v51, %v1008_v57  ;;  %v1344_v1 = vsel %vm1045_vm14, %v1339_v55, 0  ;;  %vm1027_vm2 = vmor %vm1025_vm1, %vm1026_vm12 }
 0x3b7   : > { %v1022_v4 = vsub.f32 1.0, %v1021_v59  ;;  %1353 = vmatpush.bf16.msrb.mxu2 %v1344_v1 }
 0x3b8   : > { %v1010_v5 = vadd.f32 %v4044_v51, %v1009_v60 }
 0x3b9   : > { %v1023_v11 = vmul.f32 %v4046_v53, %v1022_v4 }
 0x3ba   : > { %v1014_v13 = vsel %vm1013_vm11, %v4044_v51, %v1010_v5 }
 0x3bb   : > { %v1019_v15 = vsel %vm1016_vm13, %v1018_v10, %v1014_v13  ;;  %v1024_v16 = vadd.f32 %v4046_v53, %v1023_v11 }
 0x3bc   : > { %v1036_v17 = vmul.f32 %v4829_v63, %v1019_v15 }
 0x3bd   : > { %v1028_v21 = vsel %vm1027_vm2, %v4046_v53, %v1024_v16 }
 0x3be   : > { %v1033_v22 = vsel %vm1030_vm3, %v1032_v18, %v1028_v21  ;;  %v1040_v39 = vpack.c.bf16 %v1036_v17, %v1036_v17  ;;  %v1360_v21 = vunpack.c.l.b16 %v4751_v54 }
 0x3bf   : > { %v1037_v23 = vmul.f32 %v4834_v2, %v1033_v22 }
 0x3c0   : > { %3652 = vmatmul.msk.bf16.vlgmr.msra.gmra.mxu0 %vm865_vm15, %v1040_v39  ;;  %v4911_v22 = vpack.c.b16 %v1360_v21, %v1360_v21 }
 0x3c1   : > { %v1041_v24 = vpack.c.bf16 %v1037_v23, %v1037_v23 }
 0x3c3   : > { %3653 = vmatmul.msk.bf16.vlgmr.msrb.gmra.mxu1 %vm865_vm15, %v1041_v24 }
 0x3d0   : > { %3656 = vmatmul.msk.bf16.vlgmr.msrb.gmra.mxu0 %vm865_vm15, %v1181_v25 }
 0x3d3   : > { %3657 = vmatmul.msk.bf16.vlgmr.msra.gmra.mxu1 %vm865_vm15, %v1210_v26 }
 0x405   : > { %v4868_v63 = vpop.f32.mrf.mxu2 }
 0x40d   : > { %v1060_v27 = vpop.f32.mrf.mxu2 }
 0x415   : > { %v4870_v28 = vpop.f32.mrf.mxu3 }
 0x418   : > { %v1144_v31 = vpop.f32.mrf.mxu2 }
 0x419   : > { %v1235_v20 = vsel %vm865_vm15, %v1144_v31, -inf }
 0x41a   : > { %1236 = vmax.xlane.f32.xlu1 %v1235_v20 }
 0x41d   : > { %v1079_v2 = vpop.f32.mrf.mxu3 }
 0x420   : > { %v1146_v33 = vpop.f32.mrf.mxu2 }
 0x425   : > { %v1173_v19 = vpop.f32.mrf.mxu3 }
 0x426   : > { %v1238_v47 = vsel %vm865_vm15, %v1173_v19, -inf }
 0x42d   : > { %v1175_v34 = vpop.f32.mrf.mxu3 }
 0x433   : > { %1433 = vrot.lane.b32.xlu1 %v4791_v32, %s4482_s6 }
 0x43b   : > { %1431 = vrot.lane.b32.xlu1 %v4815_v50, %s4482_s6 }
 0x43d   : > { %v4877_v29 = vpop.f32.mrf.mxu0 }
 0x440   : > { %v4879_v30 = vpop.f32.mrf.mxu1 }
 0x443   : > { %1454 = vrot.lane.b32.xlu1 %v4796_v35, %s4482_s6 }
 0x445   : > { %v1098_v37 = vpop.f32.mrf.mxu0 }
 0x448   : > { %v1117_v38 = vpop.f32.mrf.mxu1 }
 0x44b   : > { %1386 = vrot.lane.b32.xlu1 %v4884_v40, %s4481_s28 }
 0x44d   : > { %v1202_v41 = vpop.f32.mrf.mxu0 }
 0x44e   : > { %v1241_v42 = vsel %vm865_vm15, %v1202_v41, -inf }
 0x44f   : > { %1242 = vmax.xlane.f32.xlu2 %v1241_v42 }
 0x450   : > { %v1231_v43 = vpop.f32.mrf.mxu1 }
 0x451   : > { %v1244_v44 = vsel %vm865_vm15, %v1231_v43, -inf }
 0x452   : > { %1245 = vmax.xlane.f32.xlu0 %v1244_v44 }
 0x453   : > { %1479 = vrot.lane.b32.xlu1 %v4820_v56, %s4482_s6 }
 0x455   : > { %v1204_v46 = vpop.f32.mrf.mxu0 }
 0x458   : > { %v1233_v62 = vpop.f32.mrf.mxu1 }
 0x45a   : > { %1239 = vmax.xlane.f32.xlu0 %v1238_v47 }
 0x45b   : > { %1477 = vrot.lane.b32.xlu1 %v4836_v3, %s4482_s6 }
 0x463   : > { %1500 = vrot.lane.b32.xlu1 %v4843_v6, %s4482_s6 }
 0x48d   : > { %v1237_v49 = vpop.xlane.xlu1 %1236 }
 0x48e   : > { %v1247_v45 = vsub.f32 %v1144_v31, %v1237_v49 }
 0x490   : > { %v1251_v51 = vmul.f32 1.442695, %v1247_v45 }
 0x492   : > { %4047 = vpow2.f32 %v1251_v51 }
 0x498   : > { %v4048_v52 = vpop.eup %4047 }
 0x499   : > { %v1259_v53 = vsel %vm865_vm15, %v4048_v52, 0.0 }
 0x49a   : > { %1260 = vadd.xlane.f32.xlu2 %v1259_v53 }
 0x4a5   : > { %v1434_v57 = vpop.permute.xlu1 %1433 }
 0x4a6   : > { %v1439_v58 = vsel %vm865_vm15, %v1434_v57, 0 }
 0x4a7   : > { %1448 = vmatpush.bf16.xpose.msra.mxu2 %v1439_v58 }
 0x4ad   : > { %v1432_v59 = vpop.permute.xlu1 %1431 }
 0x4b2   : > { %1456 = vrot.lane.b32.xlu2 %v4810_v48, %s4482_s6 }
 0x4b5   : > { %v4901_v55 = vpop.permute.xlu1 %1454 }
 0x4bd   : > { %v1387_v60 = vpop.permute.xlu1 %1386 }
 0x4be   : > { %v1392_v0 = vsel %vm1045_vm14, %v1387_v60, 0 }
 0x4bf   : > { %1401 = vmatpush.bf16.msra.mxu0 %v1392_v0 }
 0x4c2   : > { %v1243_v39 = vpop.xlane.xlu2 %1242 }
 0x4c3   : > { %v1249_v23 = vsub.f32 %v1202_v41, %v1243_v39 }
 0x4c5   : > { %v1480_v1 = vpop.permute.xlu1 %1479  ;;  %v1246_v4 = vpop.xlane.xlu0 %1245  ;;  %v1255_v24 = vmul.f32 1.442695, %v1249_v23 }
 0x4c6   : > { %v1485_v5 = vsel %vm865_vm15, %v1480_v1, 0  ;;  %v1250_v7 = vsub.f32 %v1231_v43, %v1246_v4  ;;  %v1408_v43 = vunpack.c.l.b16 %v4771_v9 }
 0x4c7   : > { %1494 = vmatpush.bf16.xpose.msrb.mxu0 %v1485_v5 }
 0x4c8   : > { %v1257_v10 = vmul.f32 1.442695, %v1250_v7  ;;  %v4923_v44 = vpack.c.b16 %v1408_v43, %v1408_v43 }
 0x4ca   : > { %4049 = vpow2.f32 %v1257_v10 }
 0x4cd   : > { %v1240_v11 = vpop.xlane.xlu0 %1239 }
 0x4ce   : > { %v1248_v12 = vsub.f32 %v1173_v19, %v1240_v11 }
 0x4d0   : > { %v1253_v13 = vmul.f32 1.442695, %v1248_v12  ;;  %v4905_v15 = vpop.eup %4049 }
 0x4d1   : > { %v1268_v18 = vsel %vm865_vm15, %v4905_v15, 0.0 }
 0x4d2   : > { %4051 = vpow2.f32 %v1253_v13 }
 0x4d3   : > { %4053 = vpow2.f32 %v1255_v24 }
 0x4d8   : > { %v4052_v16 = vpop.eup %4051 }
 0x4d9   : > { %v1262_v17 = vsel %vm865_vm15, %v4052_v16, 0.0  ;;  %v4917_v26 = vpop.eup %4053 }
 0x4da   : > { %1263 = vadd.xlane.f32.xlu0 %v1262_v17  ;;  %v1265_v54 = vsel %vm865_vm15, %v4917_v26, 0.0 }
 0x4db   : > { %1269 = vadd.xlane.f32.xlu2 %v1268_v18 }
 0x4ee   : > { %1362 = vrot.lane.b32.xlu0 %v4911_v22, %s4481_s28 }
 0x4f3   : > { %1502 = vrot.lane.b32.xlu2 %v4825_v61, %s4482_s6 }
 0x50d   : > { %v1261_v25 = vpop.xlane.xlu2 %1260 }
 0x50e   : > { %4055 = vrcp.f32 %v1261_v25  ;;  %v1282_v2 = vand.u32 2147483648, %v1261_v25  ;;  %v1280_v19 = vand.u32 2147483647, %v1261_v25  ;;  %vm1276_vm5 = vweird.f32 %v1261_v25 }
 0x510   : > { %v1283_v36 = vor.u32 1.1754944e-38, %v1282_v2  ;;  %vm1281_vm7 = vcmp.eq.f32.partialorder %v1280_v19, 8.507059e+37 }
 0x514   : > { %v4056_v27 = vpop.eup %4055 }
 0x515   : > { %v1272_v31 = vmul.f32 %v4056_v27, %v1261_v25  ;;  %vm1277_vm4 = vweird.f32 %v4056_v27  ;;  %v1457_v60 = vpop.permute.xlu2 %1456 }
 0x516   : > { %vm1278_vm6 = vmor %vm1276_vm5, %vm1277_vm4  ;;  %v1462_v4 = vsel %vm865_vm15, %v1457_v60, 0 }
 0x517   : > { %v1273_v20 = vsub.f32 1.0, %v1272_v31 }
 0x518   : > { %1266 = vadd.xlane.f32.xlu0 %v1265_v54 }
 0x519   : > { %v1274_v33 = vmul.f32 %v4056_v27, %v1273_v20 }
 0x51b   : > { %v1275_v34 = vadd.f32 %v4056_v27, %v1274_v33 }
 0x51d   : > { %v1279_v37 = vsel %vm1278_vm6, %v4056_v27, %v1275_v34 }
 0x51e   : > { %v1284_v38 = vsel %vm1281_vm7, %v1283_v36, %v1279_v37 }
 0x51f   : > { %v1327_v41 = vmul.f32 %v4048_v52, %v1284_v38 }
 0x521   : > { %v1331_v42 = vpack.c.bf16 %v1327_v41, %v1327_v41 }
 0x523   : > { %3658 = vmatmul.msk.bf16.vlgmr.msrb.gmra.mxu2 %vm865_vm15, %v1331_v42 }
 0x52c   : > { %1410 = vrot.lane.b32.xlu0 %v4923_v44, %s4481_s28 }
 0x533   : > { %3662 = vmatmul.msk.bf16.vlgmr.msra.gmra.mxu2 %vm865_vm15, %v1432_v59 }
 0x54d   : > { %v1264_v46 = vpop.xlane.xlu0 %1263 }
 0x54e   : > { %4057 = vrcp.f32 %v1264_v46  ;;  %v1296_v45 = vand.u32 2147483648, %v1264_v46  ;;  %v1294_v52 = vand.u32 2147483647, %v1264_v46  ;;  %vm1290_vm9 = vweird.f32 %v1264_v46  ;;  %v1270_v7 = vpop.xlane.xlu2 %1269 }
 0x54f   : > { %4059 = vrcp.f32 %v1270_v7  ;;  %v1324_v39 = vand.u32 2147483648, %v1270_v7  ;;  %vm1318_vm13 = vweird.f32 %v1270_v7  ;;  %v1322_v23 = vand.u32 2147483647, %v1270_v7 }
 0x550   : > { %v1297_v9 = vor.u32 1.1754944e-38, %v1296_v45  ;;  %vm1295_vm11 = vcmp.eq.f32.partialorder %v1294_v52, 8.507059e+37 }
 0x551   : > { %v1325_v20 = vor.u32 1.1754944e-38, %v1324_v39  ;;  %vm1323_vm3 = vcmp.eq.f32.partialorder %v1322_v23, 8.507059e+37 }
 0x554   : > { %v4058_v62 = vpop.eup %4057 }
 0x555   : > { %v1286_v47 = vmul.f32 %v4058_v62, %v1264_v46  ;;  %vm1291_vm8 = vweird.f32 %v4058_v62  ;;  %v4060_v10 = vpop.eup %4059 }
 0x556   : > { %vm1292_vm10 = vmor %vm1290_vm9, %vm1291_vm8  ;;  %v1314_v11 = vmul.f32 %v4060_v10, %v1270_v7  ;;  %vm1319_vm12 = vweird.f32 %v4060_v10  ;;  %v1503_v37 = vpop.permute.xlu2 %1502 }
 0x557   : > { %v1287_v49 = vsub.f32 1.0, %v1286_v47  ;;  %vm1320_vm1 = vmor %vm1318_vm13, %vm1319_vm12  ;;  %v1508_v46 = vsel %vm865_vm15, %v1503_v37, 0 }
 0x558   : > { %v1315_v12 = vsub.f32 1.0, %v1314_v11 }
 0x559   : > { %v1288_v51 = vmul.f32 %v4058_v62, %v1287_v49  ;;  %v1478_v49 = vpop.permute.xlu1 %1477 }
 0x55b   : > { %v1289_v53 = vadd.f32 %v4058_v62, %v1288_v51 }
 0x55d   : > { %v1293_v57 = vsel %vm1292_vm10, %v4058_v62, %v1289_v53 }
 0x55e   : > { %v1298_v58 = vsel %vm1295_vm11, %v1297_v9, %v1293_v57 }
 0x55f   : > { %v1328_v0 = vmul.f32 %v4052_v16, %v1298_v58  ;;  %v1316_v16 = vmul.f32 %v4060_v10, %v1315_v12 }
 0x560   : > { %v1363_v1 = vpop.permute.xlu0 %1362 }
 0x561   : > { %v1368_v59 = vsel %vm1045_vm14, %v1363_v1, 0  ;;  %v1332_v5 = vpack.c.bf16 %v1328_v0, %v1328_v0  ;;  %v1317_v18 = vadd.f32 %v4060_v10, %v1316_v16 }
 0x562   : > { %1377 = vmatpush.bf16.msra.mxu3 %v1368_v59 }
 0x563   : > { %v1321_v27 = vsel %vm1320_vm1, %v4060_v10, %v1317_v18 }
 0x564   : > { %v1326_v2 = vsel %vm1323_vm3, %v1325_v20, %v1321_v27 }
 0x565   : > { %3659 = vmatmul.msk.bf16.vlgmr.msra.gmra.mxu3 %vm865_vm15, %v1332_v5  ;;  %v1330_v36 = vmul.f32 %v4905_v15, %v1326_v2 }
 0x566   : > { %1471 = vmatpush.bf16.xpose.msrb.mxu3 %v1462_v4 }
 0x567   : > { %v1334_v62 = vpack.c.bf16 %v1330_v36, %v1330_v36 }
 0x575   : > { %3663 = vmatmul.msk.bf16.vlgmr.msrb.gmra.mxu3 %vm865_vm15, %v4901_v55 }
 0x58b   : > { %v1267_v13 = vpop.xlane.xlu0 %1266 }
 0x58c   : > { %4061 = vrcp.f32 %v1267_v13  ;;  %v1310_v25 = vand.u32 2147483648, %v1267_v13  ;;  %v1308_v31 = vand.u32 2147483647, %v1267_v13  ;;  %vm1304_vm4 = vweird.f32 %v1267_v13 }
 0x58e   : > { %v1311_v33 = vor.u32 1.1754944e-38, %v1310_v25  ;;  %vm1309_vm6 = vcmp.eq.f32.partialorder %v1308_v31, 8.507059e+37 }
 0x592   : > { %v4062_v17 = vpop.eup %4061 }
 0x593   : > { %v1300_v21 = vmul.f32 %v4062_v17, %v1267_v13  ;;  %vm1305_vm2 = vweird.f32 %v4062_v17 }
 0x594   : > { %vm1306_vm5 = vmor %vm1304_vm4, %vm1305_vm2 }
 0x595   : > { %v1301_v24 = vsub.f32 1.0, %v1300_v21 }
 0x597   : > { %v1302_v55 = vmul.f32 %v4062_v17, %v1301_v24 }
 0x599   : > { %v1303_v54 = vadd.f32 %v4062_v17, %v1302_v55 }
 0x59b   : > { %v1307_v19 = vsel %vm1306_vm5, %v4062_v17, %v1303_v54 }
 0x59c   : > { %v1312_v34 = vsel %vm1309_vm6, %v1311_v33, %v1307_v19 }
 0x59d   : > { %v1329_v38 = vmul.f32 %v4917_v26, %v1312_v34  ;;  %v1501_v26 = vpop.permute.xlu1 %1500 }
 0x59e   : > { %v1411_v41 = vpop.permute.xlu0 %1410 }
 0x59f   : > { %v1416_v42 = vsel %vm1045_vm14, %v1411_v41, 0  ;;  %v1333_v43 = vpack.c.bf16 %v1329_v38, %v1329_v38 }
 0x5a0   : > { %1425 = vmatpush.bf16.msrb.mxu1 %v1416_v42 }
 0x5a1   : > { %3660 = vmatmul.msk.bf16.vlgmr.msra.gmra.mxu0 %vm865_vm15, %v1333_v43 }
 0x5a3   : > { %3661 = vmatmul.msk.bf16.vlgmr.msrb.gmra.mxu1 %vm865_vm15, %v1334_v62 }
 0x5a4   : > { %1517 = vmatpush.bf16.xpose.msra.mxu1 %v1508_v46 }
 0x5a6   : > { %v4939_v47 = vpop.f32.mrf.mxu2 }
 0x5ae   : > { %v1357_v15 = vpop.f32.mrf.mxu2 }
 0x5b1   : > { %3664 = vmatmul.msk.bf16.vlgmr.msrb.gmra.mxu0 %vm865_vm15, %v1478_v49 }
 0x5b3   : > { %3665 = vmatmul.msk.bf16.vlgmr.msra.gmra.mxu1 %vm865_vm15, %v1501_v26 }
 0x5b6   : > { %v1450_v45 = vpop.f32.mrf.mxu2 }
 0x5b7   : > { %v1523_v51 = vsel %vm865_vm15, %v1450_v45, -inf }
 0x5b8   : > { %1524 = vmax.xlane.f32.xlu0 %v1523_v51 }
 0x5be   : > { %v1452_v52 = vpop.f32.mrf.mxu2 }
 0x5e8   : > { %v4944_v53 = vpop.f32.mrf.mxu3 }
 0x5e9   : > { %v3945_v9 = vpack.i.bf16 %v4944_v53, %v4939_v47 }
 0x5f0   : > { %v1381_v57 = vpop.f32.mrf.mxu3 }
 0x5f8   : > { %v1473_v58 = vpop.f32.mrf.mxu3 }
 0x5f9   : > { %v1526_v60 = vsel %vm865_vm15, %v1473_v58, -inf }
 0x5fa   : > { %1527 = vmax.xlane.f32.xlu1 %v1526_v60 }
 0x600   : > { %v1475_v0 = vpop.f32.mrf.mxu3 }
 0x613   : > { %1644 = vrot.lane.b32.xlu1 %v4911_v22, %s4482_s6 }
 0x61e   : > { %v4951_v1 = vpop.f32.mrf.mxu0 }
 0x620   : > { %v4953_v59 = vpop.f32.mrf.mxu1 }
 0x621   : > { %v3960_v4 = vpack.i.bf16 %v4953_v59, %v4951_v1 }
 0x626   : > { %v1405_v5 = vpop.f32.mrf.mxu0 }
 0x628   : > { %v1429_v7 = vpop.f32.mrf.mxu1 }
 0x62b   : > { %v1525_v10 = vpop.xlane.xlu0 %1524 }
 0x62c   : > { %v1535_v11 = vsub.f32 %v1450_v45, %v1525_v10 }
 0x62e   : > { %v1496_v12 = vpop.f32.mrf.mxu0  ;;  %v1539_v13 = vmul.f32 1.442695, %v1535_v11 }
 0x62f   : > { %v1529_v16 = vsel %vm865_vm15, %v1496_v12, -inf }
 0x630   : > { %1530 = vmax.xlane.f32.xlu2 %v1529_v16  ;;  %v1519_v17 = vpop.f32.mrf.mxu1  ;;  %4063 = vpow2.f32 %v1539_v13 }
 0x631   : > { %v1532_v18 = vsel %vm865_vm15, %v1519_v17, -inf }
 0x632   : > { %1533 = vmax.xlane.f32.xlu0 %v1532_v18 }
 0x636   : > { %v1498_v21 = vpop.f32.mrf.mxu0  ;;  %v4064_v23 = vpop.eup %4063 }
 0x637   : > { %v1547_v24 = vsel %vm865_vm15, %v4064_v23, 0.0 }
 0x638   : > { %v1521_v39 = vpop.f32.mrf.mxu1 }
 0x63d   : > { %1548 = vadd.xlane.f32.xlu1 %v1547_v24 }
 0x648   : > { %1623 = vrot.lane.b32.xlu2 %v4848_v8, %s4482_s6 }
 0x650   : > { %1732 = vrot.lane.b32.xlu2 %v4810_v48, %s4483_s24 }
 0x656   : > { %1707 = vrot.lane.b32.xlu1 %v4815_v50, %s4483_s24 }
 0x658   : > { %1730 = vrot.lane.b32.xlu2 %v4796_v35, %s4483_s24 }
 0x65e   : > { %1665 = vrot.lane.b32.xlu1 %v4884_v40, %s4482_s6 }
 0x660   : > { %1686 = vrot.lane.b32.xlu2 %v4923_v44, %s4482_s6 }
 0x666   : > { %1778 = vrot.lane.b32.xlu1 %v4825_v61, %s4483_s24 }
 0x668   : > { %1753 = vrot.lane.b32.xlu2 %v4836_v3, %s4483_s24 }
 0x66d   : > { %v1528_v25 = vpop.xlane.xlu1 %1527 }
 0x66e   : > { %v1536_v19 = vsub.f32 %v1473_v58, %v1528_v25 }
 0x670   : > { %v1541_v36 = vmul.f32 1.442695, %v1536_v19 }
 0x685   : > { %v1645_v48 = vpop.permute.xlu1 %1644 }
 0x686   : > { %v1650_v27 = vsel %vm1045_vm14, %v1645_v48, 0 }
 0x687   : > { %1659 = vmatpush.bf16.msra.mxu3 %v1650_v27 }
 0x6a3   : > { %v1531_v50 = vpop.xlane.xlu2 %1530 }
 0x6a4   : > { %v1537_v55 = vsub.f32 %v1496_v12, %v1531_v50 }
 0x6a5   : > { %v1534_v35 = vpop.xlane.xlu0 %1533 }
 0x6a6   : > { %v1543_v31 = vmul.f32 1.442695, %v1537_v55  ;;  %v1538_v20 = vsub.f32 %v1519_v17, %v1534_v35 }
 0x6a8   : > { %4065 = vpow2.f32 %v1543_v31  ;;  %v1545_v54 = vmul.f32 1.442695, %v1538_v20 }
 0x6aa   : > { %4067 = vpow2.f32 %v1545_v54 }
 0x6ab   : > { %v1624_v2 = vpop.permute.xlu2 %1623 }
 0x6ac   : > { %v1629_v33 = vsel %vm1045_vm14, %v1624_v2, 0 }
 0x6ad   : > { %1638 = vmatpush.bf16.msrb.mxu2 %v1629_v33 }
 0x6ae   : > { %v4978_v61 = vpop.eup %4065 }
 0x6af   : > { %v1553_v3 = vsel %vm865_vm15, %v4978_v61, 0.0 }
 0x6b0   : > { %1554 = vadd.xlane.f32.xlu0 %v1553_v3  ;;  %v1549_v34 = vpop.xlane.xlu1 %1548  ;;  %v4982_v38 = vpop.eup %4067 }
 0x6b1   : > { %4069 = vrcp.f32 %v1549_v34  ;;  %v1556_v43 = vsel %vm865_vm15, %v4982_v38, 0.0  ;;  %v1570_v49 = vand.u32 2147483648, %v1549_v34  ;;  %v1568_v51 = vand.u32 2147483647, %v1549_v34 }
 0x6b2   : > { %4071 = vpow2.f32 %v1541_v36  ;;  %vm1564_vm8 = vweird.f32 %v1549_v34 }
 0x6b3   : > { %v1733_v37 = vpop.permute.xlu2 %1732  ;;  %v1571_v57 = vor.u32 1.1754944e-38, %v1570_v49  ;;  %vm1569_vm10 = vcmp.eq.f32.partialorder %v1568_v51, 8.507059e+37 }
 0x6b4   : > { %v1738_v41 = vsel %vm865_vm15, %v1733_v37, 0 }
 0x6b5   : > { %1747 = vmatpush.bf16.xpose.msrb.mxu3 %v1738_v41 }
 0x6b7   : > { %v4070_v42 = vpop.eup %4069 }
 0x6b8   : > { %v1560_v46 = vmul.f32 %v4070_v42, %v1549_v34  ;;  %1557 = vadd.xlane.f32.xlu0 %v1556_v43  ;;  %v4989_v26 = vpop.eup %4071  ;;  %vm1565_vm7 = vweird.f32 %v4070_v42 }
 0x6b9   : > { %vm1566_vm9 = vmor %vm1564_vm8, %vm1565_vm7  ;;  %v1550_v58 = vsel %vm865_vm15, %v4989_v26, 0.0 }
 0x6ba   : > { %v1561_v62 = vsub.f32 1.0, %v1560_v46 }
 0x6bb   : > { %v4987_v15 = vpop.permute.xlu2 %1730 }
 0x6bc   : > { %v1562_v45 = vmul.f32 %v4070_v42, %v1561_v62 }
 0x6be   : > { %v1563_v52 = vadd.f32 %v4070_v42, %v1562_v45 }
 0x6c0   : > { %v1567_v60 = vsel %vm1566_vm9, %v4070_v42, %v1563_v52  ;;  %1551 = vadd.xlane.f32.xlu0 %v1550_v58 }
 0x6c1   : > { %v1572_v0 = vsel %vm1569_vm10, %v1571_v57, %v1567_v60 }
 0x6c2   : > { %v1615_v5 = vmul.f32 %v4064_v23, %v1572_v0 }
 0x6c3   : > { %v1687_v7 = vpop.permute.xlu2 %1686 }
 0x6c4   : > { %v1692_v10 = vsel %vm1045_vm14, %v1687_v7, 0  ;;  %v1619_v11 = vpack.c.bf16 %v1615_v5, %v1615_v5 }
 0x6c5   : > { %1701 = vmatpush.bf16.msrb.mxu1 %v1692_v10 }
 0x6c6   : > { %3666 = vmatmul.msk.bf16.vlgmr.msrb.gmra.mxu2 %vm865_vm15, %v1619_v11 }
 0x6c8   : > { %v4995_v12 = vpop.permute.xlu1 %1707 }
 0x6d0   : > { %v1666_v13 = vpop.permute.xlu1 %1665 }
 0x6d1   : > { %v1671_v16 = vsel %vm1045_vm14, %v1666_v13, 0 }
 0x6d2   : > { %1680 = vmatpush.bf16.msra.mxu0 %v1671_v16 }
 0x6d4   : > { %1709 = vrot.lane.b32.xlu0 %v4791_v32, %s4483_s24 }
 0x6d8   : > { %v1779_v17 = vpop.permute.xlu1 %1778 }
 0x6d9   : > { %v1784_v18 = vsel %vm865_vm15, %v1779_v17, 0 }
 0x6da   : > { %1793 = vmatpush.bf16.xpose.msra.mxu1 %v1784_v18  ;;  %v1754_v18 = vpop.permute.xlu2 %1753 }
 0x6dc   : > { %1755 = vrot.lane.b32.xlu0 %v4820_v56, %s4483_s24 }
 0x6e4   : > { %1776 = vrot.lane.b32.xlu0 %v4843_v6, %s4483_s24 }
 0x723   : > { %v1555_v21 = vpop.xlane.xlu0 %1554 }
 0x724   : > { %4073 = vrcp.f32 %v1555_v21  ;;  %v1598_v48 = vand.u32 2147483648, %v1555_v21  ;;  %v1596_v32 = vand.u32 2147483647, %v1555_v21  ;;  %vm1592_vm12 = vweird.f32 %v1555_v21 }
 0x726   : > { %v1599_v35 = vor.u32 1.1754944e-38, %v1598_v48  ;;  %vm1597_vm1 = vcmp.eq.f32.partialorder %v1596_v32, 8.507059e+37 }
 0x72a   : > { %v4074_v39 = vpop.eup %4073 }
 0x72b   : > { %v1588_v23 = vmul.f32 %v4074_v39, %v1555_v21  ;;  %v1558_v24 = vpop.xlane.xlu0 %1557  ;;  %vm1593_vm11 = vweird.f32 %v4074_v39 }
 0x72c   : > { %4075 = vrcp.f32 %v1558_v24  ;;  %vm1594_vm13 = vmor %vm1592_vm12, %vm1593_vm11  ;;  %v1612_v33 = vand.u32 2147483648, %v1558_v24  ;;  %v1610_v3 = vand.u32 2147483647, %v1558_v24  ;;  %vm1606_vm3 = vweird.f32 %v1558_v24 }
 0x72d   : > { %v1589_v25 = vsub.f32 1.0, %v1588_v23 }
 0x72e   : > { %v1613_v41 = vor.u32 1.1754944e-38, %v1612_v33  ;;  %vm1611_vm5 = vcmp.eq.f32.partialorder %v1610_v3, 8.507059e+37 }
 0x72f   : > { %v1590_v27 = vmul.f32 %v4074_v39, %v1589_v25 }
 0x731   : > { %v1591_v50 = vadd.f32 %v4074_v39, %v1590_v27 }
 0x732   : > { %v4076_v55 = vpop.eup %4075 }
 0x733   : > { %v1595_v56 = vsel %vm1594_vm13, %v4074_v39, %v1591_v50  ;;  %v1602_v31 = vmul.f32 %v4076_v55, %v1558_v24  ;;  %v1552_v6 = vpop.xlane.xlu0 %1551  ;;  %vm1607_vm2 = vweird.f32 %v4076_v55 }
 0x734   : > { %v1600_v20 = vsel %vm1597_vm1, %v1599_v35, %v1595_v56  ;;  %4077 = vrcp.f32 %v1552_v6  ;;  %vm1608_vm4 = vmor %vm1606_vm3, %vm1607_vm2  ;;  %v1584_v49 = vand.u32 2147483648, %v1552_v6  ;;  %v1582_v51 = vand.u32 2147483647, %v1552_v6 }
 0x735   : > { %v1617_v54 = vmul.f32 %v4978_v61, %v1600_v20  ;;  %v1603_v2 = vsub.f32 1.0, %v1602_v31  ;;  %vm1578_vm7 = vweird.f32 %v1552_v6 }
 0x736   : > { %v1585_v58 = vor.u32 1.1754944e-38, %v1584_v49  ;;  %vm1583_vm9 = vcmp.eq.f32.partialorder %v1582_v51, 8.507059e+37 }
 0x737   : > { %v1604_v19 = vmul.f32 %v4076_v55, %v1603_v2  ;;  %v1621_v34 = vpack.c.bf16 %v1617_v54, %v1617_v54 }
 0x739   : > { %v1605_v36 = vadd.f32 %v4076_v55, %v1604_v19  ;;  %3668 = vmatmul.msk.bf16.vlgmr.msra.gmra.mxu0 %vm865_vm15, %v1621_v34 }
 0x73a   : > { %v4078_v37 = vpop.eup %4077 }
 0x73b   : > { %v1609_v42 = vsel %vm1608_vm4, %v4076_v55, %v1605_v36  ;;  %v1574_v43 = vmul.f32 %v4078_v37, %v1552_v6  ;;  %vm1579_vm6 = vweird.f32 %v4078_v37 }
 0x73c   : > { %v1614_v46 = vsel %vm1611_vm5, %v1613_v41, %v1609_v42  ;;  %vm1580_vm8 = vmor %vm1578_vm7, %vm1579_vm6 }
 0x73d   : > { %v1618_v62 = vmul.f32 %v4982_v38, %v1614_v46  ;;  %v1575_v61 = vsub.f32 1.0, %v1574_v43 }
 0x73f   : > { %v1576_v45 = vmul.f32 %v4078_v37, %v1575_v61  ;;  %v1622_v52 = vpack.c.bf16 %v1618_v62, %v1618_v62 }
 0x741   : > { %v1577_v57 = vadd.f32 %v4078_v37, %v1576_v45  ;;  %3669 = vmatmul.msk.bf16.vlgmr.msrb.gmra.mxu1 %vm865_vm15, %v1622_v52 }
 0x743   : > { %v1581_v60 = vsel %vm1580_vm8, %v4078_v37, %v1577_v57 }
 0x744   : > { %v1586_v0 = vsel %vm1583_vm9, %v1585_v58, %v1581_v60 }
 0x745   : > { %v1616_v5 = vmul.f32 %v4989_v26, %v1586_v0 }
 0x746   : > { %v1710_v7 = vpop.permute.xlu0 %1709 }
 0x747   : > { %v1715_v38 = vsel %vm865_vm15, %v1710_v7, 0  ;;  %v1620_v10 = vpack.c.bf16 %v1616_v5, %v1616_v5 }
 0x748   : > { %1724 = vmatpush.bf16.xpose.msra.mxu2 %v1715_v38 }
 0x749   : > { %v1640_v11 = vpop.f32.mrf.mxu2  ;;  %3667 = vmatmul.msk.bf16.vlgmr.msra.gmra.mxu3 %vm865_vm15, %v1620_v10 }
 0x74e   : > { %v1756_v13 = vpop.permute.xlu0 %1755 }
 0x74f   : > { %v1761_v16 = vsel %vm865_vm15, %v1756_v13, 0  ;;  %3670 = vmatmul.msk.bf16.vlgmr.msra.gmra.mxu2 %vm865_vm15, %v4995_v12 }
 0x750   : > { %1770 = vmatpush.bf16.xpose.msrb.mxu0 %v1761_v16 }
 0x751   : > { %v1642_v17 = vpop.f32.mrf.mxu2 }
 0x756   : > { %v1777_v21 = vpop.permute.xlu0 %1776 }
 0x757   : > { %3672 = vmatmul.msk.bf16.vlgmr.msrb.gmra.mxu0 %vm865_vm15, %v1754_v18  ;;  %3673 = vmatmul.msk.bf16.vlgmr.msra.gmra.mxu1 %vm865_vm15, %v1777_v21 }
 0x759   : > { %3671 = vmatmul.msk.bf16.vlgmr.msrb.gmra.mxu3 %vm865_vm15, %v4987_v15 }
 0x7b6   : > { %v5019_v26 = vpop.f32.mrf.mxu0 }
 0x7be   : > { %v1684_v39 = vpop.f32.mrf.mxu0  ;;  %v5021_v23 = vpop.f32.mrf.mxu1 }
 0x7bf   : > { %v3965_v24 = vpack.i.bf16 %v5021_v23, %v5019_v26 }
 0x7c6   : > { %v1705_v12 = vpop.f32.mrf.mxu1 }
 0x7cc   : > { %v1661_v25 = vpop.f32.mrf.mxu3 }
 0x7cd   : > { %v3950_v33 = vpack.i.bf16 %v1661_v25, %v1640_v11 }
 0x7d2   : > { %v1726_v48 = vpop.f32.mrf.mxu2 }
 0x7d3   : > { %v1799_v27 = vsel %vm865_vm15, %v1726_v48, -inf }
 0x7d4   : > { %1800 = vmax.xlane.f32.xlu1 %v1799_v27  ;;  %v1663_v32 = vpop.f32.mrf.mxu3  ;;  %v1772_v50 = vpop.f32.mrf.mxu0 }
 0x7d5   : > { %v1795_v55 = vpop.f32.mrf.mxu1  ;;  %v1805_v35 = vsel %vm865_vm15, %v1772_v50, -inf }
 0x7d6   : > { %1806 = vmax.xlane.f32.xlu0 %v1805_v35  ;;  %v1808_v56 = vsel %vm865_vm15, %v1795_v55, -inf }
 0x7da   : > { %v1728_v15 = vpop.f32.mrf.mxu2 }
 0x7dc   : > { %v1774_v31 = vpop.f32.mrf.mxu0  ;;  %1809 = vmax.xlane.f32.xlu1 %v1808_v56  ;;  %v1749_v6 = vpop.f32.mrf.mxu3 }
 0x7dd   : > { %v1797_v20 = vpop.f32.mrf.mxu1  ;;  %v1802_v54 = vsel %vm865_vm15, %v1749_v6, -inf }
 0x7de   : > { %1803 = vmax.xlane.f32.xlu2 %v1802_v54 }
 0x7e4   : > { %v1751_v2 = vpop.f32.mrf.mxu3 }
 0x7f5   : > { %1899 = vrot.lane.b32.xlu1 %v4848_v8, %s4483_s24 }
 0x7fd   : > { %1962 = vrot.lane.b32.xlu1 %v4923_v44, %s4483_s24 }
 0x805   : > { %3951 = vrot.lane.b32.xlu1 %v3950_v33, %s4484_s2 }
 0x80d   : > { %3961 = vrot.lane.b32.xlu1 %v3960_v4, %s4485_s27 }
 0x847   : > { %v1801_v19 = vpop.xlane.xlu1 %1800 }
 0x848   : > { %v1811_v3 = vsub.f32 %v1726_v48, %v1801_v19 }
 0x849   : > { %v1807_v34 = vpop.xlane.xlu0 %1806 }
 0x84a   : > { %v1815_v36 = vmul.f32 1.442695, %v1811_v3  ;;  %v1813_v37 = vsub.f32 %v1772_v50, %v1807_v34 }
 0x84c   : > { %4079 = vpow2.f32 %v1815_v36  ;;  %v1819_v8 = vmul.f32 1.442695, %v1813_v37 }
 0x84e   : > { %4081 = vpow2.f32 %v1819_v8 }
 0x84f   : > { %v1810_v41 = vpop.xlane.xlu1 %1809 }
 0x850   : > { %v1814_v44 = vsub.f32 %v1795_v55, %v1810_v41 }
 0x851   : > { %v1804_v42 = vpop.xlane.xlu2 %1803 }
 0x852   : > { %v4080_v43 = vpop.eup %4079  ;;  %v1821_v46 = vmul.f32 1.442695, %v1814_v44  ;;  %v1812_v1 = vsub.f32 %v1749_v6, %v1804_v42 }
 0x853   : > { %v1823_v62 = vsel %vm865_vm15, %v4080_v43, 0.0 }
 0x854   : > { %v5039_v61 = vpop.eup %4081  ;;  %4083 = vpow2.f32 %v1821_v46  ;;  %1824 = vadd.xlane.f32.xlu2 %v1823_v62  ;;  %v1817_v4 = vmul.f32 1.442695, %v1812_v1 }
 0x855   : > { %v1829_v59 = vsel %vm865_vm15, %v5039_v61, 0.0 }
 0x856   : > { %1830 = vadd.xlane.f32.xlu0 %v1829_v59  ;;  %4085 = vpow2.f32 %v1817_v4 }
 0x85a   : > { %v5043_v49 = vpop.eup %4083 }
 0x85b   : > { %v1832_v45 = vsel %vm865_vm15, %v5043_v49, 0.0 }
 0x85c   : > { %v5047_v51 = vpop.eup %4085 }
 0x85d   : > { %v1826_v52 = vsel %vm865_vm15, %v5047_v51, 0.0 }
 0x85e   : > { %1833 = vadd.xlane.f32.xlu0 %v1832_v45 }
 0x866   : > { %1827 = vadd.xlane.f32.xlu0 %v1826_v52 }
 0x867   : > { %v1900_v57 = vpop.permute.xlu1 %1899 }
 0x868   : > { %v1905_v58 = vsel %vm1045_vm14, %v1900_v57, 0 }
 0x869   : > { %1914 = vmatpush.bf16.msrb.mxu2 %v1905_v58 }
 0x86c   : > { %1920 = vrot.lane.b32.xlu2 %v4911_v22, %s4483_s24 }
 0x86f   : > { %v1963_v60 = vpop.permute.xlu1 %1962 }
 0x870   : > { %v1968_v0 = vsel %vm1045_vm14, %v1963_v60, 0 }
 0x871   : > { %1977 = vmatpush.bf16.msrb.mxu1 %v1968_v0 }
 0x874   : > { %3946 = vrot.lane.b32.xlu2 %v3945_v9, %s4485_s27 }
 0x87a   : > { %1941 = vrot.lane.b32.xlu0 %v4884_v40, %s4483_s24 }
 0x882   : > { %3966 = vrot.lane.b32.xlu0 %v3965_v24, %s4484_s2 }
 0x8c7   : > { %v1825_v5 = vpop.xlane.xlu2 %1824 }
 0x8c8   : > { %4087 = vrcp.f32 %v1825_v5  ;;  %v1846_v9 = vand.u32 2147483648, %v1825_v5  ;;  %v1844_v16 = vand.u32 2147483647, %v1825_v5  ;;  %vm1840_vm11 = vweird.f32 %v1825_v5 }
 0x8c9   : > { %v1831_v22 = vpop.xlane.xlu0 %1830 }
 0x8ca   : > { %4089 = vrcp.f32 %v1831_v22  ;;  %v1847_v21 = vor.u32 1.1754944e-38, %v1846_v9  ;;  %vm1845_vm13 = vcmp.eq.f32.partialorder %v1844_v16, 8.507059e+37  ;;  %vm1868_vm6 = vweird.f32 %v1831_v22  ;;  %v3800_v9 = vld [vmem:[%s5602_s5] sm:$0xff] }
 0x8cb   : > { %v1874_v33 = vand.u32 2147483648, %v1831_v22  ;;  %v1872_v34 = vand.u32 2147483647, %v1831_v22 }
 0x8cd   : > { %v1875_v46 = vor.u32 1.1754944e-38, %v1874_v33  ;;  %vm1873_vm9 = vcmp.eq.f32.partialorder %v1872_v34, 8.507059e+37 }
 0x8ce   : > { %v4088_v7 = vpop.eup %4087 }
 0x8cf   : > { %v1836_v38 = vmul.f32 %v4088_v7, %v1825_v5  ;;  %v1921_v10 = vpop.permute.xlu2 %1920  ;;  %vm1841_vm10 = vweird.f32 %v4088_v7  ;;  %v3801_v5 = vld [vmem:[%s5602_s5 + $0x8] sm:$0xff] }
 0x8d0   : > { %v1926_v11 = vsel %vm1045_vm14, %v1921_v10, 0  ;;  %v4090_v13 = vpop.eup %4089  ;;  %vm1842_vm12 = vmor %vm1840_vm11, %vm1841_vm10  ;;  %2079 = vmatpush.bf16.msra.mxu2 %v3801_v5 }
 0x8d1   : > { %v1837_v47 = vsub.f32 1.0, %v1836_v38  ;;  %v1834_v53 = vpop.xlane.xlu0 %1833  ;;  %1935 = vmatpush.bf16.msra.mxu3 %v1926_v11  ;;  %v1864_v17 = vmul.f32 %v4090_v13, %v1831_v22  ;;  %vm1869_vm3 = vweird.f32 %v4090_v13 }
 0x8d2   : > { %4091 = vrcp.f32 %v1834_v53  ;;  %v1888_v50 = vand.u32 2147483648, %v1834_v53  ;;  %v1886_v15 = vand.u32 2147483647, %v1834_v53  ;;  %vm1882_vm2 = vweird.f32 %v1834_v53  ;;  %vm5067_vm7 = vmor %vm1868_vm6, %vm1869_vm3 }
 0x8d3   : > { %v1838_v40 = vmul.f32 %v4088_v7, %v1837_v47  ;;  %v1865_v24 = vsub.f32 1.0, %v1864_v17 }
 0x8d4   : > { %v1889_v20 = vor.u32 1.1754944e-38, %v1888_v50  ;;  %vm1887_vm5 = vcmp.eq.f32.partialorder %v1886_v15, 8.507059e+37  ;;  %2080 = vmatpush.bf16.msra.mxu2 %v3800_v9 }
 0x8d5   : > { %v1839_v18 = vadd.f32 %v4088_v7, %v1838_v40  ;;  %v1866_v32 = vmul.f32 %v4090_v13, %v1865_v24 }
 0x8d7   : > { %v1843_v26 = vsel %vm1842_vm12, %v4088_v7, %v1839_v18  ;;  %v1867_v6 = vadd.f32 %v4090_v13, %v1866_v32  ;;  %v3947_v40 = vpop.permute.xlu2 %3946  ;;  %v3952_v18 = vpop.permute.xlu1 %3951 }
 0x8d8   : > { %v4092_v39 = vpop.eup %4091  ;;  %v1848_v23 = vsel %vm1845_vm13, %v1847_v21, %v1843_v26  ;;  %v3949_v16 = vunpack.i.h.bf16 %v3947_v40  ;;  %v3948_v17 = vunpack.i.l.bf16 %v3947_v40  ;;  %vm2040_vm13 = vcmask 195584  }
 0x8d9   : > { %v1891_v12 = vmul.f32 %v4080_v43, %v1848_v23  ;;  %v1878_v25 = vmul.f32 %v4092_v39, %v1834_v53  ;;  %v1828_v48 = vpop.xlane.xlu0 %1827  ;;  %vm1883_vm1 = vweird.f32 %v4092_v39  ;;  %v1871_v8 = vsel %vm5067_vm7, %v4090_v13, %v1867_v6 }
 0x8da   : > { %4093 = vrcp.f32 %v1828_v48  ;;  %vm1884_vm4 = vmor %vm1882_vm2, %vm1883_vm1  ;;  %v1860_v41 = vand.u32 2147483648, %v1828_v48  ;;  %v1858_v42 = vand.u32 2147483647, %v1828_v48  ;;  %vm1854_vm10 = vweird.f32 %v1828_v48 }
 0x8db   : > { %v1879_v27 = vsub.f32 1.0, %v1878_v25  ;;  %v1895_v55 = vpack.c.bf16 %v1891_v12, %v1891_v12  ;;  %v1876_v1 = vsel %vm1873_vm9, %v1875_v46, %v1871_v8  ;;  %v2032_v21 = vsel %vm865_vm15, %v4870_v28, %v3949_v16  ;;  %v4010_v8 = vld [vmem:[#allocation8] ss:$0 sm:$0xff] }
 0x8dc   : > { %v1861_v59 = vor.u32 1.1754944e-38, %v1860_v41  ;;  %vm1859_vm12 = vcmp.eq.f32.partialorder %v1858_v42, 8.507059e+37  ;;  %v1893_v45 = vmul.f32 %v5039_v61, %v1876_v1  ;;  %v2031_v26 = vsel %vm865_vm15, %v4868_v63, %v3948_v17 }
 0x8dd   : > { %v1880_v35 = vmul.f32 %v4092_v39, %v1879_v27  ;;  %3674 = vmatmul.msk.bf16.vlgmr.msrb.gmra.mxu2 %vm865_vm15, %v1895_v55  ;;  %v3953_v23 = vunpack.i.l.bf16 %v3952_v18 }
 0x8de   : > { %v1897_v0 = vpack.c.bf16 %v1893_v45, %v1893_v45  ;;  %v4177_v45 = vld [vmem:[%s4687_s17 + $0x10] sm:$0xff] }
 0x8df   : > { %v1881_v56 = vadd.f32 %v4092_v39, %v1880_v35  ;;  %v3962_v28 = vpop.permute.xlu1 %3961 }
 0x8e0   : > { %v4094_v31 = vpop.eup %4093  ;;  %v3964_v15 = vunpack.i.h.bf16 %v3962_v28 }
 0x8e1   : > { %v1885_v54 = vsel %vm1884_vm4, %v4092_v39, %v1881_v56  ;;  %v1850_v2 = vmul.f32 %v4094_v31, %v1828_v48  ;;  %vm1855_vm8 = vweird.f32 %v4094_v31  ;;  %v3954_v39 = vunpack.i.h.bf16 %v3952_v18 }
 0x8e2   : > { %v1890_v19 = vsel %vm1887_vm5, %v1889_v20, %v1885_v54  ;;  %vm1856_vm11 = vmor %vm1854_vm10, %vm1855_vm8  ;;  %v3963_v56 = vunpack.i.l.bf16 %v3962_v28  ;;  %v3802_v28 = vld [vmem:[#allocation10] sm:$0xff] }
 0x8e3   : > { %v1894_v36 = vmul.f32 %v5043_v49, %v1890_v19  ;;  %v1851_v37 = vsub.f32 1.0, %v1850_v2  ;;  %v2034_v2 = vsel %vm865_vm15, %v4879_v30, %v3964_v15  ;;  %v4175_v30 = vld [vmem:[%s4687_s17] sm:$0xff] }
 0x8e4   : > { %v2033_v33 = vsel %vm865_vm15, %v4877_v29, %v3963_v56 }
 0x8e5   : > { %v1852_v44 = vmul.f32 %v4094_v31, %v1851_v37  ;;  %v1898_v43 = vpack.c.bf16 %v1894_v36, %v1894_v36 }
 0x8e7   : > { %v1853_v62 = vadd.f32 %v4094_v31, %v1852_v44  ;;  %3677 = vmatmul.msk.bf16.vlgmr.msrb.gmra.mxu1 %vm865_vm15, %v1898_v43 }
 0x8e9   : > { %v1857_v4 = vsel %vm1856_vm11, %v4094_v31, %v1853_v62  ;;  %v4176_v62 = vld [vmem:[%s4687_s17 + $0x8] sm:$0xff] }
 0x8ea   : > { %v1862_v49 = vsel %vm1859_vm12, %v1861_v59, %v1857_v4 }
 0x8eb   : > { %v1892_v52 = vmul.f32 %v5047_v51, %v1862_v49 }
 0x8ec   : > { %v1942_v57 = vpop.permute.xlu0 %1941 }
 0x8ed   : > { %v1947_v58 = vsel %vm1045_vm14, %v1942_v57, 0  ;;  %v1896_v60 = vpack.c.bf16 %v1892_v52, %v1892_v52  ;;  %vm2035_vm14 = vcmask 130048  }
 0x8ee   : > { %1956 = vmatpush.bf16.msra.mxu0 %v1947_v58  ;;  %v2036_v48 = vsel %vm2035_vm14, %v2031_v26, %v3953_v23  ;;  %v2037_v27 = vsel %vm2035_vm14, %v2032_v21, %v3954_v39 }
 0x8ef   : > { %3675 = vmatmul.msk.bf16.vlgmr.msra.gmra.mxu3 %vm865_vm15, %v1896_v60 }
 0x8f1   : > { %3676 = vmatmul.msk.bf16.vlgmr.msra.gmra.mxu0 %vm865_vm15, %v1897_v0  ;;  %v4178_v0 = vld [vmem:[%s4687_s17 + $0x18] sm:$0xff]  ;;  %s3458_s17 = scalar_lea.hbm %s5653_s20, %s3820_s14 }
 0x8f2   : > { %s3461_s23 = sshll.u32 %s3458_s17, 4  ;;  %s3462_s23 = int_to_ptr.hbm [resolvable:$true] %s3461_s23 }
 0x8f3   : > { %s4403_s18 = sshra.s32 %s3462_s23, 4  ;;  %s4404_s18 = int_to_ptr.hbm [resolvable:$true] %s4403_s18 }
 0x8f4   : > { %v3967_v63 = vpop.permute.xlu0 %3966  ;;  %s4405_s26 = scalar_lea.hbm %s4404_s18, 32  ;;  %p4410_p3 = scmp.lt.s32.totalorder %s4404_s18, %s5654_s30 }
 0x8f5   : > { %v3969_v31 = vunpack.i.h.bf16 %v3967_v63  ;;  %v3968_v6 = vunpack.i.l.bf16 %v3967_v63  ;;  %v3804_v63 = vld [vmem:[#allocation10 + $0x10] sm:$0xff]  ;;  %p4406_p0 = scmp.ne.s32.totalorder %s4404_s18, %s4405_s26 }
 0x8f7   : > { %v2039_v19 = vsel %vm2035_vm14, %v2034_v2, %v3969_v31  ;;  %v2038_v3 = vsel %vm2035_vm14, %v2033_v33, %v3968_v6  ;;  %p4407_p1 = pnand %p4406_p0, %p4606_p5 }
 0x8f9   : > { %p4408_p2 = pneg %p4407_p1 }
 0x960   : > { %v1916_v22 = vpop.f32.mrf.mxu2 }
 0x964   : > { %v1979_v7 = vpop.f32.mrf.mxu1 }
 0x968   : > { %v1918_v61 = vpop.f32.mrf.mxu2 }
 0x96c   : > { %v1981_v38 = vpop.f32.mrf.mxu1 }
 0x96e   : > { %v1958_v51 = vpop.f32.mrf.mxu0 }
 0x96f   : > { %v3970_v53 = vpack.i.bf16 %v1979_v7, %v1958_v51 }
 0x972   : > { %v1937_v10 = vpop.f32.mrf.mxu3 }
 0x973   : > { %v3955_v11 = vpack.i.bf16 %v1937_v10, %v1916_v22 }
 0x975   : > { %3956 = vrot.lane.b32.xlu2 %v3955_v11, %s4486_s16 }
 0x976   : > { %v1960_v13 = vpop.f32.mrf.mxu0 }
 0x97a   : > { %v1939_v47 = vpop.f32.mrf.mxu3 }
 0x97d   : > { %3971 = vrot.lane.b32.xlu2 %v3970_v53, %s4486_s16 }
 0x9cf   : > { %v3957_v24 = vpop.permute.xlu2 %3956 }
 0x9d0   : > { %v3959_v12 = vunpack.i.h.bf16 %v3957_v24  ;;  %v3958_v25 = vunpack.i.l.bf16 %v3957_v24 }
 0x9d2   : > { %v2042_v32 = vsel %vm2040_vm13, %v2037_v27, %v3959_v12  ;;  %v2041_v50 = vsel %vm2040_vm13, %v2036_v48, %v3958_v25  ;;  %v3803_v48 = vld [vmem:[#allocation10 + $0x8] sm:$0xff]  ;;  %v3805_v27 = vld [vmem:[#allocation10 + $0x18] sm:$0xff] }
 0x9d3   : > { %v2045_v55 = vpack.c.bf16 %v2042_v32, %v2041_v50  ;;  %v3807_v32 = vld [vmem:[#allocation10 + $0x28] sm:$0xff]  ;;  %2236 = vmatpush.bf16.msrb.mxu3 %v3803_v48  ;;  %2277 = vmatpush.bf16.msrb.mxu0 %v3805_v27 }
 0x9d4   : > { %2318 = vmatpush.bf16.msra.mxu1 %v3807_v32 }
 0x9d5   : > { %3686 = vmatmul.msk.bf16.vlgmr.msra.gmra.mxu2 %vm612_vm0, %v2045_v55 }
 0x9d7   : > { %v3972_v35 = vpop.permute.xlu2 %3971  ;;  %2237 = vmatpush.bf16.msrb.mxu3 %v3802_v28  ;;  %2278 = vmatpush.bf16.msrb.mxu0 %v3804_v63 }
 0x9d8   : > { %v3974_v20 = vunpack.i.h.bf16 %v3972_v35  ;;  %v3973_v54 = vunpack.i.l.bf16 %v3972_v35  ;;  %v3806_v35 = vld [vmem:[#allocation10 + $0x20] sm:$0xff] }
 0x9d9   : > { %2319 = vmatpush.bf16.msra.mxu1 %v3806_v35 }
 0x9da   : > { %v2043_v34 = vsel %vm2040_vm13, %v2038_v3, %v3973_v54  ;;  %v2044_v36 = vsel %vm2040_vm13, %v2039_v19, %v3974_v20 }
 0x9db   : > { %v2046_v37 = vpack.c.bf16 %v2044_v36, %v2043_v34 }
 0x9e5   : > { %3687 = vmatmul.msk.bf16.gmra.mxu2 %vm612_vm0, %v2046_v37 }
 0xa58   : > { %v2082_v41 = vpop.f32.mrf.mxu2 }
 0xa59   : > { %v2083_v44 = vadd.f32 %v4010_v8, %v2082_v41 }
 0xa5b   : > { %v5107_v42 = vadd.f32 %v4175_v30, %v2083_v44 }
 0xa5d   : > { %v2096_v29 = vsel %vm612_vm0, %v5107_v42, 0.0 }
 0xa5e   : > { %2097 = vadd.xlane.f32.xlu1 %v2096_v29 }
 0xa60   : > { %v2084_v43 = vpop.f32.mrf.mxu2 }
 0xa61   : > { %v2085_v46 = vadd.f32 %v4010_v8, %v2084_v43 }
 0xa63   : > { %v5112_v1 = vadd.f32 %v4176_v62, %v2085_v46 }
 0xa65   : > { %v2099_v59 = vsel %vm612_vm0, %v5112_v1, 0.0 }
 0xa66   : > { %2100 = vadd.xlane.f32.xlu0 %v2099_v59  ;;  %v4011_v59 = vld [vmem:[#allocation2 + $0x1] ss:$0 sm:$0xff] }
 0xa68   : > { %v2087_v4 = vpop.f32.mrf.mxu2 }
 0xa69   : > { %v2088_v49 = vadd.f32 %v4010_v8, %v2087_v4 }
 0xa6b   : > { %v5117_v52 = vadd.f32 %v4177_v45, %v2088_v49 }
 0xa6d   : > { %v2102_v57 = vsel %vm612_vm0, %v5117_v52, 0.0 }
 0xa6e   : > { %2103 = vadd.xlane.f32.xlu2 %v2102_v57 }
 0xa70   : > { %v2089_v58 = vpop.f32.mrf.mxu2 }
 0xa71   : > { %v2090_v60 = vadd.f32 %v4010_v8, %v2089_v58 }
 0xa73   : > { %v5122_v5 = vadd.f32 %v4178_v0, %v2090_v60  ;;  %v4012_v0 = vld [vmem:[#allocation5 + $0x1] ss:$0 sm:$0xff] }
 0xa75   : > { %v2105_v22 = vsel %vm612_vm0, %v5122_v5, 0.0 }
 0xa76   : > { %2106 = vadd.xlane.f32.xlu1 %v2105_v22 }
 0xad1   : > { %v2098_v7 = vpop.xlane.xlu1 %2097 }
 0xad2   : > { %v2108_v61 = vmul.f32 %v2098_v7, %v4697_v14 }
 0xad4   : > { %v5128_v38 = vsub.f32 %v5107_v42, %v2108_v61 }
 0xad6   : > { %v2116_v51 = vmul.f32 %v5128_v38, %v5128_v38 }
 0xad8   : > { %v2120_v10 = vsel %vm612_vm0, %v2116_v51, 0.0 }
 0xad9   : > { %v2101_v11 = vpop.xlane.xlu0 %2100  ;;  %2121 = vadd.xlane.f32.xlu2 %v2120_v10 }
 0xada   : > { %v2109_v13 = vmul.f32 %v2101_v11, %v4697_v14 }
 0xadc   : > { %v5135_v47 = vsub.f32 %v5112_v1, %v2109_v13 }
 0xade   : > { %v2117_v53 = vmul.f32 %v5135_v47, %v5135_v47 }
 0xae0   : > { %v2123_v9 = vsel %vm612_vm0, %v2117_v53, 0.0 }
 0xae1   : > { %v2104_v40 = vpop.xlane.xlu2 %2103  ;;  %2124 = vadd.xlane.f32.xlu0 %v2123_v9 }
 0xae2   : > { %v2110_v16 = vmul.f32 %v2104_v40, %v4697_v14 }
 0xae4   : > { %v5142_v17 = vsub.f32 %v5117_v52, %v2110_v16 }
 0xae6   : > { %v2118_v18 = vmul.f32 %v5142_v17, %v5142_v17 }
 0xae8   : > { %v2126_v21 = vsel %vm612_vm0, %v2118_v18, 0.0 }
 0xae9   : > { %2127 = vadd.xlane.f32.xlu1 %v2126_v21  ;;  %v2107_v26 = vpop.xlane.xlu1 %2106 }
 0xaea   : > { %v2111_v39 = vmul.f32 %v2107_v26, %v4697_v14 }
 0xaec   : > { %v5149_v23 = vsub.f32 %v5122_v5, %v2111_v39 }
 0xaee   : > { %v2119_v24 = vmul.f32 %v5149_v23, %v5149_v23 }
 0xaf0   : > { %v2129_v12 = vsel %vm612_vm0, %v2119_v24, 0.0 }
 0xaf1   : > { %2130 = vadd.xlane.f32.xlu2 %v2129_v12 }
 0xb4c   : > { %v2122_v25 = vpop.xlane.xlu2 %2121 }
 0xb4d   : > { %v2132_v50 = vmul.f32 %v2122_v25, %v4697_v14 }
 0xb4f   : > { %v2136_v55 = vadd.f32 1e-05, %v2132_v50 }
 0xb51   : > { %4095 = vrsqrt.f32 %v2136_v55  ;;  %vm2146_vm2 = vweird.f32 %v2136_v55 }
 0xb54   : > { %v2125_v15 = vpop.xlane.xlu0 %2124 }
 0xb55   : > { %v2133_v56 = vmul.f32 %v2125_v15, %v4697_v14 }
 0xb57   : > { %v4096_v31 = vpop.eup %4095  ;;  %v2137_v6 = vadd.f32 1e-05, %v2133_v56 }
 0xb58   : > { %v2141_v20 = vmul.f32 %v4096_v31, %v2136_v55  ;;  %vm2147_vm1 = vweird.f32 %v4096_v31 }
 0xb59   : > { %4097 = vrsqrt.f32 %v2137_v6  ;;  %vm2148_vm3 = vmor %vm2146_vm2, %vm2147_vm1  ;;  %vm2156_vm5 = vweird.f32 %v2137_v6 }
 0xb5a   : > { %v2142_v54 = vmul.f32 %v4096_v31, %v2141_v20 }
 0xb5c   : > { %v2143_v2 = vmul.f32 0.5, %v2142_v54  ;;  %v2128_v33 = vpop.xlane.xlu1 %2127 }
 0xb5d   : > { %v2134_v19 = vmul.f32 %v2128_v33, %v4697_v14 }
 0xb5e   : > { %v2144_v3 = vsub.f32 1.5, %v2143_v2 }
 0xb5f   : > { %v4098_v34 = vpop.eup %4097  ;;  %v2138_v36 = vadd.f32 1e-05, %v2134_v19 }
 0xb60   : > { %v2145_v37 = vmul.f32 %v4096_v31, %v2144_v3  ;;  %v2151_v8 = vmul.f32 %v4098_v34, %v2137_v6  ;;  %vm2157_vm4 = vweird.f32 %v4098_v34 }
 0xb61   : > { %4099 = vrsqrt.f32 %v2138_v36  ;;  %vm2158_vm6 = vmor %vm2156_vm5, %vm2157_vm4  ;;  %vm2166_vm8 = vweird.f32 %v2138_v36 }
 0xb62   : > { %v2152_v41 = vmul.f32 %v4098_v34, %v2151_v8  ;;  %v2149_v44 = vsel %vm2148_vm3, %v4096_v31, %v2145_v37 }
 0xb63   : > { %v2180_v4 = vmul.f32 %v2149_v44, %v5128_v38 }
 0xb64   : > { %v2153_v30 = vmul.f32 0.5, %v2152_v41  ;;  %v2131_v29 = vpop.xlane.xlu2 %2130 }
 0xb65   : > { %v2135_v43 = vmul.f32 %v2131_v29, %v4697_v14  ;;  %v2189_v22 = vmul.f32 %v4011_v59, %v2180_v4  ;;  %v4014_v29 = vld [vmem:[%s5605_s8 + $0x2] ss:$0 sm:$0xff] }
 0xb66   : > { %v2154_v46 = vsub.f32 1.5, %v2153_v30 }
 0xb67   : > { %v4100_v62 = vpop.eup %4099  ;;  %v2139_v49 = vadd.f32 1e-05, %v2135_v43  ;;  %v2198_v13 = vadd.f32 %v4012_v0, %v2189_v22 }
 0xb68   : > { %v2155_v45 = vmul.f32 %v4098_v34, %v2154_v46  ;;  %v2161_v57 = vmul.f32 %v4100_v62, %v2138_v36  ;;  %vm2167_vm7 = vweird.f32 %v4100_v62 }
 0xb69   : > { %4101 = vrsqrt.f32 %v2139_v49  ;;  %vm2168_vm9 = vmor %vm2166_vm8, %vm2167_vm7  ;;  %vm2176_vm11 = vweird.f32 %v2139_v49 }
 0xb6a   : > { %v2159_v58 = vsel %vm2158_vm6, %v4098_v34, %v2155_v45  ;;  %v2162_v60 = vmul.f32 %v4100_v62, %v2161_v57 }
 0xb6b   : > { %v2181_v7 = vmul.f32 %v2159_v58, %v5135_v47 }
 0xb6c   : > { %v2163_v61 = vmul.f32 0.5, %v2162_v60 }
 0xb6d   : > { %v2190_v51 = vmul.f32 %v4011_v59, %v2181_v7 }
 0xb6e   : > { %v2164_v10 = vsub.f32 1.5, %v2163_v61 }
 0xb6f   : > { %v4102_v11 = vpop.eup %4101  ;;  %v2199_v53 = vadd.f32 %v4012_v0, %v2190_v51 }
 0xb70   : > { %v2165_v9 = vmul.f32 %v4100_v62, %v2164_v10  ;;  %v2171_v38 = vmul.f32 %v4102_v11, %v2139_v49  ;;  %vm2177_vm10 = vweird.f32 %v4102_v11 }
 0xb71   : > { %v2202_v40 = vpack.c.bf16 %v2199_v53, %v2198_v13  ;;  %vm2178_vm12 = vmor %vm2176_vm11, %vm2177_vm10 }
 0xb72   : > { %v2172_v16 = vmul.f32 %v4102_v11, %v2171_v38  ;;  %v2169_v18 = vsel %vm2168_vm9, %v4100_v62, %v2165_v9 }
 0xb73   : > { %3696 = vmatmul.msk.bf16.vlgmr.msrb.gmra.mxu3 %vm612_vm0, %v2202_v40  ;;  %3707 = vmatmul.msk.bf16.vlgmr.msrb.gmra.mxu0 %vm612_vm0, %v2202_v40  ;;  %v2182_v26 = vmul.f32 %v2169_v18, %v5142_v17  ;;  %v4013_v17 = vld [vmem:[%s5605_s8 + $0x1] ss:$0 sm:$0xff] }
 0xb74   : > { %v2173_v21 = vmul.f32 0.5, %v2172_v16  ;;  %3718 = vmatmul.msk.bf16.vlgmr.msra.gmra.mxu1 %vm612_vm0, %v2202_v40 }
 0xb75   : > { %v2191_v25 = vmul.f32 %v4011_v59, %v2182_v26 }
 0xb76   : > { %v2174_v47 = vsub.f32 1.5, %v2173_v21 }
 0xb77   : > { %v2200_v27 = vadd.f32 %v4012_v0, %v2191_v25 }
 0xb78   : > { %v2175_v39 = vmul.f32 %v4102_v11, %v2174_v47 }
 0xb7a   : > { %v2179_v24 = vsel %vm2178_vm12, %v4102_v11, %v2175_v39 }
 0xb7b   : > { %v2183_v12 = vmul.f32 %v2179_v24, %v5149_v23  ;;  %v4015_v23 = vld [vmem:[%s5605_s8] ss:$0 sm:$0xff] }
 0xb7d   : > { %v2192_v48 = vmul.f32 %v4011_v59, %v2183_v12 }
 0xb7f   : > { %v2201_v32 = vadd.f32 %v4012_v0, %v2192_v48 }
 0xb81   : > { %v2203_v50 = vpack.c.bf16 %v2201_v32, %v2200_v27 }
 0xb83   : > { %3697 = vmatmul.msk.bf16.gmra.mxu3 %vm612_vm0, %v2203_v50  ;;  %3708 = vmatmul.msk.bf16.gmra.mxu0 %vm612_vm0, %v2203_v50 }
 0xb84   : > { %3719 = vmatmul.msk.bf16.gmra.mxu1 %vm612_vm0, %v2203_v50 }
 0xbf0   : > { %v2280_v55 = vpop.f32.mrf.mxu0 }
 0xbf1   : > { %v2321_v28 = vpop.f32.mrf.mxu1  ;;  %v2281_v63 = vadd.f32 %v4013_v17, %v2280_v55 }
 0xbf2   : > { %v2322_v60 = vadd.f32 %v4014_v29, %v2321_v28 }
 0xbf3   : > { %v2335_v56 = vpack.c.bf16 %v2281_v63, %v2281_v63 }
 0xbf4   : > { %v2339_v53 = vpack.c.bf16 %v2322_v60, %v2322_v60 }
 0xbf5   : > { %v2357_v2 = vunpack.c.l.b16 %v2335_v56 }
 0xbf6   : > { %v2239_v35 = vpop.f32.mrf.mxu3  ;;  %v2508_v12 = vunpack.c.l.b16 %v2339_v53 }
 0xbf7   : > { %v2240_v20 = vadd.f32 %v4015_v23, %v2239_v35 }
 0xbf8   : > { %v2282_v15 = vpop.f32.mrf.mxu0 }
 0xbf9   : > { %v2283_v31 = vadd.f32 %v4013_v17, %v2282_v15  ;;  %v2323_v6 = vpop.f32.mrf.mxu1  ;;  %v2331_v3 = vpack.c.bf16 %v2240_v20, %v2240_v20 }
 0xbfa   : > { %v2324_v4 = vadd.f32 %v4014_v29, %v2323_v6 }
 0xbfb   : > { %v2336_v54 = vpack.c.bf16 %v2283_v31, %v2283_v31  ;;  %v2347_v44 = vunpack.c.l.b16 %v2331_v3 }
 0xbfc   : > { %v2340_v51 = vpack.c.bf16 %v2324_v4, %v2324_v4 }
 0xbfd   : > { %v2358_v33 = vunpack.c.l.b16 %v2336_v54 }
 0xbfe   : > { %v2241_v19 = vpop.f32.mrf.mxu3  ;;  %v2509_v47 = vunpack.c.l.b16 %v2340_v51 }
 0xbff   : > { %v2361_v34 = vpack.c.b16 %v2358_v33, %v2357_v2  ;;  %v2242_v36 = vadd.f32 %v4015_v23, %v2241_v19 }
 0xc00   : > { %v2285_v37 = vpop.f32.mrf.mxu0  ;;  %v5185_v27 = vpack.c.b16 %v2509_v47, %v2508_v12 }
 0xc01   : > { %v2332_v8 = vpack.c.bf16 %v2242_v36, %v2242_v36  ;;  %v2326_v41 = vpop.f32.mrf.mxu1  ;;  %2545 = vrot.lane.b32.xlu1 %v2361_v34, %s4481_s28  ;;  %v2286_v46 = vadd.f32 %v4013_v17, %v2285_v37  ;;  %v2370_v50 = vsel %vm865_vm15, %v2361_v34, 0 }
 0xc02   : > { %v2327_v62 = vadd.f32 %v4014_v29, %v2326_v41 }
 0xc03   : > { %v2348_v30 = vunpack.c.l.b16 %v2332_v8  ;;  %v2337_v45 = vpack.c.bf16 %v2286_v46, %v2286_v46 }
 0xc04   : > { %v2341_v0 = vpack.c.bf16 %v2327_v62, %v2327_v62 }
 0xc05   : > { %v2351_v43 = vpack.c.b16 %v2348_v30, %v2347_v44  ;;  %v2359_v11 = vunpack.c.l.b16 %v2337_v45 }
 0xc06   : > { %v2244_v59 = vpop.f32.mrf.mxu3  ;;  %v2510_v9 = vunpack.c.l.b16 %v2341_v0 }
 0xc07   : > { %2541 = vrot.lane.b32.xlu2 %v2351_v43, %s4481_s28  ;;  %v2245_v7 = vadd.f32 %v4015_v23, %v2244_v59 }
 0xc08   : > { %v2287_v49 = vpop.f32.mrf.mxu0 }
 0xc09   : > { %v2288_v57 = vadd.f32 %v4013_v17, %v2287_v49  ;;  %v2328_v58 = vpop.f32.mrf.mxu1  ;;  %v2333_v16 = vpack.c.bf16 %v2245_v7, %v2245_v7 }
 0xc0a   : > { %v2329_v22 = vadd.f32 %v4014_v29, %v2328_v58 }
 0xc0b   : > { %v2338_v61 = vpack.c.bf16 %v2288_v57, %v2288_v57  ;;  %v2349_v25 = vunpack.c.l.b16 %v2333_v16 }
 0xc0c   : > { %v2342_v10 = vpack.c.bf16 %v2329_v22, %v2329_v22 }
 0xc0d   : > { %v2360_v13 = vunpack.c.l.b16 %v2338_v61 }
 0xc0e   : > { %v2511_v38 = vunpack.c.l.b16 %v2342_v10  ;;  %v2246_v40 = vpop.f32.mrf.mxu3 }
 0xc0f   : > { %v2362_v18 = vpack.c.b16 %v2360_v13, %v2359_v11  ;;  %v2247_v21 = vadd.f32 %v4015_v23, %v2246_v40 }
 0xc10   : > { %v5179_v26 = vpack.c.b16 %v2511_v38, %v2510_v9 }
 0xc11   : > { %v2334_v39 = vpack.c.bf16 %v2247_v21, %v2247_v21  ;;  %2547 = vrot.lane.b32.xlu0 %v2362_v18, %s4481_s28  ;;  %2907 = vrot.lane.b32.xlu2 %v2362_v18, %s4483_s24  ;;  %v2373_v24 = vsel %vm865_vm15, %v2362_v18, 0 }
 0xc12   : > { %2528 = vmatpush.bf16.msra.mxu3 %v5179_v26  ;;  %2381 = vmatpush.bf16.xpose.msrb.mxu2 %v2373_v24 }
 0xc13   : > { %v2350_v48 = vunpack.c.l.b16 %v2334_v39 }
 0xc15   : > { %v2352_v32 = vpack.c.b16 %v2350_v48, %v2349_v25 }
 0xc16   : > { %2529 = vmatpush.bf16.msra.mxu3 %v5185_v27 }
 0xc17   : > { %2543 = vrot.lane.b32.xlu1 %v2352_v32, %s4481_s28 }
 0xc19   : > { %2727 = vrot.lane.b32.xlu0 %v2362_v18, %s4482_s6  ;;  %2901 = vrot.lane.b32.xlu2 %v2351_v43, %s4483_s24 }
 0xc1a   : > { %2382 = vmatpush.bf16.xpose.msrb.mxu2 %v2370_v50 }
 0xc1f   : > { %2905 = vrot.lane.b32.xlu1 %v2361_v34, %s4483_s24 }
 0xc21   : > { %2725 = vrot.lane.b32.xlu0 %v2361_v34, %s4482_s6  ;;  %3720 = vmatmul.msk.bf16.vlgmr.msrb.gmra.mxu2 %vm865_vm15, %v2351_v43 }
 0xc27   : > { %2903 = vrot.lane.b32.xlu1 %v2352_v32, %s4483_s24 }
 0xc29   : > { %2721 = vrot.lane.b32.xlu0 %v2351_v43, %s4482_s6 }
 0xc31   : > { %2723 = vrot.lane.b32.xlu0 %v2352_v32, %s4482_s6  ;;  %3721 = vmatmul.msk.bf16.gmra.mxu2 %vm865_vm15, %v2352_v32 }
 0xc61   : > { %v2542_v17 = vpop.permute.xlu2 %2541 }
 0xc6b   : > { %v2908_v23 = vpop.permute.xlu2 %2907 }
 0xc6c   : > { %v2919_v6 = vsel %vm865_vm15, %v2908_v23, 0 }
 0xc73   : > { %v2546_v55 = vpop.permute.xlu1 %2545  ;;  %v2902_v41 = vpop.permute.xlu2 %2901 }
 0xc74   : > { %v2556_v56 = vsel %vm865_vm15, %v2546_v55, 0 }
 0xc83   : > { %v2548_v28 = vpop.permute.xlu0 %2547 }
 0xc84   : > { %v2559_v63 = vsel %vm865_vm15, %v2548_v28, 0 }
 0xc85   : > { %2567 = vmatpush.bf16.xpose.msra.mxu0 %v2559_v63 }
 0xc89   : > { %v2544_v35 = vpop.permute.xlu1 %2543 }
 0xc8b   : > { %v2728_v15 = vpop.permute.xlu0 %2727 }
 0xc8c   : > { %v2739_v31 = vsel %vm865_vm15, %v2728_v15, 0 }
 0xc8d   : > { %2568 = vmatpush.bf16.xpose.msra.mxu0 %v2556_v56  ;;  %2747 = vmatpush.bf16.xpose.msra.mxu2 %v2739_v31 }
 0xc91   : > { %v2906_v20 = vpop.permute.xlu1 %2905 }
 0xc92   : > { %v2916_v33 = vsel %vm865_vm15, %v2906_v20, 0 }
 0xc93   : > { %v2726_v54 = vpop.permute.xlu0 %2725 }
 0xc94   : > { %v2736_v2 = vsel %vm865_vm15, %v2726_v54, 0  ;;  %3724 = vmatmul.msk.bf16.vlgmr.msra.gmra.mxu0 %vm865_vm15, %v2542_v17 }
 0xc95   : > { %2927 = vmatpush.bf16.xpose.msrb.mxu0 %v2919_v6  ;;  %2748 = vmatpush.bf16.xpose.msra.mxu2 %v2736_v2 }
 0xc99   : > { %v2904_v46 = vpop.permute.xlu1 %2903 }
 0xc9b   : > { %v2722_v19 = vpop.permute.xlu0 %2721 }
 0xc9c   : > { %3728 = vmatmul.msk.bf16.vlgmr.msra.gmra.mxu2 %vm865_vm15, %v2722_v19 }
 0xc9d   : > { %2928 = vmatpush.bf16.xpose.msrb.mxu0 %v2916_v33 }
 0xca3   : > { %v2724_v36 = vpop.permute.xlu0 %2723 }
 0xca4   : > { %v2384_v3 = vpop.f32.mrf.mxu2  ;;  %3725 = vmatmul.msk.bf16.gmra.mxu0 %vm865_vm15, %v2544_v35 }
 0xca5   : > { %v2394_v34 = vsel %vm612_vm0, %v2384_v3, -inf }
 0xca6   : > { %2395 = vmax.xlane.f32.xlu2 %v2394_v34 }
 0xcac   : > { %v2386_v37 = vpop.f32.mrf.mxu2  ;;  %3729 = vmatmul.msk.bf16.gmra.mxu2 %vm865_vm15, %v2724_v36 }
 0xcad   : > { %v2397_v8 = vsel %vm612_vm0, %v2386_v37, -inf }
 0xcae   : > { %2398 = vmax.xlane.f32.xlu0 %v2397_v8 }
 0xcb4   : > { %v2389_v44 = vpop.f32.mrf.mxu2  ;;  %3732 = vmatmul.msk.bf16.vlgmr.msrb.gmra.mxu0 %vm865_vm15, %v2902_v41 }
 0xcb5   : > { %v2400_v30 = vsel %vm612_vm0, %v2389_v44, -inf }
 0xcb6   : > { %2401 = vmax.xlane.f32.xlu0 %v2400_v30 }
 0xcbc   : > { %v2391_v29 = vpop.f32.mrf.mxu2 }
 0xcbd   : > { %v2403_v43 = vsel %vm612_vm0, %v2391_v29, -inf }
 0xcbe   : > { %2404 = vmax.xlane.f32.xlu2 %v2403_v43 }
 0xcc4   : > { %3733 = vmatmul.msk.bf16.gmra.mxu0 %vm865_vm15, %v2904_v46 }
 0xd11   : > { %v5215_v62 = vpop.f32.mrf.mxu0 }
 0xd12   : > { %v2580_v59 = vsel %vm612_vm0, %v5215_v62, -inf }
 0xd13   : > { %2581 = vmax.xlane.f32.xlu1 %v2580_v59 }
 0xd19   : > { %v5219_v4 = vpop.f32.mrf.mxu0  ;;  %v2396_v49 = vpop.xlane.xlu2 %2395 }
 0xd1a   : > { %v2406_v45 = vsub.f32 %v2384_v3, %v2396_v49  ;;  %v2583_v51 = vsel %vm612_vm0, %v5219_v4, -inf }
 0xd1c   : > { %v2410_v22 = vmul.f32 1.442695, %v2406_v45 }
 0xd1e   : > { %4103 = vpow2.f32 %v2410_v22 }
 0xd1f   : > { %v5221_v57 = vpop.f32.mrf.mxu2 }
 0xd20   : > { %v2760_v58 = vsel %vm612_vm0, %v5221_v57, -inf }
 0xd21   : > { %v5225_v60 = vpop.f32.mrf.mxu0  ;;  %v2399_v0 = vpop.xlane.xlu0 %2398  ;;  %2761 = vmax.xlane.f32.xlu2 %v2760_v58 }
 0xd22   : > { %v2407_v40 = vsub.f32 %v2386_v37, %v2399_v0  ;;  %v2586_v18 = vsel %vm612_vm0, %v5225_v60, -inf }
 0xd24   : > { %v5237_v38 = vpop.eup %4103  ;;  %v2412_v39 = vmul.f32 1.442695, %v2407_v40 }
 0xd25   : > { %v2418_v21 = vsel %vm612_vm0, %v5237_v38, 0.0 }
 0xd27   : > { %v5227_v7 = vpop.f32.mrf.mxu2 }
 0xd28   : > { %v2763_v61 = vsel %vm612_vm0, %v5227_v7, -inf }
 0xd29   : > { %v5233_v10 = vpop.f32.mrf.mxu0  ;;  %v2402_v11 = vpop.xlane.xlu0 %2401  ;;  %2764 = vmax.xlane.f32.xlu1 %v2763_v61  ;;  %2584 = vmax.xlane.f32.xlu2 %v2583_v51 }
 0xd2a   : > { %v2408_v13 = vsub.f32 %v2389_v44, %v2402_v11  ;;  %v2589_v53 = vsel %vm612_vm0, %v5233_v10, -inf }
 0xd2b   : > { %2590 = vmax.xlane.f32.xlu0 %v2589_v53 }
 0xd2c   : > { %v2414_v9 = vmul.f32 1.442695, %v2408_v13 }
 0xd2e   : > { %4105 = vpow2.f32 %v2414_v9 }
 0xd2f   : > { %v5239_v16 = vpop.f32.mrf.mxu2  ;;  %4107 = vpow2.f32 %v2412_v39 }
 0xd30   : > { %v2766_v32 = vsel %vm612_vm0, %v5239_v16, -inf }
 0xd31   : > { %v5245_v47 = vpop.f32.mrf.mxu0  ;;  %2587 = vmax.xlane.f32.xlu1 %v2586_v18  ;;  %2419 = vadd.xlane.f32.xlu2 %v2418_v21  ;;  %v2405_v24 = vpop.xlane.xlu2 %2404 }
 0xd32   : > { %v2409_v25 = vsub.f32 %v2391_v29, %v2405_v24  ;;  %v2940_v23 = vsel %vm612_vm0, %v5245_v47, -inf }
 0xd34   : > { %v5247_v12 = vpop.eup %4105  ;;  %v2416_v28 = vmul.f32 1.442695, %v2409_v25 }
 0xd35   : > { %v2424_v17 = vsel %vm612_vm0, %v5247_v12, 0.0  ;;  %v5259_v63 = vpop.eup %4107 }
 0xd36   : > { %4109 = vpow2.f32 %v2416_v28  ;;  %v2421_v35 = vsel %vm612_vm0, %v5259_v63, 0.0 }
 0xd37   : > { %v5249_v48 = vpop.f32.mrf.mxu2 }
 0xd38   : > { %v2769_v50 = vsel %vm612_vm0, %v5249_v48, -inf }
 0xd39   : > { %v5255_v55 = vpop.f32.mrf.mxu0  ;;  %2767 = vmax.xlane.f32.xlu1 %v2766_v32  ;;  %2770 = vmax.xlane.f32.xlu0 %v2769_v50 }
 0xd3a   : > { %2425 = vadd.xlane.f32.xlu2 %v2424_v17  ;;  %v2943_v56 = vsel %vm612_vm0, %v5255_v55, -inf }
 0xd3c   : > { %v5269_v31 = vpop.eup %4109 }
 0xd3d   : > { %v2427_v20 = vsel %vm612_vm0, %v5269_v31, 0.0 }
 0xd41   : > { %v5265_v15 = vpop.f32.mrf.mxu0  ;;  %2422 = vadd.xlane.f32.xlu1 %v2421_v35  ;;  %2941 = vmax.xlane.f32.xlu0 %v2940_v23 }
 0xd42   : > { %2944 = vmax.xlane.f32.xlu2 %v2943_v56  ;;  %v2946_v6 = vsel %vm612_vm0, %v5265_v15, -inf }
 0xd49   : > { %v5275_v54 = vpop.f32.mrf.mxu0  ;;  %2947 = vmax.xlane.f32.xlu0 %v2946_v6  ;;  %2428 = vadd.xlane.f32.xlu1 %v2427_v20 }
 0xd4a   : > { %v2949_v2 = vsel %vm612_vm0, %v5275_v54, -inf }
 0xd4b   : > { %2950 = vmax.xlane.f32.xlu2 %v2949_v2 }
 0xd5d   : > { %2690 = vrot.lane.b32.xlu0 %v5185_v27, %s4481_s28 }
 0xd63   : > { %2872 = vrot.lane.b32.xlu2 %v5179_v26, %s4482_s6 }
 0xd6b   : > { %2870 = vrot.lane.b32.xlu2 %v5185_v27, %s4482_s6  ;;  %s4409_s6 = scalar_lea.hbm %s5654_s30, 64 }
 0xd6c   : > { %p4411_p4 = scmp.lt.s32.totalorder %s4409_s6, %s4405_s26 }
 0xd6e   : > { %p4412_p7 = por %p4411_p4, %p4410_p3 }
 0xd70   : > { %p4413_p8 = pnand %p4412_p7, %p4408_p2 }
 0xd86   : > { %v2582_v33 = vpop.xlane.xlu1 %2581 }
 0xd87   : > { %v2592_v19 = vsub.f32 %v5215_v62, %v2582_v33 }
 0xd89   : > { %v2596_v3 = vmul.f32 1.442695, %v2592_v19 }
 0xd8b   : > { %4111 = vpow2.f32 %v2596_v3 }
 0xd91   : > { %v5286_v34 = vpop.eup %4111 }
 0xd92   : > { %v2604_v36 = vsel %vm612_vm0, %v5286_v34, 0.0 }
 0xd93   : > { %2605 = vadd.xlane.f32.xlu1 %v2604_v36 }
 0xd94   : > { %v2762_v37 = vpop.xlane.xlu2 %2761 }
 0xd95   : > { %v2772_v8 = vsub.f32 %v5221_v57, %v2762_v37 }
 0xd97   : > { %v2776_v41 = vmul.f32 1.442695, %v2772_v8 }
 0xd99   : > { %4113 = vpow2.f32 %v2776_v41 }
 0xd9c   : > { %v2765_v44 = vpop.xlane.xlu1 %2764  ;;  %v2585_v30 = vpop.xlane.xlu2 %2584 }
 0xd9d   : > { %v2773_v29 = vsub.f32 %v5227_v7, %v2765_v44  ;;  %v2593_v43 = vsub.f32 %v5219_v4, %v2585_v30 }
 0xd9e   : > { %v2591_v46 = vpop.xlane.xlu0 %2590 }
 0xd9f   : > { %v5293_v62 = vpop.eup %4113  ;;  %v2778_v59 = vmul.f32 1.442695, %v2773_v29  ;;  %v2598_v49 = vmul.f32 1.442695, %v2593_v43  ;;  %v2595_v45 = vsub.f32 %v5233_v10, %v2591_v46 }
 0xda0   : > { %v2784_v58 = vsel %vm612_vm0, %v5293_v62, 0.0 }
 0xda1   : > { %4115 = vpow2.f32 %v2778_v59  ;;  %2785 = vadd.xlane.f32.xlu2 %v2784_v58  ;;  %v2602_v57 = vmul.f32 1.442695, %v2595_v45 }
 0xda2   : > { %4117 = vpow2.f32 %v2598_v49 }
 0xda4   : > { %v2588_v0 = vpop.xlane.xlu1 %2587  ;;  %v2420_v22 = vpop.xlane.xlu2 %2419 }
 0xda5   : > { %v2594_v7 = vsub.f32 %v5225_v60, %v2588_v0  ;;  %4119 = vrcp.f32 %v2420_v22  ;;  %v2441_v33 = vand.u32 2147483648, %v2420_v22  ;;  %vm2435_vm2 = vweird.f32 %v2420_v22 }
 0xda6   : > { %4121 = vpow2.f32 %v2602_v57  ;;  %v2439_v37 = vand.u32 2147483647, %v2420_v22 }
 0xda7   : > { %v5299_v4 = vpop.eup %4115  ;;  %v2600_v61 = vmul.f32 1.442695, %v2594_v7  ;;  %v2442_v29 = vor.u32 1.1754944e-38, %v2441_v33 }
 0xda8   : > { %v5301_v51 = vpop.eup %4117  ;;  %v2787_v10 = vsel %vm612_vm0, %v5299_v4, 0.0  ;;  %vm2440_vm4 = vcmp.eq.f32.partialorder %v2439_v37, 8.507059e+37 }
 0xda9   : > { %4123 = vpow2.f32 %v2600_v61  ;;  %2788 = vadd.xlane.f32.xlu2 %v2787_v10  ;;  %v2607_v11 = vsel %vm612_vm0, %v5301_v51, 0.0 }
 0xdaa   : > { %2608 = vadd.xlane.f32.xlu0 %v2607_v11 }
 0xdab   : > { %v4120_v13 = vpop.eup %4119 }
 0xdac   : > { %v2431_v53 = vmul.f32 %v4120_v13, %v2420_v22  ;;  %v5307_v9 = vpop.xlane.xlu1 %2767  ;;  %v2771_v60 = vpop.xlane.xlu0 %2770  ;;  %2692 = vrot.lane.b32.xlu1 %v5179_v26, %s4481_s28  ;;  %vm2436_vm1 = vweird.f32 %v4120_v13 }
 0xdad   : > { %v5311_v40 = vpop.eup %4121  ;;  %v2775_v18 = vsub.f32 %v5249_v48, %v2771_v60  ;;  %v5314_v21 = vpop.xlane.xlu2 %2425  ;;  %vm2437_vm3 = vmor %vm2435_vm2, %vm2436_vm1 }
 0xdae   : > { %v2432_v25 = vsub.f32 1.0, %v2431_v53  ;;  %v2613_v32 = vsel %vm612_vm0, %v5311_v40, 0.0  ;;  %4125 = vrcp.f32 %v5314_v21  ;;  %v2774_v53 = vsub.f32 %v5239_v16, %v5307_v9 }
 0xdaf   : > { %v5316_v39 = vpop.eup %4123  ;;  %v2782_v24 = vmul.f32 1.442695, %v2775_v18  ;;  %vm2463_vm11 = vweird.f32 %v5314_v21 }
 0xdb0   : > { %v2610_v50 = vsel %vm612_vm0, %v5316_v39, 0.0  ;;  %v2433_v17 = vmul.f32 %v4120_v13, %v2432_v25  ;;  %v2780_v16 = vmul.f32 1.442695, %v2774_v53 }
 0xdb1   : > { %2614 = vadd.xlane.f32.xlu2 %v2613_v32  ;;  %4127 = vpow2.f32 %v2782_v24 }
 0xdb2   : > { %2611 = vadd.xlane.f32.xlu0 %v2610_v50  ;;  %v2434_v2 = vadd.f32 %v4120_v13, %v2433_v17 }
 0xdb4   : > { %v2423_v28 = vpop.xlane.xlu1 %2422  ;;  %v2942_v48 = vpop.xlane.xlu0 %2941 }
 0xdb5   : > { %4129 = vrcp.f32 %v2423_v28  ;;  %v2945_v35 = vpop.xlane.xlu2 %2944  ;;  %v5323_v23 = vpop.eup %4125  ;;  %v2952_v56 = vsub.f32 %v5245_v47, %v2942_v48  ;;  %v2455_v58 = vand.u32 2147483648, %v2423_v28  ;;  %v2453_v22 = vand.u32 2147483647, %v2423_v28 }
 0xdb6   : > { %v2953_v6 = vsub.f32 %v5255_v55, %v2945_v35  ;;  %v2459_v47 = vmul.f32 %v5323_v23, %v5314_v21  ;;  %v2438_v55 = vsel %vm2437_vm3, %v4120_v13, %v2434_v2  ;;  %vm2449_vm6 = vweird.f32 %v2423_v28 }
 0xdb7   : > { %v5327_v20 = vpop.eup %4127  ;;  %v2956_v19 = vmul.f32 1.442695, %v2952_v56  ;;  %v2443_v49 = vsel %vm2440_vm4, %v2442_v29, %v2438_v55  ;;  %v2456_v18 = vor.u32 1.1754944e-38, %v2455_v58  ;;  %vm2454_vm8 = vcmp.eq.f32.partialorder %v2453_v22, 8.507059e+37 }
 0xdb8   : > { %v2958_v3 = vmul.f32 1.442695, %v2953_v6  ;;  %v2793_v36 = vsel %vm612_vm0, %v5327_v20, 0.0  ;;  %v2460_v45 = vsub.f32 1.0, %v2459_v47  ;;  %v2486_v10 = vmul.f32 %v5237_v38, %v2443_v49 }
 0xdb9   : > { %2794 = vadd.xlane.f32.xlu2 %v2793_v36  ;;  %4131 = vpow2.f32 %v2956_v19  ;;  %vm2464_vm9 = vweird.f32 %v5323_v23  ;;  %v2467_v19 = vand.u32 2147483647, %v5314_v21 }
 0xdba   : > { %4133 = vpow2.f32 %v2958_v3  ;;  %v2461_v60 = vmul.f32 %v5323_v23, %v2460_v45  ;;  %v2490_v50 = vpack.c.bf16 %v2486_v10, %v2486_v10  ;;  %vm5358_vm12 = vmor %vm2463_vm11, %vm2464_vm9 }
 0xdbb   : > { %v4130_v8 = vpop.eup %4129  ;;  %vm2468_vm4 = vcmp.eq.f32.partialorder %v2467_v19, 8.507059e+37 }
 0xdbc   : > { %v2445_v41 = vmul.f32 %v4130_v8, %v2423_v28  ;;  %v2948_v44 = vpop.xlane.xlu0 %2947  ;;  %v2429_v30 = vpop.xlane.xlu1 %2428  ;;  %vm2450_vm5 = vweird.f32 %v4130_v8  ;;  %v2462_v9 = vadd.f32 %v5323_v23, %v2461_v60  ;;  %v2498_v36 = vunpack.c.l.b16 %v2490_v50 }
 0xdbd   : > { %v2954_v43 = vsub.f32 %v5265_v15, %v2948_v44  ;;  %4135 = vrcp.f32 %v2429_v30  ;;  %vm2451_vm7 = vmor %vm2449_vm6, %vm2450_vm5  ;;  %v2483_v56 = vand.u32 2147483648, %v2429_v30  ;;  %v2481_v33 = vand.u32 2147483647, %v2429_v30 }
 0xdbe   : > { %v2446_v46 = vsub.f32 1.0, %v2445_v41  ;;  %v5334_v59 = vpop.xlane.xlu2 %2950  ;;  %vm2477_vm1 = vweird.f32 %v2429_v30  ;;  %v2466_v55 = vsel %vm5358_vm12, %v5323_v23, %v2462_v9 }
 0xdbf   : > { %v2960_v57 = vmul.f32 1.442695, %v2954_v43  ;;  %v5336_v7 = vpop.eup %4131  ;;  %v2484_v41 = vor.u32 1.1754944e-38, %v2483_v56  ;;  %vm2482_vm3 = vcmp.eq.f32.partialorder %v2481_v33, 8.507059e+37 }
 0xdc0   : > { %v2447_v0 = vmul.f32 %v4130_v8, %v2446_v46  ;;  %v5338_v61 = vpop.eup %4133  ;;  %v2964_v11 = vsel %vm612_vm0, %v5336_v7, 0.0 }
 0xdc1   : > { %4137 = vpow2.f32 %v2960_v57  ;;  %2965 = vadd.xlane.f32.xlu2 %v2964_v11  ;;  %v2967_v24 = vsel %vm612_vm0, %v5338_v61, 0.0 }
 0xdc2   : > { %v2448_v15 = vadd.f32 %v4130_v8, %v2447_v0  ;;  %2968 = vadd.xlane.f32.xlu0 %v2967_v24  ;;  %4139 = vpow2.f32 %v2780_v16 }
 0xdc3   : > { %v4136_v13 = vpop.eup %4135 }
 0xdc4   : > { %v2452_v25 = vsel %vm2451_vm7, %v4130_v8, %v2448_v15  ;;  %v2473_v38 = vmul.f32 %v4136_v13, %v2429_v30  ;;  %vm2478_vm10 = vweird.f32 %v4136_v13 }
 0xdc5   : > { %v2457_v32 = vsel %vm2454_vm8, %v2456_v18, %v2452_v25  ;;  %vm2479_vm2 = vmor %vm2477_vm1, %vm2478_vm10 }
 0xdc6   : > { %v2487_v17 = vmul.f32 %v5259_v63, %v2457_v32  ;;  %v2474_v28 = vsub.f32 1.0, %v2473_v38  ;;  %v2873_v48 = vpop.permute.xlu2 %2872  ;;  %v2469_v63 = vand.u32 2147483648, %v5314_v21  ;;  %v2955_v21 = vsub.f32 %v5275_v54, %v5334_v59 }
 0xdc7   : > { %v5349_v35 = vpop.eup %4137  ;;  %2888 = vmatpush.bf16.msrb.mxu3 %v2873_v48 }
 0xdc8   : > { %v2491_v6 = vpack.c.bf16 %v2487_v17, %v2487_v17  ;;  %v2475_v2 = vmul.f32 %v4136_v13, %v2474_v28  ;;  %v2970_v3 = vsel %vm612_vm0, %v5349_v35, 0.0  ;;  %v2470_v43 = vor.u32 1.1754944e-38, %v2469_v63  ;;  %v5369_v58 = vpop.eup %4139 }
 0xdc9   : > { %v2962_v45 = vmul.f32 1.442695, %v2955_v21  ;;  %v2790_v54 = vsel %vm612_vm0, %v5369_v58, 0.0 }
 0xdca   : > { %v2499_v8 = vunpack.c.l.b16 %v2491_v6  ;;  %v2476_v47 = vadd.f32 %v4136_v13, %v2475_v2  ;;  %2971 = vadd.xlane.f32.xlu0 %v2970_v3  ;;  %v2471_v49 = vsel %vm2468_vm4, %v2470_v43, %v2466_v55 }
 0xdcb   : > { %v2488_v57 = vmul.f32 %v5247_v12, %v2471_v49  ;;  %4141 = vpow2.f32 %v2962_v45 }
 0xdcc   : > { %v2480_v44 = vsel %vm2479_vm2, %v4136_v13, %v2476_v47  ;;  %v2502_v29 = vpack.c.b16 %v2499_v8, %v2498_v36 }
 0xdcd   : > { %v2485_v46 = vsel %vm2482_vm3, %v2484_v41, %v2480_v44  ;;  %v2492_v59 = vpack.c.bf16 %v2488_v57, %v2488_v57 }
 0xdce   : > { %3722 = vmatmul.msk.bf16.vlgmr.msra.gmra.mxu3 %vm612_vm0, %v2502_v29  ;;  %v2871_v30 = vpop.permute.xlu2 %2870  ;;  %v2489_v23 = vmul.f32 %v5269_v31, %v2485_v46 }
 0xdcf   : > { %2889 = vmatpush.bf16.msrb.mxu3 %v2871_v30  ;;  %v2500_v15 = vunpack.c.l.b16 %v2492_v59  ;;  %v2691_v18 = vpop.permute.xlu0 %2690 }
 0xdd0   : > { %v2493_v0 = vpack.c.bf16 %v2489_v23, %v2489_v23 }
 0xdd1   : > { %v5374_v10 = vpop.eup %4141 }
 0xdd2   : > { %v2501_v22 = vunpack.c.l.b16 %v2493_v0  ;;  %v2973_v31 = vsel %vm612_vm0, %v5374_v10, 0.0 }
 0xdd4   : > { %v2503_v11 = vpack.c.b16 %v2501_v22, %v2500_v15 }
 0xdd6   : > { %2791 = vadd.xlane.f32.xlu1 %v2790_v54 }
 0xdd9   : > { %3052 = vrot.lane.b32.xlu2 %v5179_v26, %s4483_s24 }
 0xdde   : > { %3723 = vmatmul.msk.bf16.gmra.mxu3 %vm612_vm0, %v2503_v11  ;;  %2974 = vadd.xlane.f32.xlu1 %v2973_v31 }
 0xddf   : > { %3050 = vrot.lane.b32.xlu0 %v5185_v27, %s4483_s24  ;;  %s5651_s24 = sld [smem:[#allocation31_spill]] }
 0xe06   : > { %v2606_v12 = vpop.xlane.xlu1 %2605 }
 0xe07   : > { %4143 = vrcp.f32 %v2606_v12  ;;  %v2627_v28 = vand.u32 2147483648, %v2606_v12  ;;  %vm2621_vm6 = vweird.f32 %v2606_v12  ;;  %v2625_v16 = vand.u32 2147483647, %v2606_v12 }
 0xe09   : > { %v2628_v2 = vor.u32 1.1754944e-38, %v2627_v28  ;;  %vm2626_vm10 = vcmp.eq.f32.partialorder %v2625_v16, 8.507059e+37 }
 0xe0d   : > { %v4144_v13 = vpop.eup %4143 }
 0xe0e   : > { %v2617_v53 = vmul.f32 %v4144_v13, %v2606_v12  ;;  %vm2622_vm5 = vweird.f32 %v4144_v13 }
 0xe0f   : > { %vm2623_vm7 = vmor %vm2621_vm6, %vm2622_vm5 }
 0xe10   : > { %v2618_v24 = vsub.f32 1.0, %v2617_v53 }
 0xe12   : > { %v2619_v25 = vmul.f32 %v4144_v13, %v2618_v24 }
 0xe14   : > { %v2786_v60 = vpop.xlane.xlu2 %2785  ;;  %v2620_v50 = vadd.f32 %v4144_v13, %v2619_v25 }
 0xe15   : > { %4145 = vrcp.f32 %v2786_v60  ;;  %v2807_v6 = vand.u32 2147483648, %v2786_v60  ;;  %vm2801_vm9 = vweird.f32 %v2786_v60  ;;  %v2805_v19 = vand.u32 2147483647, %v2786_v60 }
 0xe16   : > { %v2624_v56 = vsel %vm2623_vm7, %v4144_v13, %v2620_v50 }
 0xe17   : > { %v2629_v37 = vsel %vm2626_vm10, %v2628_v2, %v2624_v56  ;;  %v2808_v41 = vor.u32 1.1754944e-38, %v2807_v6  ;;  %vm2806_vm12 = vcmp.eq.f32.partialorder %v2805_v19, 8.507059e+37 }
 0xe18   : > { %v2672_v43 = vmul.f32 %v5286_v34, %v2629_v37 }
 0xe1a   : > { %v2676_v11 = vpack.c.bf16 %v2672_v43, %v2672_v43 }
 0xe1b   : > { %v4146_v26 = vpop.eup %4145 }
 0xe1c   : > { %v2797_v38 = vmul.f32 %v4146_v26, %v2786_v60  ;;  %v2789_v32 = vpop.xlane.xlu2 %2788  ;;  %vm2802_vm8 = vweird.f32 %v4146_v26 }
 0xe1d   : > { %v2609_v17 = vpop.xlane.xlu0 %2608  ;;  %4147 = vrcp.f32 %v2789_v32  ;;  %vm5383_vm11 = vmor %vm2801_vm9, %vm2802_vm8  ;;  %v2821_v49 = vand.u32 2147483648, %v2789_v32  ;;  %v2819_v57 = vand.u32 2147483647, %v2789_v32  ;;  %vm2815_vm3 = vweird.f32 %v2789_v32 }
 0xe1e   : > { %v2798_v48 = vsub.f32 1.0, %v2797_v38  ;;  %4149 = vrcp.f32 %v2609_v17  ;;  %v2693_v27 = vpop.permute.xlu1 %2692  ;;  %v2641_v45 = vand.u32 2147483648, %v2609_v17  ;;  %v2639_v54 = vand.u32 2147483647, %v2609_v17 }
 0xe1f   : > { %2708 = vmatpush.bf16.msrb.mxu1 %v2693_v27  ;;  %vm2635_vm4 = vweird.f32 %v2609_v17  ;;  %v2822_v34 = vor.u32 1.1754944e-38, %v2821_v49  ;;  %vm2820_vm7 = vcmp.eq.f32.partialorder %v2819_v57, 8.507059e+37 }
 0xe20   : > { %v2799_v9 = vmul.f32 %v4146_v26, %v2798_v48  ;;  %v2642_v13 = vor.u32 1.1754944e-38, %v2641_v45  ;;  %vm2640_vm8 = vcmp.eq.f32.partialorder %v2639_v54, 8.507059e+37 }
 0xe22   : > { %v2800_v33 = vadd.f32 %v4146_v26, %v2799_v9 }
 0xe23   : > { %v4148_v63 = vpop.eup %4147  ;;  %2709 = vmatpush.bf16.msrb.mxu1 %v2691_v18 }
 0xe24   : > { %v4150_v36 = vpop.eup %4149  ;;  %v2804_v8 = vsel %vm5383_vm11, %v4146_v26, %v2800_v33  ;;  %v2811_v47 = vmul.f32 %v4148_v63, %v2789_v32  ;;  %v5389_v55 = vpop.xlane.xlu2 %2614  ;;  %vm2816_vm1 = vweird.f32 %v4148_v63 }
 0xe25   : > { %v2631_v44 = vmul.f32 %v4150_v36, %v2609_v17  ;;  %v5391_v21 = vpop.xlane.xlu0 %2611  ;;  %4151 = vrcp.f32 %v5389_v55  ;;  %v2809_v46 = vsel %vm2806_vm12, %v2808_v41, %v2804_v8  ;;  %vm2636_vm2 = vweird.f32 %v4150_v36  ;;  %vm2817_vm5 = vmor %vm2815_vm3, %vm2816_vm1 }
 0xe26   : > { %v2812_v29 = vsub.f32 1.0, %v2811_v47  ;;  %4153 = vrcp.f32 %v5391_v21  ;;  %v2852_v59 = vmul.f32 %v5293_v62, %v2809_v46  ;;  %vm2637_vm6 = vmor %vm2635_vm4, %vm2636_vm2  ;;  %v2653_v48 = vand.u32 2147483647, %v5391_v21 }
 0xe27   : > { %v2632_v30 = vsub.f32 1.0, %v2631_v44  ;;  %v2655_v27 = vand.u32 2147483648, %v5391_v21  ;;  %v2669_v56 = vand.u32 2147483648, %v5389_v55  ;;  %v2667_v33 = vand.u32 2147483647, %v5389_v55 }
 0xe28   : > { %v2813_v23 = vmul.f32 %v4148_v63, %v2812_v29  ;;  %v2856_v26 = vpack.c.bf16 %v2852_v59, %v2852_v59  ;;  %vm2663_vm11 = vweird.f32 %v5389_v55  ;;  %vm2649_vm12 = vweird.f32 %v5391_v21 }
 0xe29   : > { %v2633_v0 = vmul.f32 %v4150_v36, %v2632_v30  ;;  %v2656_v8 = vor.u32 1.1754944e-38, %v2655_v27  ;;  %v2670_v41 = vor.u32 1.1754944e-38, %v2669_v56  ;;  %vm2654_vm3 = vcmp.eq.f32.partialorder %v2653_v48, 8.507059e+37 }
 0xe2a   : > { %v2814_v22 = vadd.f32 %v4148_v63, %v2813_v23  ;;  %v2864_v19 = vunpack.c.l.b16 %v2856_v26  ;;  %vm2668_vm4 = vcmp.eq.f32.partialorder %v2667_v33, 8.507059e+37 }
 0xe2b   : > { %v4152_v15 = vpop.eup %4151  ;;  %v2634_v31 = vadd.f32 %v4150_v36, %v2633_v0 }
 0xe2c   : > { %v4154_v12 = vpop.eup %4153  ;;  %v2818_v53 = vsel %vm2817_vm5, %v4148_v63, %v2814_v22  ;;  %v2659_v60 = vmul.f32 %v4152_v15, %v5389_v55  ;;  %v5399_v25 = vpop.xlane.xlu2 %2794  ;;  %vm2664_vm9 = vweird.f32 %v4152_v15 }
 0xe2d   : > { %v2638_v18 = vsel %vm2637_vm6, %v4150_v36, %v2634_v31  ;;  %v2823_v24 = vsel %vm2820_vm7, %v2822_v34, %v2818_v53  ;;  %v2645_v62 = vmul.f32 %v4154_v12, %v5391_v21  ;;  %vm2650_vm10 = vweird.f32 %v4154_v12  ;;  %vm2665_vm1 = vmor %vm2663_vm11, %vm2664_vm9 }
 0xe2e   : > { %v2643_v38 = vsel %vm2640_vm8, %v2642_v13, %v2638_v18  ;;  %v2853_v32 = vmul.f32 %v5299_v4, %v2823_v24  ;;  %v2660_v50 = vsub.f32 1.0, %v2659_v60  ;;  %vm2651_vm2 = vmor %vm2649_vm12, %vm2650_vm10  ;;  %4155 = vrcp.f32 %v5399_v25 }
 0xe2f   : > { %v2673_v17 = vmul.f32 %v5301_v51, %v2643_v38  ;;  %v2646_v28 = vsub.f32 1.0, %v2645_v62  ;;  %v2684_v51 = vunpack.c.l.b16 %v2676_v11 }
 0xe30   : > { %v2857_v16 = vpack.c.bf16 %v2853_v32, %v2853_v32  ;;  %v2661_v9 = vmul.f32 %v4152_v15, %v2660_v50 }
 0xe31   : > { %v2677_v6 = vpack.c.bf16 %v2673_v17, %v2673_v17  ;;  %v2647_v2 = vmul.f32 %v4154_v12, %v2646_v28 }
 0xe32   : > { %v2865_v4 = vunpack.c.l.b16 %v2857_v16  ;;  %v2662_v63 = vadd.f32 %v4152_v15, %v2661_v9 }
 0xe33   : > { %v2685_v3 = vunpack.c.l.b16 %v2677_v6  ;;  %v2648_v36 = vadd.f32 %v4154_v12, %v2647_v2 }
 0xe34   : > { %v2868_v37 = vpack.c.b16 %v2865_v4, %v2864_v19  ;;  %v2666_v47 = vsel %vm2665_vm1, %v4152_v15, %v2662_v63  ;;  %v2966_v55 = vpop.xlane.xlu2 %2965  ;;  %v5414_v45 = vpop.eup %4155 }
 0xe35   : > { %v2688_v44 = vpack.c.b16 %v2685_v3, %v2684_v51  ;;  %v2652_v29 = vsel %vm2651_vm2, %v4154_v12, %v2648_v36  ;;  %v2671_v46 = vsel %vm2668_vm4, %v2670_v41, %v2666_v47  ;;  %v2969_v30 = vpop.xlane.xlu0 %2968  ;;  %4157 = vrcp.f32 %v2966_v55 }
 0xe36   : > { %v2657_v43 = vsel %vm2654_vm3, %v2656_v8, %v2652_v29  ;;  %3730 = vmatmul.msk.bf16.vlgmr.msrb.gmra.mxu3 %vm612_vm0, %v2868_v37  ;;  %4159 = vrcp.f32 %v2969_v30  ;;  %v2675_v49 = vmul.f32 %v5311_v40, %v2671_v46  ;;  %v2839_v31 = vmul.f32 %v5414_v45, %v5399_v25 }
 0xe37   : > { %3726 = vmatmul.msk.bf16.vlgmr.msrb.gmra.mxu1 %vm612_vm0, %v2688_v44  ;;  %v2674_v21 = vmul.f32 %v5316_v39, %v2657_v43  ;;  %v2987_v40 = vand.u32 2147483648, %v2966_v55  ;;  %v3001_v53 = vand.u32 2147483648, %v2969_v30  ;;  %v2985_v18 = vand.u32 2147483647, %v2966_v55 }
 0xe38   : > { %v2679_v0 = vpack.c.bf16 %v2675_v49, %v2675_v49  ;;  %v2999_v62 = vand.u32 2147483647, %v2969_v30  ;;  %v2840_v26 = vsub.f32 1.0, %v2839_v31  ;;  %vm2981_vm7 = vweird.f32 %v2966_v55 }
 0xe39   : > { %v2678_v57 = vpack.c.bf16 %v2674_v21, %v2674_v21  ;;  %vm2995_vm8 = vweird.f32 %v2969_v30  ;;  %v2988_v50 = vor.u32 1.1754944e-38, %v2987_v40  ;;  %v3002_v48 = vor.u32 1.1754944e-38, %v3001_v53 }
 0xe3a   : > { %v2687_v13 = vunpack.c.l.b16 %v2679_v0  ;;  %vm2986_vm11 = vcmp.eq.f32.partialorder %v2985_v18, 8.507059e+37  ;;  %vm3000_vm12 = vcmp.eq.f32.partialorder %v2999_v62, 8.507059e+37  ;;  %v2841_v56 = vmul.f32 %v5414_v45, %v2840_v26 }
 0xe3b   : > { %v4158_v23 = vpop.eup %4157  ;;  %v2686_v12 = vunpack.c.l.b16 %v2678_v57  ;;  %vm2844_vm1 = vweird.f32 %v5414_v45  ;;  %v2849_v51 = vand.u32 2147483648, %v5399_v25  ;;  %vm2843_vm2 = vweird.f32 %v5399_v25 }
 0xe3c   : > { %v4160_v54 = vpop.eup %4159  ;;  %v2977_v59 = vmul.f32 %v4158_v23, %v2966_v55  ;;  %v3053_v22 = vpop.permute.xlu2 %3052  ;;  %vm2982_vm5 = vweird.f32 %v4158_v23  ;;  %v2842_v63 = vadd.f32 %v5414_v45, %v2841_v56  ;;  %vm2845_vm3 = vmor %vm2843_vm2, %vm2844_vm1 }
 0xe3d   : > { %v2991_v15 = vmul.f32 %v4160_v54, %v2969_v30  ;;  %v5416_v11 = vpop.xlane.xlu0 %2971  ;;  %3068 = vmatpush.bf16.msra.mxu1 %v3053_v22  ;;  %vm2996_vm6 = vweird.f32 %v4160_v54  ;;  %vm2983_vm9 = vmor %vm2981_vm7, %vm2982_vm5  ;;  %v2689_v17 = vpack.c.b16 %v2687_v13, %v2686_v12  ;;  %v2850_v47 = vor.u32 1.1754944e-38, %v2849_v51 }
 0xe3e   : > { %v2978_v34 = vsub.f32 1.0, %v2977_v59  ;;  %4161 = vrcp.f32 %v5416_v11  ;;  %vm2997_vm10 = vmor %vm2995_vm8, %vm2996_vm6  ;;  %v2846_v8 = vsel %vm2845_vm3, %v5414_v45, %v2842_v63  ;;  %vm3009_vm7 = vweird.f32 %v5416_v11 }
 0xe3f   : > { %v2992_v39 = vsub.f32 1.0, %v2991_v15  ;;  %v3015_v0 = vand.u32 2147483648, %v5416_v11  ;;  %v3013_v22 = vand.u32 2147483647, %v5416_v11 }
 0xe40   : > { %v2979_v60 = vmul.f32 %v4158_v23, %v2978_v34 }
 0xe41   : > { %v2993_v24 = vmul.f32 %v4160_v54, %v2992_v39  ;;  %v3016_v12 = vor.u32 1.1754944e-38, %v3015_v0 }
 0xe42   : > { %v2980_v38 = vadd.f32 %v4158_v23, %v2979_v60 }
 0xe43   : > { %v2994_v32 = vadd.f32 %v4160_v54, %v2993_v24 }
 0xe44   : > { %v5421_v28 = vpop.eup %4161  ;;  %v2984_v27 = vsel %vm2983_vm9, %v4158_v23, %v2980_v38 }
 0xe45   : > { %v2998_v16 = vsel %vm2997_vm10, %v4160_v54, %v2994_v32  ;;  %v2989_v9 = vsel %vm2986_vm11, %v2988_v50, %v2984_v27  ;;  %v3005_v19 = vmul.f32 %v5421_v28, %v5416_v11  ;;  %vm3010_vm5 = vweird.f32 %v5421_v28 }
 0xe46   : > { %v3003_v6 = vsel %vm3000_vm12, %v3002_v48, %v2998_v16  ;;  %v3032_v33 = vmul.f32 %v5336_v7, %v2989_v9  ;;  %vm5441_vm8 = vmor %vm3009_vm7, %vm3010_vm5  ;;  %vm3014_vm12 = vcmp.eq.f32.partialorder %v3013_v22, 8.507059e+37 }
 0xe47   : > { %3727 = vmatmul.msk.bf16.gmra.mxu1 %vm612_vm0, %v2689_v17  ;;  %v3033_v2 = vmul.f32 %v5338_v61, %v3003_v6  ;;  %v3006_v37 = vsub.f32 1.0, %v3005_v19  ;;  %v2847_v61 = vand.u32 2147483647, %v5399_v25 }
 0xe48   : > { %v3036_v36 = vpack.c.bf16 %v3032_v33, %v3032_v33 }
 0xe49   : > { %v2792_v4 = vpop.xlane.xlu1 %2791  ;;  %v3037_v3 = vpack.c.bf16 %v3033_v2, %v3033_v2  ;;  %v3007_v29 = vmul.f32 %v5421_v28, %v3006_v37  ;;  %vm2848_vm4 = vcmp.eq.f32.partialorder %v2847_v61, 8.507059e+37 }
 0xe4a   : > { %4163 = vrcp.f32 %v2792_v4  ;;  %v3044_v44 = vunpack.c.l.b16 %v3036_v36  ;;  %v2851_v30 = vsel %vm2848_vm4, %v2850_v47, %v2846_v8  ;;  %v2833_v25 = vand.u32 2147483647, %v2792_v4 }
 0xe4b   : > { %v3045_v41 = vunpack.c.l.b16 %v3037_v3  ;;  %v2835_v49 = vand.u32 2147483648, %v2792_v4  ;;  %v3008_v45 = vadd.f32 %v5421_v28, %v3007_v29  ;;  %v2855_v54 = vmul.f32 %v5327_v20, %v2851_v30 }
 0xe4c   : > { %vm2829_vm9 = vweird.f32 %v2792_v4  ;;  %vm2834_vm11 = vcmp.eq.f32.partialorder %v2833_v25, 8.507059e+37 }
 0xe4d   : > { %v3048_v23 = vpack.c.b16 %v3045_v41, %v3044_v44  ;;  %v2836_v34 = vor.u32 1.1754944e-38, %v2835_v49  ;;  %v3012_v39 = vsel %vm5441_vm8, %v5421_v28, %v3008_v45  ;;  %v2859_v53 = vpack.c.bf16 %v2855_v54, %v2855_v54  ;;  %v3808_v45 = vld [vmem:[#allocation11] sm:$0xff] }
 0xe4e   : > { %v3017_v18 = vsel %vm3014_vm12, %v3016_v12, %v3012_v39 }
 0xe4f   : > { %v2867_v32 = vunpack.c.l.b16 %v2859_v53  ;;  %v3034_v28 = vmul.f32 %v5349_v35, %v3017_v18 }
 0xe50   : > { %v4164_v7 = vpop.eup %4163 }
 0xe51   : > { %v2825_v43 = vmul.f32 %v4164_v7, %v2792_v4  ;;  %v2975_v46 = vpop.xlane.xlu1 %2974  ;;  %v3051_v55 = vpop.permute.xlu0 %3050  ;;  %vm2830_vm6 = vweird.f32 %v4164_v7  ;;  %v3038_v56 = vpack.c.bf16 %v3034_v28, %v3034_v28 }
 0xe52   : > { %4165 = vrcp.f32 %v2975_v46  ;;  %3069 = vmatpush.bf16.msra.mxu1 %v3051_v55  ;;  %vm2831_vm10 = vmor %vm2829_vm9, %vm2830_vm6  ;;  %v3029_v24 = vand.u32 2147483648, %v2975_v46  ;;  %v3027_v26 = vand.u32 2147483647, %v2975_v46  ;;  %vm3023_vm2 = vweird.f32 %v2975_v46  ;;  %v2531_v4 = vpop.f32.mrf.mxu3 }
 0xe53   : > { %v2826_v21 = vsub.f32 1.0, %v2825_v43  ;;  %v3046_v2 = vunpack.c.l.b16 %v3038_v56 }
 0xe54   : > { %v3030_v48 = vor.u32 1.1754944e-38, %v3029_v24  ;;  %vm3028_vm4 = vcmp.eq.f32.partialorder %v3027_v26, 8.507059e+37 }
 0xe55   : > { %v2827_v57 = vmul.f32 %v4164_v7, %v2826_v21 }
 0xe57   : > { %v2828_v15 = vadd.f32 %v4164_v7, %v2827_v57  ;;  %3734 = vmatmul.msk.bf16.vlgmr.msra.gmra.mxu1 %vm612_vm0, %v3048_v23  ;;  %v3809_v23 = vld [vmem:[#allocation11 + $0x8] sm:$0xff] }
 0xe58   : > { %v4166_v31 = vpop.eup %4165  ;;  %3175 = vmatpush.bf16.msrb.mxu2 %v3809_v23 }
 0xe59   : > { %v2832_v40 = vsel %vm2831_vm10, %v4164_v7, %v2828_v15  ;;  %v3019_v20 = vmul.f32 %v4166_v31, %v2975_v46  ;;  %vm3024_vm1 = vweird.f32 %v4166_v31 }
 0xe5a   : > { %v2837_v13 = vsel %vm2834_vm11, %v2836_v34, %v2832_v40  ;;  %vm3025_vm3 = vmor %vm3023_vm2, %vm3024_vm1  ;;  %v2533_v63 = vpop.f32.mrf.mxu3 }
 0xe5b   : > { %v3020_v60 = vsub.f32 1.0, %v3019_v20  ;;  %v2854_v11 = vmul.f32 %v5369_v58, %v2837_v13 }
 0xe5c   : > { %3176 = vmatpush.bf16.msrb.mxu2 %v3808_v45 }
 0xe5d   : > { %v3021_v62 = vmul.f32 %v4166_v31, %v3020_v60  ;;  %v2858_v38 = vpack.c.bf16 %v2854_v11, %v2854_v11 }
 0xe5f   : > { %v3022_v50 = vadd.f32 %v4166_v31, %v3021_v62  ;;  %v2866_v17 = vunpack.c.l.b16 %v2858_v38 }
 0xe61   : > { %v3026_v27 = vsel %vm3025_vm3, %v4166_v31, %v3022_v50  ;;  %v2869_v16 = vpack.c.b16 %v2867_v32, %v2866_v17 }
 0xe62   : > { %v3031_v9 = vsel %vm3028_vm4, %v3030_v48, %v3026_v27  ;;  %v2536_v35 = vpop.f32.mrf.mxu3 }
 0xe63   : > { %3731 = vmatmul.msk.bf16.gmra.mxu3 %vm612_vm0, %v2869_v16  ;;  %v3035_v58 = vmul.f32 %v5374_v10, %v3031_v9 }
 0xe65   : > { %v3039_v6 = vpack.c.bf16 %v3035_v58, %v3035_v58 }
 0xe67   : > { %v3047_v33 = vunpack.c.l.b16 %v3039_v6 }
 0xe69   : > { %v3049_v19 = vpack.c.b16 %v3047_v33, %v3046_v2  ;;  %v4016_v2 = vld [vmem:[%s5607_s10] ss:$0 sm:$0xff] }
 0xe6a   : > { %v2538_v51 = vpop.f32.mrf.mxu3 }
 0xe6b   : > { %3735 = vmatmul.msk.bf16.gmra.mxu1 %vm612_vm0, %v3049_v19 }
 0xeb4   : > { %v2711_v3 = vpop.f32.mrf.mxu1 }
 0xeb9   : > { %v2891_v36 = vpop.f32.mrf.mxu3 }
 0xebc   : > { %v2713_v37 = vpop.f32.mrf.mxu1 }
 0xebd   : > { %v3975_v61 = vpack.i.bf16 %v2713_v37, %v2711_v3 }
 0xebf   : > { %3976 = vrot.lane.b32.xlu1 %v3975_v61, %s4485_s27 }
 0xec1   : > { %v2893_v7 = vpop.f32.mrf.mxu3 }
 0xec2   : > { %v3980_v8 = vpack.i.bf16 %v2893_v7, %v2891_v36 }
 0xec4   : > { %v2716_v10 = vpop.f32.mrf.mxu1  ;;  %3981 = vrot.lane.b32.xlu2 %v3980_v8, %s4484_s2 }
 0xecc   : > { %v2718_v47 = vpop.f32.mrf.mxu1 }
 0xecd   : > { %v3990_v41 = vpack.i.bf16 %v2718_v47, %v2716_v10 }
 0xecf   : > { %3991 = vrot.lane.b32.xlu0 %v3990_v41, %s4485_s27 }
 0xed4   : > { %v3071_v44 = vpop.f32.mrf.mxu1 }
 0xedc   : > { %v3073_v29 = vpop.f32.mrf.mxu1 }
 0xedd   : > { %v3985_v43 = vpack.i.bf16 %v3073_v29, %v3071_v44 }
 0xedf   : > { %3986 = vrot.lane.b32.xlu2 %v3985_v43, %s4486_s16 }
 0xee6   : > { %v2896_v46 = vpop.f32.mrf.mxu3 }
 0xee8   : > { %v3076_v55 = vpop.f32.mrf.mxu1 }
 0xeee   : > { %v2898_v30 = vpop.f32.mrf.mxu3 }
 0xeef   : > { %v3995_v21 = vpack.i.bf16 %v2898_v30, %v2896_v46 }
 0xef0   : > { %v3078_v25 = vpop.f32.mrf.mxu1 }
 0xef1   : > { %v4000_v49 = vpack.i.bf16 %v3078_v25, %v3076_v55  ;;  %3996 = vrot.lane.b32.xlu2 %v3995_v21, %s4484_s2  ;;  %s3611_s2 = sshll.u32 %s599_s15, 5 }
 0xef2   : > { %s601_s25 = scalar_lea.vmem [#allocation14], %s3611_s2 }
 0xef3   : > { %4001 = vrot.lane.b32.xlu1 %v4000_v49, %s4486_s16  ;;  %s3459_s29 = sshll.u32 %s601_s25, 4  ;;  %s3460_s29 = int_to_ptr.vmem [resolvable:$true] %s3459_s29 }
 0xf1e   : > { %v3982_v57 = vpop.permute.xlu2 %3981 }
 0xf1f   : > { %v3984_v31 = vunpack.i.h.bf16 %v3982_v57  ;;  %v3983_v34 = vunpack.i.l.bf16 %v3982_v57 }
 0xf31   : > { %v3977_v0 = vpop.permute.xlu1 %3976 }
 0xf32   : > { %v3979_v54 = vunpack.i.h.bf16 %v3977_v0  ;;  %v3978_v59 = vunpack.i.l.bf16 %v3977_v0 }
 0xf34   : > { %v3130_v22 = vsel %vm865_vm15, %v2533_v63, %v3979_v54  ;;  %v3129_v15 = vsel %vm865_vm15, %v2531_v4, %v3978_v59 }
 0xf35   : > { %v3133_v12 = vsel %vm2035_vm14, %v3129_v15, %v3983_v34  ;;  %v3134_v13 = vsel %vm2035_vm14, %v3130_v22, %v3984_v31 }
 0xf39   : > { %v3987_v39 = vpop.permute.xlu2 %3986 }
 0xf3a   : > { %v3989_v40 = vunpack.i.h.bf16 %v3987_v39  ;;  %v3988_v20 = vunpack.i.l.bf16 %v3987_v39  ;;  %v3811_v39 = vld [vmem:[#allocation13 + $0x8] sm:$0xff] }
 0xf3b   : > { %3332 = vmatpush.bf16.msra.mxu3 %v3811_v39 }
 0xf3c   : > { %v3137_v53 = vsel %vm2040_vm13, %v3133_v12, %v3988_v20  ;;  %v3138_v60 = vsel %vm2040_vm13, %v3134_v13, %v3989_v40  ;;  %v3810_v20 = vld [vmem:[#allocation13] sm:$0xff] }
 0xf3d   : > { %v3141_v11 = vpack.c.bf16 %v3138_v60, %v3137_v53 }
 0xf3f   : > { %3744 = vmatmul.msk.bf16.vlgmr.msrb.gmra.mxu2 %vm612_vm0, %v3141_v11  ;;  %3333 = vmatpush.bf16.msra.mxu3 %v3810_v20  ;;  %v3815_v20 = vld [vmem:[%s5610_s13 + $0x18] sm:$0xff] }
 0xf41   : > { %v3992_v18 = vpop.permute.xlu0 %3991 }
 0xf42   : > { %v3994_v62 = vunpack.i.h.bf16 %v3992_v18  ;;  %v3993_v26 = vunpack.i.l.bf16 %v3992_v18 }
 0xf44   : > { %v3132_v17 = vsel %vm865_vm15, %v2538_v51, %v3994_v62  ;;  %v3131_v28 = vsel %vm865_vm15, %v2536_v35, %v3993_v26 }
 0xf4b   : > { %v3997_v24 = vpop.permute.xlu2 %3996 }
 0xf4c   : > { %v3999_v38 = vunpack.i.h.bf16 %v3997_v24  ;;  %v3998_v32 = vunpack.i.l.bf16 %v3997_v24 }
 0xf4e   : > { %v3136_v16 = vsel %vm2035_vm14, %v3132_v17, %v3999_v38  ;;  %v3135_v9 = vsel %vm2035_vm14, %v3131_v28, %v3998_v32 }
 0xf65   : > { %v4002_v50 = vpop.permute.xlu1 %4001 }
 0xf66   : > { %v4004_v48 = vunpack.i.h.bf16 %v4002_v50  ;;  %v4003_v27 = vunpack.i.l.bf16 %v4002_v50 }
 0xf68   : > { %v3139_v58 = vsel %vm2040_vm13, %v3135_v9, %v4003_v27  ;;  %v3140_v56 = vsel %vm2040_vm13, %v3136_v16, %v4004_v48  ;;  %v4017_v27 = vld [vmem:[#allocation2 + $0x2] ss:$0 sm:$0xff] }
 0xf69   : > { %v3142_v6 = vpack.c.bf16 %v3140_v56, %v3139_v58  ;;  %v4018_v56 = vld [vmem:[#allocation5 + $0x2] ss:$0 sm:$0xff] }
 0xf6b   : > { %3745 = vmatmul.msk.bf16.gmra.mxu2 %vm612_vm0, %v3142_v6 }
 0xfc2   : > { %v3178_v33 = vpop.f32.mrf.mxu2 }
 0xfc3   : > { %v3179_v19 = vadd.f32 %v4016_v2, %v3178_v33 }
 0xfc5   : > { %v5479_v4 = vadd.f32 %v3179_v19, %v5107_v42 }
 0xfc7   : > { %v3192_v63 = vsel %vm612_vm0, %v5479_v4, 0.0 }
 0xfc8   : > { %3193 = vadd.xlane.f32.xlu0 %v3192_v63 }
 0xfca   : > { %v3180_v35 = vpop.f32.mrf.mxu2 }
 0xfcb   : > { %v3181_v51 = vadd.f32 %v4016_v2, %v3180_v35 }
 0xfcd   : > { %v5484_v3 = vadd.f32 %v3181_v51, %v5112_v1 }
 0xfcf   : > { %v3195_v36 = vsel %vm612_vm0, %v5484_v3, 0.0 }
 0xfd0   : > { %3196 = vadd.xlane.f32.xlu2 %v3195_v36 }
 0xfee   : > { %v3183_v37 = vpop.f32.mrf.mxu2 }
 0xfef   : > { %v3184_v61 = vadd.f32 %v4016_v2, %v3183_v37 }
 0xff1   : > { %v5489_v7 = vadd.f32 %v3184_v61, %v5117_v52  ;;  %v3819_v61 = vld [vmem:[%s5610_s13 + $0x38] sm:$0xff] }
 0xff2   : > { %3419 = vmatpush.bf16.msra.mxu0 %v3819_v61 }
 0xff3   : > { %v3198_v42 = vsel %vm612_vm0, %v5489_v7, 0.0 }
 0xff4   : > { %3199 = vadd.xlane.f32.xlu1 %v3198_v42 }
 0xff6   : > { %v3185_v8 = vpop.f32.mrf.mxu2 }
 0xff7   : > { %v3186_v10 = vadd.f32 %v4016_v2, %v3185_v8 }
 0xff9   : > { %v5494_v47 = vadd.f32 %v3186_v10, %v5122_v5  ;;  %v3818_v10 = vld [vmem:[%s5610_s13 + $0x30] sm:$0xff] }
 0xffa   : > { %3420 = vmatpush.bf16.msra.mxu0 %v3818_v10 }
 0xffb   : > { %v3201_v1 = vsel %vm612_vm0, %v5494_v47, 0.0 }
 0xffc   : > { %3202 = vadd.xlane.f32.xlu2 %v3201_v1 }
0x103b   : > { %v3194_v41 = vpop.xlane.xlu0 %3193 }
0x103c   : > { %v3204_v44 = vmul.f32 %v3194_v41, %v4697_v14 }
0x103e   : > { %v3208_v29 = vsub.f32 %v5479_v4, %v3204_v44 }
0x1040   : > { %v3212_v52 = vmul.f32 %v3208_v29, %v3208_v29 }
0x1042   : > { %v3216_v43 = vsel %vm612_vm0, %v3212_v52, 0.0 }
0x1043   : > { %v3197_v46 = vpop.xlane.xlu2 %3196  ;;  %3217 = vadd.xlane.f32.xlu0 %v3216_v43 }
0x1044   : > { %v3205_v55 = vmul.f32 %v3197_v46, %v4697_v14 }
0x1046   : > { %v3209_v30 = vsub.f32 %v5484_v3, %v3205_v55 }
0x1048   : > { %v3213_v5 = vmul.f32 %v3209_v30, %v3209_v30 }
0x104a   : > { %v3219_v21 = vsel %vm612_vm0, %v3213_v5, 0.0 }
0x104b   : > { %3220 = vadd.xlane.f32.xlu1 %v3219_v21 }
0x1067   : > { %v3200_v25 = vpop.xlane.xlu1 %3199 }
0x1068   : > { %v3206_v49 = vmul.f32 %v3200_v25, %v4697_v14 }
0x106a   : > { %v5506_v23 = vsub.f32 %v5489_v7, %v3206_v49 }
0x106c   : > { %v3214_v45 = vmul.f32 %v5506_v23, %v5506_v23 }
0x106e   : > { %v3222_v57 = vsel %vm612_vm0, %v3214_v45, 0.0 }
0x106f   : > { %3223 = vadd.xlane.f32.xlu2 %v3222_v57  ;;  %v3203_v0 = vpop.xlane.xlu2 %3202 }
0x1070   : > { %v3207_v54 = vmul.f32 %v3203_v0, %v4697_v14 }
0x1072   : > { %v5513_v59 = vsub.f32 %v5494_v47, %v3207_v54 }
0x1074   : > { %v3215_v22 = vmul.f32 %v5513_v59, %v5513_v59 }
0x1076   : > { %v3225_v15 = vsel %vm612_vm0, %v3215_v22, 0.0 }
0x1077   : > { %3226 = vadd.xlane.f32.xlu0 %v3225_v15 }
0x10b6   : > { %v3218_v31 = vpop.xlane.xlu0 %3217 }
0x10b7   : > { %v3228_v34 = vmul.f32 %v3218_v31, %v4697_v14 }
0x10b9   : > { %v3232_v40 = vadd.f32 1e-05, %v3228_v34 }
0x10bb   : > { %4167 = vrsqrt.f32 %v3232_v40  ;;  %vm3242_vm14 = vweird.f32 %v3232_v40 }
0x10be   : > { %v3221_v12 = vpop.xlane.xlu1 %3220 }
0x10bf   : > { %v3229_v13 = vmul.f32 %v3221_v12, %v4697_v14  ;;  %v3812_v12 = vld [vmem:[%s5610_s13] sm:$0xff] }
0x10c1   : > { %v4168_v53 = vpop.eup %4167  ;;  %v3233_v60 = vadd.f32 1e-05, %v3229_v13 }
0x10c2   : > { %v3237_v11 = vmul.f32 %v4168_v53, %v3232_v40  ;;  %vm3243_vm15 = vweird.f32 %v4168_v53 }
0x10c3   : > { %4169 = vrsqrt.f32 %v3233_v60  ;;  %vm3244_vm13 = vmor %vm3242_vm14, %vm3243_vm15  ;;  %vm3252_vm6 = vweird.f32 %v3233_v60 }
0x10c4   : > { %v3238_v18 = vmul.f32 %v4168_v53, %v3237_v11 }
0x10c6   : > { %v3239_v24 = vmul.f32 0.5, %v3238_v18 }
0x10c8   : > { %v3240_v62 = vsub.f32 1.5, %v3239_v24 }
0x10c9   : > { %v4170_v26 = vpop.eup %4169 }
0x10ca   : > { %v3241_v38 = vmul.f32 %v4168_v53, %v3240_v62  ;;  %v3247_v32 = vmul.f32 %v4170_v26, %v3233_v60  ;;  %vm3253_vm5 = vweird.f32 %v4170_v26 }
0x10cb   : > { %vm3254_vm7 = vmor %vm3252_vm6, %vm3253_vm5 }
0x10cc   : > { %v3248_v50 = vmul.f32 %v4170_v26, %v3247_v32  ;;  %v3245_v17 = vsel %vm3244_vm13, %v4168_v53, %v3241_v38  ;;  %v4019_v53 = vld [vmem:[%s5609_s12] ss:$0 sm:$0xff] }
0x10cd   : > { %v3276_v16 = vmul.f32 %v3245_v17, %v3208_v29  ;;  %v3817_v29 = vld [vmem:[%s5610_s13 + $0x28] sm:$0xff] }
0x10ce   : > { %v3249_v28 = vmul.f32 0.5, %v3248_v50  ;;  %3421 = vmatpush.bf16.msra.mxu0 %v3817_v29 }
0x10cf   : > { %v3285_v6 = vmul.f32 %v4017_v27, %v3276_v16  ;;  %v4020_v16 = vld [vmem:[%s5651_s24] ss:$0 sm:$0xff] }
0x10d0   : > { %v3250_v48 = vsub.f32 1.5, %v3249_v28 }
0x10d1   : > { %v3294_v19 = vadd.f32 %v4018_v56, %v3285_v6 }
0x10d2   : > { %v3251_v9 = vmul.f32 %v4170_v26, %v3250_v48 }
0x10d4   : > { %v3255_v58 = vsel %vm3254_vm7, %v4170_v26, %v3251_v9 }
0x10d5   : > { %v3277_v2 = vmul.f32 %v3255_v58, %v3209_v30 }
0x10d7   : > { %v3286_v33 = vmul.f32 %v4017_v27, %v3277_v2 }
0x10d9   : > { %v3295_v63 = vadd.f32 %v4018_v56, %v3286_v33 }
0x10db   : > { %v3298_v35 = vpack.c.bf16 %v3295_v63, %v3294_v19 }
0x10dd   : > { %3754 = vmatmul.msk.bf16.vlgmr.msra.gmra.mxu3 %vm612_vm0, %v3298_v35 }
0x10e2   : > { %v3224_v51 = vpop.xlane.xlu2 %3223 }
0x10e3   : > { %v3230_v36 = vmul.f32 %v3224_v51, %v4697_v14 }
0x10e5   : > { %v3234_v37 = vadd.f32 1e-05, %v3230_v36 }
0x10e7   : > { %4171 = vrsqrt.f32 %v3234_v37  ;;  %vm3262_vm9 = vweird.f32 %v3234_v37 }
0x10ea   : > { %v3227_v42 = vpop.xlane.xlu0 %3226 }
0x10eb   : > { %v3231_v8 = vmul.f32 %v3227_v42, %v4697_v14  ;;  %v3816_v14 = vld [vmem:[%s5610_s13 + $0x20] sm:$0xff] }
0x10ec   : > { %3422 = vmatpush.bf16.msra.mxu0 %v3816_v14 }
0x10ed   : > { %v4172_v1 = vpop.eup %4171  ;;  %v3235_v41 = vadd.f32 1e-05, %v3231_v8 }
0x10ee   : > { %v3257_v44 = vmul.f32 %v4172_v1, %v3234_v37  ;;  %vm3263_vm8 = vweird.f32 %v4172_v1 }
0x10ef   : > { %4173 = vrsqrt.f32 %v3235_v41  ;;  %vm3264_vm10 = vmor %vm3262_vm9, %vm3263_vm8  ;;  %vm3272_vm12 = vweird.f32 %v3235_v41 }
0x10f0   : > { %v3258_v52 = vmul.f32 %v4172_v1, %v3257_v44  ;;  %3423 = vmatpush.bf16.msra.mxu0 %v3815_v20 }
0x10f2   : > { %v3259_v43 = vmul.f32 0.5, %v3258_v52 }
0x10f4   : > { %v3260_v46 = vsub.f32 1.5, %v3259_v43 }
0x10f5   : > { %v4174_v55 = vpop.eup %4173 }
0x10f6   : > { %v3261_v30 = vmul.f32 %v4172_v1, %v3260_v46  ;;  %v3267_v5 = vmul.f32 %v4174_v55, %v3235_v41  ;;  %vm3273_vm11 = vweird.f32 %v4174_v55 }
0x10f7   : > { %vm3274_vm1 = vmor %vm3272_vm12, %vm3273_vm11 }
0x10f8   : > { %v3268_v21 = vmul.f32 %v4174_v55, %v3267_v5  ;;  %v3265_v25 = vsel %vm3264_vm10, %v4172_v1, %v3261_v30 }
0x10f9   : > { %v3278_v57 = vmul.f32 %v3265_v25, %v5506_v23  ;;  %v3814_v23 = vld [vmem:[%s5610_s13 + $0x10] sm:$0xff] }
0x10fa   : > { %v3269_v49 = vmul.f32 0.5, %v3268_v21  ;;  %3424 = vmatpush.bf16.msra.mxu0 %v3814_v23 }
0x10fb   : > { %v3287_v15 = vmul.f32 %v4017_v27, %v3278_v57 }
0x10fc   : > { %v3270_v45 = vsub.f32 1.5, %v3269_v49 }
0x10fd   : > { %v3296_v34 = vadd.f32 %v4018_v56, %v3287_v15 }
0x10fe   : > { %v3271_v0 = vmul.f32 %v4174_v55, %v3270_v45 }
0x1100   : > { %v3275_v54 = vsel %vm3274_vm1, %v4174_v55, %v3271_v0 }
0x1101   : > { %v3279_v22 = vmul.f32 %v3275_v54, %v5513_v59  ;;  %v3813_v59 = vld [vmem:[%s5610_s13 + $0x8] sm:$0xff] }
0x1102   : > { %3425 = vmatpush.bf16.msra.mxu0 %v3813_v59 }
0x1103   : > { %v3288_v31 = vmul.f32 %v4017_v27, %v3279_v22 }
0x1105   : > { %v3297_v39 = vadd.f32 %v4018_v56, %v3288_v31 }
0x1106   : > { %3426 = vmatpush.bf16.msra.mxu0 %v3812_v12 }
0x1107   : > { %v3299_v40 = vpack.c.bf16 %v3297_v39, %v3296_v34 }
0x1109   : > { %3755 = vmatmul.msk.bf16.gmra.mxu3 %vm612_vm0, %v3299_v40 }
0x1160   : > { %v3335_v13 = vpop.f32.mrf.mxu3 }
0x1161   : > { %v3336_v60 = vadd.f32 %v4019_v53, %v3335_v13 }
0x1163   : > { %v3345_v24 = vmax.f32 %v3336_v60, 0.0 }
0x1168   : > { %v3337_v11 = vpop.f32.mrf.mxu3 }
0x1169   : > { %v3338_v18 = vadd.f32 %v4019_v53, %v3337_v11 }
0x116b   : > { %v3346_v62 = vmax.f32 %v3338_v18, 0.0 }
0x116d   : > { %v3349_v26 = vpack.c.bf16 %v3346_v62, %v3345_v24 }
0x116f   : > { %3427 = vmatmul.bf16.vlgmr.msra.gmra.mxu0 %v3349_v26 }
0x118c   : > { %v3340_v38 = vpop.f32.mrf.mxu3 }
0x118d   : > { %v3341_v32 = vadd.f32 %v4019_v53, %v3340_v38 }
0x118f   : > { %v3347_v28 = vmax.f32 %v3341_v32, 0.0 }
0x1194   : > { %v3342_v50 = vpop.f32.mrf.mxu3 }
0x1195   : > { %v3343_v17 = vadd.f32 %v4019_v53, %v3342_v50 }
0x1197   : > { %v3348_v48 = vmax.f32 %v3343_v17, 0.0 }
0x1199   : > { %v3350_v27 = vpack.c.bf16 %v3348_v48, %v3347_v28 }
0x119b   : > { %3432 = vmatmul.bf16.gmra.mxu0 %v3350_v27 }
0x11ec   : > { %v3428_v9 = vpop.f32.mrf.mxu0 }
0x11ed   : > { %v3429_v58 = vadd.f32 %v4020_v16, %v3428_v9 }
0x11ef   : > { %v3438_v56 = vadd.f32 %v3429_v58, %v5479_v4 }
0x11f1   : > { %3442 = vst.msk [vmem:[%s601_s25] sm:$0xff] %vm612_vm0, %v3438_v56 }
0x11f4   : > { %v3430_v6 = vpop.f32.mrf.mxu0 }
0x11f5   : > { %v3431_v2 = vadd.f32 %v4020_v16, %v3430_v6 }
0x11f7   : > { %v3439_v33 = vadd.f32 %v3431_v2, %v5484_v3 }
0x11f9   : > { %3443 = vst.msk [vmem:[%s601_s25 + $0x8] sm:$0xff] %vm612_vm0, %v3439_v33 }
0x1218   : > { %v3433_v19 = vpop.f32.mrf.mxu0 }
0x1219   : > { %v3434_v63 = vadd.f32 %v4020_v16, %v3433_v19 }
0x121b   : > { %v3440_v35 = vadd.f32 %v3434_v63, %v5489_v7 }
0x121d   : > { %3444 = vst.msk [vmem:[%s601_s25 + $0x10] sm:$0xff] %vm612_vm0, %v3440_v35 }
0x1220   : > { %v3435_v4 = vpop.f32.mrf.mxu0 }
0x1221   : > { %v3436_v51 = vadd.f32 %v4020_v16, %v3435_v4 }
0x1223   : > { %v3441_v3 = vadd.f32 %v3436_v51, %v5494_v47 }
0x1225   : > { %3445 = vst.msk [vmem:[%s601_s25 + $0x18] sm:$0xff] %vm612_vm0, %v3441_v3 }
0x1226   : > { %4416 = shalt.err (!%p4413_p8)
}
0x1227   : > { %s4487_s15 = smov 128  }
0x1228   : > { %3851 = dma.vmem_to_hbm [thread:$0]  (%p4606_p5), %s3460_s29, 512, %s3462_s23, %s3447_s22, %s4487_s15, %s4487_s15, %s4485_s27  }
0x1229 PF: > { %s5655_s25 = sld [smem:[#allocation22_spill]] }
0x122a   : > { %s5656_s14 = sld [smem:[#allocation20_spill]] }
0x122f   : > { %p3893_p9 = scmp.ge.s32.totalorder %s5655_s25, 2 }
0x1230   : > { %s3476_s9 = sand.u32 1, %s5656_s14  }
0x1231   : > { %p3876_p10 = pnand %p3893_p9, %p4610_p6  ;;  %s3477_s20 = scalar_lea.sflag [#allocation4], %s3476_s9 }
0x1233   : > { %p3877_p11 = pneg %p3876_p10 }
0x1235   : > { %4450 = dma.done.wait (%p3877_p11), %s3477_s20, 512  }
0x1236   : > { %4452 = vsyncadd (%p3877_p11), %s3477_s20, 4294966784  ;;  %s5658_s21 = sld [smem:[#allocation23_spill]]  ;;  %s5661_s18 = smov %s4459_s19 }
0x1237   : > { %s5659_s17 = sld [smem:[#allocation21_spill]] }
0x1238   : > { %s5660_s20 = sld [smem:[#allocation24_spill]] }
0x123c   : > { %p29_p12 = scmp.ge.s32.totalorder %s5658_s21, 4  }
0x123d   : > { %s5662_s19 = smov %s5659_s17 }
0x123e   :  { %31 = sbr.rel (!%p29_p12) target bundleno = 14 (0xe), region = 156 }
0x1243   :  { %3483 = vsyncpa [#allocation3], 1 }
0x1244   :  { %3485 = vsyncpa [#allocation3 + $0x1], 1 }
0x1245   :  { %3486 = vsyncpa [#allocation6], 1 }
0x1246   :  { %3487 = vsyncpa [#allocation9], 1 }
0x1247   :  { %3488 = vsyncpa [#allocation12], 1 }
0x1248   :  { %3489 = vsyncpa [#allocation4], 1 }
0x1249   :  { %3491 = vsyncpa [#allocation4 + $0x1], 1 }

// kernel: tpu_custom_call.1
= control target key start
LH: loop header
LB: loop body
LE: loop exit
PB: predicated region body
PF: predicated region fallthrough
CT: control target
= control target key end

     0   :  { %s5597_s0 = inlined_call_operand.vmem [shape: f32[2,32,32], index: 0, kind: input, shape index: {}]   ;;  %s5598_s1 = inlined_call_operand.hbm [shape: f32[3,1,32], index: 1, kind: input, shape index: {}]   ;;  %s5599_s2 = inlined_call_operand.hbm [shape: f32[3,1,32], index: 2, kind: input, shape index: {}]   ;;  %s5600_s3 = inlined_call_operand.hbm [shape: bf16[3,32,32], index: 3, kind: input, shape index: {}]   ;;  %s5601_s4 = inlined_call_operand.vmem [shape: f32[3,1,32], index: 4, kind: input, shape index: {}]   ;;  %s5602_s5 = inlined_call_operand.vmem [shape: bf16[32,32], index: 5, kind: input, shape index: {}]   ;;  %s5603_s6 = inlined_call_operand.hbm [shape: f32[1,32], index: 6, kind: input, shape index: {}]   ;;  %s5604_s7 = inlined_call_operand.hbm [shape: bf16[3,32,32], index: 7, kind: input, shape index: {}]   ;;  %s5605_s8 = inlined_call_operand.vmem [shape: f32[3,1,32], index: 8, kind: input, shape index: {}]   ;;  %s5606_s9 = inlined_call_operand.hbm [shape: bf16[32,32], index: 9, kind: input, shape index: {}]   ;;  %s5607_s10 = inlined_call_operand.vmem [shape: f32[1,32], index: 10, kind: input, shape index: {}]   ;;  %s5608_s11 = inlined_call_operand.hbm [shape: bf16[32,128], index: 11, kind: input, shape index: {}]   ;;  %s5609_s12 = inlined_call_operand.vmem [shape: f32[1,128], index: 12, kind: input, shape index: {}]   ;;  %s5610_s13 = inlined_call_operand.vmem [shape: bf16[128,32], index: 13, kind: input, shape index: {}]   ;;  %s5611_s14 = inlined_call_operand.vmem [shape: f32[1,32], index: 14, kind: input, shape index: {}]   ;;  %s5612_s15 = inlined_call_operand.hbm [shape: f32[2,32,32], index: 15, kind: output, shape index: {}]  }
   0x1   :  { %5622 = sst [smem:[#allocation27_spill]] %s5598_s1 }
   0x2   :  { %5623 = sst [smem:[#allocation28_spill]] %s5599_s2 }
   0x3   :  { %5624 = sst [smem:[#allocation29_spill]] %s5603_s6 }
   0x4   :  { %5625 = sst [smem:[#allocation30_spill]] %s5606_s9 }
   0x5   :  { %5626 = sst [smem:[#allocation31_spill]] %s5611_s14 }
   0x6   :  { %5627 = sst [smem:[#allocation32_spill]] %s5612_s15 }
   0x7   :  { %20 = vsyncpa [#allocation3], 0 }
   0x8   :  { %21 = vsyncpa [#allocation6], 0 }
   0x9   :  { %22 = vsyncpa [#allocation9], 0 }
   0xa   :  { %23 = vsyncpa [#allocation12], 0 }
   0xb   :  { %24 = vsyncpa [#allocation4], 0 }
   0xc   :  { %26 = vsyncpa [#allocation4 + $0x1], 0  ;;  %s4568_s18 = smov 0   ;;  %s4570_s19 = smov 0  }
   0xd   :  { %s4572_s20 = smov 0   ;;  %s4574_s21 = smov 0  }
   0xe LB: > { %5628 = sst [smem:[#allocation20_spill]] %s4455_s18  ;;  %s4589_s22 = sadd.s32 4294967295, %s4467_s21   ;;  %s4467_s21 = sphi %s4574_s21, %s5658_s21   ;;  %s4463_s20 = sphi %s4572_s20, %s5660_s20   ;;  %s4459_s19 = sphi %s4570_s19, %s5662_s19   ;;  %s4455_s18 = sphi %s4568_s18, %s5661_s18  }
   0xf   : > { %5629 = sst [smem:[#allocation21_spill]] %s4463_s20  ;;  %s3593_s23 = sadd.s32 4294967294, %s4467_s21  }
  0x10   : > { %5630 = sst [smem:[#allocation22_spill]] %s4467_s21  ;;  %s4593_s24 = sadd.s32 1, %s4467_s21  }
  0x11   : > { %5631 = sst [smem:[#allocation23_spill]] %s4593_s24  ;;  %s359_s25 = sadd.s32 1, %s4463_s20 }
  0x12   : > { %s356_s26 = ssub.s32 %s4467_s21, %s4593_s24  ;;  %p369_p0 = scmp.ne.s32.totalorder %s4463_s20, %s4459_s19 }
  0x13   : > { %p357_p1 = scmp.eq.s32.totalorder %s356_s26, 0  ;;  %p370_p2 = scmp.eq.s32.totalorder %s4589_s22, 1 }
  0x14   : > { %p375_p3 = scmp.ne.s32.totalorder %s4459_s19, %s4455_s18  ;;  %p376_p4 = scmp.eq.s32.totalorder %s3593_s23, 1 }
  0x15   : > { %s4604_s27 = scalar_select %p357_p1, %s4463_s20, %s359_s25  }
  0x16   : > { %p4606_p5 = por %p370_p2, %p369_p0  ;;  %p4610_p6 = por %p376_p4, %p375_p3 }
  0x17   : > { %5632 = sst [smem:[#allocation24_spill]] %s4604_s27  ;;  %p3594_p7 = scmp.ge.s32.totalorder %s4467_s21, 1 }
  0x18   : > { %s5633_s28 = scalar_select %p4606_p5, 1, 0 }
  0x19   : > { %s5635_s29 = scalar_select %p4610_p6, 1, 0 }
  0x1a   : > { %5634 = sst [smem:[#allocation25_spill]] %s5633_s28  ;;  %p383_p8 = scmp.lt.s32.totalorder %s4467_s21, 3 }
  0x1b   : > { %5636 = sst [smem:[#allocation26_spill]] %s5635_s29  ;;  %p3879_p9 = scmp.eq.s32.totalorder %s4589_s22, 0 }
  0x1c   : > { %p4617_p10 = pnand %p3594_p7, %p383_p8  ;;  %s5638_s2 = sld [smem:[#allocation28_spill]] }
  0x1d   : > { %s5639_s6 = sld [smem:[#allocation29_spill]]  ;;  %s4469_s24 = smov [#allocation5]  }
  0x1e   : > { %p3853_p11 = pneg %p4617_p10  ;;  %s410_s29 = sshll.u32 %s4469_s24, 4  ;;  %s411_s29 = int_to_ptr.vmem [resolvable:$true] %s410_s29 }
  0x1f   : > { %s4470_s16 = smov 16   ;;  %s4471_s17 = smov 1  }
  0x20   : > { %p4631_p12 = pnand %p3879_p9, %p3853_p11  ;;  %s5641_s9 = sld [smem:[#allocation30_spill]] }
  0x21   : > { %s4473_s21 = smov [#allocation11]   ;;  %s5642_s1 = sld [smem:[#allocation27_spill]] }
  0x22   : > { %s408_s23 = sshll.u32 %s5638_s2, 4  ;;  %s4472_s2 = smov [#allocation8]   ;;  %s409_s23 = int_to_ptr.hbm [resolvable:$true] %s408_s23 }
  0x23   : > { %s443_s27 = sshll.u32 %s5639_s6, 4  ;;  %s445_s18 = sshll.u32 %s4472_s2, 4  ;;  %s444_s27 = int_to_ptr.hbm [resolvable:$true] %s443_s27  ;;  %s446_s18 = int_to_ptr.vmem [resolvable:$true] %s445_s18 }
  0x24   : > { %3859 = dma.hbm_to_vmem [thread:$0]  (!%p4631_p12), %s409_s23, 48, %s411_s29, [#allocation6], %s4470_s16, %s4470_s16, %s4471_s17  }
  0x25   : > { %3865 = dma.hbm_to_vmem [thread:$0]  (!%p4631_p12), %s444_s27, 16, %s446_s18, [#allocation9]  }
  0x26   : > { %s471_s6 = sshll.u32 %s5641_s9, 4  ;;  %s473_s24 = sshll.u32 %s4473_s21, 4  ;;  %s472_s6 = int_to_ptr.hbm [resolvable:$true] %s471_s6  ;;  %s474_s24 = int_to_ptr.vmem [resolvable:$true] %s473_s24 }
  0x27   : > { %s394_s14 = sshll.u32 %s5642_s1, 4  ;;  %s4474_s29 = smov 64   ;;  %s395_s14 = int_to_ptr.hbm [resolvable:$true] %s394_s14 }
  0x28   : > { %s4475_s23 = smov 4   ;;  %s4476_s2 = smov [#allocation2]  }
  0x29   : > { %3871 = dma.hbm_to_vmem [thread:$0]  (!%p4631_p12), %s472_s6, 256, %s474_s24, [#allocation12], %s4474_s29, %s4474_s29, %s4475_s23  }
  0x2a   : > { %s396_s18 = sshll.u32 %s4476_s2, 4  ;;  %s422_s26 = sshll.u32 %s5600_s3, 4  ;;  %s397_s18 = int_to_ptr.vmem [resolvable:$true] %s396_s18  ;;  %s423_s26 = int_to_ptr.hbm [resolvable:$true] %s422_s26 }
  0x2b   : > { %3856 = dma.hbm_to_vmem [thread:$0]  (!%p4631_p12), %s395_s14, 48, %s397_s18, [#allocation3], %s4470_s16, %s4470_s16, %s4471_s17  }
  0x2c   : > { %s454_s28 = sshll.u32 %s5604_s7, 4  ;;  %s4477_s1 = smov [#allocation7]   ;;  %s455_s28 = int_to_ptr.hbm [resolvable:$true] %s454_s28 }
  0x2d   : > { %s424_s9 = sshll.u32 %s4477_s1, 4  ;;  %s4478_s6 = smov [#allocation10]   ;;  %s425_s9 = int_to_ptr.vmem [resolvable:$true] %s424_s9 }
  0x2e   : > { %3862 = dma.hbm_to_vmem [thread:$0]  (!%p4631_p12), %s423_s26, 768, %s425_s9, [#allocation6], %s4474_s29, %s4474_s29, %s4475_s23  }
  0x2f   : > { %s456_s24 = sshll.u32 %s4478_s6, 4  ;;  %s488_s25 = sshll.u32 %s5608_s11, 4  ;;  %s457_s24 = int_to_ptr.vmem [resolvable:$true] %s456_s24  ;;  %s489_s25 = int_to_ptr.hbm [resolvable:$true] %s488_s25 }
  0x30   : > { %3868 = dma.hbm_to_vmem [thread:$0]  (!%p4631_p12), %s455_s28, 768, %s457_s24, [#allocation9], %s4474_s29, %s4474_s29, %s4475_s23  }
  0x31   : > { %s4479_s14 = smov [#allocation13]   ;;  %523 = sbr.rel (%p4617_p10) target bundleno = 4649 (0x1229), region = 80 }
  0x32   : > { %s490_s16 = sshll.u32 %s4479_s14, 4  ;;  %s491_s16 = int_to_ptr.vmem [resolvable:$true] %s490_s16 }
  0x33   : > { %3874 = dma.hbm_to_vmem [thread:$0]  (!%p4631_p12), %s489_s25, 256, %s491_s16, [#allocation12], %s4474_s29, %s4474_s29, %s4475_s23  }
  0x36   : > { %4434 = dma.done.wait (%p3879_p9), [#allocation3], 48  }
  0x37   : > { %4436 = vsyncadd (%p3879_p9), [#allocation3], 4294967248 }
  0x38   : > { %4438 = dma.done.wait (%p3879_p9), [#allocation6], 816  }
  0x39   : > { %4440 = vsyncadd (%p3879_p9), [#allocation6], 4294966480 }
  0x3a   : > { %4442 = dma.done.wait (%p3879_p9), [#allocation9], 784  }
  0x3b   : > { %4444 = vsyncadd (%p3879_p9), [#allocation9], 4294966512 }
  0x3c   : > { %4446 = dma.done.wait (%p3879_p9), [#allocation12], 512  }
  0x3d   : > { %4448 = vsyncadd (%p3879_p9), [#allocation12], 4294966784  ;;  %p602_p13 = scmp.lt.s32.totalorder %s4589_s22, 1  ;;  %vm612_vm0 = vcmask 261120   ;;  %v4480_v8 = vmov 32.0   ;;  %v3795_v35 = vld [vmem:[#allocation7 + $0x8] sm:$0xff] }
  0x3e   : > { %4021 = vrcp.f32 %v4480_v8  ;;  %v3799_v36 = vld [vmem:[#allocation7 + $0x28] sm:$0xff]  ;;  %758 = vmatpush.bf16.msra.mxu0 %v3795_v35  ;;  %3821 = vmatpush.bf16.msra.mxu1 %v3795_v35  ;;  %v3794_v41 = vld [vmem:[#allocation7] sm:$0xff]  ;;  %v3797_v47 = vld [vmem:[#allocation7 + $0x18] sm:$0xff]  ;;  %vm1045_vm14 = vcmask 1043456   ;;  %vm865_vm15 = vcmask 64512   ;;  %s4481_s28 = smov 120  }
  0x3f   : > { %s603_s1 = scalar_select %p602_p13, %s4589_s22, 1  ;;  %840 = vmatpush.bf16.msra.mxu2 %v3799_v36  ;;  %v3798_v42 = vld [vmem:[#allocation7 + $0x20] sm:$0xff]  ;;  %v3796_v50 = vld [vmem:[#allocation7 + $0x10] sm:$0xff] }
  0x40   : > { %s4482_s6 = smov 112   ;;  %s4483_s24 = smov 104  }
  0x41   : > { %s3793_s9 = sshll.u32 %s603_s1, 5  ;;  %s4484_s2 = smov 16  }
  0x42   : > { %s4687_s17 = scalar_lea.vmem %s5597_s0, %s3793_s9  ;;  %759 = vmatpush.bf16.msra.mxu0 %v3794_v41  ;;  %3822 = vmatpush.bf16.msra.mxu1 %v3794_v41  ;;  %v4009_v41 = vld [vmem:[%s5601_s4 + $0x1] ss:$0 sm:$0xff]  ;;  %s4485_s27 = smov 8  }
  0x43   : > { %v610_v0 = vld [vmem:[%s4687_s17 + $0x10] sm:$0xff]  ;;  %v608_v1 = vld [vmem:[%s4687_s17] sm:$0xff]  ;;  %v611_v2 = vld [vmem:[%s4687_s17 + $0x18] sm:$0xff]  ;;  %841 = vmatpush.bf16.msra.mxu2 %v3798_v42  ;;  %s4486_s16 = smov 24   ;;  %s599_s15 = sand.u32 1, %s4459_s19  }
  0x44   : > { %v619_v3 = vsel %vm612_vm0, %v610_v0, 0.0  ;;  %v613_v4 = vsel %vm612_vm0, %v608_v1, 0.0  ;;  %v609_v5 = vld [vmem:[%s4687_s17 + $0x8] sm:$0xff]  ;;  %v622_v6 = vsel %vm612_vm0, %v611_v2, 0.0  ;;  %v4022_v9 = vpop.eup %4021  ;;  %s3820_s14 = sshll.u32 %s4589_s22, 5  ;;  %s5653_s20 = sld [smem:[#allocation32_spill]] }
  0x45   : > { %620 = vadd.xlane.f32.xlu0 %v619_v3  ;;  %614 = vadd.xlane.f32.xlu1 %v613_v4  ;;  %v616_v7 = vsel %vm612_vm0, %v609_v5, 0.0  ;;  %v626_v10 = vmul.f32 32.0, %v4022_v9  ;;  %vm630_vm1 = vweird.f32 %v4022_v9  ;;  %s3447_s22 = scalar_lea.sflag [#allocation4], %s599_s15 }
  0x46   : > { %799 = vmatpush.bf16.msrb.mxu1 %v3797_v47 }
  0x47   : > { %v627_v11 = vsub.f32 1.0, %v626_v10 }
  0x49   : > { %v628_v12 = vmul.f32 %v4022_v9, %v627_v11 }
  0x4a   : > { %800 = vmatpush.bf16.msrb.mxu1 %v3796_v50  ;;  %s5654_s30 = smov %s5653_s20 }
  0x4b   : > { %v629_v13 = vadd.f32 %v4022_v9, %v628_v12 }
  0x4d   : > { %623 = vadd.xlane.f32.xlu0 %v622_v6  ;;  %617 = vadd.xlane.f32.xlu1 %v616_v7  ;;  %v4697_v14 = vsel %vm630_vm1, %v4022_v9, %v629_v13  ;;  %v4005_v13 = vld [vmem:[#allocation2] ss:$0 sm:$0xff] }
  0xb8   : > { %v621_v15 = vpop.xlane.xlu0 %620  ;;  %v615_v16 = vpop.xlane.xlu1 %614 }
  0xb9   : > { %v634_v17 = vmul.f32 %v4697_v14, %v621_v15  ;;  %v632_v18 = vmul.f32 %v4697_v14, %v615_v16 }
  0xbb   : > { %v4701_v19 = vsub.f32 %v608_v1, %v632_v18  ;;  %v4703_v20 = vsub.f32 %v610_v0, %v634_v17 }
  0xbd   : > { %v642_v21 = vmul.f32 %v4703_v20, %v4703_v20  ;;  %v640_v22 = vmul.f32 %v4701_v19, %v4701_v19 }
  0xbf   : > { %v650_v23 = vsel %vm612_vm0, %v642_v21, 0.0  ;;  %v644_v24 = vsel %vm612_vm0, %v640_v22, 0.0 }
  0xc0   : > { %651 = vadd.xlane.f32.xlu2 %v650_v23  ;;  %v624_v25 = vpop.xlane.xlu0 %623  ;;  %645 = vadd.xlane.f32.xlu0 %v644_v24  ;;  %v618_v26 = vpop.xlane.xlu1 %617  ;;  %v4006_v23 = vld [vmem:[#allocation5] ss:$0 sm:$0xff] }
  0xc1   : > { %v635_v27 = vmul.f32 %v4697_v14, %v624_v25  ;;  %v633_v28 = vmul.f32 %v4697_v14, %v618_v26 }
  0xc3   : > { %v4713_v29 = vsub.f32 %v611_v2, %v635_v27  ;;  %v4715_v30 = vsub.f32 %v609_v5, %v633_v28 }
  0xc5   : > { %v643_v31 = vmul.f32 %v4713_v29, %v4713_v29  ;;  %v641_v32 = vmul.f32 %v4715_v30, %v4715_v30 }
  0xc7   : > { %v653_v33 = vsel %vm612_vm0, %v643_v31, 0.0  ;;  %v647_v34 = vsel %vm612_vm0, %v641_v32, 0.0 }
  0xc8   : > { %654 = vadd.xlane.f32.xlu2 %v653_v33  ;;  %648 = vadd.xlane.f32.xlu1 %v647_v34 }
 0x133   : > { %v652_v37 = vpop.xlane.xlu2 %651  ;;  %v646_v38 = vpop.xlane.xlu0 %645 }
 0x134   : > { %v658_v39 = vmul.f32 %v652_v37, %v4697_v14  ;;  %v656_v40 = vmul.f32 %v646_v38, %v4697_v14 }
 0x136   : > { %v662_v43 = vadd.f32 1e-05, %v658_v39  ;;  %v660_v44 = vadd.f32 1e-05, %v656_v40 }
 0x138   : > { %4023 = vrsqrt.f32 %v662_v43  ;;  %vm670_vm2 = vweird.f32 %v660_v44  ;;  %vm690_vm5 = vweird.f32 %v662_v43 }
 0x139   : > { %4025 = vrsqrt.f32 %v660_v44 }
 0x13b   : > { %v655_v45 = vpop.xlane.xlu2 %654  ;;  %v649_v46 = vpop.xlane.xlu1 %648 }
 0x13c   : > { %v659_v48 = vmul.f32 %v655_v45, %v4697_v14  ;;  %v657_v49 = vmul.f32 %v649_v46, %v4697_v14  ;;  %v4007_v45 = vld [vmem:[%s5601_s4] ss:$0 sm:$0xff] }
 0x13e   : > { %v4024_v51 = vpop.eup %4023  ;;  %v663_v52 = vadd.f32 1e-05, %v659_v48  ;;  %v661_v53 = vadd.f32 1e-05, %v657_v49 }
 0x13f   : > { %v4026_v54 = vpop.eup %4025  ;;  %v685_v55 = vmul.f32 %v4024_v51, %v662_v43  ;;  %vm691_vm4 = vweird.f32 %v4024_v51 }
 0x140   : > { %v665_v56 = vmul.f32 %v4026_v54, %v660_v44  ;;  %4027 = vrsqrt.f32 %v663_v52  ;;  %vm671_vm3 = vweird.f32 %v4026_v54  ;;  %vm692_vm7 = vmor %vm690_vm5, %vm691_vm4  ;;  %vm680_vm8 = vweird.f32 %v661_v53 }
 0x141   : > { %v686_v57 = vmul.f32 %v4024_v51, %v685_v55  ;;  %4029 = vrsqrt.f32 %v661_v53  ;;  %vm672_vm6 = vmor %vm670_vm2, %vm671_vm3  ;;  %vm700_vm11 = vweird.f32 %v663_v52 }
 0x142   : > { %v666_v58 = vmul.f32 %v4026_v54, %v665_v56 }
 0x143   : > { %v687_v59 = vmul.f32 0.5, %v686_v57 }
 0x144   : > { %v667_v60 = vmul.f32 0.5, %v666_v58 }
 0x145   : > { %v688_v61 = vsub.f32 1.5, %v687_v59 }
 0x146   : > { %v4028_v62 = vpop.eup %4027  ;;  %v668_v63 = vsub.f32 1.5, %v667_v60 }
 0x147   : > { %v4030_v0 = vpop.eup %4029  ;;  %v689_v1 = vmul.f32 %v4024_v51, %v688_v61  ;;  %v695_v2 = vmul.f32 %v4028_v62, %v663_v52  ;;  %vm701_vm10 = vweird.f32 %v4028_v62 }
 0x148   : > { %v669_v3 = vmul.f32 %v4026_v54, %v668_v63  ;;  %v675_v4 = vmul.f32 %v4030_v0, %v661_v53  ;;  %vm681_vm9 = vweird.f32 %v4030_v0  ;;  %vm702_vm13 = vmor %vm700_vm11, %vm701_vm10 }
 0x149   : > { %v696_v5 = vmul.f32 %v4028_v62, %v695_v2  ;;  %v693_v7 = vsel %vm692_vm7, %v4024_v51, %v689_v1  ;;  %vm682_vm12 = vmor %vm680_vm8, %vm681_vm9 }
 0x14a   : > { %v676_v6 = vmul.f32 %v4030_v0, %v675_v4  ;;  %v673_v9 = vsel %vm672_vm6, %v4026_v54, %v669_v3  ;;  %v706_v15 = vmul.f32 %v693_v7, %v4703_v20 }
 0x14b   : > { %v697_v8 = vmul.f32 0.5, %v696_v5  ;;  %v704_v16 = vmul.f32 %v673_v9, %v4701_v19 }
 0x14c   : > { %v677_v10 = vmul.f32 0.5, %v676_v6  ;;  %v714_v25 = vmul.f32 %v4005_v13, %v706_v15 }
 0x14d   : > { %v698_v11 = vsub.f32 1.5, %v697_v8  ;;  %v712_v27 = vmul.f32 %v4005_v13, %v704_v16 }
 0x14e   : > { %v678_v12 = vsub.f32 1.5, %v677_v10  ;;  %v722_v32 = vadd.f32 %v4006_v23, %v714_v25 }
 0x14f   : > { %v699_v17 = vmul.f32 %v4028_v62, %v698_v11  ;;  %v720_v33 = vadd.f32 %v4006_v23, %v712_v27 }
 0x150   : > { %v679_v18 = vmul.f32 %v4030_v0, %v678_v12 }
 0x151   : > { %v703_v21 = vsel %vm702_vm13, %v4028_v62, %v699_v17 }
 0x152   : > { %v683_v22 = vsel %vm682_vm12, %v4030_v0, %v679_v18  ;;  %v707_v24 = vmul.f32 %v703_v21, %v4713_v29 }
 0x153   : > { %v705_v26 = vmul.f32 %v683_v22, %v4715_v30  ;;  %v4008_v30 = vld [vmem:[%s5601_s4 + $0x2] ss:$0 sm:$0xff] }
 0x154   : > { %v715_v28 = vmul.f32 %v4005_v13, %v707_v24 }
 0x155   : > { %v713_v31 = vmul.f32 %v4005_v13, %v705_v26 }
 0x156   : > { %v723_v20 = vadd.f32 %v4006_v23, %v715_v28 }
 0x157   : > { %v721_v19 = vadd.f32 %v4006_v23, %v713_v31 }
 0x158   : > { %v725_v34 = vpack.c.bf16 %v723_v20, %v722_v32 }
 0x159   : > { %v724_v35 = vpack.c.bf16 %v721_v19, %v720_v33 }
 0x15a   : > { %3623 = vmatmul.msk.bf16.vlgmr.msra.gmra.mxu1 %vm612_vm0, %v725_v34 }
 0x15b   : > { %3622 = vmatmul.msk.bf16.vlgmr.msra.gmra.mxu0 %vm612_vm0, %v724_v35  ;;  %3644 = vmatmul.msk.bf16.vlgmr.msra.gmra.mxu2 %vm612_vm0, %v724_v35 }
 0x16a   : > { %3633 = vmatmul.msk.bf16.vlgmr.msrb.gmra.mxu1 %vm612_vm0, %v724_v35 }
 0x16b   : > { %3645 = vmatmul.msk.bf16.gmra.mxu2 %vm612_vm0, %v725_v34 }
 0x17a   : > { %3634 = vmatmul.msk.bf16.gmra.mxu1 %vm612_vm0, %v725_v34 }
 0x1d7   : > { %v766_v29 = vpop.f32.mrf.mxu1 }
 0x1d8   : > { %v761_v47 = vpop.f32.mrf.mxu0  ;;  %v767_v5 = vadd.f32 %v4007_v45, %v766_v29 }
 0x1d9   : > { %v762_v50 = vadd.f32 %v4007_v45, %v761_v47 }
 0x1da   : > { %v4773_v10 = vpack.c.bf16 %v767_v5, %v767_v5 }
 0x1db   : > { %v4753_v55 = vpack.c.bf16 %v762_v50, %v762_v50 }
 0x1de   : > { %v843_v36 = vpop.f32.mrf.mxu2 }
 0x1df   : > { %v844_v37 = vadd.f32 %v4008_v30, %v843_v36  ;;  %v768_v38 = vpop.f32.mrf.mxu1 }
 0x1e0   : > { %v763_v1 = vpop.f32.mrf.mxu0  ;;  %v769_v16 = vadd.f32 %v4007_v45, %v768_v38 }
 0x1e1   : > { %v4740_v39 = vpack.c.bf16 %v844_v37, %v844_v37  ;;  %v764_v6 = vadd.f32 %v4007_v45, %v763_v1 }
 0x1e2   : > { %v4784_v17 = vpack.c.bf16 %v769_v16, %v769_v16 }
 0x1e3   : > { %v1047_v40 = vsel %vm1045_vm14, %v4740_v39, 0  ;;  %v854_v11 = vpack.c.bf16 %v764_v6, %v764_v6 }
 0x1e4   : > { %1056 = vmatpush.bf16.msrb.mxu2 %v1047_v40  ;;  %v1207_v5 = vunpack.c.l.b16 %v4784_v17 }
 0x1e5   : > { %v1149_v34 = vunpack.c.l.b16 %v854_v11 }
 0x1e6   : > { %v845_v42 = vpop.f32.mrf.mxu2  ;;  %v4843_v6 = vpack.c.b16 %v1207_v5, %v1207_v5 }
 0x1e7   : > { %v802_v43 = vpop.f32.mrf.mxu1  ;;  %v846_v49 = vadd.f32 %v4008_v30, %v845_v42  ;;  %v4796_v35 = vpack.c.b16 %v1149_v34, %v1149_v34 }
 0x1e8   : > { %v803_v44 = vadd.f32 %v4009_v41, %v802_v43 }
 0x1e9   : > { %v4751_v54 = vpack.c.bf16 %v846_v49, %v846_v49  ;;  %v1120_v49 = vunpack.c.l.b16 %v4753_v55 }
 0x1ea   : > { %v857_v46 = vpack.c.bf16 %v803_v44, %v803_v44 }
 0x1eb   : > { %v1066_v59 = vsel %vm1045_vm14, %v4751_v54, 0  ;;  %v4815_v50 = vpack.c.b16 %v1120_v49, %v1120_v49 }
 0x1ec   : > { %v870_v48 = vsel %vm865_vm15, %v857_v46, 0  ;;  %v1125_v31 = vunpack.c.l.b16 %v857_v46 }
 0x1ed   : > { %879 = vmatpush.bf16.xpose.msra.mxu3 %v870_v48 }
 0x1ee   : > { %v848_v52 = vpop.f32.mrf.mxu2  ;;  %v4791_v32 = vpack.c.b16 %v1125_v31, %v1125_v31 }
 0x1ef   : > { %v804_v51 = vpop.f32.mrf.mxu1  ;;  %v849_v58 = vadd.f32 %v4008_v30, %v848_v52 }
 0x1f0   : > { %v805_v53 = vadd.f32 %v4009_v41, %v804_v51 }
 0x1f1   : > { %v4763_v62 = vpack.c.bf16 %v849_v58, %v849_v58 }
 0x1f2   : > { %v4755_v56 = vpack.c.bf16 %v805_v53, %v805_v53 }
 0x1f3   : > { %v1085_v3 = vsel %vm1045_vm14, %v4763_v62, 0 }
 0x1f4   : > { %3646 = vmatmul.msk.bf16.vlgmr.msra.gmra.mxu3 %vm865_vm15, %v4753_v55  ;;  %v889_v57 = vsel %vm865_vm15, %v4755_v56, 0  ;;  %v1154_v46 = vunpack.c.l.b16 %v4755_v56 }
 0x1f5   : > { %898 = vmatpush.bf16.xpose.msrb.mxu3 %v889_v57 }
 0x1f6   : > { %v850_v63 = vpop.f32.mrf.mxu2  ;;  %v4810_v48 = vpack.c.b16 %v1154_v46, %v1154_v46 }
 0x1f7   : > { %v807_v60 = vpop.f32.mrf.mxu1  ;;  %v851_v4 = vadd.f32 %v4008_v30, %v850_v63 }
 0x1f8   : > { %v808_v61 = vadd.f32 %v4009_v41, %v807_v60 }
 0x1f9   : > { %v4771_v9 = vpack.c.bf16 %v851_v4, %v851_v4 }
 0x1fa   : > { %v4765_v0 = vpack.c.bf16 %v808_v61, %v808_v61 }
 0x1fb   : > { %v1104_v15 = vsel %vm1045_vm14, %v4771_v9, 0 }
 0x1fc   : > { %v908_v2 = vsel %vm865_vm15, %v4765_v0, 0  ;;  %v1183_v52 = vunpack.c.l.b16 %v4765_v0  ;;  %v1178_v0 = vunpack.c.l.b16 %v4773_v10 }
 0x1fd   : > { %1075 = vmatpush.bf16.msra.mxu3 %v1066_v59  ;;  %917 = vmatpush.bf16.xpose.msrb.mxu0 %v908_v2 }
 0x1fe   : > { %v4820_v56 = vpack.c.b16 %v1183_v52, %v1183_v52 }
 0x1ff   : > { %v809_v7 = vpop.f32.mrf.mxu1 }
 0x200   : > { %v810_v8 = vadd.f32 %v4009_v41, %v809_v7  ;;  %v1336_v7 = vunpack.c.l.b16 %v4740_v39 }
 0x202   : > { %v4775_v12 = vpack.c.bf16 %v810_v8, %v810_v8  ;;  %v4848_v8 = vpack.c.b16 %v1336_v7, %v1336_v7 }
 0x204   : > { %3647 = vmatmul.msk.bf16.vlgmr.msrb.gmra.mxu3 %vm865_vm15, %v854_v11  ;;  %3648 = vmatmul.msk.bf16.vlgmr.msrb.gmra.mxu0 %vm865_vm15, %v4773_v10  ;;  %v927_v13 = vsel %vm865_vm15, %v4775_v12, 0  ;;  %v1212_v58 = vunpack.c.l.b16 %v4775_v12 }
 0x205   : > { %1094 = vmatpush.bf16.msra.mxu0 %v1085_v3  ;;  %936 = vmatpush.bf16.xpose.msra.mxu1 %v927_v13  ;;  %v4836_v3 = vpack.c.b16 %v1178_v0, %v1178_v0 }
 0x206   : > { %v4825_v61 = vpack.c.b16 %v1212_v58, %v1212_v58 }
 0x20c   : > { %3649 = vmatmul.msk.bf16.vlgmr.msra.gmra.mxu1 %vm865_vm15, %v4784_v17 }
 0x20d   : > { %1113 = vmatpush.bf16.msrb.mxu1 %v1104_v15 }
 0x277   : > { %v881_v18 = vpop.f32.mrf.mxu3 }
 0x278   : > { %v942_v21 = vsel %vm865_vm15, %v881_v18, -inf }
 0x279   : > { %943 = vmax.xlane.f32.xlu2 %v942_v21 }
 0x27f   : > { %v883_v22 = vpop.f32.mrf.mxu3 }
 0x281   : > { %v919_v23 = vpop.f32.mrf.mxu0 }
 0x282   : > { %v948_v24 = vsel %vm865_vm15, %v919_v23, -inf }
 0x283   : > { %949 = vmax.xlane.f32.xlu1 %v948_v24 }
 0x287   : > { %v900_v25 = vpop.f32.mrf.mxu3 }
 0x288   : > { %v945_v26 = vsel %vm865_vm15, %v900_v25, -inf }
 0x289   : > { %v921_v27 = vpop.f32.mrf.mxu0  ;;  %v938_v28 = vpop.f32.mrf.mxu1  ;;  %946 = vmax.xlane.f32.xlu0 %v945_v26 }
 0x28a   : > { %v951_v19 = vsel %vm865_vm15, %v938_v28, -inf }
 0x28f   : > { %v902_v20 = vpop.f32.mrf.mxu3 }
 0x291   : > { %v940_v33 = vpop.f32.mrf.mxu1  ;;  %1127 = vrot.lane.b32.xlu2 %v4791_v32, %s4481_s28 }
 0x2ba   : > { %952 = vmax.xlane.f32.xlu2 %v951_v19 }
 0x2d2   : > { %1151 = vrot.lane.b32.xlu2 %v4796_v35, %s4481_s28 }
 0x2ec   : > { %v944_v29 = vpop.xlane.xlu2 %943 }
 0x2ed   : > { %v954_v30 = vsub.f32 %v881_v18, %v944_v29 }
 0x2ef   : > { %v958_v36 = vmul.f32 1.442695, %v954_v30 }
 0x2f1   : > { %4031 = vpow2.f32 %v958_v36 }
 0x2f4   : > { %v1128_v37 = vpop.permute.xlu2 %1127 }
 0x2f5   : > { %v1133_v38 = vsel %vm865_vm15, %v1128_v37, 0 }
 0x2f6   : > { %1142 = vmatpush.bf16.xpose.msra.mxu2 %v1133_v38  ;;  %v950_v51 = vpop.xlane.xlu1 %949 }
 0x2f7   : > { %v4801_v40 = vpop.eup %4031  ;;  %v956_v53 = vsub.f32 %v919_v23, %v950_v51 }
 0x2f8   : > { %v966_v41 = vsel %vm865_vm15, %v4801_v40, 0.0 }
 0x2f9   : > { %967 = vadd.xlane.f32.xlu0 %v966_v41  ;;  %v962_v57 = vmul.f32 1.442695, %v956_v53 }
 0x2fc   : > { %v947_v42 = vpop.xlane.xlu0 %946 }
 0x2fd   : > { %v955_v43 = vsub.f32 %v900_v25, %v947_v42 }
 0x2ff   : > { %v960_v44 = vmul.f32 1.442695, %v955_v43 }
 0x301   : > { %4033 = vpow2.f32 %v960_v44 }
 0x302   : > { %4035 = vpow2.f32 %v962_v57 }
 0x307   : > { %v4805_v45 = vpop.eup %4033 }
 0x308   : > { %v969_v47 = vsel %vm865_vm15, %v4805_v45, 0.0  ;;  %v4829_v63 = vpop.eup %4035 }
 0x309   : > { %970 = vadd.xlane.f32.xlu1 %v969_v47  ;;  %v972_v1 = vsel %vm865_vm15, %v4829_v63, 0.0 }
 0x30d   : > { %1156 = vrot.lane.b32.xlu0 %v4810_v48, %s4481_s28 }
 0x322   : > { %1122 = vrot.lane.b32.xlu1 %v4815_v50, %s4481_s28 }
 0x32a   : > { %1185 = vrot.lane.b32.xlu1 %v4820_v56, %s4481_s28 }
 0x32d   : > { %v953_v59 = vpop.xlane.xlu2 %952 }
 0x32e   : > { %v957_v55 = vsub.f32 %v938_v28, %v953_v59 }
 0x330   : > { %v964_v60 = vmul.f32 1.442695, %v957_v55 }
 0x332   : > { %4037 = vpow2.f32 %v964_v60  ;;  %1214 = vrot.lane.b32.xlu1 %v4825_v61, %s4481_s28 }
 0x335   : > { %v1152_v44 = vpop.permute.xlu2 %1151 }
 0x337   : > { %973 = vadd.xlane.f32.xlu0 %v972_v1 }
 0x338   : > { %v4834_v2 = vpop.eup %4037 }
 0x339   : > { %v975_v4 = vsel %vm865_vm15, %v4834_v2, 0.0 }
 0x33a   : > { %976 = vadd.xlane.f32.xlu2 %v975_v4  ;;  %1180 = vrot.lane.b32.xlu1 %v4836_v3, %s4481_s28 }
 0x342   : > { %1209 = vrot.lane.b32.xlu1 %v4843_v6, %s4481_s28 }
 0x352   : > { %1338 = vrot.lane.b32.xlu2 %v4848_v8, %s4481_s28 }
 0x36c   : > { %v968_v10 = vpop.xlane.xlu0 %967 }
 0x36d   : > { %4039 = vrcp.f32 %v968_v10  ;;  %v989_v16 = vand.u32 2147483648, %v968_v10  ;;  %v987_v17 = vand.u32 2147483647, %v968_v10  ;;  %vm983_vm2 = vweird.f32 %v968_v10 }
 0x36f   : > { %v990_v21 = vor.u32 1.1754944e-38, %v989_v16  ;;  %vm988_vm4 = vcmp.eq.f32.partialorder %v987_v17, 8.507059e+37 }
 0x373   : > { %v4040_v11 = vpop.eup %4039 }
 0x374   : > { %v979_v12 = vmul.f32 %v4040_v11, %v968_v10  ;;  %vm984_vm1 = vweird.f32 %v4040_v11 }
 0x375   : > { %vm985_vm3 = vmor %vm983_vm2, %vm984_vm1 }
 0x376   : > { %v980_v13 = vsub.f32 1.0, %v979_v12 }
 0x378   : > { %v981_v15 = vmul.f32 %v4040_v11, %v980_v13 }
 0x37a   : > { %v982_v18 = vadd.f32 %v4040_v11, %v981_v15 }
 0x37c   : > { %v971_v22 = vpop.xlane.xlu1 %970  ;;  %v986_v39 = vsel %vm985_vm3, %v4040_v11, %v982_v18 }
 0x37d   : > { %4041 = vrcp.f32 %v971_v22  ;;  %v991_v23 = vsel %vm988_vm4, %v990_v21, %v986_v39  ;;  %v1003_v33 = vand.u32 2147483648, %v971_v22  ;;  %v1001_v34 = vand.u32 2147483647, %v971_v22 }
 0x37e   : > { %v1034_v25 = vmul.f32 %v4801_v40, %v991_v23  ;;  %vm997_vm6 = vweird.f32 %v971_v22 }
 0x37f   : > { %v1157_v24 = vpop.permute.xlu0 %1156  ;;  %v1004_v30 = vor.u32 1.1754944e-38, %v1003_v33  ;;  %vm1002_vm8 = vcmp.eq.f32.partialorder %v1001_v34, 8.507059e+37 }
 0x380   : > { %v1162_v26 = vsel %vm865_vm15, %v1157_v24, 0  ;;  %v1038_v27 = vpack.c.bf16 %v1034_v25, %v1034_v25 }
 0x381   : > { %1171 = vmatpush.bf16.xpose.msrb.mxu3 %v1162_v26 }
 0x382   : > { %3650 = vmatmul.msk.bf16.vlgmr.msrb.gmra.mxu2 %vm865_vm15, %v1038_v27 }
 0x383   : > { %v4042_v28 = vpop.eup %4041 }
 0x384   : > { %v993_v31 = vmul.f32 %v4042_v28, %v971_v22  ;;  %vm998_vm5 = vweird.f32 %v4042_v28 }
 0x385   : > { %vm999_vm7 = vmor %vm997_vm6, %vm998_vm5 }
 0x386   : > { %v994_v20 = vsub.f32 1.0, %v993_v31 }
 0x388   : > { %v995_v19 = vmul.f32 %v4042_v28, %v994_v20 }
 0x38a   : > { %v996_v29 = vadd.f32 %v4042_v28, %v995_v19 }
 0x38c   : > { %v1000_v36 = vsel %vm999_vm7, %v4042_v28, %v996_v29 }
 0x38d   : > { %v1005_v37 = vsel %vm1002_vm8, %v1004_v30, %v1000_v36  ;;  %v1384_v36 = vunpack.c.l.b16 %v4763_v62 }
 0x38e   : > { %v1035_v38 = vmul.f32 %v4805_v45, %v1005_v37 }
 0x390   : > { %v1039_v40 = vpack.c.bf16 %v1035_v38, %v1035_v38 }
 0x392   : > { %3651 = vmatmul.msk.bf16.vlgmr.msra.gmra.mxu3 %vm865_vm15, %v1039_v40  ;;  %v4884_v40 = vpack.c.b16 %v1384_v36, %v1384_v36 }
 0x394   : > { %v1123_v41 = vpop.permute.xlu1 %1122 }
 0x395   : > { %3654 = vmatmul.msk.bf16.vlgmr.msra.gmra.mxu2 %vm865_vm15, %v1123_v41 }
 0x39c   : > { %v1186_v42 = vpop.permute.xlu1 %1185 }
 0x39d   : > { %v1191_v43 = vsel %vm865_vm15, %v1186_v42, 0 }
 0x39e   : > { %1200 = vmatpush.bf16.xpose.msrb.mxu0 %v1191_v43 }
 0x3a2   : > { %3655 = vmatmul.msk.bf16.vlgmr.msrb.gmra.mxu3 %vm865_vm15, %v1152_v44 }
 0x3a4   : > { %v1215_v46 = vpop.permute.xlu1 %1214 }
 0x3a5   : > { %v1220_v47 = vsel %vm865_vm15, %v1215_v46, 0 }
 0x3a6   : > { %1229 = vmatpush.bf16.xpose.msra.mxu1 %v1220_v47 }
 0x3aa   : > { %v974_v49 = vpop.xlane.xlu0 %973 }
 0x3ab   : > { %4043 = vrcp.f32 %v974_v49  ;;  %v1017_v58 = vand.u32 2147483648, %v974_v49  ;;  %v1015_v0 = vand.u32 2147483647, %v974_v49  ;;  %vm1011_vm10 = vweird.f32 %v974_v49 }
 0x3ac   : > { %v1181_v25 = vpop.permute.xlu1 %1180 }
 0x3ad   : > { %v977_v45 = vpop.xlane.xlu2 %976  ;;  %v1018_v10 = vor.u32 1.1754944e-38, %v1017_v58  ;;  %vm1016_vm13 = vcmp.eq.f32.partialorder %v1015_v0, 8.507059e+37 }
 0x3ae   : > { %4045 = vrcp.f32 %v977_v45  ;;  %v1031_v7 = vand.u32 2147483648, %v977_v45  ;;  %v1029_v12 = vand.u32 2147483647, %v977_v45  ;;  %vm1025_vm1 = vweird.f32 %v977_v45 }
 0x3b0   : > { %v1032_v18 = vor.u32 1.1754944e-38, %v1031_v7  ;;  %vm1030_vm3 = vcmp.eq.f32.partialorder %v1029_v12, 8.507059e+37 }
 0x3b1   : > { %v4044_v51 = vpop.eup %4043 }
 0x3b2   : > { %v1007_v52 = vmul.f32 %v4044_v51, %v974_v49  ;;  %vm1012_vm9 = vweird.f32 %v4044_v51 }
 0x3b3   : > { %vm1013_vm11 = vmor %vm1011_vm10, %vm1012_vm9 }
 0x3b4   : > { %v4046_v53 = vpop.eup %4045  ;;  %v1008_v57 = vsub.f32 1.0, %v1007_v52  ;;  %v1210_v26 = vpop.permute.xlu1 %1209 }
 0x3b5   : > { %v1021_v59 = vmul.f32 %v4046_v53, %v977_v45  ;;  %v1339_v55 = vpop.permute.xlu2 %1338  ;;  %vm1026_vm12 = vweird.f32 %v4046_v53 }
 0x3b6   : > { %v1009_v60 = vmul.f32 %v4044_v51, %v1008_v57  ;;  %v1344_v1 = vsel %vm1045_vm14, %v1339_v55, 0  ;;  %vm1027_vm2 = vmor %vm1025_vm1, %vm1026_vm12 }
 0x3b7   : > { %v1022_v4 = vsub.f32 1.0, %v1021_v59  ;;  %1353 = vmatpush.bf16.msrb.mxu2 %v1344_v1 }
 0x3b8   : > { %v1010_v5 = vadd.f32 %v4044_v51, %v1009_v60 }
 0x3b9   : > { %v1023_v11 = vmul.f32 %v4046_v53, %v1022_v4 }
 0x3ba   : > { %v1014_v13 = vsel %vm1013_vm11, %v4044_v51, %v1010_v5 }
 0x3bb   : > { %v1019_v15 = vsel %vm1016_vm13, %v1018_v10, %v1014_v13  ;;  %v1024_v16 = vadd.f32 %v4046_v53, %v1023_v11 }
 0x3bc   : > { %v1036_v17 = vmul.f32 %v4829_v63, %v1019_v15 }
 0x3bd   : > { %v1028_v21 = vsel %vm1027_vm2, %v4046_v53, %v1024_v16 }
 0x3be   : > { %v1033_v22 = vsel %vm1030_vm3, %v1032_v18, %v1028_v21  ;;  %v1040_v39 = vpack.c.bf16 %v1036_v17, %v1036_v17  ;;  %v1360_v21 = vunpack.c.l.b16 %v4751_v54 }
 0x3bf   : > { %v1037_v23 = vmul.f32 %v4834_v2, %v1033_v22 }
 0x3c0   : > { %3652 = vmatmul.msk.bf16.vlgmr.msra.gmra.mxu0 %vm865_vm15, %v1040_v39  ;;  %v4911_v22 = vpack.c.b16 %v1360_v21, %v1360_v21 }
 0x3c1   : > { %v1041_v24 = vpack.c.bf16 %v1037_v23, %v1037_v23 }
 0x3c3   : > { %3653 = vmatmul.msk.bf16.vlgmr.msrb.gmra.mxu1 %vm865_vm15, %v1041_v24 }
 0x3d0   : > { %3656 = vmatmul.msk.bf16.vlgmr.msrb.gmra.mxu0 %vm865_vm15, %v1181_v25 }
 0x3d3   : > { %3657 = vmatmul.msk.bf16.vlgmr.msra.gmra.mxu1 %vm865_vm15, %v1210_v26 }
 0x405   : > { %v4868_v63 = vpop.f32.mrf.mxu2 }
 0x40d   : > { %v1060_v27 = vpop.f32.mrf.mxu2 }
 0x415   : > { %v4870_v28 = vpop.f32.mrf.mxu3 }
 0x418   : > { %v1144_v31 = vpop.f32.mrf.mxu2 }
 0x419   : > { %v1235_v20 = vsel %vm865_vm15, %v1144_v31, -inf }
 0x41a   : > { %1236 = vmax.xlane.f32.xlu1 %v1235_v20 }
 0x41d   : > { %v1079_v2 = vpop.f32.mrf.mxu3 }
 0x420   : > { %v1146_v33 = vpop.f32.mrf.mxu2 }
 0x425   : > { %v1173_v19 = vpop.f32.mrf.mxu3 }
 0x426   : > { %v1238_v47 = vsel %vm865_vm15, %v1173_v19, -inf }
 0x42d   : > { %v1175_v34 = vpop.f32.mrf.mxu3 }
 0x433   : > { %1433 = vrot.lane.b32.xlu1 %v4791_v32, %s4482_s6 }
 0x43b   : > { %1431 = vrot.lane.b32.xlu1 %v4815_v50, %s4482_s6 }
 0x43d   : > { %v4877_v29 = vpop.f32.mrf.mxu0 }
 0x440   : > { %v4879_v30 = vpop.f32.mrf.mxu1 }
 0x443   : > { %1454 = vrot.lane.b32.xlu1 %v4796_v35, %s4482_s6 }
 0x445   : > { %v1098_v37 = vpop.f32.mrf.mxu0 }
 0x448   : > { %v1117_v38 = vpop.f32.mrf.mxu1 }
 0x44b   : > { %1386 = vrot.lane.b32.xlu1 %v4884_v40, %s4481_s28 }
 0x44d   : > { %v1202_v41 = vpop.f32.mrf.mxu0 }
 0x44e   : > { %v1241_v42 = vsel %vm865_vm15, %v1202_v41, -inf }
 0x44f   : > { %1242 = vmax.xlane.f32.xlu2 %v1241_v42 }
 0x450   : > { %v1231_v43 = vpop.f32.mrf.mxu1 }
 0x451   : > { %v1244_v44 = vsel %vm865_vm15, %v1231_v43, -inf }
 0x452   : > { %1245 = vmax.xlane.f32.xlu0 %v1244_v44 }
 0x453   : > { %1479 = vrot.lane.b32.xlu1 %v4820_v56, %s4482_s6 }
 0x455   : > { %v1204_v46 = vpop.f32.mrf.mxu0 }
 0x458   : > { %v1233_v62 = vpop.f32.mrf.mxu1 }
 0x45a   : > { %1239 = vmax.xlane.f32.xlu0 %v1238_v47 }
 0x45b   : > { %1477 = vrot.lane.b32.xlu1 %v4836_v3, %s4482_s6 }
 0x463   : > { %1500 = vrot.lane.b32.xlu1 %v4843_v6, %s4482_s6 }
 0x48d   : > { %v1237_v49 = vpop.xlane.xlu1 %1236 }
 0x48e   : > { %v1247_v45 = vsub.f32 %v1144_v31, %v1237_v49 }
 0x490   : > { %v1251_v51 = vmul.f32 1.442695, %v1247_v45 }
 0x492   : > { %4047 = vpow2.f32 %v1251_v51 }
 0x498   : > { %v4048_v52 = vpop.eup %4047 }
 0x499   : > { %v1259_v53 = vsel %vm865_vm15, %v4048_v52, 0.0 }
 0x49a   : > { %1260 = vadd.xlane.f32.xlu2 %v1259_v53 }
 0x4a5   : > { %v1434_v57 = vpop.permute.xlu1 %1433 }
 0x4a6   : > { %v1439_v58 = vsel %vm865_vm15, %v1434_v57, 0 }
 0x4a7   : > { %1448 = vmatpush.bf16.xpose.msra.mxu2 %v1439_v58 }
 0x4ad   : > { %v1432_v59 = vpop.permute.xlu1 %1431 }
 0x4b2   : > { %1456 = vrot.lane.b32.xlu2 %v4810_v48, %s4482_s6 }
 0x4b5   : > { %v4901_v55 = vpop.permute.xlu1 %1454 }
 0x4bd   : > { %v1387_v60 = vpop.permute.xlu1 %1386 }
 0x4be   : > { %v1392_v0 = vsel %vm1045_vm14, %v1387_v60, 0 }
 0x4bf   : > { %1401 = vmatpush.bf16.msra.mxu0 %v1392_v0 }
 0x4c2   : > { %v1243_v39 = vpop.xlane.xlu2 %1242 }
 0x4c3   : > { %v1249_v23 = vsub.f32 %v1202_v41, %v1243_v39 }
 0x4c5   : > { %v1480_v1 = vpop.permute.xlu1 %1479  ;;  %v1246_v4 = vpop.xlane.xlu0 %1245  ;;  %v1255_v24 = vmul.f32 1.442695, %v1249_v23 }
 0x4c6   : > { %v1485_v5 = vsel %vm865_vm15, %v1480_v1, 0  ;;  %v1250_v7 = vsub.f32 %v1231_v43, %v1246_v4  ;;  %v1408_v43 = vunpack.c.l.b16 %v4771_v9 }
 0x4c7   : > { %1494 = vmatpush.bf16.xpose.msrb.mxu0 %v1485_v5 }
 0x4c8   : > { %v1257_v10 = vmul.f32 1.442695, %v1250_v7  ;;  %v4923_v44 = vpack.c.b16 %v1408_v43, %v1408_v43 }
 0x4ca   : > { %4049 = vpow2.f32 %v1257_v10 }
 0x4cd   : > { %v1240_v11 = vpop.xlane.xlu0 %1239 }
 0x4ce   : > { %v1248_v12 = vsub.f32 %v1173_v19, %v1240_v11 }
 0x4d0   : > { %v1253_v13 = vmul.f32 1.442695, %v1248_v12  ;;  %v4905_v15 = vpop.eup %4049 }
 0x4d1   : > { %v1268_v18 = vsel %vm865_vm15, %v4905_v15, 0.0 }
 0x4d2   : > { %4051 = vpow2.f32 %v1253_v13 }
 0x4d3   : > { %4053 = vpow2.f32 %v1255_v24 }
 0x4d8   : > { %v4052_v16 = vpop.eup %4051 }
 0x4d9   : > { %v1262_v17 = vsel %vm865_vm15, %v4052_v16, 0.0  ;;  %v4917_v26 = vpop.eup %4053 }
 0x4da   : > { %1263 = vadd.xlane.f32.xlu0 %v1262_v17  ;;  %v1265_v54 = vsel %vm865_vm15, %v4917_v26, 0.0 }
 0x4db   : > { %1269 = vadd.xlane.f32.xlu2 %v1268_v18 }
 0x4ee   : > { %1362 = vrot.lane.b32.xlu0 %v4911_v22, %s4481_s28 }
 0x4f3   : > { %1502 = vrot.lane.b32.xlu2 %v4825_v61, %s4482_s6 }
 0x50d   : > { %v1261_v25 = vpop.xlane.xlu2 %1260 }
 0x50e   : > { %4055 = vrcp.f32 %v1261_v25  ;;  %v1282_v2 = vand.u32 2147483648, %v1261_v25  ;;  %v1280_v19 = vand.u32 2147483647, %v1261_v25  ;;  %vm1276_vm5 = vweird.f32 %v1261_v25 }
 0x510   : > { %v1283_v36 = vor.u32 1.1754944e-38, %v1282_v2  ;;  %vm1281_vm7 = vcmp.eq.f32.partialorder %v1280_v19, 8.507059e+37 }
 0x514   : > { %v4056_v27 = vpop.eup %4055 }
 0x515   : > { %v1272_v31 = vmul.f32 %v4056_v27, %v1261_v25  ;;  %vm1277_vm4 = vweird.f32 %v4056_v27  ;;  %v1457_v60 = vpop.permute.xlu2 %1456 }
 0x516   : > { %vm1278_vm6 = vmor %vm1276_vm5, %vm1277_vm4  ;;  %v1462_v4 = vsel %vm865_vm15, %v1457_v60, 0 }
 0x517   : > { %v1273_v20 = vsub.f32 1.0, %v1272_v31 }
 0x518   : > { %1266 = vadd.xlane.f32.xlu0 %v1265_v54 }
 0x519   : > { %v1274_v33 = vmul.f32 %v4056_v27, %v1273_v20 }
 0x51b   : > { %v1275_v34 = vadd.f32 %v4056_v27, %v1274_v33 }
 0x51d   : > { %v1279_v37 = vsel %vm1278_vm6, %v4056_v27, %v1275_v34 }
 0x51e   : > { %v1284_v38 = vsel %vm1281_vm7, %v1283_v36, %v1279_v37 }
 0x51f   : > { %v1327_v41 = vmul.f32 %v4048_v52, %v1284_v38 }
 0x521   : > { %v1331_v42 = vpack.c.bf16 %v1327_v41, %v1327_v41 }
 0x523   : > { %3658 = vmatmul.msk.bf16.vlgmr.msrb.gmra.mxu2 %vm865_vm15, %v1331_v42 }
 0x52c   : > { %1410 = vrot.lane.b32.xlu0 %v4923_v44, %s4481_s28 }
 0x533   : > { %3662 = vmatmul.msk.bf16.vlgmr.msra.gmra.mxu2 %vm865_vm15, %v1432_v59 }
 0x54d   : > { %v1264_v46 = vpop.xlane.xlu0 %1263 }
 0x54e   : > { %4057 = vrcp.f32 %v1264_v46  ;;  %v1296_v45 = vand.u32 2147483648, %v1264_v46  ;;  %v1294_v52 = vand.u32 2147483647, %v1264_v46  ;;  %vm1290_vm9 = vweird.f32 %v1264_v46  ;;  %v1270_v7 = vpop.xlane.xlu2 %1269 }
 0x54f   : > { %4059 = vrcp.f32 %v1270_v7  ;;  %v1324_v39 = vand.u32 2147483648, %v1270_v7  ;;  %vm1318_vm13 = vweird.f32 %v1270_v7  ;;  %v1322_v23 = vand.u32 2147483647, %v1270_v7 }
 0x550   : > { %v1297_v9 = vor.u32 1.1754944e-38, %v1296_v45  ;;  %vm1295_vm11 = vcmp.eq.f32.partialorder %v1294_v52, 8.507059e+37 }
 0x551   : > { %v1325_v20 = vor.u32 1.1754944e-38, %v1324_v39  ;;  %vm1323_vm3 = vcmp.eq.f32.partialorder %v1322_v23, 8.507059e+37 }
 0x554   : > { %v4058_v62 = vpop.eup %4057 }
 0x555   : > { %v1286_v47 = vmul.f32 %v4058_v62, %v1264_v46  ;;  %vm1291_vm8 = vweird.f32 %v4058_v62  ;;  %v4060_v10 = vpop.eup %4059 }
 0x556   : > { %vm1292_vm10 = vmor %vm1290_vm9, %vm1291_vm8  ;;  %v1314_v11 = vmul.f32 %v4060_v10, %v1270_v7  ;;  %vm1319_vm12 = vweird.f32 %v4060_v10  ;;  %v1503_v37 = vpop.permute.xlu2 %1502 }
 0x557   : > { %v1287_v49 = vsub.f32 1.0, %v1286_v47  ;;  %vm1320_vm1 = vmor %vm1318_vm13, %vm1319_vm12  ;;  %v1508_v46 = vsel %vm865_vm15, %v1503_v37, 0 }
 0x558   : > { %v1315_v12 = vsub.f32 1.0, %v1314_v11 }
 0x559   : > { %v1288_v51 = vmul.f32 %v4058_v62, %v1287_v49  ;;  %v1478_v49 = vpop.permute.xlu1 %1477 }
 0x55b   : > { %v1289_v53 = vadd.f32 %v4058_v62, %v1288_v51 }
 0x55d   : > { %v1293_v57 = vsel %vm1292_vm10, %v4058_v62, %v1289_v53 }
 0x55e   : > { %v1298_v58 = vsel %vm1295_vm11, %v1297_v9, %v1293_v57 }
 0x55f   : > { %v1328_v0 = vmul.f32 %v4052_v16, %v1298_v58  ;;  %v1316_v16 = vmul.f32 %v4060_v10, %v1315_v12 }
 0x560   : > { %v1363_v1 = vpop.permute.xlu0 %1362 }
 0x561   : > { %v1368_v59 = vsel %vm1045_vm14, %v1363_v1, 0  ;;  %v1332_v5 = vpack.c.bf16 %v1328_v0, %v1328_v0  ;;  %v1317_v18 = vadd.f32 %v4060_v10, %v1316_v16 }
 0x562   : > { %1377 = vmatpush.bf16.msra.mxu3 %v1368_v59 }
 0x563   : > { %v1321_v27 = vsel %vm1320_vm1, %v4060_v10, %v1317_v18 }
 0x564   : > { %v1326_v2 = vsel %vm1323_vm3, %v1325_v20, %v1321_v27 }
 0x565   : > { %3659 = vmatmul.msk.bf16.vlgmr.msra.gmra.mxu3 %vm865_vm15, %v1332_v5  ;;  %v1330_v36 = vmul.f32 %v4905_v15, %v1326_v2 }
 0x566   : > { %1471 = vmatpush.bf16.xpose.msrb.mxu3 %v1462_v4 }
 0x567   : > { %v1334_v62 = vpack.c.bf16 %v1330_v36, %v1330_v36 }
 0x575   : > { %3663 = vmatmul.msk.bf16.vlgmr.msrb.gmra.mxu3 %vm865_vm15, %v4901_v55 }
 0x58b   : > { %v1267_v13 = vpop.xlane.xlu0 %1266 }
 0x58c   : > { %4061 = vrcp.f32 %v1267_v13  ;;  %v1310_v25 = vand.u32 2147483648, %v1267_v13  ;;  %v1308_v31 = vand.u32 2147483647, %v1267_v13  ;;  %vm1304_vm4 = vweird.f32 %v1267_v13 }
 0x58e   : > { %v1311_v33 = vor.u32 1.1754944e-38, %v1310_v25  ;;  %vm1309_vm6 = vcmp.eq.f32.partialorder %v1308_v31, 8.507059e+37 }
 0x592   : > { %v4062_v17 = vpop.eup %4061 }
 0x593   : > { %v1300_v21 = vmul.f32 %v4062_v17, %v1267_v13  ;;  %vm1305_vm2 = vweird.f32 %v4062_v17 }
 0x594   : > { %vm1306_vm5 = vmor %vm1304_vm4, %vm1305_vm2 }
 0x595   : > { %v1301_v24 = vsub.f32 1.0, %v1300_v21 }
 0x597   : > { %v1302_v55 = vmul.f32 %v4062_v17, %v1301_v24 }
 0x599   : > { %v1303_v54 = vadd.f32 %v4062_v17, %v1302_v55 }
 0x59b   : > { %v1307_v19 = vsel %vm1306_vm5, %v4062_v17, %v1303_v54 }
 0x59c   : > { %v1312_v34 = vsel %vm1309_vm6, %v1311_v33, %v1307_v19 }
 0x59d   : > { %v1329_v38 = vmul.f32 %v4917_v26, %v1312_v34  ;;  %v1501_v26 = vpop.permute.xlu1 %1500 }
 0x59e   : > { %v1411_v41 = vpop.permute.xlu0 %1410 }
 0x59f   : > { %v1416_v42 = vsel %vm1045_vm14, %v1411_v41, 0  ;;  %v1333_v43 = vpack.c.bf16 %v1329_v38, %v1329_v38 }
 0x5a0   : > { %1425 = vmatpush.bf16.msrb.mxu1 %v1416_v42 }
 0x5a1   : > { %3660 = vmatmul.msk.bf16.vlgmr.msra.gmra.mxu0 %vm865_vm15, %v1333_v43 }
 0x5a3   : > { %3661 = vmatmul.msk.bf16.vlgmr.msrb.gmra.mxu1 %vm865_vm15, %v1334_v62 }
 0x5a4   : > { %1517 = vmatpush.bf16.xpose.msra.mxu1 %v1508_v46 }
 0x5a6   : > { %v4939_v47 = vpop.f32.mrf.mxu2 }
 0x5ae   : > { %v1357_v15 = vpop.f32.mrf.mxu2 }
 0x5b1   : > { %3664 = vmatmul.msk.bf16.vlgmr.msrb.gmra.mxu0 %vm865_vm15, %v1478_v49 }
 0x5b3   : > { %3665 = vmatmul.msk.bf16.vlgmr.msra.gmra.mxu1 %vm865_vm15, %v1501_v26 }
 0x5b6   : > { %v1450_v45 = vpop.f32.mrf.mxu2 }
 0x5b7   : > { %v1523_v51 = vsel %vm865_vm15, %v1450_v45, -inf }
 0x5b8   : > { %1524 = vmax.xlane.f32.xlu0 %v1523_v51 }
 0x5be   : > { %v1452_v52 = vpop.f32.mrf.mxu2 }
 0x5e8   : > { %v4944_v53 = vpop.f32.mrf.mxu3 }
 0x5e9   : > { %v3945_v9 = vpack.i.bf16 %v4944_v53, %v4939_v47 }
 0x5f0   : > { %v1381_v57 = vpop.f32.mrf.mxu3 }
 0x5f8   : > { %v1473_v58 = vpop.f32.mrf.mxu3 }
 0x5f9   : > { %v1526_v60 = vsel %vm865_vm15, %v1473_v58, -inf }
 0x5fa   : > { %1527 = vmax.xlane.f32.xlu1 %v1526_v60 }
 0x600   : > { %v1475_v0 = vpop.f32.mrf.mxu3 }
 0x613   : > { %1644 = vrot.lane.b32.xlu1 %v4911_v22, %s4482_s6 }
 0x61e   : > { %v4951_v1 = vpop.f32.mrf.mxu0 }
 0x620   : > { %v4953_v59 = vpop.f32.mrf.mxu1 }
 0x621   : > { %v3960_v4 = vpack.i.bf16 %v4953_v59, %v4951_v1 }
 0x626   : > { %v1405_v5 = vpop.f32.mrf.mxu0 }
 0x628   : > { %v1429_v7 = vpop.f32.mrf.mxu1 }
 0x62b   : > { %v1525_v10 = vpop.xlane.xlu0 %1524 }
 0x62c   : > { %v1535_v11 = vsub.f32 %v1450_v45, %v1525_v10 }
 0x62e   : > { %v1496_v12 = vpop.f32.mrf.mxu0  ;;  %v1539_v13 = vmul.f32 1.442695, %v1535_v11 }
 0x62f   : > { %v1529_v16 = vsel %vm865_vm15, %v1496_v12, -inf }
 0x630   : > { %1530 = vmax.xlane.f32.xlu2 %v1529_v16  ;;  %v1519_v17 = vpop.f32.mrf.mxu1  ;;  %4063 = vpow2.f32 %v1539_v13 }
 0x631   : > { %v1532_v18 = vsel %vm865_vm15, %v1519_v17, -inf }
 0x632   : > { %1533 = vmax.xlane.f32.xlu0 %v1532_v18 }
 0x636   : > { %v1498_v21 = vpop.f32.mrf.mxu0  ;;  %v4064_v23 = vpop.eup %4063 }
 0x637   : > { %v1547_v24 = vsel %vm865_vm15, %v4064_v23, 0.0 }
 0x638   : > { %v1521_v39 = vpop.f32.mrf.mxu1 }
 0x63d   : > { %1548 = vadd.xlane.f32.xlu1 %v1547_v24 }
 0x648   : > { %1623 = vrot.lane.b32.xlu2 %v4848_v8, %s4482_s6 }
 0x650   : > { %1732 = vrot.lane.b32.xlu2 %v4810_v48, %s4483_s24 }
 0x656   : > { %1707 = vrot.lane.b32.xlu1 %v4815_v50, %s4483_s24 }
 0x658   : > { %1730 = vrot.lane.b32.xlu2 %v4796_v35, %s4483_s24 }
 0x65e   : > { %1665 = vrot.lane.b32.xlu1 %v4884_v40, %s4482_s6 }
 0x660   : > { %1686 = vrot.lane.b32.xlu2 %v4923_v44, %s4482_s6 }
 0x666   : > { %1778 = vrot.lane.b32.xlu1 %v4825_v61, %s4483_s24 }
 0x668   : > { %1753 = vrot.lane.b32.xlu2 %v4836_v3, %s4483_s24 }
 0x66d   : > { %v1528_v25 = vpop.xlane.xlu1 %1527 }
 0x66e   : > { %v1536_v19 = vsub.f32 %v1473_v58, %v1528_v25 }
 0x670   : > { %v1541_v36 = vmul.f32 1.442695, %v1536_v19 }
 0x685   : > { %v1645_v48 = vpop.permute.xlu1 %1644 }
 0x686   : > { %v1650_v27 = vsel %vm1045_vm14, %v1645_v48, 0 }
 0x687   : > { %1659 = vmatpush.bf16.msra.mxu3 %v1650_v27 }
 0x6a3   : > { %v1531_v50 = vpop.xlane.xlu2 %1530 }
 0x6a4   : > { %v1537_v55 = vsub.f32 %v1496_v12, %v1531_v50 }
 0x6a5   : > { %v1534_v35 = vpop.xlane.xlu0 %1533 }
 0x6a6   : > { %v1543_v31 = vmul.f32 1.442695, %v1537_v55  ;;  %v1538_v20 = vsub.f32 %v1519_v17, %v1534_v35 }
 0x6a8   : > { %4065 = vpow2.f32 %v1543_v31  ;;  %v1545_v54 = vmul.f32 1.442695, %v1538_v20 }
 0x6aa   : > { %4067 = vpow2.f32 %v1545_v54 }
 0x6ab   : > { %v1624_v2 = vpop.permute.xlu2 %1623 }
 0x6ac   : > { %v1629_v33 = vsel %vm1045_vm14, %v1624_v2, 0 }
 0x6ad   : > { %1638 = vmatpush.bf16.msrb.mxu2 %v1629_v33 }
 0x6ae   : > { %v4978_v61 = vpop.eup %4065 }
 0x6af   : > { %v1553_v3 = vsel %vm865_vm15, %v4978_v61, 0.0 }
 0x6b0   : > { %1554 = vadd.xlane.f32.xlu0 %v1553_v3  ;;  %v1549_v34 = vpop.xlane.xlu1 %1548  ;;  %v4982_v38 = vpop.eup %4067 }
 0x6b1   : > { %4069 = vrcp.f32 %v1549_v34  ;;  %v1556_v43 = vsel %vm865_vm15, %v4982_v38, 0.0  ;;  %v1570_v49 = vand.u32 2147483648, %v1549_v34  ;;  %v1568_v51 = vand.u32 2147483647, %v1549_v34 }
 0x6b2   : > { %4071 = vpow2.f32 %v1541_v36  ;;  %vm1564_vm8 = vweird.f32 %v1549_v34 }
 0x6b3   : > { %v1733_v37 = vpop.permute.xlu2 %1732  ;;  %v1571_v57 = vor.u32 1.1754944e-38, %v1570_v49  ;;  %vm1569_vm10 = vcmp.eq.f32.partialorder %v1568_v51, 8.507059e+37 }
 0x6b4   : > { %v1738_v41 = vsel %vm865_vm15, %v1733_v37, 0 }
 0x6b5   : > { %1747 = vmatpush.bf16.xpose.msrb.mxu3 %v1738_v41 }
 0x6b7   : > { %v4070_v42 = vpop.eup %4069 }
 0x6b8   : > { %v1560_v46 = vmul.f32 %v4070_v42, %v1549_v34  ;;  %1557 = vadd.xlane.f32.xlu0 %v1556_v43  ;;  %v4989_v26 = vpop.eup %4071  ;;  %vm1565_vm7 = vweird.f32 %v4070_v42 }
 0x6b9   : > { %vm1566_vm9 = vmor %vm1564_vm8, %vm1565_vm7  ;;  %v1550_v58 = vsel %vm865_vm15, %v4989_v26, 0.0 }
 0x6ba   : > { %v1561_v62 = vsub.f32 1.0, %v1560_v46 }
 0x6bb   : > { %v4987_v15 = vpop.permute.xlu2 %1730 }
 0x6bc   : > { %v1562_v45 = vmul.f32 %v4070_v42, %v1561_v62 }
 0x6be   : > { %v1563_v52 = vadd.f32 %v4070_v42, %v1562_v45 }
 0x6c0   : > { %v1567_v60 = vsel %vm1566_vm9, %v4070_v42, %v1563_v52  ;;  %1551 = vadd.xlane.f32.xlu0 %v1550_v58 }
 0x6c1   : > { %v1572_v0 = vsel %vm1569_vm10, %v1571_v57, %v1567_v60 }
 0x6c2   : > { %v1615_v5 = vmul.f32 %v4064_v23, %v1572_v0 }
 0x6c3   : > { %v1687_v7 = vpop.permute.xlu2 %1686 }
 0x6c4   : > { %v1692_v10 = vsel %vm1045_vm14, %v1687_v7, 0  ;;  %v1619_v11 = vpack.c.bf16 %v1615_v5, %v1615_v5 }
 0x6c5   : > { %1701 = vmatpush.bf16.msrb.mxu1 %v1692_v10 }
 0x6c6   : > { %3666 = vmatmul.msk.bf16.vlgmr.msrb.gmra.mxu2 %vm865_vm15, %v1619_v11 }
 0x6c8   : > { %v4995_v12 = vpop.permute.xlu1 %1707 }
 0x6d0   : > { %v1666_v13 = vpop.permute.xlu1 %1665 }
 0x6d1   : > { %v1671_v16 = vsel %vm1045_vm14, %v1666_v13, 0 }
 0x6d2   : > { %1680 = vmatpush.bf16.msra.mxu0 %v1671_v16 }
 0x6d4   : > { %1709 = vrot.lane.b32.xlu0 %v4791_v32, %s4483_s24 }
 0x6d8   : > { %v1779_v17 = vpop.permute.xlu1 %1778 }
 0x6d9   : > { %v1784_v18 = vsel %vm865_vm15, %v1779_v17, 0 }
 0x6da   : > { %1793 = vmatpush.bf16.xpose.msra.mxu1 %v1784_v18  ;;  %v1754_v18 = vpop.permute.xlu2 %1753 }
 0x6dc   : > { %1755 = vrot.lane.b32.xlu0 %v4820_v56, %s4483_s24 }
 0x6e4   : > { %1776 = vrot.lane.b32.xlu0 %v4843_v6, %s4483_s24 }
 0x723   : > { %v1555_v21 = vpop.xlane.xlu0 %1554 }
 0x724   : > { %4073 = vrcp.f32 %v1555_v21  ;;  %v1598_v48 = vand.u32 2147483648, %v1555_v21  ;;  %v1596_v32 = vand.u32 2147483647, %v1555_v21  ;;  %vm1592_vm12 = vweird.f32 %v1555_v21 }
 0x726   : > { %v1599_v35 = vor.u32 1.1754944e-38, %v1598_v48  ;;  %vm1597_vm1 = vcmp.eq.f32.partialorder %v1596_v32, 8.507059e+37 }
 0x72a   : > { %v4074_v39 = vpop.eup %4073 }
 0x72b   : > { %v1588_v23 = vmul.f32 %v4074_v39, %v1555_v21  ;;  %v1558_v24 = vpop.xlane.xlu0 %1557  ;;  %vm1593_vm11 = vweird.f32 %v4074_v39 }
 0x72c   : > { %4075 = vrcp.f32 %v1558_v24  ;;  %vm1594_vm13 = vmor %vm1592_vm12, %vm1593_vm11  ;;  %v1612_v33 = vand.u32 2147483648, %v1558_v24  ;;  %v1610_v3 = vand.u32 2147483647, %v1558_v24  ;;  %vm1606_vm3 = vweird.f32 %v1558_v24 }
 0x72d   : > { %v1589_v25 = vsub.f32 1.0, %v1588_v23 }
 0x72e   : > { %v1613_v41 = vor.u32 1.1754944e-38, %v1612_v33  ;;  %vm1611_vm5 = vcmp.eq.f32.partialorder %v1610_v3, 8.507059e+37 }
 0x72f   : > { %v1590_v27 = vmul.f32 %v4074_v39, %v1589_v25 }
 0x731   : > { %v1591_v50 = vadd.f32 %v4074_v39, %v1590_v27 }
 0x732   : > { %v4076_v55 = vpop.eup %4075 }
 0x733   : > { %v1595_v56 = vsel %vm1594_vm13, %v4074_v39, %v1591_v50  ;;  %v1602_v31 = vmul.f32 %v4076_v55, %v1558_v24  ;;  %v1552_v6 = vpop.xlane.xlu0 %1551  ;;  %vm1607_vm2 = vweird.f32 %v4076_v55 }
 0x734   : > { %v1600_v20 = vsel %vm1597_vm1, %v1599_v35, %v1595_v56  ;;  %4077 = vrcp.f32 %v1552_v6  ;;  %vm1608_vm4 = vmor %vm1606_vm3, %vm1607_vm2  ;;  %v1584_v49 = vand.u32 2147483648, %v1552_v6  ;;  %v1582_v51 = vand.u32 2147483647, %v1552_v6 }
 0x735   : > { %v1617_v54 = vmul.f32 %v4978_v61, %v1600_v20  ;;  %v1603_v2 = vsub.f32 1.0, %v1602_v31  ;;  %vm1578_vm7 = vweird.f32 %v1552_v6 }
 0x736   : > { %v1585_v58 = vor.u32 1.1754944e-38, %v1584_v49  ;;  %vm1583_vm9 = vcmp.eq.f32.partialorder %v1582_v51, 8.507059e+37 }
 0x737   : > { %v1604_v19 = vmul.f32 %v4076_v55, %v1603_v2  ;;  %v1621_v34 = vpack.c.bf16 %v1617_v54, %v1617_v54 }
 0x739   : > { %v1605_v36 = vadd.f32 %v4076_v55, %v1604_v19  ;;  %3668 = vmatmul.msk.bf16.vlgmr.msra.gmra.mxu0 %vm865_vm15, %v1621_v34 }
 0x73a   : > { %v4078_v37 = vpop.eup %4077 }
 0x73b   : > { %v1609_v42 = vsel %vm1608_vm4, %v4076_v55, %v1605_v36  ;;  %v1574_v43 = vmul.f32 %v4078_v37, %v1552_v6  ;;  %vm1579_vm6 = vweird.f32 %v4078_v37 }
 0x73c   : > { %v1614_v46 = vsel %vm1611_vm5, %v1613_v41, %v1609_v42  ;;  %vm1580_vm8 = vmor %vm1578_vm7, %vm1579_vm6 }
 0x73d   : > { %v1618_v62 = vmul.f32 %v4982_v38, %v1614_v46  ;;  %v1575_v61 = vsub.f32 1.0, %v1574_v43 }
 0x73f   : > { %v1576_v45 = vmul.f32 %v4078_v37, %v1575_v61  ;;  %v1622_v52 = vpack.c.bf16 %v1618_v62, %v1618_v62 }
 0x741   : > { %v1577_v57 = vadd.f32 %v4078_v37, %v1576_v45  ;;  %3669 = vmatmul.msk.bf16.vlgmr.msrb.gmra.mxu1 %vm865_vm15, %v1622_v52 }
 0x743   : > { %v1581_v60 = vsel %vm1580_vm8, %v4078_v37, %v1577_v57 }
 0x744   : > { %v1586_v0 = vsel %vm1583_vm9, %v1585_v58, %v1581_v60 }
 0x745   : > { %v1616_v5 = vmul.f32 %v4989_v26, %v1586_v0 }
 0x746   : > { %v1710_v7 = vpop.permute.xlu0 %1709 }
 0x747   : > { %v1715_v38 = vsel %vm865_vm15, %v1710_v7, 0  ;;  %v1620_v10 = vpack.c.bf16 %v1616_v5, %v1616_v5 }
 0x748   : > { %1724 = vmatpush.bf16.xpose.msra.mxu2 %v1715_v38 }
 0x749   : > { %v1640_v11 = vpop.f32.mrf.mxu2  ;;  %3667 = vmatmul.msk.bf16.vlgmr.msra.gmra.mxu3 %vm865_vm15, %v1620_v10 }
 0x74e   : > { %v1756_v13 = vpop.permute.xlu0 %1755 }
 0x74f   : > { %v1761_v16 = vsel %vm865_vm15, %v1756_v13, 0  ;;  %3670 = vmatmul.msk.bf16.vlgmr.msra.gmra.mxu2 %vm865_vm15, %v4995_v12 }
 0x750   : > { %1770 = vmatpush.bf16.xpose.msrb.mxu0 %v1761_v16 }
 0x751   : > { %v1642_v17 = vpop.f32.mrf.mxu2 }
 0x756   : > { %v1777_v21 = vpop.permute.xlu0 %1776 }
 0x757   : > { %3672 = vmatmul.msk.bf16.vlgmr.msrb.gmra.mxu0 %vm865_vm15, %v1754_v18  ;;  %3673 = vmatmul.msk.bf16.vlgmr.msra.gmra.mxu1 %vm865_vm15, %v1777_v21 }
 0x759   : > { %3671 = vmatmul.msk.bf16.vlgmr.msrb.gmra.mxu3 %vm865_vm15, %v4987_v15 }
 0x7b6   : > { %v5019_v26 = vpop.f32.mrf.mxu0 }
 0x7be   : > { %v1684_v39 = vpop.f32.mrf.mxu0  ;;  %v5021_v23 = vpop.f32.mrf.mxu1 }
 0x7bf   : > { %v3965_v24 = vpack.i.bf16 %v5021_v23, %v5019_v26 }
 0x7c6   : > { %v1705_v12 = vpop.f32.mrf.mxu1 }
 0x7cc   : > { %v1661_v25 = vpop.f32.mrf.mxu3 }
 0x7cd   : > { %v3950_v33 = vpack.i.bf16 %v1661_v25, %v1640_v11 }
 0x7d2   : > { %v1726_v48 = vpop.f32.mrf.mxu2 }
 0x7d3   : > { %v1799_v27 = vsel %vm865_vm15, %v1726_v48, -inf }
 0x7d4   : > { %1800 = vmax.xlane.f32.xlu1 %v1799_v27  ;;  %v1663_v32 = vpop.f32.mrf.mxu3  ;;  %v1772_v50 = vpop.f32.mrf.mxu0 }
 0x7d5   : > { %v1795_v55 = vpop.f32.mrf.mxu1  ;;  %v1805_v35 = vsel %vm865_vm15, %v1772_v50, -inf }
 0x7d6   : > { %1806 = vmax.xlane.f32.xlu0 %v1805_v35  ;;  %v1808_v56 = vsel %vm865_vm15, %v1795_v55, -inf }
 0x7da   : > { %v1728_v15 = vpop.f32.mrf.mxu2 }
 0x7dc   : > { %v1774_v31 = vpop.f32.mrf.mxu0  ;;  %1809 = vmax.xlane.f32.xlu1 %v1808_v56  ;;  %v1749_v6 = vpop.f32.mrf.mxu3 }
 0x7dd   : > { %v1797_v20 = vpop.f32.mrf.mxu1  ;;  %v1802_v54 = vsel %vm865_vm15, %v1749_v6, -inf }
 0x7de   : > { %1803 = vmax.xlane.f32.xlu2 %v1802_v54 }
 0x7e4   : > { %v1751_v2 = vpop.f32.mrf.mxu3 }
 0x7f5   : > { %1899 = vrot.lane.b32.xlu1 %v4848_v8, %s4483_s24 }
 0x7fd   : > { %1962 = vrot.lane.b32.xlu1 %v4923_v44, %s4483_s24 }
 0x805   : > { %3951 = vrot.lane.b32.xlu1 %v3950_v33, %s4484_s2 }
 0x80d   : > { %3961 = vrot.lane.b32.xlu1 %v3960_v4, %s4485_s27 }
 0x847   : > { %v1801_v19 = vpop.xlane.xlu1 %1800 }
 0x848   : > { %v1811_v3 = vsub.f32 %v1726_v48, %v1801_v19 }
 0x849   : > { %v1807_v34 = vpop.xlane.xlu0 %1806 }
 0x84a   : > { %v1815_v36 = vmul.f32 1.442695, %v1811_v3  ;;  %v1813_v37 = vsub.f32 %v1772_v50, %v1807_v34 }
 0x84c   : > { %4079 = vpow2.f32 %v1815_v36  ;;  %v1819_v8 = vmul.f32 1.442695, %v1813_v37 }
 0x84e   : > { %4081 = vpow2.f32 %v1819_v8 }
 0x84f   : > { %v1810_v41 = vpop.xlane.xlu1 %1809 }
 0x850   : > { %v1814_v44 = vsub.f32 %v1795_v55, %v1810_v41 }
 0x851   : > { %v1804_v42 = vpop.xlane.xlu2 %1803 }
 0x852   : > { %v4080_v43 = vpop.eup %4079  ;;  %v1821_v46 = vmul.f32 1.442695, %v1814_v44  ;;  %v1812_v1 = vsub.f32 %v1749_v6, %v1804_v42 }
 0x853   : > { %v1823_v62 = vsel %vm865_vm15, %v4080_v43, 0.0 }
 0x854   : > { %v5039_v61 = vpop.eup %4081  ;;  %4083 = vpow2.f32 %v1821_v46  ;;  %1824 = vadd.xlane.f32.xlu2 %v1823_v62  ;;  %v1817_v4 = vmul.f32 1.442695, %v1812_v1 }
 0x855   : > { %v1829_v59 = vsel %vm865_vm15, %v5039_v61, 0.0 }
 0x856   : > { %1830 = vadd.xlane.f32.xlu0 %v1829_v59  ;;  %4085 = vpow2.f32 %v1817_v4 }
 0x85a   : > { %v5043_v49 = vpop.eup %4083 }
 0x85b   : > { %v1832_v45 = vsel %vm865_vm15, %v5043_v49, 0.0 }
 0x85c   : > { %v5047_v51 = vpop.eup %4085 }
 0x85d   : > { %v1826_v52 = vsel %vm865_vm15, %v5047_v51, 0.0 }
 0x85e   : > { %1833 = vadd.xlane.f32.xlu0 %v1832_v45 }
 0x866   : > { %1827 = vadd.xlane.f32.xlu0 %v1826_v52 }
 0x867   : > { %v1900_v57 = vpop.permute.xlu1 %1899 }
 0x868   : > { %v1905_v58 = vsel %vm1045_vm14, %v1900_v57, 0 }
 0x869   : > { %1914 = vmatpush.bf16.msrb.mxu2 %v1905_v58 }
 0x86c   : > { %1920 = vrot.lane.b32.xlu2 %v4911_v22, %s4483_s24 }
 0x86f   : > { %v1963_v60 = vpop.permute.xlu1 %1962 }
 0x870   : > { %v1968_v0 = vsel %vm1045_vm14, %v1963_v60, 0 }
 0x871   : > { %1977 = vmatpush.bf16.msrb.mxu1 %v1968_v0 }
 0x874   : > { %3946 = vrot.lane.b32.xlu2 %v3945_v9, %s4485_s27 }
 0x87a   : > { %1941 = vrot.lane.b32.xlu0 %v4884_v40, %s4483_s24 }
 0x882   : > { %3966 = vrot.lane.b32.xlu0 %v3965_v24, %s4484_s2 }
 0x8c7   : > { %v1825_v5 = vpop.xlane.xlu2 %1824 }
 0x8c8   : > { %4087 = vrcp.f32 %v1825_v5  ;;  %v1846_v9 = vand.u32 2147483648, %v1825_v5  ;;  %v1844_v16 = vand.u32 2147483647, %v1825_v5  ;;  %vm1840_vm11 = vweird.f32 %v1825_v5 }
 0x8c9   : > { %v1831_v22 = vpop.xlane.xlu0 %1830 }
 0x8ca   : > { %4089 = vrcp.f32 %v1831_v22  ;;  %v1847_v21 = vor.u32 1.1754944e-38, %v1846_v9  ;;  %vm1845_vm13 = vcmp.eq.f32.partialorder %v1844_v16, 8.507059e+37  ;;  %vm1868_vm6 = vweird.f32 %v1831_v22  ;;  %v3800_v9 = vld [vmem:[%s5602_s5] sm:$0xff] }
 0x8cb   : > { %v1874_v33 = vand.u32 2147483648, %v1831_v22  ;;  %v1872_v34 = vand.u32 2147483647, %v1831_v22 }
 0x8cd   : > { %v1875_v46 = vor.u32 1.1754944e-38, %v1874_v33  ;;  %vm1873_vm9 = vcmp.eq.f32.partialorder %v1872_v34, 8.507059e+37 }
 0x8ce   : > { %v4088_v7 = vpop.eup %4087 }
 0x8cf   : > { %v1836_v38 = vmul.f32 %v4088_v7, %v1825_v5  ;;  %v1921_v10 = vpop.permute.xlu2 %1920  ;;  %vm1841_vm10 = vweird.f32 %v4088_v7  ;;  %v3801_v5 = vld [vmem:[%s5602_s5 + $0x8] sm:$0xff] }
 0x8d0   : > { %v1926_v11 = vsel %vm1045_vm14, %v1921_v10, 0  ;;  %v4090_v13 = vpop.eup %4089  ;;  %vm1842_vm12 = vmor %vm1840_vm11, %vm1841_vm10  ;;  %2079 = vmatpush.bf16.msra.mxu2 %v3801_v5 }
 0x8d1   : > { %v1837_v47 = vsub.f32 1.0, %v1836_v38  ;;  %v1834_v53 = vpop.xlane.xlu0 %1833  ;;  %1935 = vmatpush.bf16.msra.mxu3 %v1926_v11  ;;  %v1864_v17 = vmul.f32 %v4090_v13, %v1831_v22  ;;  %vm1869_vm3 = vweird.f32 %v4090_v13 }
 0x8d2   : > { %4091 = vrcp.f32 %v1834_v53  ;;  %v1888_v50 = vand.u32 2147483648, %v1834_v53  ;;  %v1886_v15 = vand.u32 2147483647, %v1834_v53  ;;  %vm1882_vm2 = vweird.f32 %v1834_v53  ;;  %vm5067_vm7 = vmor %vm1868_vm6, %vm1869_vm3 }
 0x8d3   : > { %v1838_v40 = vmul.f32 %v4088_v7, %v1837_v47  ;;  %v1865_v24 = vsub.f32 1.0, %v1864_v17 }
 0x8d4   : > { %v1889_v20 = vor.u32 1.1754944e-38, %v1888_v50  ;;  %vm1887_vm5 = vcmp.eq.f32.partialorder %v1886_v15, 8.507059e+37  ;;  %2080 = vmatpush.bf16.msra.mxu2 %v3800_v9 }
 0x8d5   : > { %v1839_v18 = vadd.f32 %v4088_v7, %v1838_v40  ;;  %v1866_v32 = vmul.f32 %v4090_v13, %v1865_v24 }
 0x8d7   : > { %v1843_v26 = vsel %vm1842_vm12, %v4088_v7, %v1839_v18  ;;  %v1867_v6 = vadd.f32 %v4090_v13, %v1866_v32  ;;  %v3947_v40 = vpop.permute.xlu2 %3946  ;;  %v3952_v18 = vpop.permute.xlu1 %3951 }
 0x8d8   : > { %v4092_v39 = vpop.eup %4091  ;;  %v1848_v23 = vsel %vm1845_vm13, %v1847_v21, %v1843_v26  ;;  %v3949_v16 = vunpack.i.h.bf16 %v3947_v40  ;;  %v3948_v17 = vunpack.i.l.bf16 %v3947_v40  ;;  %vm2040_vm13 = vcmask 195584  }
 0x8d9   : > { %v1891_v12 = vmul.f32 %v4080_v43, %v1848_v23  ;;  %v1878_v25 = vmul.f32 %v4092_v39, %v1834_v53  ;;  %v1828_v48 = vpop.xlane.xlu0 %1827  ;;  %vm1883_vm1 = vweird.f32 %v4092_v39  ;;  %v1871_v8 = vsel %vm5067_vm7, %v4090_v13, %v1867_v6 }
 0x8da   : > { %4093 = vrcp.f32 %v1828_v48  ;;  %vm1884_vm4 = vmor %vm1882_vm2, %vm1883_vm1  ;;  %v1860_v41 = vand.u32 2147483648, %v1828_v48  ;;  %v1858_v42 = vand.u32 2147483647, %v1828_v48  ;;  %vm1854_vm10 = vweird.f32 %v1828_v48 }
 0x8db   : > { %v1879_v27 = vsub.f32 1.0, %v1878_v25  ;;  %v1895_v55 = vpack.c.bf16 %v1891_v12, %v1891_v12  ;;  %v1876_v1 = vsel %vm1873_vm9, %v1875_v46, %v1871_v8  ;;  %v2032_v21 = vsel %vm865_vm15, %v4870_v28, %v3949_v16  ;;  %v4010_v8 = vld [vmem:[#allocation8] ss:$0 sm:$0xff] }
 0x8dc   : > { %v1861_v59 = vor.u32 1.1754944e-38, %v1860_v41  ;;  %vm1859_vm12 = vcmp.eq.f32.partialorder %v1858_v42, 8.507059e+37  ;;  %v1893_v45 = vmul.f32 %v5039_v61, %v1876_v1  ;;  %v2031_v26 = vsel %vm865_vm15, %v4868_v63, %v3948_v17 }
 0x8dd   : > { %v1880_v35 = vmul.f32 %v4092_v39, %v1879_v27  ;;  %3674 = vmatmul.msk.bf16.vlgmr.msrb.gmra.mxu2 %vm865_vm15, %v1895_v55  ;;  %v3953_v23 = vunpack.i.l.bf16 %v3952_v18 }
 0x8de   : > { %v1897_v0 = vpack.c.bf16 %v1893_v45, %v1893_v45  ;;  %v4177_v45 = vld [vmem:[%s4687_s17 + $0x10] sm:$0xff] }
 0x8df   : > { %v1881_v56 = vadd.f32 %v4092_v39, %v1880_v35  ;;  %v3962_v28 = vpop.permute.xlu1 %3961 }
 0x8e0   : > { %v4094_v31 = vpop.eup %4093  ;;  %v3964_v15 = vunpack.i.h.bf16 %v3962_v28 }
 0x8e1   : > { %v1885_v54 = vsel %vm1884_vm4, %v4092_v39, %v1881_v56  ;;  %v1850_v2 = vmul.f32 %v4094_v31, %v1828_v48  ;;  %vm1855_vm8 = vweird.f32 %v4094_v31  ;;  %v3954_v39 = vunpack.i.h.bf16 %v3952_v18 }
 0x8e2   : > { %v1890_v19 = vsel %vm1887_vm5, %v1889_v20, %v1885_v54  ;;  %vm1856_vm11 = vmor %vm1854_vm10, %vm1855_vm8  ;;  %v3963_v56 = vunpack.i.l.bf16 %v3962_v28  ;;  %v3802_v28 = vld [vmem:[#allocation10] sm:$0xff] }
 0x8e3   : > { %v1894_v36 = vmul.f32 %v5043_v49, %v1890_v19  ;;  %v1851_v37 = vsub.f32 1.0, %v1850_v2  ;;  %v2034_v2 = vsel %vm865_vm15, %v4879_v30, %v3964_v15  ;;  %v4175_v30 = vld [vmem:[%s4687_s17] sm:$0xff] }
 0x8e4   : > { %v2033_v33 = vsel %vm865_vm15, %v4877_v29, %v3963_v56 }
 0x8e5   : > { %v1852_v44 = vmul.f32 %v4094_v31, %v1851_v37  ;;  %v1898_v43 = vpack.c.bf16 %v1894_v36, %v1894_v36 }
 0x8e7   : > { %v1853_v62 = vadd.f32 %v4094_v31, %v1852_v44  ;;  %3677 = vmatmul.msk.bf16.vlgmr.msrb.gmra.mxu1 %vm865_vm15, %v1898_v43 }
 0x8e9   : > { %v1857_v4 = vsel %vm1856_vm11, %v4094_v31, %v1853_v62  ;;  %v4176_v62 = vld [vmem:[%s4687_s17 + $0x8] sm:$0xff] }
 0x8ea   : > { %v1862_v49 = vsel %vm1859_vm12, %v1861_v59, %v1857_v4 }
 0x8eb   : > { %v1892_v52 = vmul.f32 %v5047_v51, %v1862_v49 }
 0x8ec   : > { %v1942_v57 = vpop.permute.xlu0 %1941 }
 0x8ed   : > { %v1947_v58 = vsel %vm1045_vm14, %v1942_v57, 0  ;;  %v1896_v60 = vpack.c.bf16 %v1892_v52, %v1892_v52  ;;  %vm2035_vm14 = vcmask 130048  }
 0x8ee   : > { %1956 = vmatpush.bf16.msra.mxu0 %v1947_v58  ;;  %v2036_v48 = vsel %vm2035_vm14, %v2031_v26, %v3953_v23  ;;  %v2037_v27 = vsel %vm2035_vm14, %v2032_v21, %v3954_v39 }
 0x8ef   : > { %3675 = vmatmul.msk.bf16.vlgmr.msra.gmra.mxu3 %vm865_vm15, %v1896_v60 }
 0x8f1   : > { %3676 = vmatmul.msk.bf16.vlgmr.msra.gmra.mxu0 %vm865_vm15, %v1897_v0  ;;  %v4178_v0 = vld [vmem:[%s4687_s17 + $0x18] sm:$0xff]  ;;  %s3458_s17 = scalar_lea.hbm %s5653_s20, %s3820_s14 }
 0x8f2   : > { %s3461_s23 = sshll.u32 %s3458_s17, 4  ;;  %s3462_s23 = int_to_ptr.hbm [resolvable:$true] %s3461_s23 }
 0x8f3   : > { %s4403_s18 = sshra.s32 %s3462_s23, 4  ;;  %s4404_s18 = int_to_ptr.hbm [resolvable:$true] %s4403_s18 }
 0x8f4   : > { %v3967_v63 = vpop.permute.xlu0 %3966  ;;  %s4405_s26 = scalar_lea.hbm %s4404_s18, 32  ;;  %p4410_p3 = scmp.lt.s32.totalorder %s4404_s18, %s5654_s30 }
 0x8f5   : > { %v3969_v31 = vunpack.i.h.bf16 %v3967_v63  ;;  %v3968_v6 = vunpack.i.l.bf16 %v3967_v63  ;;  %v3804_v63 = vld [vmem:[#allocation10 + $0x10] sm:$0xff]  ;;  %p4406_p0 = scmp.ne.s32.totalorder %s4404_s18, %s4405_s26 }
 0x8f7   : > { %v2039_v19 = vsel %vm2035_vm14, %v2034_v2, %v3969_v31  ;;  %v2038_v3 = vsel %vm2035_vm14, %v2033_v33, %v3968_v6  ;;  %p4407_p1 = pnand %p4406_p0, %p4606_p5 }
 0x8f9   : > { %p4408_p2 = pneg %p4407_p1 }
 0x960   : > { %v1916_v22 = vpop.f32.mrf.mxu2 }
 0x964   : > { %v1979_v7 = vpop.f32.mrf.mxu1 }
 0x968   : > { %v1918_v61 = vpop.f32.mrf.mxu2 }
 0x96c   : > { %v1981_v38 = vpop.f32.mrf.mxu1 }
 0x96e   : > { %v1958_v51 = vpop.f32.mrf.mxu0 }
 0x96f   : > { %v3970_v53 = vpack.i.bf16 %v1979_v7, %v1958_v51 }
 0x972   : > { %v1937_v10 = vpop.f32.mrf.mxu3 }
 0x973   : > { %v3955_v11 = vpack.i.bf16 %v1937_v10, %v1916_v22 }
 0x975   : > { %3956 = vrot.lane.b32.xlu2 %v3955_v11, %s4486_s16 }
 0x976   : > { %v1960_v13 = vpop.f32.mrf.mxu0 }
 0x97a   : > { %v1939_v47 = vpop.f32.mrf.mxu3 }
 0x97d   : > { %3971 = vrot.lane.b32.xlu2 %v3970_v53, %s4486_s16 }
 0x9cf   : > { %v3957_v24 = vpop.permute.xlu2 %3956 }
 0x9d0   : > { %v3959_v12 = vunpack.i.h.bf16 %v3957_v24  ;;  %v3958_v25 = vunpack.i.l.bf16 %v3957_v24 }
 0x9d2   : > { %v2042_v32 = vsel %vm2040_vm13, %v2037_v27, %v3959_v12  ;;  %v2041_v50 = vsel %vm2040_vm13, %v2036_v48, %v3958_v25  ;;  %v3803_v48 = vld [vmem:[#allocation10 + $0x8] sm:$0xff]  ;;  %v3805_v27 = vld [vmem:[#allocation10 + $0x18] sm:$0xff] }
 0x9d3   : > { %v2045_v55 = vpack.c.bf16 %v2042_v32, %v2041_v50  ;;  %v3807_v32 = vld [vmem:[#allocation10 + $0x28] sm:$0xff]  ;;  %2236 = vmatpush.bf16.msrb.mxu3 %v3803_v48  ;;  %2277 = vmatpush.bf16.msrb.mxu0 %v3805_v27 }
 0x9d4   : > { %2318 = vmatpush.bf16.msra.mxu1 %v3807_v32 }
 0x9d5   : > { %3686 = vmatmul.msk.bf16.vlgmr.msra.gmra.mxu2 %vm612_vm0, %v2045_v55 }
 0x9d7   : > { %v3972_v35 = vpop.permute.xlu2 %3971  ;;  %2237 = vmatpush.bf16.msrb.mxu3 %v3802_v28  ;;  %2278 = vmatpush.bf16.msrb.mxu0 %v3804_v63 }
 0x9d8   : > { %v3974_v20 = vunpack.i.h.bf16 %v3972_v35  ;;  %v3973_v54 = vunpack.i.l.bf16 %v3972_v35  ;;  %v3806_v35 = vld [vmem:[#allocation10 + $0x20] sm:$0xff] }
 0x9d9   : > { %2319 = vmatpush.bf16.msra.mxu1 %v3806_v35 }
 0x9da   : > { %v2043_v34 = vsel %vm2040_vm13, %v2038_v3, %v3973_v54  ;;  %v2044_v36 = vsel %vm2040_vm13, %v2039_v19, %v3974_v20 }
 0x9db   : > { %v2046_v37 = vpack.c.bf16 %v2044_v36, %v2043_v34 }
 0x9e5   : > { %3687 = vmatmul.msk.bf16.gmra.mxu2 %vm612_vm0, %v2046_v37 }
 0xa58   : > { %v2082_v41 = vpop.f32.mrf.mxu2 }
 0xa59   : > { %v2083_v44 = vadd.f32 %v4010_v8, %v2082_v41 }
 0xa5b   : > { %v5107_v42 = vadd.f32 %v4175_v30, %v2083_v44 }
 0xa5d   : > { %v2096_v29 = vsel %vm612_vm0, %v5107_v42, 0.0 }
 0xa5e   : > { %2097 = vadd.xlane.f32.xlu1 %v2096_v29 }
 0xa60   : > { %v2084_v43 = vpop.f32.mrf.mxu2 }
 0xa61   : > { %v2085_v46 = vadd.f32 %v4010_v8, %v2084_v43 }
 0xa63   : > { %v5112_v1 = vadd.f32 %v4176_v62, %v2085_v46 }
 0xa65   : > { %v2099_v59 = vsel %vm612_vm0, %v5112_v1, 0.0 }
 0xa66   : > { %2100 = vadd.xlane.f32.xlu0 %v2099_v59  ;;  %v4011_v59 = vld [vmem:[#allocation2 + $0x1] ss:$0 sm:$0xff] }
 0xa68   : > { %v2087_v4 = vpop.f32.mrf.mxu2 }
 0xa69   : > { %v2088_v49 = vadd.f32 %v4010_v8, %v2087_v4 }
 0xa6b   : > { %v5117_v52 = vadd.f32 %v4177_v45, %v2088_v49 }
 0xa6d   : > { %v2102_v57 = vsel %vm612_vm0, %v5117_v52, 0.0 }
 0xa6e   : > { %2103 = vadd.xlane.f32.xlu2 %v2102_v57 }
 0xa70   : > { %v2089_v58 = vpop.f32.mrf.mxu2 }
 0xa71   : > { %v2090_v60 = vadd.f32 %v4010_v8, %v2089_v58 }
 0xa73   : > { %v5122_v5 = vadd.f32 %v4178_v0, %v2090_v60  ;;  %v4012_v0 = vld [vmem:[#allocation5 + $0x1] ss:$0 sm:$0xff] }
 0xa75   : > { %v2105_v22 = vsel %vm612_vm0, %v5122_v5, 0.0 }
 0xa76   : > { %2106 = vadd.xlane.f32.xlu1 %v2105_v22 }
 0xad1   : > { %v2098_v7 = vpop.xlane.xlu1 %2097 }
 0xad2   : > { %v2108_v61 = vmul.f32 %v2098_v7, %v4697_v14 }
 0xad4   : > { %v5128_v38 = vsub.f32 %v5107_v42, %v2108_v61 }
 0xad6   : > { %v2116_v51 = vmul.f32 %v5128_v38, %v5128_v38 }
 0xad8   : > { %v2120_v10 = vsel %vm612_vm0, %v2116_v51, 0.0 }
 0xad9   : > { %v2101_v11 = vpop.xlane.xlu0 %2100  ;;  %2121 = vadd.xlane.f32.xlu2 %v2120_v10 }
 0xada   : > { %v2109_v13 = vmul.f32 %v2101_v11, %v4697_v14 }
 0xadc   : > { %v5135_v47 = vsub.f32 %v5112_v1, %v2109_v13 }
 0xade   : > { %v2117_v53 = vmul.f32 %v5135_v47, %v5135_v47 }
 0xae0   : > { %v2123_v9 = vsel %vm612_vm0, %v2117_v53, 0.0 }
 0xae1   : > { %v2104_v40 = vpop.xlane.xlu2 %2103  ;;  %2124 = vadd.xlane.f32.xlu0 %v2123_v9 }
 0xae2   : > { %v2110_v16 = vmul.f32 %v2104_v40, %v4697_v14 }
 0xae4   : > { %v5142_v17 = vsub.f32 %v5117_v52, %v2110_v16 }
 0xae6   : > { %v2118_v18 = vmul.f32 %v5142_v17, %v5142_v17 }
 0xae8   : > { %v2126_v21 = vsel %vm612_vm0, %v2118_v18, 0.0 }
 0xae9   : > { %2127 = vadd.xlane.f32.xlu1 %v2126_v21  ;;  %v2107_v26 = vpop.xlane.xlu1 %2106 }
 0xaea   : > { %v2111_v39 = vmul.f32 %v2107_v26, %v4697_v14 }
 0xaec   : > { %v5149_v23 = vsub.f32 %v5122_v5, %v2111_v39 }
 0xaee   : > { %v2119_v24 = vmul.f32 %v5149_v23, %v5149_v23 }
 0xaf0   : > { %v2129_v12 = vsel %vm612_vm0, %v2119_v24, 0.0 }
 0xaf1   : > { %2130 = vadd.xlane.f32.xlu2 %v2129_v12 }
 0xb4c   : > { %v2122_v25 = vpop.xlane.xlu2 %2121 }
 0xb4d   : > { %v2132_v50 = vmul.f32 %v2122_v25, %v4697_v14 }
 0xb4f   : > { %v2136_v55 = vadd.f32 1e-05, %v2132_v50 }
 0xb51   : > { %4095 = vrsqrt.f32 %v2136_v55  ;;  %vm2146_vm2 = vweird.f32 %v2136_v55 }
 0xb54   : > { %v2125_v15 = vpop.xlane.xlu0 %2124 }
 0xb55   : > { %v2133_v56 = vmul.f32 %v2125_v15, %v4697_v14 }
 0xb57   : > { %v4096_v31 = vpop.eup %4095  ;;  %v2137_v6 = vadd.f32 1e-05, %v2133_v56 }
 0xb58   : > { %v2141_v20 = vmul.f32 %v4096_v31, %v2136_v55  ;;  %vm2147_vm1 = vweird.f32 %v4096_v31 }
 0xb59   : > { %4097 = vrsqrt.f32 %v2137_v6  ;;  %vm2148_vm3 = vmor %vm2146_vm2, %vm2147_vm1  ;;  %vm2156_vm5 = vweird.f32 %v2137_v6 }
 0xb5a   : > { %v2142_v54 = vmul.f32 %v4096_v31, %v2141_v20 }
 0xb5c   : > { %v2143_v2 = vmul.f32 0.5, %v2142_v54  ;;  %v2128_v33 = vpop.xlane.xlu1 %2127 }
 0xb5d   : > { %v2134_v19 = vmul.f32 %v2128_v33, %v4697_v14 }
 0xb5e   : > { %v2144_v3 = vsub.f32 1.5, %v2143_v2 }
 0xb5f   : > { %v4098_v34 = vpop.eup %4097  ;;  %v2138_v36 = vadd.f32 1e-05, %v2134_v19 }
 0xb60   : > { %v2145_v37 = vmul.f32 %v4096_v31, %v2144_v3  ;;  %v2151_v8 = vmul.f32 %v4098_v34, %v2137_v6  ;;  %vm2157_vm4 = vweird.f32 %v4098_v34 }
 0xb61   : > { %4099 = vrsqrt.f32 %v2138_v36  ;;  %vm2158_vm6 = vmor %vm2156_vm5, %vm2157_vm4  ;;  %vm2166_vm8 = vweird.f32 %v2138_v36 }
 0xb62   : > { %v2152_v41 = vmul.f32 %v4098_v34, %v2151_v8  ;;  %v2149_v44 = vsel %vm2148_vm3, %v4096_v31, %v2145_v37 }
 0xb63   : > { %v2180_v4 = vmul.f32 %v2149_v44, %v5128_v38 }
 0xb64   : > { %v2153_v30 = vmul.f32 0.5, %v2152_v41  ;;  %v2131_v29 = vpop.xlane.xlu2 %2130 }
 0xb65   : > { %v2135_v43 = vmul.f32 %v2131_v29, %v4697_v14  ;;  %v2189_v22 = vmul.f32 %v4011_v59, %v2180_v4  ;;  %v4014_v29 = vld [vmem:[%s5605_s8 + $0x2] ss:$0 sm:$0xff] }
 0xb66   : > { %v2154_v46 = vsub.f32 1.5, %v2153_v30 }
 0xb67   : > { %v4100_v62 = vpop.eup %4099  ;;  %v2139_v49 = vadd.f32 1e-05, %v2135_v43  ;;  %v2198_v13 = vadd.f32 %v4012_v0, %v2189_v22 }
 0xb68   : > { %v2155_v45 = vmul.f32 %v4098_v34, %v2154_v46  ;;  %v2161_v57 = vmul.f32 %v4100_v62, %v2138_v36  ;;  %vm2167_vm7 = vweird.f32 %v4100_v62 }
 0xb69   : > { %4101 = vrsqrt.f32 %v2139_v49  ;;  %vm2168_vm9 = vmor %vm2166_vm8, %vm2167_vm7  ;;  %vm2176_vm11 = vweird.f32 %v2139_v49 }
 0xb6a   : > { %v2159_v58 = vsel %vm2158_vm6, %v4098_v34, %v2155_v45  ;;  %v2162_v60 = vmul.f32 %v4100_v62, %v2161_v57 }
 0xb6b   : > { %v2181_v7 = vmul.f32 %v2159_v58, %v5135_v47 }
 0xb6c   : > { %v2163_v61 = vmul.f32 0.5, %v2162_v60 }
 0xb6d   : > { %v2190_v51 = vmul.f32 %v4011_v59, %v2181_v7 }
 0xb6e   : > { %v2164_v10 = vsub.f32 1.5, %v2163_v61 }
 0xb6f   : > { %v4102_v11 = vpop.eup %4101  ;;  %v2199_v53 = vadd.f32 %v4012_v0, %v2190_v51 }
 0xb70   : > { %v2165_v9 = vmul.f32 %v4100_v62, %v2164_v10  ;;  %v2171_v38 = vmul.f32 %v4102_v11, %v2139_v49  ;;  %vm2177_vm10 = vweird.f32 %v4102_v11 }
 0xb71   : > { %v2202_v40 = vpack.c.bf16 %v2199_v53, %v2198_v13  ;;  %vm2178_vm12 = vmor %vm2176_vm11, %vm2177_vm10 }
 0xb72   : > { %v2172_v16 = vmul.f32 %v4102_v11, %v2171_v38  ;;  %v2169_v18 = vsel %vm2168_vm9, %v4100_v62, %v2165_v9 }
 0xb73   : > { %3696 = vmatmul.msk.bf16.vlgmr.msrb.gmra.mxu3 %vm612_vm0, %v2202_v40  ;;  %3707 = vmatmul.msk.bf16.vlgmr.msrb.gmra.mxu0 %vm612_vm0, %v2202_v40  ;;  %v2182_v26 = vmul.f32 %v2169_v18, %v5142_v17  ;;  %v4013_v17 = vld [vmem:[%s5605_s8 + $0x1] ss:$0 sm:$0xff] }
 0xb74   : > { %v2173_v21 = vmul.f32 0.5, %v2172_v16  ;;  %3718 = vmatmul.msk.bf16.vlgmr.msra.gmra.mxu1 %vm612_vm0, %v2202_v40 }
 0xb75   : > { %v2191_v25 = vmul.f32 %v4011_v59, %v2182_v26 }
 0xb76   : > { %v2174_v47 = vsub.f32 1.5, %v2173_v21 }
 0xb77   : > { %v2200_v27 = vadd.f32 %v4012_v0, %v2191_v25 }
 0xb78   : > { %v2175_v39 = vmul.f32 %v4102_v11, %v2174_v47 }
 0xb7a   : > { %v2179_v24 = vsel %vm2178_vm12, %v4102_v11, %v2175_v39 }
 0xb7b   : > { %v2183_v12 = vmul.f32 %v2179_v24, %v5149_v23  ;;  %v4015_v23 = vld [vmem:[%s5605_s8] ss:$0 sm:$0xff] }
 0xb7d   : > { %v2192_v48 = vmul.f32 %v4011_v59, %v2183_v12 }
 0xb7f   : > { %v2201_v32 = vadd.f32 %v4012_v0, %v2192_v48 }
 0xb81   : > { %v2203_v50 = vpack.c.bf16 %v2201_v32, %v2200_v27 }
 0xb83   : > { %3697 = vmatmul.msk.bf16.gmra.mxu3 %vm612_vm0, %v2203_v50  ;;  %3708 = vmatmul.msk.bf16.gmra.mxu0 %vm612_vm0, %v2203_v50 }
 0xb84   : > { %3719 = vmatmul.msk.bf16.gmra.mxu1 %vm612_vm0, %v2203_v50 }
 0xbf0   : > { %v2280_v55 = vpop.f32.mrf.mxu0 }
 0xbf1   : > { %v2321_v28 = vpop.f32.mrf.mxu1  ;;  %v2281_v63 = vadd.f32 %v4013_v17, %v2280_v55 }
 0xbf2   : > { %v2322_v60 = vadd.f32 %v4014_v29, %v2321_v28 }
 0xbf3   : > { %v2335_v56 = vpack.c.bf16 %v2281_v63, %v2281_v63 }
 0xbf4   : > { %v2339_v53 = vpack.c.bf16 %v2322_v60, %v2322_v60 }
 0xbf5   : > { %v2357_v2 = vunpack.c.l.b16 %v2335_v56 }
 0xbf6   : > { %v2239_v35 = vpop.f32.mrf.mxu3  ;;  %v2508_v12 = vunpack.c.l.b16 %v2339_v53 }
 0xbf7   : > { %v2240_v20 = vadd.f32 %v4015_v23, %v2239_v35 }
 0xbf8   : > { %v2282_v15 = vpop.f32.mrf.mxu0 }
 0xbf9   : > { %v2283_v31 = vadd.f32 %v4013_v17, %v2282_v15  ;;  %v2323_v6 = vpop.f32.mrf.mxu1  ;;  %v2331_v3 = vpack.c.bf16 %v2240_v20, %v2240_v20 }
 0xbfa   : > { %v2324_v4 = vadd.f32 %v4014_v29, %v2323_v6 }
 0xbfb   : > { %v2336_v54 = vpack.c.bf16 %v2283_v31, %v2283_v31  ;;  %v2347_v44 = vunpack.c.l.b16 %v2331_v3 }
 0xbfc   : > { %v2340_v51 = vpack.c.bf16 %v2324_v4, %v2324_v4 }
 0xbfd   : > { %v2358_v33 = vunpack.c.l.b16 %v2336_v54 }
 0xbfe   : > { %v2241_v19 = vpop.f32.mrf.mxu3  ;;  %v2509_v47 = vunpack.c.l.b16 %v2340_v51 }
 0xbff   : > { %v2361_v34 = vpack.c.b16 %v2358_v33, %v2357_v2  ;;  %v2242_v36 = vadd.f32 %v4015_v23, %v2241_v19 }
 0xc00   : > { %v2285_v37 = vpop.f32.mrf.mxu0  ;;  %v5185_v27 = vpack.c.b16 %v2509_v47, %v2508_v12 }
 0xc01   : > { %v2332_v8 = vpack.c.bf16 %v2242_v36, %v2242_v36  ;;  %v2326_v41 = vpop.f32.mrf.mxu1  ;;  %2545 = vrot.lane.b32.xlu1 %v2361_v34, %s4481_s28  ;;  %v2286_v46 = vadd.f32 %v4013_v17, %v2285_v37  ;;  %v2370_v50 = vsel %vm865_vm15, %v2361_v34, 0 }
 0xc02   : > { %v2327_v62 = vadd.f32 %v4014_v29, %v2326_v41 }
 0xc03   : > { %v2348_v30 = vunpack.c.l.b16 %v2332_v8  ;;  %v2337_v45 = vpack.c.bf16 %v2286_v46, %v2286_v46 }
 0xc04   : > { %v2341_v0 = vpack.c.bf16 %v2327_v62, %v2327_v62 }
 0xc05   : > { %v2351_v43 = vpack.c.b16 %v2348_v30, %v2347_v44  ;;  %v2359_v11 = vunpack.c.l.b16 %v2337_v45 }
 0xc06   : > { %v2244_v59 = vpop.f32.mrf.mxu3  ;;  %v2510_v9 = vunpack.c.l.b16 %v2341_v0 }
 0xc07   : > { %2541 = vrot.lane.b32.xlu2 %v2351_v43, %s4481_s28  ;;  %v2245_v7 = vadd.f32 %v4015_v23, %v2244_v59 }
 0xc08   : > { %v2287_v49 = vpop.f32.mrf.mxu0 }
 0xc09   : > { %v2288_v57 = vadd.f32 %v4013_v17, %v2287_v49  ;;  %v2328_v58 = vpop.f32.mrf.mxu1  ;;  %v2333_v16 = vpack.c.bf16 %v2245_v7, %v2245_v7 }
 0xc0a   : > { %v2329_v22 = vadd.f32 %v4014_v29, %v2328_v58 }
 0xc0b   : > { %v2338_v61 = vpack.c.bf16 %v2288_v57, %v2288_v57  ;;  %v2349_v25 = vunpack.c.l.b16 %v2333_v16 }
 0xc0c   : > { %v2342_v10 = vpack.c.bf16 %v2329_v22, %v2329_v22 }
 0xc0d   : > { %v2360_v13 = vunpack.c.l.b16 %v2338_v61 }
 0xc0e   : > { %v2511_v38 = vunpack.c.l.b16 %v2342_v10  ;;  %v2246_v40 = vpop.f32.mrf.mxu3 }
 0xc0f   : > { %v2362_v18 = vpack.c.b16 %v2360_v13, %v2359_v11  ;;  %v2247_v21 = vadd.f32 %v4015_v23, %v2246_v40 }
 0xc10   : > { %v5179_v26 = vpack.c.b16 %v2511_v38, %v2510_v9 }
 0xc11   : > { %v2334_v39 = vpack.c.bf16 %v2247_v21, %v2247_v21  ;;  %2547 = vrot.lane.b32.xlu0 %v2362_v18, %s4481_s28  ;;  %2907 = vrot.lane.b32.xlu2 %v2362_v18, %s4483_s24  ;;  %v2373_v24 = vsel %vm865_vm15, %v2362_v18, 0 }
 0xc12   : > { %2528 = vmatpush.bf16.msra.mxu3 %v5179_v26  ;;  %2381 = vmatpush.bf16.xpose.msrb.mxu2 %v2373_v24 }
 0xc13   : > { %v2350_v48 = vunpack.c.l.b16 %v2334_v39 }
 0xc15   : > { %v2352_v32 = vpack.c.b16 %v2350_v48, %v2349_v25 }
 0xc16   : > { %2529 = vmatpush.bf16.msra.mxu3 %v5185_v27 }
 0xc17   : > { %2543 = vrot.lane.b32.xlu1 %v2352_v32, %s4481_s28 }
 0xc19   : > { %2727 = vrot.lane.b32.xlu0 %v2362_v18, %s4482_s6  ;;  %2901 = vrot.lane.b32.xlu2 %v2351_v43, %s4483_s24 }
 0xc1a   : > { %2382 = vmatpush.bf16.xpose.msrb.mxu2 %v2370_v50 }
 0xc1f   : > { %2905 = vrot.lane.b32.xlu1 %v2361_v34, %s4483_s24 }
 0xc21   : > { %2725 = vrot.lane.b32.xlu0 %v2361_v34, %s4482_s6  ;;  %3720 = vmatmul.msk.bf16.vlgmr.msrb.gmra.mxu2 %vm865_vm15, %v2351_v43 }
 0xc27   : > { %2903 = vrot.lane.b32.xlu1 %v2352_v32, %s4483_s24 }
 0xc29   : > { %2721 = vrot.lane.b32.xlu0 %v2351_v43, %s4482_s6 }
 0xc31   : > { %2723 = vrot.lane.b32.xlu0 %v2352_v32, %s4482_s6  ;;  %3721 = vmatmul.msk.bf16.gmra.mxu2 %vm865_vm15, %v2352_v32 }
 0xc61   : > { %v2542_v17 = vpop.permute.xlu2 %2541 }
 0xc6b   : > { %v2908_v23 = vpop.permute.xlu2 %2907 }
 0xc6c   : > { %v2919_v6 = vsel %vm865_vm15, %v2908_v23, 0 }
 0xc73   : > { %v2546_v55 = vpop.permute.xlu1 %2545  ;;  %v2902_v41 = vpop.permute.xlu2 %2901 }
 0xc74   : > { %v2556_v56 = vsel %vm865_vm15, %v2546_v55, 0 }
 0xc83   : > { %v2548_v28 = vpop.permute.xlu0 %2547 }
 0xc84   : > { %v2559_v63 = vsel %vm865_vm15, %v2548_v28, 0 }
 0xc85   : > { %2567 = vmatpush.bf16.xpose.msra.mxu0 %v2559_v63 }
 0xc89   : > { %v2544_v35 = vpop.permute.xlu1 %2543 }
 0xc8b   : > { %v2728_v15 = vpop.permute.xlu0 %2727 }
 0xc8c   : > { %v2739_v31 = vsel %vm865_vm15, %v2728_v15, 0 }
 0xc8d   : > { %2568 = vmatpush.bf16.xpose.msra.mxu0 %v2556_v56  ;;  %2747 = vmatpush.bf16.xpose.msra.mxu2 %v2739_v31 }
 0xc91   : > { %v2906_v20 = vpop.permute.xlu1 %2905 }
 0xc92   : > { %v2916_v33 = vsel %vm865_vm15, %v2906_v20, 0 }
 0xc93   : > { %v2726_v54 = vpop.permute.xlu0 %2725 }
 0xc94   : > { %v2736_v2 = vsel %vm865_vm15, %v2726_v54, 0  ;;  %3724 = vmatmul.msk.bf16.vlgmr.msra.gmra.mxu0 %vm865_vm15, %v2542_v17 }
 0xc95   : > { %2927 = vmatpush.bf16.xpose.msrb.mxu0 %v2919_v6  ;;  %2748 = vmatpush.bf16.xpose.msra.mxu2 %v2736_v2 }
 0xc99   : > { %v2904_v46 = vpop.permute.xlu1 %2903 }
 0xc9b   : > { %v2722_v19 = vpop.permute.xlu0 %2721 }
 0xc9c   : > { %3728 = vmatmul.msk.bf16.vlgmr.msra.gmra.mxu2 %vm865_vm15, %v2722_v19 }
 0xc9d   : > { %2928 = vmatpush.bf16.xpose.msrb.mxu0 %v2916_v33 }
 0xca3   : > { %v2724_v36 = vpop.permute.xlu0 %2723 }
 0xca4   : > { %v2384_v3 = vpop.f32.mrf.mxu2  ;;  %3725 = vmatmul.msk.bf16.gmra.mxu0 %vm865_vm15, %v2544_v35 }
 0xca5   : > { %v2394_v34 = vsel %vm612_vm0, %v2384_v3, -inf }
 0xca6   : > { %2395 = vmax.xlane.f32.xlu2 %v2394_v34 }
 0xcac   : > { %v2386_v37 = vpop.f32.mrf.mxu2  ;;  %3729 = vmatmul.msk.bf16.gmra.mxu2 %vm865_vm15, %v2724_v36 }
 0xcad   : > { %v2397_v8 = vsel %vm612_vm0, %v2386_v37, -inf }
 0xcae   : > { %2398 = vmax.xlane.f32.xlu0 %v2397_v8 }
 0xcb4   : > { %v2389_v44 = vpop.f32.mrf.mxu2  ;;  %3732 = vmatmul.msk.bf16.vlgmr.msrb.gmra.mxu0 %vm865_vm15, %v2902_v41 }
 0xcb5   : > { %v2400_v30 = vsel %vm612_vm0, %v2389_v44, -inf }
 0xcb6   : > { %2401 = vmax.xlane.f32.xlu0 %v2400_v30 }
 0xcbc   : > { %v2391_v29 = vpop.f32.mrf.mxu2 }
 0xcbd   : > { %v2403_v43 = vsel %vm612_vm0, %v2391_v29, -inf }
 0xcbe   : > { %2404 = vmax.xlane.f32.xlu2 %v2403_v43 }
 0xcc4   : > { %3733 = vmatmul.msk.bf16.gmra.mxu0 %vm865_vm15, %v2904_v46 }
 0xd11   : > { %v5215_v62 = vpop.f32.mrf.mxu0 }
 0xd12   : > { %v2580_v59 = vsel %vm612_vm0, %v5215_v62, -inf }
 0xd13   : > { %2581 = vmax.xlane.f32.xlu1 %v2580_v59 }
 0xd19   : > { %v5219_v4 = vpop.f32.mrf.mxu0  ;;  %v2396_v49 = vpop.xlane.xlu2 %2395 }
 0xd1a   : > { %v2406_v45 = vsub.f32 %v2384_v3, %v2396_v49  ;;  %v2583_v51 = vsel %vm612_vm0, %v5219_v4, -inf }
 0xd1c   : > { %v2410_v22 = vmul.f32 1.442695, %v2406_v45 }
 0xd1e   : > { %4103 = vpow2.f32 %v2410_v22 }
 0xd1f   : > { %v5221_v57 = vpop.f32.mrf.mxu2 }
 0xd20   : > { %v2760_v58 = vsel %vm612_vm0, %v5221_v57, -inf }
 0xd21   : > { %v5225_v60 = vpop.f32.mrf.mxu0  ;;  %v2399_v0 = vpop.xlane.xlu0 %2398  ;;  %2761 = vmax.xlane.f32.xlu2 %v2760_v58 }
 0xd22   : > { %v2407_v40 = vsub.f32 %v2386_v37, %v2399_v0  ;;  %v2586_v18 = vsel %vm612_vm0, %v5225_v60, -inf }
 0xd24   : > { %v5237_v38 = vpop.eup %4103  ;;  %v2412_v39 = vmul.f32 1.442695, %v2407_v40 }
 0xd25   : > { %v2418_v21 = vsel %vm612_vm0, %v5237_v38, 0.0 }
 0xd27   : > { %v5227_v7 = vpop.f32.mrf.mxu2 }
 0xd28   : > { %v2763_v61 = vsel %vm612_vm0, %v5227_v7, -inf }
 0xd29   : > { %v5233_v10 = vpop.f32.mrf.mxu0  ;;  %v2402_v11 = vpop.xlane.xlu0 %2401  ;;  %2764 = vmax.xlane.f32.xlu1 %v2763_v61  ;;  %2584 = vmax.xlane.f32.xlu2 %v2583_v51 }
 0xd2a   : > { %v2408_v13 = vsub.f32 %v2389_v44, %v2402_v11  ;;  %v2589_v53 = vsel %vm612_vm0, %v5233_v10, -inf }
 0xd2b   : > { %2590 = vmax.xlane.f32.xlu0 %v2589_v53 }
 0xd2c   : > { %v2414_v9 = vmul.f32 1.442695, %v2408_v13 }
 0xd2e   : > { %4105 = vpow2.f32 %v2414_v9 }
 0xd2f   : > { %v5239_v16 = vpop.f32.mrf.mxu2  ;;  %4107 = vpow2.f32 %v2412_v39 }
 0xd30   : > { %v2766_v32 = vsel %vm612_vm0, %v5239_v16, -inf }
 0xd31   : > { %v5245_v47 = vpop.f32.mrf.mxu0  ;;  %2587 = vmax.xlane.f32.xlu1 %v2586_v18  ;;  %2419 = vadd.xlane.f32.xlu2 %v2418_v21  ;;  %v2405_v24 = vpop.xlane.xlu2 %2404 }
 0xd32   : > { %v2409_v25 = vsub.f32 %v2391_v29, %v2405_v24  ;;  %v2940_v23 = vsel %vm612_vm0, %v5245_v47, -inf }
 0xd34   : > { %v5247_v12 = vpop.eup %4105  ;;  %v2416_v28 = vmul.f32 1.442695, %v2409_v25 }
 0xd35   : > { %v2424_v17 = vsel %vm612_vm0, %v5247_v12, 0.0  ;;  %v5259_v63 = vpop.eup %4107 }
 0xd36   : > { %4109 = vpow2.f32 %v2416_v28  ;;  %v2421_v35 = vsel %vm612_vm0, %v5259_v63, 0.0 }
 0xd37   : > { %v5249_v48 = vpop.f32.mrf.mxu2 }
 0xd38   : > { %v2769_v50 = vsel %vm612_vm0, %v5249_v48, -inf }
 0xd39   : > { %v5255_v55 = vpop.f32.mrf.mxu0  ;;  %2767 = vmax.xlane.f32.xlu1 %v2766_v32  ;;  %2770 = vmax.xlane.f32.xlu0 %v2769_v50 }
 0xd3a   : > { %2425 = vadd.xlane.f32.xlu2 %v2424_v17  ;;  %v2943_v56 = vsel %vm612_vm0, %v5255_v55, -inf }
 0xd3c   : > { %v5269_v31 = vpop.eup %4109 }
 0xd3d   : > { %v2427_v20 = vsel %vm612_vm0, %v5269_v31, 0.0 }
 0xd41   : > { %v5265_v15 = vpop.f32.mrf.mxu0  ;;  %2422 = vadd.xlane.f32.xlu1 %v2421_v35  ;;  %2941 = vmax.xlane.f32.xlu0 %v2940_v23 }
 0xd42   : > { %2944 = vmax.xlane.f32.xlu2 %v2943_v56  ;;  %v2946_v6 = vsel %vm612_vm0, %v5265_v15, -inf }
 0xd49   : > { %v5275_v54 = vpop.f32.mrf.mxu0  ;;  %2947 = vmax.xlane.f32.xlu0 %v2946_v6  ;;  %2428 = vadd.xlane.f32.xlu1 %v2427_v20 }
 0xd4a   : > { %v2949_v2 = vsel %vm612_vm0, %v5275_v54, -inf }
 0xd4b   : > { %2950 = vmax.xlane.f32.xlu2 %v2949_v2 }
 0xd5d   : > { %2690 = vrot.lane.b32.xlu0 %v5185_v27, %s4481_s28 }
 0xd63   : > { %2872 = vrot.lane.b32.xlu2 %v5179_v26, %s4482_s6 }
 0xd6b   : > { %2870 = vrot.lane.b32.xlu2 %v5185_v27, %s4482_s6  ;;  %s4409_s6 = scalar_lea.hbm %s5654_s30, 64 }
 0xd6c   : > { %p4411_p4 = scmp.lt.s32.totalorder %s4409_s6, %s4405_s26 }
 0xd6e   : > { %p4412_p7 = por %p4411_p4, %p4410_p3 }
 0xd70   : > { %p4413_p8 = pnand %p4412_p7, %p4408_p2 }
 0xd86   : > { %v2582_v33 = vpop.xlane.xlu1 %2581 }
 0xd87   : > { %v2592_v19 = vsub.f32 %v5215_v62, %v2582_v33 }
 0xd89   : > { %v2596_v3 = vmul.f32 1.442695, %v2592_v19 }
 0xd8b   : > { %4111 = vpow2.f32 %v2596_v3 }
 0xd91   : > { %v5286_v34 = vpop.eup %4111 }
 0xd92   : > { %v2604_v36 = vsel %vm612_vm0, %v5286_v34, 0.0 }
 0xd93   : > { %2605 = vadd.xlane.f32.xlu1 %v2604_v36 }
 0xd94   : > { %v2762_v37 = vpop.xlane.xlu2 %2761 }
 0xd95   : > { %v2772_v8 = vsub.f32 %v5221_v57, %v2762_v37 }
 0xd97   : > { %v2776_v41 = vmul.f32 1.442695, %v2772_v8 }
 0xd99   : > { %4113 = vpow2.f32 %v2776_v41 }
 0xd9c   : > { %v2765_v44 = vpop.xlane.xlu1 %2764  ;;  %v2585_v30 = vpop.xlane.xlu2 %2584 }
 0xd9d   : > { %v2773_v29 = vsub.f32 %v5227_v7, %v2765_v44  ;;  %v2593_v43 = vsub.f32 %v5219_v4, %v2585_v30 }
 0xd9e   : > { %v2591_v46 = vpop.xlane.xlu0 %2590 }
 0xd9f   : > { %v5293_v62 = vpop.eup %4113  ;;  %v2778_v59 = vmul.f32 1.442695, %v2773_v29  ;;  %v2598_v49 = vmul.f32 1.442695, %v2593_v43  ;;  %v2595_v45 = vsub.f32 %v5233_v10, %v2591_v46 }
 0xda0   : > { %v2784_v58 = vsel %vm612_vm0, %v5293_v62, 0.0 }
 0xda1   : > { %4115 = vpow2.f32 %v2778_v59  ;;  %2785 = vadd.xlane.f32.xlu2 %v2784_v58  ;;  %v2602_v57 = vmul.f32 1.442695, %v2595_v45 }
 0xda2   : > { %4117 = vpow2.f32 %v2598_v49 }
 0xda4   : > { %v2588_v0 = vpop.xlane.xlu1 %2587  ;;  %v2420_v22 = vpop.xlane.xlu2 %2419 }
 0xda5   : > { %v2594_v7 = vsub.f32 %v5225_v60, %v2588_v0  ;;  %4119 = vrcp.f32 %v2420_v22  ;;  %v2441_v33 = vand.u32 2147483648, %v2420_v22  ;;  %vm2435_vm2 = vweird.f32 %v2420_v22 }
 0xda6   : > { %4121 = vpow2.f32 %v2602_v57  ;;  %v2439_v37 = vand.u32 2147483647, %v2420_v22 }
 0xda7   : > { %v5299_v4 = vpop.eup %4115  ;;  %v2600_v61 = vmul.f32 1.442695, %v2594_v7  ;;  %v2442_v29 = vor.u32 1.1754944e-38, %v2441_v33 }
 0xda8   : > { %v5301_v51 = vpop.eup %4117  ;;  %v2787_v10 = vsel %vm612_vm0, %v5299_v4, 0.0  ;;  %vm2440_vm4 = vcmp.eq.f32.partialorder %v2439_v37, 8.507059e+37 }
 0xda9   : > { %4123 = vpow2.f32 %v2600_v61  ;;  %2788 = vadd.xlane.f32.xlu2 %v2787_v10  ;;  %v2607_v11 = vsel %vm612_vm0, %v5301_v51, 0.0 }
 0xdaa   : > { %2608 = vadd.xlane.f32.xlu0 %v2607_v11 }
 0xdab   : > { %v4120_v13 = vpop.eup %4119 }
 0xdac   : > { %v2431_v53 = vmul.f32 %v4120_v13, %v2420_v22  ;;  %v5307_v9 = vpop.xlane.xlu1 %2767  ;;  %v2771_v60 = vpop.xlane.xlu0 %2770  ;;  %2692 = vrot.lane.b32.xlu1 %v5179_v26, %s4481_s28  ;;  %vm2436_vm1 = vweird.f32 %v4120_v13 }
 0xdad   : > { %v5311_v40 = vpop.eup %4121  ;;  %v2775_v18 = vsub.f32 %v5249_v48, %v2771_v60  ;;  %v5314_v21 = vpop.xlane.xlu2 %2425  ;;  %vm2437_vm3 = vmor %vm2435_vm2, %vm2436_vm1 }
 0xdae   : > { %v2432_v25 = vsub.f32 1.0, %v2431_v53  ;;  %v2613_v32 = vsel %vm612_vm0, %v5311_v40, 0.0  ;;  %4125 = vrcp.f32 %v5314_v21  ;;  %v2774_v53 = vsub.f32 %v5239_v16, %v5307_v9 }
 0xdaf   : > { %v5316_v39 = vpop.eup %4123  ;;  %v2782_v24 = vmul.f32 1.442695, %v2775_v18  ;;  %vm2463_vm11 = vweird.f32 %v5314_v21 }
 0xdb0   : > { %v2610_v50 = vsel %vm612_vm0, %v5316_v39, 0.0  ;;  %v2433_v17 = vmul.f32 %v4120_v13, %v2432_v25  ;;  %v2780_v16 = vmul.f32 1.442695, %v2774_v53 }
 0xdb1   : > { %2614 = vadd.xlane.f32.xlu2 %v2613_v32  ;;  %4127 = vpow2.f32 %v2782_v24 }
 0xdb2   : > { %2611 = vadd.xlane.f32.xlu0 %v2610_v50  ;;  %v2434_v2 = vadd.f32 %v4120_v13, %v2433_v17 }
 0xdb4   : > { %v2423_v28 = vpop.xlane.xlu1 %2422  ;;  %v2942_v48 = vpop.xlane.xlu0 %2941 }
 0xdb5   : > { %4129 = vrcp.f32 %v2423_v28  ;;  %v2945_v35 = vpop.xlane.xlu2 %2944  ;;  %v5323_v23 = vpop.eup %4125  ;;  %v2952_v56 = vsub.f32 %v5245_v47, %v2942_v48  ;;  %v2455_v58 = vand.u32 2147483648, %v2423_v28  ;;  %v2453_v22 = vand.u32 2147483647, %v2423_v28 }
 0xdb6   : > { %v2953_v6 = vsub.f32 %v5255_v55, %v2945_v35  ;;  %v2459_v47 = vmul.f32 %v5323_v23, %v5314_v21  ;;  %v2438_v55 = vsel %vm2437_vm3, %v4120_v13, %v2434_v2  ;;  %vm2449_vm6 = vweird.f32 %v2423_v28 }
 0xdb7   : > { %v5327_v20 = vpop.eup %4127  ;;  %v2956_v19 = vmul.f32 1.442695, %v2952_v56  ;;  %v2443_v49 = vsel %vm2440_vm4, %v2442_v29, %v2438_v55  ;;  %v2456_v18 = vor.u32 1.1754944e-38, %v2455_v58  ;;  %vm2454_vm8 = vcmp.eq.f32.partialorder %v2453_v22, 8.507059e+37 }
 0xdb8   : > { %v2958_v3 = vmul.f32 1.442695, %v2953_v6  ;;  %v2793_v36 = vsel %vm612_vm0, %v5327_v20, 0.0  ;;  %v2460_v45 = vsub.f32 1.0, %v2459_v47  ;;  %v2486_v10 = vmul.f32 %v5237_v38, %v2443_v49 }
 0xdb9   : > { %2794 = vadd.xlane.f32.xlu2 %v2793_v36  ;;  %4131 = vpow2.f32 %v2956_v19  ;;  %vm2464_vm9 = vweird.f32 %v5323_v23  ;;  %v2467_v19 = vand.u32 2147483647, %v5314_v21 }
 0xdba   : > { %4133 = vpow2.f32 %v2958_v3  ;;  %v2461_v60 = vmul.f32 %v5323_v23, %v2460_v45  ;;  %v2490_v50 = vpack.c.bf16 %v2486_v10, %v2486_v10  ;;  %vm5358_vm12 = vmor %vm2463_vm11, %vm2464_vm9 }
 0xdbb   : > { %v4130_v8 = vpop.eup %4129  ;;  %vm2468_vm4 = vcmp.eq.f32.partialorder %v2467_v19, 8.507059e+37 }
 0xdbc   : > { %v2445_v41 = vmul.f32 %v4130_v8, %v2423_v28  ;;  %v2948_v44 = vpop.xlane.xlu0 %2947  ;;  %v2429_v30 = vpop.xlane.xlu1 %2428  ;;  %vm2450_vm5 = vweird.f32 %v4130_v8  ;;  %v2462_v9 = vadd.f32 %v5323_v23, %v2461_v60  ;;  %v2498_v36 = vunpack.c.l.b16 %v2490_v50 }
 0xdbd   : > { %v2954_v43 = vsub.f32 %v5265_v15, %v2948_v44  ;;  %4135 = vrcp.f32 %v2429_v30  ;;  %vm2451_vm7 = vmor %vm2449_vm6, %vm2450_vm5  ;;  %v2483_v56 = vand.u32 2147483648, %v2429_v30  ;;  %v2481_v33 = vand.u32 2147483647, %v2429_v30 }
 0xdbe   : > { %v2446_v46 = vsub.f32 1.0, %v2445_v41  ;;  %v5334_v59 = vpop.xlane.xlu2 %2950  ;;  %vm2477_vm1 = vweird.f32 %v2429_v30  ;;  %v2466_v55 = vsel %vm5358_vm12, %v5323_v23, %v2462_v9 }
 0xdbf   : > { %v2960_v57 = vmul.f32 1.442695, %v2954_v43  ;;  %v5336_v7 = vpop.eup %4131  ;;  %v2484_v41 = vor.u32 1.1754944e-38, %v2483_v56  ;;  %vm2482_vm3 = vcmp.eq.f32.partialorder %v2481_v33, 8.507059e+37 }
 0xdc0   : > { %v2447_v0 = vmul.f32 %v4130_v8, %v2446_v46  ;;  %v5338_v61 = vpop.eup %4133  ;;  %v2964_v11 = vsel %vm612_vm0, %v5336_v7, 0.0 }
 0xdc1   : > { %4137 = vpow2.f32 %v2960_v57  ;;  %2965 = vadd.xlane.f32.xlu2 %v2964_v11  ;;  %v2967_v24 = vsel %vm612_vm0, %v5338_v61, 0.0 }
 0xdc2   : > { %v2448_v15 = vadd.f32 %v4130_v8, %v2447_v0  ;;  %2968 = vadd.xlane.f32.xlu0 %v2967_v24  ;;  %4139 = vpow2.f32 %v2780_v16 }
 0xdc3   : > { %v4136_v13 = vpop.eup %4135 }
 0xdc4   : > { %v2452_v25 = vsel %vm2451_vm7, %v4130_v8, %v2448_v15  ;;  %v2473_v38 = vmul.f32 %v4136_v13, %v2429_v30  ;;  %vm2478_vm10 = vweird.f32 %v4136_v13 }
 0xdc5   : > { %v2457_v32 = vsel %vm2454_vm8, %v2456_v18, %v2452_v25  ;;  %vm2479_vm2 = vmor %vm2477_vm1, %vm2478_vm10 }
 0xdc6   : > { %v2487_v17 = vmul.f32 %v5259_v63, %v2457_v32  ;;  %v2474_v28 = vsub.f32 1.0, %v2473_v38  ;;  %v2873_v48 = vpop.permute.xlu2 %2872  ;;  %v2469_v63 = vand.u32 2147483648, %v5314_v21  ;;  %v2955_v21 = vsub.f32 %v5275_v54, %v5334_v59 }
 0xdc7   : > { %v5349_v35 = vpop.eup %4137  ;;  %2888 = vmatpush.bf16.msrb.mxu3 %v2873_v48 }
 0xdc8   : > { %v2491_v6 = vpack.c.bf16 %v2487_v17, %v2487_v17  ;;  %v2475_v2 = vmul.f32 %v4136_v13, %v2474_v28  ;;  %v2970_v3 = vsel %vm612_vm0, %v5349_v35, 0.0  ;;  %v2470_v43 = vor.u32 1.1754944e-38, %v2469_v63  ;;  %v5369_v58 = vpop.eup %4139 }
 0xdc9   : > { %v2962_v45 = vmul.f32 1.442695, %v2955_v21  ;;  %v2790_v54 = vsel %vm612_vm0, %v5369_v58, 0.0 }
 0xdca   : > { %v2499_v8 = vunpack.c.l.b16 %v2491_v6  ;;  %v2476_v47 = vadd.f32 %v4136_v13, %v2475_v2  ;;  %2971 = vadd.xlane.f32.xlu0 %v2970_v3  ;;  %v2471_v49 = vsel %vm2468_vm4, %v2470_v43, %v2466_v55 }
 0xdcb   : > { %v2488_v57 = vmul.f32 %v5247_v12, %v2471_v49  ;;  %4141 = vpow2.f32 %v2962_v45 }
 0xdcc   : > { %v2480_v44 = vsel %vm2479_vm2, %v4136_v13, %v2476_v47  ;;  %v2502_v29 = vpack.c.b16 %v2499_v8, %v2498_v36 }
 0xdcd   : > { %v2485_v46 = vsel %vm2482_vm3, %v2484_v41, %v2480_v44  ;;  %v2492_v59 = vpack.c.bf16 %v2488_v57, %v2488_v57 }
 0xdce   : > { %3722 = vmatmul.msk.bf16.vlgmr.msra.gmra.mxu3 %vm612_vm0, %v2502_v29  ;;  %v2871_v30 = vpop.permute.xlu2 %2870  ;;  %v2489_v23 = vmul.f32 %v5269_v31, %v2485_v46 }
 0xdcf   : > { %2889 = vmatpush.bf16.msrb.mxu3 %v2871_v30  ;;  %v2500_v15 = vunpack.c.l.b16 %v2492_v59  ;;  %v2691_v18 = vpop.permute.xlu0 %2690 }
 0xdd0   : > { %v2493_v0 = vpack.c.bf16 %v2489_v23, %v2489_v23 }
 0xdd1   : > { %v5374_v10 = vpop.eup %4141 }
 0xdd2   : > { %v2501_v22 = vunpack.c.l.b16 %v2493_v0  ;;  %v2973_v31 = vsel %vm612_vm0, %v5374_v10, 0.0 }
 0xdd4   : > { %v2503_v11 = vpack.c.b16 %v2501_v22, %v2500_v15 }
 0xdd6   : > { %2791 = vadd.xlane.f32.xlu1 %v2790_v54 }
 0xdd9   : > { %3052 = vrot.lane.b32.xlu2 %v5179_v26, %s4483_s24 }
 0xdde   : > { %3723 = vmatmul.msk.bf16.gmra.mxu3 %vm612_vm0, %v2503_v11  ;;  %2974 = vadd.xlane.f32.xlu1 %v2973_v31 }
 0xddf   : > { %3050 = vrot.lane.b32.xlu0 %v5185_v27, %s4483_s24  ;;  %s5651_s24 = sld [smem:[#allocation31_spill]] }
 0xe06   : > { %v2606_v12 = vpop.xlane.xlu1 %2605 }
 0xe07   : > { %4143 = vrcp.f32 %v2606_v12  ;;  %v2627_v28 = vand.u32 2147483648, %v2606_v12  ;;  %vm2621_vm6 = vweird.f32 %v2606_v12  ;;  %v2625_v16 = vand.u32 2147483647, %v2606_v12 }
 0xe09   : > { %v2628_v2 = vor.u32 1.1754944e-38, %v2627_v28  ;;  %vm2626_vm10 = vcmp.eq.f32.partialorder %v2625_v16, 8.507059e+37 }
 0xe0d   : > { %v4144_v13 = vpop.eup %4143 }
 0xe0e   : > { %v2617_v53 = vmul.f32 %v4144_v13, %v2606_v12  ;;  %vm2622_vm5 = vweird.f32 %v4144_v13 }
 0xe0f   : > { %vm2623_vm7 = vmor %vm2621_vm6, %vm2622_vm5 }
 0xe10   : > { %v2618_v24 = vsub.f32 1.0, %v2617_v53 }
 0xe12   : > { %v2619_v25 = vmul.f32 %v4144_v13, %v2618_v24 }
 0xe14   : > { %v2786_v60 = vpop.xlane.xlu2 %2785  ;;  %v2620_v50 = vadd.f32 %v4144_v13, %v2619_v25 }
 0xe15   : > { %4145 = vrcp.f32 %v2786_v60  ;;  %v2807_v6 = vand.u32 2147483648, %v2786_v60  ;;  %vm2801_vm9 = vweird.f32 %v2786_v60  ;;  %v2805_v19 = vand.u32 2147483647, %v2786_v60 }
 0xe16   : > { %v2624_v56 = vsel %vm2623_vm7, %v4144_v13, %v2620_v50 }
 0xe17   : > { %v2629_v37 = vsel %vm2626_vm10, %v2628_v2, %v2624_v56  ;;  %v2808_v41 = vor.u32 1.1754944e-38, %v2807_v6  ;;  %vm2806_vm12 = vcmp.eq.f32.partialorder %v2805_v19, 8.507059e+37 }
 0xe18   : > { %v2672_v43 = vmul.f32 %v5286_v34, %v2629_v37 }
 0xe1a   : > { %v2676_v11 = vpack.c.bf16 %v2672_v43, %v2672_v43 }
 0xe1b   : > { %v4146_v26 = vpop.eup %4145 }
 0xe1c   : > { %v2797_v38 = vmul.f32 %v4146_v26, %v2786_v60  ;;  %v2789_v32 = vpop.xlane.xlu2 %2788  ;;  %vm2802_vm8 = vweird.f32 %v4146_v26 }
 0xe1d   : > { %v2609_v17 = vpop.xlane.xlu0 %2608  ;;  %4147 = vrcp.f32 %v2789_v32  ;;  %vm5383_vm11 = vmor %vm2801_vm9, %vm2802_vm8  ;;  %v2821_v49 = vand.u32 2147483648, %v2789_v32  ;;  %v2819_v57 = vand.u32 2147483647, %v2789_v32  ;;  %vm2815_vm3 = vweird.f32 %v2789_v32 }
 0xe1e   : > { %v2798_v48 = vsub.f32 1.0, %v2797_v38  ;;  %4149 = vrcp.f32 %v2609_v17  ;;  %v2693_v27 = vpop.permute.xlu1 %2692  ;;  %v2641_v45 = vand.u32 2147483648, %v2609_v17  ;;  %v2639_v54 = vand.u32 2147483647, %v2609_v17 }
 0xe1f   : > { %2708 = vmatpush.bf16.msrb.mxu1 %v2693_v27  ;;  %vm2635_vm4 = vweird.f32 %v2609_v17  ;;  %v2822_v34 = vor.u32 1.1754944e-38, %v2821_v49  ;;  %vm2820_vm7 = vcmp.eq.f32.partialorder %v2819_v57, 8.507059e+37 }
 0xe20   : > { %v2799_v9 = vmul.f32 %v4146_v26, %v2798_v48  ;;  %v2642_v13 = vor.u32 1.1754944e-38, %v2641_v45  ;;  %vm2640_vm8 = vcmp.eq.f32.partialorder %v2639_v54, 8.507059e+37 }
 0xe22   : > { %v2800_v33 = vadd.f32 %v4146_v26, %v2799_v9 }
 0xe23   : > { %v4148_v63 = vpop.eup %4147  ;;  %2709 = vmatpush.bf16.msrb.mxu1 %v2691_v18 }
 0xe24   : > { %v4150_v36 = vpop.eup %4149  ;;  %v2804_v8 = vsel %vm5383_vm11, %v4146_v26, %v2800_v33  ;;  %v2811_v47 = vmul.f32 %v4148_v63, %v2789_v32  ;;  %v5389_v55 = vpop.xlane.xlu2 %2614  ;;  %vm2816_vm1 = vweird.f32 %v4148_v63 }
 0xe25   : > { %v2631_v44 = vmul.f32 %v4150_v36, %v2609_v17  ;;  %v5391_v21 = vpop.xlane.xlu0 %2611  ;;  %4151 = vrcp.f32 %v5389_v55  ;;  %v2809_v46 = vsel %vm2806_vm12, %v2808_v41, %v2804_v8  ;;  %vm2636_vm2 = vweird.f32 %v4150_v36  ;;  %vm2817_vm5 = vmor %vm2815_vm3, %vm2816_vm1 }
 0xe26   : > { %v2812_v29 = vsub.f32 1.0, %v2811_v47  ;;  %4153 = vrcp.f32 %v5391_v21  ;;  %v2852_v59 = vmul.f32 %v5293_v62, %v2809_v46  ;;  %vm2637_vm6 = vmor %vm2635_vm4, %vm2636_vm2  ;;  %v2653_v48 = vand.u32 2147483647, %v5391_v21 }
 0xe27   : > { %v2632_v30 = vsub.f32 1.0, %v2631_v44  ;;  %v2655_v27 = vand.u32 2147483648, %v5391_v21  ;;  %v2669_v56 = vand.u32 2147483648, %v5389_v55  ;;  %v2667_v33 = vand.u32 2147483647, %v5389_v55 }
 0xe28   : > { %v2813_v23 = vmul.f32 %v4148_v63, %v2812_v29  ;;  %v2856_v26 = vpack.c.bf16 %v2852_v59, %v2852_v59  ;;  %vm2663_vm11 = vweird.f32 %v5389_v55  ;;  %vm2649_vm12 = vweird.f32 %v5391_v21 }
 0xe29   : > { %v2633_v0 = vmul.f32 %v4150_v36, %v2632_v30  ;;  %v2656_v8 = vor.u32 1.1754944e-38, %v2655_v27  ;;  %v2670_v41 = vor.u32 1.1754944e-38, %v2669_v56  ;;  %vm2654_vm3 = vcmp.eq.f32.partialorder %v2653_v48, 8.507059e+37 }
 0xe2a   : > { %v2814_v22 = vadd.f32 %v4148_v63, %v2813_v23  ;;  %v2864_v19 = vunpack.c.l.b16 %v2856_v26  ;;  %vm2668_vm4 = vcmp.eq.f32.partialorder %v2667_v33, 8.507059e+37 }
 0xe2b   : > { %v4152_v15 = vpop.eup %4151  ;;  %v2634_v31 = vadd.f32 %v4150_v36, %v2633_v0 }
 0xe2c   : > { %v4154_v12 = vpop.eup %4153  ;;  %v2818_v53 = vsel %vm2817_vm5, %v4148_v63, %v2814_v22  ;;  %v2659_v60 = vmul.f32 %v4152_v15, %v5389_v55  ;;  %v5399_v25 = vpop.xlane.xlu2 %2794  ;;  %vm2664_vm9 = vweird.f32 %v4152_v15 }
 0xe2d   : > { %v2638_v18 = vsel %vm2637_vm6, %v4150_v36, %v2634_v31  ;;  %v2823_v24 = vsel %vm2820_vm7, %v2822_v34, %v2818_v53  ;;  %v2645_v62 = vmul.f32 %v4154_v12, %v5391_v21  ;;  %vm2650_vm10 = vweird.f32 %v4154_v12  ;;  %vm2665_vm1 = vmor %vm2663_vm11, %vm2664_vm9 }
 0xe2e   : > { %v2643_v38 = vsel %vm2640_vm8, %v2642_v13, %v2638_v18  ;;  %v2853_v32 = vmul.f32 %v5299_v4, %v2823_v24  ;;  %v2660_v50 = vsub.f32 1.0, %v2659_v60  ;;  %vm2651_vm2 = vmor %vm2649_vm12, %vm2650_vm10  ;;  %4155 = vrcp.f32 %v5399_v25 }
 0xe2f   : > { %v2673_v17 = vmul.f32 %v5301_v51, %v2643_v38  ;;  %v2646_v28 = vsub.f32 1.0, %v2645_v62  ;;  %v2684_v51 = vunpack.c.l.b16 %v2676_v11 }
 0xe30   : > { %v2857_v16 = vpack.c.bf16 %v2853_v32, %v2853_v32  ;;  %v2661_v9 = vmul.f32 %v4152_v15, %v2660_v50 }
 0xe31   : > { %v2677_v6 = vpack.c.bf16 %v2673_v17, %v2673_v17  ;;  %v2647_v2 = vmul.f32 %v4154_v12, %v2646_v28 }
 0xe32   : > { %v2865_v4 = vunpack.c.l.b16 %v2857_v16  ;;  %v2662_v63 = vadd.f32 %v4152_v15, %v2661_v9 }
 0xe33   : > { %v2685_v3 = vunpack.c.l.b16 %v2677_v6  ;;  %v2648_v36 = vadd.f32 %v4154_v12, %v2647_v2 }
 0xe34   : > { %v2868_v37 = vpack.c.b16 %v2865_v4, %v2864_v19  ;;  %v2666_v47 = vsel %vm2665_vm1, %v4152_v15, %v2662_v63  ;;  %v2966_v55 = vpop.xlane.xlu2 %2965  ;;  %v5414_v45 = vpop.eup %4155 }
 0xe35   : > { %v2688_v44 = vpack.c.b16 %v2685_v3, %v2684_v51  ;;  %v2652_v29 = vsel %vm2651_vm2, %v4154_v12, %v2648_v36  ;;  %v2671_v46 = vsel %vm2668_vm4, %v2670_v41, %v2666_v47  ;;  %v2969_v30 = vpop.xlane.xlu0 %2968  ;;  %4157 = vrcp.f32 %v2966_v55 }
 0xe36   : > { %v2657_v43 = vsel %vm2654_vm3, %v2656_v8, %v2652_v29  ;;  %3730 = vmatmul.msk.bf16.vlgmr.msrb.gmra.mxu3 %vm612_vm0, %v2868_v37  ;;  %4159 = vrcp.f32 %v2969_v30  ;;  %v2675_v49 = vmul.f32 %v5311_v40, %v2671_v46  ;;  %v2839_v31 = vmul.f32 %v5414_v45, %v5399_v25 }
 0xe37   : > { %3726 = vmatmul.msk.bf16.vlgmr.msrb.gmra.mxu1 %vm612_vm0, %v2688_v44  ;;  %v2674_v21 = vmul.f32 %v5316_v39, %v2657_v43  ;;  %v2987_v40 = vand.u32 2147483648, %v2966_v55  ;;  %v3001_v53 = vand.u32 2147483648, %v2969_v30  ;;  %v2985_v18 = vand.u32 2147483647, %v2966_v55 }
 0xe38   : > { %v2679_v0 = vpack.c.bf16 %v2675_v49, %v2675_v49  ;;  %v2999_v62 = vand.u32 2147483647, %v2969_v30  ;;  %v2840_v26 = vsub.f32 1.0, %v2839_v31  ;;  %vm2981_vm7 = vweird.f32 %v2966_v55 }
 0xe39   : > { %v2678_v57 = vpack.c.bf16 %v2674_v21, %v2674_v21  ;;  %vm2995_vm8 = vweird.f32 %v2969_v30  ;;  %v2988_v50 = vor.u32 1.1754944e-38, %v2987_v40  ;;  %v3002_v48 = vor.u32 1.1754944e-38, %v3001_v53 }
 0xe3a   : > { %v2687_v13 = vunpack.c.l.b16 %v2679_v0  ;;  %vm2986_vm11 = vcmp.eq.f32.partialorder %v2985_v18, 8.507059e+37  ;;  %vm3000_vm12 = vcmp.eq.f32.partialorder %v2999_v62, 8.507059e+37  ;;  %v2841_v56 = vmul.f32 %v5414_v45, %v2840_v26 }
 0xe3b   : > { %v4158_v23 = vpop.eup %4157  ;;  %v2686_v12 = vunpack.c.l.b16 %v2678_v57  ;;  %vm2844_vm1 = vweird.f32 %v5414_v45  ;;  %v2849_v51 = vand.u32 2147483648, %v5399_v25  ;;  %vm2843_vm2 = vweird.f32 %v5399_v25 }
 0xe3c   : > { %v4160_v54 = vpop.eup %4159  ;;  %v2977_v59 = vmul.f32 %v4158_v23, %v2966_v55  ;;  %v3053_v22 = vpop.permute.xlu2 %3052  ;;  %vm2982_vm5 = vweird.f32 %v4158_v23  ;;  %v2842_v63 = vadd.f32 %v5414_v45, %v2841_v56  ;;  %vm2845_vm3 = vmor %vm2843_vm2, %vm2844_vm1 }
 0xe3d   : > { %v2991_v15 = vmul.f32 %v4160_v54, %v2969_v30  ;;  %v5416_v11 = vpop.xlane.xlu0 %2971  ;;  %3068 = vmatpush.bf16.msra.mxu1 %v3053_v22  ;;  %vm2996_vm6 = vweird.f32 %v4160_v54  ;;  %vm2983_vm9 = vmor %vm2981_vm7, %vm2982_vm5  ;;  %v2689_v17 = vpack.c.b16 %v2687_v13, %v2686_v12  ;;  %v2850_v47 = vor.u32 1.1754944e-38, %v2849_v51 }
 0xe3e   : > { %v2978_v34 = vsub.f32 1.0, %v2977_v59  ;;  %4161 = vrcp.f32 %v5416_v11  ;;  %vm2997_vm10 = vmor %vm2995_vm8, %vm2996_vm6  ;;  %v2846_v8 = vsel %vm2845_vm3, %v5414_v45, %v2842_v63  ;;  %vm3009_vm7 = vweird.f32 %v5416_v11 }
 0xe3f   : > { %v2992_v39 = vsub.f32 1.0, %v2991_v15  ;;  %v3015_v0 = vand.u32 2147483648, %v5416_v11  ;;  %v3013_v22 = vand.u32 2147483647, %v5416_v11 }
 0xe40   : > { %v2979_v60 = vmul.f32 %v4158_v23, %v2978_v34 }
 0xe41   : > { %v2993_v24 = vmul.f32 %v4160_v54, %v2992_v39  ;;  %v3016_v12 = vor.u32 1.1754944e-38, %v3015_v0 }
 0xe42   : > { %v2980_v38 = vadd.f32 %v4158_v23, %v2979_v60 }
 0xe43   : > { %v2994_v32 = vadd.f32 %v4160_v54, %v2993_v24 }
 0xe44   : > { %v5421_v28 = vpop.eup %4161  ;;  %v2984_v27 = vsel %vm2983_vm9, %v4158_v23, %v2980_v38 }
 0xe45   : > { %v2998_v16 = vsel %vm2997_vm10, %v4160_v54, %v2994_v32  ;;  %v2989_v9 = vsel %vm2986_vm11, %v2988_v50, %v2984_v27  ;;  %v3005_v19 = vmul.f32 %v5421_v28, %v5416_v11  ;;  %vm3010_vm5 = vweird.f32 %v5421_v28 }
 0xe46   : > { %v3003_v6 = vsel %vm3000_vm12, %v3002_v48, %v2998_v16  ;;  %v3032_v33 = vmul.f32 %v5336_v7, %v2989_v9  ;;  %vm5441_vm8 = vmor %vm3009_vm7, %vm3010_vm5  ;;  %vm3014_vm12 = vcmp.eq.f32.partialorder %v3013_v22, 8.507059e+37 }
 0xe47   : > { %3727 = vmatmul.msk.bf16.gmra.mxu1 %vm612_vm0, %v2689_v17  ;;  %v3033_v2 = vmul.f32 %v5338_v61, %v3003_v6  ;;  %v3006_v37 = vsub.f32 1.0, %v3005_v19  ;;  %v2847_v61 = vand.u32 2147483647, %v5399_v25 }
 0xe48   : > { %v3036_v36 = vpack.c.bf16 %v3032_v33, %v3032_v33 }
 0xe49   : > { %v2792_v4 = vpop.xlane.xlu1 %2791  ;;  %v3037_v3 = vpack.c.bf16 %v3033_v2, %v3033_v2  ;;  %v3007_v29 = vmul.f32 %v5421_v28, %v3006_v37  ;;  %vm2848_vm4 = vcmp.eq.f32.partialorder %v2847_v61, 8.507059e+37 }
 0xe4a   : > { %4163 = vrcp.f32 %v2792_v4  ;;  %v3044_v44 = vunpack.c.l.b16 %v3036_v36  ;;  %v2851_v30 = vsel %vm2848_vm4, %v2850_v47, %v2846_v8  ;;  %v2833_v25 = vand.u32 2147483647, %v2792_v4 }
 0xe4b   : > { %v3045_v41 = vunpack.c.l.b16 %v3037_v3  ;;  %v2835_v49 = vand.u32 2147483648, %v2792_v4  ;;  %v3008_v45 = vadd.f32 %v5421_v28, %v3007_v29  ;;  %v2855_v54 = vmul.f32 %v5327_v20, %v2851_v30 }
 0xe4c   : > { %vm2829_vm9 = vweird.f32 %v2792_v4  ;;  %vm2834_vm11 = vcmp.eq.f32.partialorder %v2833_v25, 8.507059e+37 }
 0xe4d   : > { %v3048_v23 = vpack.c.b16 %v3045_v41, %v3044_v44  ;;  %v2836_v34 = vor.u32 1.1754944e-38, %v2835_v49  ;;  %v3012_v39 = vsel %vm5441_vm8, %v5421_v28, %v3008_v45  ;;  %v2859_v53 = vpack.c.bf16 %v2855_v54, %v2855_v54  ;;  %v3808_v45 = vld [vmem:[#allocation11] sm:$0xff] }
 0xe4e   : > { %v3017_v18 = vsel %vm3014_vm12, %v3016_v12, %v3012_v39 }
 0xe4f   : > { %v2867_v32 = vunpack.c.l.b16 %v2859_v53  ;;  %v3034_v28 = vmul.f32 %v5349_v35, %v3017_v18 }
 0xe50   : > { %v4164_v7 = vpop.eup %4163 }
 0xe51   : > { %v2825_v43 = vmul.f32 %v4164_v7, %v2792_v4  ;;  %v2975_v46 = vpop.xlane.xlu1 %2974  ;;  %v3051_v55 = vpop.permute.xlu0 %3050  ;;  %vm2830_vm6 = vweird.f32 %v4164_v7  ;;  %v3038_v56 = vpack.c.bf16 %v3034_v28, %v3034_v28 }
 0xe52   : > { %4165 = vrcp.f32 %v2975_v46  ;;  %3069 = vmatpush.bf16.msra.mxu1 %v3051_v55  ;;  %vm2831_vm10 = vmor %vm2829_vm9, %vm2830_vm6  ;;  %v3029_v24 = vand.u32 2147483648, %v2975_v46  ;;  %v3027_v26 = vand.u32 2147483647, %v2975_v46  ;;  %vm3023_vm2 = vweird.f32 %v2975_v46  ;;  %v2531_v4 = vpop.f32.mrf.mxu3 }
 0xe53   : > { %v2826_v21 = vsub.f32 1.0, %v2825_v43  ;;  %v3046_v2 = vunpack.c.l.b16 %v3038_v56 }
 0xe54   : > { %v3030_v48 = vor.u32 1.1754944e-38, %v3029_v24  ;;  %vm3028_vm4 = vcmp.eq.f32.partialorder %v3027_v26, 8.507059e+37 }
 0xe55   : > { %v2827_v57 = vmul.f32 %v4164_v7, %v2826_v21 }
 0xe57   : > { %v2828_v15 = vadd.f32 %v4164_v7, %v2827_v57  ;;  %3734 = vmatmul.msk.bf16.vlgmr.msra.gmra.mxu1 %vm612_vm0, %v3048_v23  ;;  %v3809_v23 = vld [vmem:[#allocation11 + $0x8] sm:$0xff] }
 0xe58   : > { %v4166_v31 = vpop.eup %4165  ;;  %3175 = vmatpush.bf16.msrb.mxu2 %v3809_v23 }
 0xe59   : > { %v2832_v40 = vsel %vm2831_vm10, %v4164_v7, %v2828_v15  ;;  %v3019_v20 = vmul.f32 %v4166_v31, %v2975_v46  ;;  %vm3024_vm1 = vweird.f32 %v4166_v31 }
 0xe5a   : > { %v2837_v13 = vsel %vm2834_vm11, %v2836_v34, %v2832_v40  ;;  %vm3025_vm3 = vmor %vm3023_vm2, %vm3024_vm1  ;;  %v2533_v63 = vpop.f32.mrf.mxu3 }
 0xe5b   : > { %v3020_v60 = vsub.f32 1.0, %v3019_v20  ;;  %v2854_v11 = vmul.f32 %v5369_v58, %v2837_v13 }
 0xe5c   : > { %3176 = vmatpush.bf16.msrb.mxu2 %v3808_v45 }
 0xe5d   : > { %v3021_v62 = vmul.f32 %v4166_v31, %v3020_v60  ;;  %v2858_v38 = vpack.c.bf16 %v2854_v11, %v2854_v11 }
 0xe5f   : > { %v3022_v50 = vadd.f32 %v4166_v31, %v3021_v62  ;;  %v2866_v17 = vunpack.c.l.b16 %v2858_v38 }
 0xe61   : > { %v3026_v27 = vsel %vm3025_vm3, %v4166_v31, %v3022_v50  ;;  %v2869_v16 = vpack.c.b16 %v2867_v32, %v2866_v17 }
 0xe62   : > { %v3031_v9 = vsel %vm3028_vm4, %v3030_v48, %v3026_v27  ;;  %v2536_v35 = vpop.f32.mrf.mxu3 }
 0xe63   : > { %3731 = vmatmul.msk.bf16.gmra.mxu3 %vm612_vm0, %v2869_v16  ;;  %v3035_v58 = vmul.f32 %v5374_v10, %v3031_v9 }
 0xe65   : > { %v3039_v6 = vpack.c.bf16 %v3035_v58, %v3035_v58 }
 0xe67   : > { %v3047_v33 = vunpack.c.l.b16 %v3039_v6 }
 0xe69   : > { %v3049_v19 = vpack.c.b16 %v3047_v33, %v3046_v2  ;;  %v4016_v2 = vld [vmem:[%s5607_s10] ss:$0 sm:$0xff] }
 0xe6a   : > { %v2538_v51 = vpop.f32.mrf.mxu3 }
 0xe6b   : > { %3735 = vmatmul.msk.bf16.gmra.mxu1 %vm612_vm0, %v3049_v19 }
 0xeb4   : > { %v2711_v3 = vpop.f32.mrf.mxu1 }
 0xeb9   : > { %v2891_v36 = vpop.f32.mrf.mxu3 }
 0xebc   : > { %v2713_v37 = vpop.f32.mrf.mxu1 }
 0xebd   : > { %v3975_v61 = vpack.i.bf16 %v2713_v37, %v2711_v3 }
 0xebf   : > { %3976 = vrot.lane.b32.xlu1 %v3975_v61, %s4485_s27 }
 0xec1   : > { %v2893_v7 = vpop.f32.mrf.mxu3 }
 0xec2   : > { %v3980_v8 = vpack.i.bf16 %v2893_v7, %v2891_v36 }
 0xec4   : > { %v2716_v10 = vpop.f32.mrf.mxu1  ;;  %3981 = vrot.lane.b32.xlu2 %v3980_v8, %s4484_s2 }
 0xecc   : > { %v2718_v47 = vpop.f32.mrf.mxu1 }
 0xecd   : > { %v3990_v41 = vpack.i.bf16 %v2718_v47, %v2716_v10 }
 0xecf   : > { %3991 = vrot.lane.b32.xlu0 %v3990_v41, %s4485_s27 }
 0xed4   : > { %v3071_v44 = vpop.f32.mrf.mxu1 }
 0xedc   : > { %v3073_v29 = vpop.f32.mrf.mxu1 }
 0xedd   : > { %v3985_v43 = vpack.i.bf16 %v3073_v29, %v3071_v44 }
 0xedf   : > { %3986 = vrot.lane.b32.xlu2 %v3985_v43, %s4486_s16 }
 0xee6   : > { %v2896_v46 = vpop.f32.mrf.mxu3 }
 0xee8   : > { %v3076_v55 = vpop.f32.mrf.mxu1 }
 0xeee   : > { %v2898_v30 = vpop.f32.mrf.mxu3 }
 0xeef   : > { %v3995_v21 = vpack.i.bf16 %v2898_v30, %v2896_v46 }
 0xef0   : > { %v3078_v25 = vpop.f32.mrf.mxu1 }
 0xef1   : > { %v4000_v49 = vpack.i.bf16 %v3078_v25, %v3076_v55  ;;  %3996 = vrot.lane.b32.xlu2 %v3995_v21, %s4484_s2  ;;  %s3611_s2 = sshll.u32 %s599_s15, 5 }
 0xef2   : > { %s601_s25 = scalar_lea.vmem [#allocation14], %s3611_s2 }
 0xef3   : > { %4001 = vrot.lane.b32.xlu1 %v4000_v49, %s4486_s16  ;;  %s3459_s29 = sshll.u32 %s601_s25, 4  ;;  %s3460_s29 = int_to_ptr.vmem [resolvable:$true] %s3459_s29 }
 0xf1e   : > { %v3982_v57 = vpop.permute.xlu2 %3981 }
 0xf1f   : > { %v3984_v31 = vunpack.i.h.bf16 %v3982_v57  ;;  %v3983_v34 = vunpack.i.l.bf16 %v3982_v57 }
 0xf31   : > { %v3977_v0 = vpop.permute.xlu1 %3976 }
 0xf32   : > { %v3979_v54 = vunpack.i.h.bf16 %v3977_v0  ;;  %v3978_v59 = vunpack.i.l.bf16 %v3977_v0 }
 0xf34   : > { %v3130_v22 = vsel %vm865_vm15, %v2533_v63, %v3979_v54  ;;  %v3129_v15 = vsel %vm865_vm15, %v2531_v4, %v3978_v59 }
 0xf35   : > { %v3133_v12 = vsel %vm2035_vm14, %v3129_v15, %v3983_v34  ;;  %v3134_v13 = vsel %vm2035_vm14, %v3130_v22, %v3984_v31 }
 0xf39   : > { %v3987_v39 = vpop.permute.xlu2 %3986 }
 0xf3a   : > { %v3989_v40 = vunpack.i.h.bf16 %v3987_v39  ;;  %v3988_v20 = vunpack.i.l.bf16 %v3987_v39  ;;  %v3811_v39 = vld [vmem:[#allocation13 + $0x8] sm:$0xff] }
 0xf3b   : > { %3332 = vmatpush.bf16.msra.mxu3 %v3811_v39 }
 0xf3c   : > { %v3137_v53 = vsel %vm2040_vm13, %v3133_v12, %v3988_v20  ;;  %v3138_v60 = vsel %vm2040_vm13, %v3134_v13, %v3989_v40  ;;  %v3810_v20 = vld [vmem:[#allocation13] sm:$0xff] }
 0xf3d   : > { %v3141_v11 = vpack.c.bf16 %v3138_v60, %v3137_v53 }
 0xf3f   : > { %3744 = vmatmul.msk.bf16.vlgmr.msrb.gmra.mxu2 %vm612_vm0, %v3141_v11  ;;  %3333 = vmatpush.bf16.msra.mxu3 %v3810_v20  ;;  %v3815_v20 = vld [vmem:[%s5610_s13 + $0x18] sm:$0xff] }
 0xf41   : > { %v3992_v18 = vpop.permute.xlu0 %3991 }
 0xf42   : > { %v3994_v62 = vunpack.i.h.bf16 %v3992_v18  ;;  %v3993_v26 = vunpack.i.l.bf16 %v3992_v18 }
 0xf44   : > { %v3132_v17 = vsel %vm865_vm15, %v2538_v51, %v3994_v62  ;;  %v3131_v28 = vsel %vm865_vm15, %v2536_v35, %v3993_v26 }
 0xf4b   : > { %v3997_v24 = vpop.permute.xlu2 %3996 }
 0xf4c   : > { %v3999_v38 = vunpack.i.h.bf16 %v3997_v24  ;;  %v3998_v32 = vunpack.i.l.bf16 %v3997_v24 }
 0xf4e   : > { %v3136_v16 = vsel %vm2035_vm14, %v3132_v17, %v3999_v38  ;;  %v3135_v9 = vsel %vm2035_vm14, %v3131_v28, %v3998_v32 }
 0xf65   : > { %v4002_v50 = vpop.permute.xlu1 %4001 }
 0xf66   : > { %v4004_v48 = vunpack.i.h.bf16 %v4002_v50  ;;  %v4003_v27 = vunpack.i.l.bf16 %v4002_v50 }
 0xf68   : > { %v3139_v58 = vsel %vm2040_vm13, %v3135_v9, %v4003_v27  ;;  %v3140_v56 = vsel %vm2040_vm13, %v3136_v16, %v4004_v48  ;;  %v4017_v27 = vld [vmem:[#allocation2 + $0x2] ss:$0 sm:$0xff] }
 0xf69   : > { %v3142_v6 = vpack.c.bf16 %v3140_v56, %v3139_v58  ;;  %v4018_v56 = vld [vmem:[#allocation5 + $0x2] ss:$0 sm:$0xff] }
 0xf6b   : > { %3745 = vmatmul.msk.bf16.gmra.mxu2 %vm612_vm0, %v3142_v6 }
 0xfc2   : > { %v3178_v33 = vpop.f32.mrf.mxu2 }
 0xfc3   : > { %v3179_v19 = vadd.f32 %v4016_v2, %v3178_v33 }
 0xfc5   : > { %v5479_v4 = vadd.f32 %v3179_v19, %v5107_v42 }
 0xfc7   : > { %v3192_v63 = vsel %vm612_vm0, %v5479_v4, 0.0 }
 0xfc8   : > { %3193 = vadd.xlane.f32.xlu0 %v3192_v63 }
 0xfca   : > { %v3180_v35 = vpop.f32.mrf.mxu2 }
 0xfcb   : > { %v3181_v51 = vadd.f32 %v4016_v2, %v3180_v35 }
 0xfcd   : > { %v5484_v3 = vadd.f32 %v3181_v51, %v5112_v1 }
 0xfcf   : > { %v3195_v36 = vsel %vm612_vm0, %v5484_v3, 0.0 }
 0xfd0   : > { %3196 = vadd.xlane.f32.xlu2 %v3195_v36 }
 0xfee   : > { %v3183_v37 = vpop.f32.mrf.mxu2 }
 0xfef   : > { %v3184_v61 = vadd.f32 %v4016_v2, %v3183_v37 }
 0xff1   : > { %v5489_v7 = vadd.f32 %v3184_v61, %v5117_v52  ;;  %v3819_v61 = vld [vmem:[%s5610_s13 + $0x38] sm:$0xff] }
 0xff2   : > { %3419 = vmatpush.bf16.msra.mxu0 %v3819_v61 }
 0xff3   : > { %v3198_v42 = vsel %vm612_vm0, %v5489_v7, 0.0 }
 0xff4   : > { %3199 = vadd.xlane.f32.xlu1 %v3198_v42 }
 0xff6   : > { %v3185_v8 = vpop.f32.mrf.mxu2 }
 0xff7   : > { %v3186_v10 = vadd.f32 %v4016_v2, %v3185_v8 }
 0xff9   : > { %v5494_v47 = vadd.f32 %v3186_v10, %v5122_v5  ;;  %v3818_v10 = vld [vmem:[%s5610_s13 + $0x30] sm:$0xff] }
 0xffa   : > { %3420 = vmatpush.bf16.msra.mxu0 %v3818_v10 }
 0xffb   : > { %v3201_v1 = vsel %vm612_vm0, %v5494_v47, 0.0 }
 0xffc   : > { %3202 = vadd.xlane.f32.xlu2 %v3201_v1 }
0x103b   : > { %v3194_v41 = vpop.xlane.xlu0 %3193 }
0x103c   : > { %v3204_v44 = vmul.f32 %v3194_v41, %v4697_v14 }
0x103e   : > { %v3208_v29 = vsub.f32 %v5479_v4, %v3204_v44 }
0x1040   : > { %v3212_v52 = vmul.f32 %v3208_v29, %v3208_v29 }
0x1042   : > { %v3216_v43 = vsel %vm612_vm0, %v3212_v52, 0.0 }
0x1043   : > { %v3197_v46 = vpop.xlane.xlu2 %3196  ;;  %3217 = vadd.xlane.f32.xlu0 %v3216_v43 }
0x1044   : > { %v3205_v55 = vmul.f32 %v3197_v46, %v4697_v14 }
0x1046   : > { %v3209_v30 = vsub.f32 %v5484_v3, %v3205_v55 }
0x1048   : > { %v3213_v5 = vmul.f32 %v3209_v30, %v3209_v30 }
0x104a   : > { %v3219_v21 = vsel %vm612_vm0, %v3213_v5, 0.0 }
0x104b   : > { %3220 = vadd.xlane.f32.xlu1 %v3219_v21 }
0x1067   : > { %v3200_v25 = vpop.xlane.xlu1 %3199 }
0x1068   : > { %v3206_v49 = vmul.f32 %v3200_v25, %v4697_v14 }
0x106a   : > { %v5506_v23 = vsub.f32 %v5489_v7, %v3206_v49 }
0x106c   : > { %v3214_v45 = vmul.f32 %v5506_v23, %v5506_v23 }
0x106e   : > { %v3222_v57 = vsel %vm612_vm0, %v3214_v45, 0.0 }
0x106f   : > { %3223 = vadd.xlane.f32.xlu2 %v3222_v57  ;;  %v3203_v0 = vpop.xlane.xlu2 %3202 }
0x1070   : > { %v3207_v54 = vmul.f32 %v3203_v0, %v4697_v14 }
0x1072   : > { %v5513_v59 = vsub.f32 %v5494_v47, %v3207_v54 }
0x1074   : > { %v3215_v22 = vmul.f32 %v5513_v59, %v5513_v59 }
0x1076   : > { %v3225_v15 = vsel %vm612_vm0, %v3215_v22, 0.0 }
0x1077   : > { %3226 = vadd.xlane.f32.xlu0 %v3225_v15 }
0x10b6   : > { %v3218_v31 = vpop.xlane.xlu0 %3217 }
0x10b7   : > { %v3228_v34 = vmul.f32 %v3218_v31, %v4697_v14 }
0x10b9   : > { %v3232_v40 = vadd.f32 1e-05, %v3228_v34 }
0x10bb   : > { %4167 = vrsqrt.f32 %v3232_v40  ;;  %vm3242_vm14 = vweird.f32 %v3232_v40 }
0x10be   : > { %v3221_v12 = vpop.xlane.xlu1 %3220 }
0x10bf   : > { %v3229_v13 = vmul.f32 %v3221_v12, %v4697_v14  ;;  %v3812_v12 = vld [vmem:[%s5610_s13] sm:$0xff] }
0x10c1   : > { %v4168_v53 = vpop.eup %4167  ;;  %v3233_v60 = vadd.f32 1e-05, %v3229_v13 }
0x10c2   : > { %v3237_v11 = vmul.f32 %v4168_v53, %v3232_v40  ;;  %vm3243_vm15 = vweird.f32 %v4168_v53 }
0x10c3   : > { %4169 = vrsqrt.f32 %v3233_v60  ;;  %vm3244_vm13 = vmor %vm3242_vm14, %vm3243_vm15  ;;  %vm3252_vm6 = vweird.f32 %v3233_v60 }
0x10c4   : > { %v3238_v18 = vmul.f32 %v4168_v53, %v3237_v11 }
0x10c6   : > { %v3239_v24 = vmul.f32 0.5, %v3238_v18 }
0x10c8   : > { %v3240_v62 = vsub.f32 1.5, %v3239_v24 }
0x10c9   : > { %v4170_v26 = vpop.eup %4169 }
0x10ca   : > { %v3241_v38 = vmul.f32 %v4168_v53, %v3240_v62  ;;  %v3247_v32 = vmul.f32 %v4170_v26, %v3233_v60  ;;  %vm3253_vm5 = vweird.f32 %v4170_v26 }
0x10cb   : > { %vm3254_vm7 = vmor %vm3252_vm6, %vm3253_vm5 }
0x10cc   : > { %v3248_v50 = vmul.f32 %v4170_v26, %v3247_v32  ;;  %v3245_v17 = vsel %vm3244_vm13, %v4168_v53, %v3241_v38  ;;  %v4019_v53 = vld [vmem:[%s5609_s12] ss:$0 sm:$0xff] }
0x10cd   : > { %v3276_v16 = vmul.f32 %v3245_v17, %v3208_v29  ;;  %v3817_v29 = vld [vmem:[%s5610_s13 + $0x28] sm:$0xff] }
0x10ce   : > { %v3249_v28 = vmul.f32 0.5, %v3248_v50  ;;  %3421 = vmatpush.bf16.msra.mxu0 %v3817_v29 }
0x10cf   : > { %v3285_v6 = vmul.f32 %v4017_v27, %v3276_v16  ;;  %v4020_v16 = vld [vmem:[%s5651_s24] ss:$0 sm:$0xff] }
0x10d0   : > { %v3250_v48 = vsub.f32 1.5, %v3249_v28 }
0x10d1   : > { %v3294_v19 = vadd.f32 %v4018_v56, %v3285_v6 }
0x10d2   : > { %v3251_v9 = vmul.f32 %v4170_v26, %v3250_v48 }
0x10d4   : > { %v3255_v58 = vsel %vm3254_vm7, %v4170_v26, %v3251_v9 }
0x10d5   : > { %v3277_v2 = vmul.f32 %v3255_v58, %v3209_v30 }
0x10d7   : > { %v3286_v33 = vmul.f32 %v4017_v27, %v3277_v2 }
0x10d9   : > { %v3295_v63 = vadd.f32 %v4018_v56, %v3286_v33 }
0x10db   : > { %v3298_v35 = vpack.c.bf16 %v3295_v63, %v3294_v19 }
0x10dd   : > { %3754 = vmatmul.msk.bf16.vlgmr.msra.gmra.mxu3 %vm612_vm0, %v3298_v35 }
0x10e2   : > { %v3224_v51 = vpop.xlane.xlu2 %3223 }
0x10e3   : > { %v3230_v36 = vmul.f32 %v3224_v51, %v4697_v14 }
0x10e5   : > { %v3234_v37 = vadd.f32 1e-05, %v3230_v36 }
0x10e7   : > { %4171 = vrsqrt.f32 %v3234_v37  ;;  %vm3262_vm9 = vweird.f32 %v3234_v37 }
0x10ea   : > { %v3227_v42 = vpop.xlane.xlu0 %3226 }
0x10eb   : > { %v3231_v8 = vmul.f32 %v3227_v42, %v4697_v14  ;;  %v3816_v14 = vld [vmem:[%s5610_s13 + $0x20] sm:$0xff] }
0x10ec   : > { %3422 = vmatpush.bf16.msra.mxu0 %v3816_v14 }
0x10ed   : > { %v4172_v1 = vpop.eup %4171  ;;  %v3235_v41 = vadd.f32 1e-05, %v3231_v8 }
0x10ee   : > { %v3257_v44 = vmul.f32 %v4172_v1, %v3234_v37  ;;  %vm3263_vm8 = vweird.f32 %v4172_v1 }
0x10ef   : > { %4173 = vrsqrt.f32 %v3235_v41  ;;  %vm3264_vm10 = vmor %vm3262_vm9, %vm3263_vm8  ;;  %vm3272_vm12 = vweird.f32 %v3235_v41 }
0x10f0   : > { %v3258_v52 = vmul.f32 %v4172_v1, %v3257_v44  ;;  %3423 = vmatpush.bf16.msra.mxu0 %v3815_v20 }
0x10f2   : > { %v3259_v43 = vmul.f32 0.5, %v3258_v52 }
0x10f4   : > { %v3260_v46 = vsub.f32 1.5, %v3259_v43 }
0x10f5   : > { %v4174_v55 = vpop.eup %4173 }
0x10f6   : > { %v3261_v30 = vmul.f32 %v4172_v1, %v3260_v46  ;;  %v3267_v5 = vmul.f32 %v4174_v55, %v3235_v41  ;;  %vm3273_vm11 = vweird.f32 %v4174_v55 }
0x10f7   : > { %vm3274_vm1 = vmor %vm3272_vm12, %vm3273_vm11 }
0x10f8   : > { %v3268_v21 = vmul.f32 %v4174_v55, %v3267_v5  ;;  %v3265_v25 = vsel %vm3264_vm10, %v4172_v1, %v3261_v30 }
0x10f9   : > { %v3278_v57 = vmul.f32 %v3265_v25, %v5506_v23  ;;  %v3814_v23 = vld [vmem:[%s5610_s13 + $0x10] sm:$0xff] }
0x10fa   : > { %v3269_v49 = vmul.f32 0.5, %v3268_v21  ;;  %3424 = vmatpush.bf16.msra.mxu0 %v3814_v23 }
0x10fb   : > { %v3287_v15 = vmul.f32 %v4017_v27, %v3278_v57 }
0x10fc   : > { %v3270_v45 = vsub.f32 1.5, %v3269_v49 }
0x10fd   : > { %v3296_v34 = vadd.f32 %v4018_v56, %v3287_v15 }
0x10fe   : > { %v3271_v0 = vmul.f32 %v4174_v55, %v3270_v45 }
0x1100   : > { %v3275_v54 = vsel %vm3274_vm1, %v4174_v55, %v3271_v0 }
0x1101   : > { %v3279_v22 = vmul.f32 %v3275_v54, %v5513_v59  ;;  %v3813_v59 = vld [vmem:[%s5610_s13 + $0x8] sm:$0xff] }
0x1102   : > { %3425 = vmatpush.bf16.msra.mxu0 %v3813_v59 }
0x1103   : > { %v3288_v31 = vmul.f32 %v4017_v27, %v3279_v22 }
0x1105   : > { %v3297_v39 = vadd.f32 %v4018_v56, %v3288_v31 }
0x1106   : > { %3426 = vmatpush.bf16.msra.mxu0 %v3812_v12 }
0x1107   : > { %v3299_v40 = vpack.c.bf16 %v3297_v39, %v3296_v34 }
0x1109   : > { %3755 = vmatmul.msk.bf16.gmra.mxu3 %vm612_vm0, %v3299_v40 }
0x1160   : > { %v3335_v13 = vpop.f32.mrf.mxu3 }
0x1161   : > { %v3336_v60 = vadd.f32 %v4019_v53, %v3335_v13 }
0x1163   : > { %v3345_v24 = vmax.f32 %v3336_v60, 0.0 }
0x1168   : > { %v3337_v11 = vpop.f32.mrf.mxu3 }
0x1169   : > { %v3338_v18 = vadd.f32 %v4019_v53, %v3337_v11 }
0x116b   : > { %v3346_v62 = vmax.f32 %v3338_v18, 0.0 }
0x116d   : > { %v3349_v26 = vpack.c.bf16 %v3346_v62, %v3345_v24 }
0x116f   : > { %3427 = vmatmul.bf16.vlgmr.msra.gmra.mxu0 %v3349_v26 }
0x118c   : > { %v3340_v38 = vpop.f32.mrf.mxu3 }
0x118d   : > { %v3341_v32 = vadd.f32 %v4019_v53, %v3340_v38 }
0x118f   : > { %v3347_v28 = vmax.f32 %v3341_v32, 0.0 }
0x1194   : > { %v3342_v50 = vpop.f32.mrf.mxu3 }
0x1195   : > { %v3343_v17 = vadd.f32 %v4019_v53, %v3342_v50 }
0x1197   : > { %v3348_v48 = vmax.f32 %v3343_v17, 0.0 }
0x1199   : > { %v3350_v27 = vpack.c.bf16 %v3348_v48, %v3347_v28 }
0x119b   : > { %3432 = vmatmul.bf16.gmra.mxu0 %v3350_v27 }
0x11ec   : > { %v3428_v9 = vpop.f32.mrf.mxu0 }
0x11ed   : > { %v3429_v58 = vadd.f32 %v4020_v16, %v3428_v9 }
0x11ef   : > { %v3438_v56 = vadd.f32 %v3429_v58, %v5479_v4 }
0x11f1   : > { %3442 = vst.msk [vmem:[%s601_s25] sm:$0xff] %vm612_vm0, %v3438_v56 }
0x11f4   : > { %v3430_v6 = vpop.f32.mrf.mxu0 }
0x11f5   : > { %v3431_v2 = vadd.f32 %v4020_v16, %v3430_v6 }
0x11f7   : > { %v3439_v33 = vadd.f32 %v3431_v2, %v5484_v3 }
0x11f9   : > { %3443 = vst.msk [vmem:[%s601_s25 + $0x8] sm:$0xff] %vm612_vm0, %v3439_v33 }
0x1218   : > { %v3433_v19 = vpop.f32.mrf.mxu0 }
0x1219   : > { %v3434_v63 = vadd.f32 %v4020_v16, %v3433_v19 }
0x121b   : > { %v3440_v35 = vadd.f32 %v3434_v63, %v5489_v7 }
0x121d   : > { %3444 = vst.msk [vmem:[%s601_s25 + $0x10] sm:$0xff] %vm612_vm0, %v3440_v35 }
0x1220   : > { %v3435_v4 = vpop.f32.mrf.mxu0 }
0x1221   : > { %v3436_v51 = vadd.f32 %v4020_v16, %v3435_v4 }
0x1223   : > { %v3441_v3 = vadd.f32 %v3436_v51, %v5494_v47 }
0x1225   : > { %3445 = vst.msk [vmem:[%s601_s25 + $0x18] sm:$0xff] %vm612_vm0, %v3441_v3 }
0x1226   : > { %4416 = shalt.err (!%p4413_p8)
}
0x1227   : > { %s4487_s15 = smov 128  }
0x1228   : > { %3851 = dma.vmem_to_hbm [thread:$0]  (%p4606_p5), %s3460_s29, 512, %s3462_s23, %s3447_s22, %s4487_s15, %s4487_s15, %s4485_s27  }
0x1229 PF: > { %s5655_s25 = sld [smem:[#allocation22_spill]] }
0x122a   : > { %s5656_s14 = sld [smem:[#allocation20_spill]] }
0x122f   : > { %p3893_p9 = scmp.ge.s32.totalorder %s5655_s25, 2 }
0x1230   : > { %s3476_s9 = sand.u32 1, %s5656_s14  }
0x1231   : > { %p3876_p10 = pnand %p3893_p9, %p4610_p6  ;;  %s3477_s20 = scalar_lea.sflag [#allocation4], %s3476_s9 }
0x1233   : > { %p3877_p11 = pneg %p3876_p10 }
0x1235   : > { %4450 = dma.done.wait (%p3877_p11), %s3477_s20, 512  }
0x1236   : > { %4452 = vsyncadd (%p3877_p11), %s3477_s20, 4294966784  ;;  %s5658_s21 = sld [smem:[#allocation23_spill]]  ;;  %s5661_s18 = smov %s4459_s19 }
0x1237   : > { %s5659_s17 = sld [smem:[#allocation21_spill]] }
0x1238   : > { %s5660_s20 = sld [smem:[#allocation24_spill]] }
0x123c   : > { %p29_p12 = scmp.ge.s32.totalorder %s5658_s21, 4  }
0x123d   : > { %s5662_s19 = smov %s5659_s17 }
0x123e   :  { %31 = sbr.rel (!%p29_p12) target bundleno = 14 (0xe), region = 156 }
0x1243   :  { %3483 = vsyncpa [#allocation3], 1 }
0x1244   :  { %3485 = vsyncpa [#allocation3 + $0x1], 1 }
0x1245   :  { %3486 = vsyncpa [#allocation6], 1 }
0x1246   :  { %3487 = vsyncpa [#allocation9], 1 }
0x1247   :  { %3488 = vsyncpa [#allocation12], 1 }
0x1248   :  { %3489 = vsyncpa [#allocation4], 1 }
0x1249   :  { %3491 = vsyncpa [#allocation4 + $0x1], 1 }

</bundles_post_ra>
